<compile_context>
chip_gen: v7x
topology: tpu7x:2x2x1
jax: 0.10.0
libtpu: 0.0.40
codegen_flags: <defaults>
</compile_context>

<pallas_src>
import jax
import jax.numpy as jnp
from jax.experimental import pallas as pl
from jax.experimental.pallas import tpu as pltpu

LANE = 128


def _round_up(x, m):
    return ((x + m - 1) // m) * m


# ---------------------------------------------------------------------------
# Kernel 1: fused conv-as-matmul + MaxPool2x2 + bias + ReLU.
# grid = (m_tiles [parallel],); the 4 pool quadrants are max-reduced in-kernel.
# ---------------------------------------------------------------------------
def _conv_pool_kernel(x_ref, w_ref, b_ref, o_ref):
    # x_ref: (4, tg, Kp) bf16 quadrant patch slabs, w_ref: (Kp, Cp) bf16,
    # b_ref: (1, Cp) f32, o_ref: (tg, Cp) bf16.
    w = w_ref[...]
    y = jnp.dot(x_ref[0], w, preferred_element_type=jnp.float32)
    for q in range(1, 4):
        y = jnp.maximum(
            y, jnp.dot(x_ref[q], w, preferred_element_type=jnp.float32))
    # bias + ReLU commute with the quadrant max (bias constant, ReLU monotone)
    o_ref[...] = jnp.maximum(y + b_ref[...], 0.0).astype(o_ref.dtype)


def conv_relu_pool(x_nhwc, w_oihw, bias, *, padding):
    """maxpool2x2(relu(conv2d(x, w, b, stride=1, padding))), NHWC in/out."""
    N, H, W, Cin = x_nhwc.shape
    Cout, Cin2, KH, KW = w_oihw.shape
    assert Cin == Cin2
    Ho = H + 2 * padding - KH + 1
    Wo = W + 2 * padding - KW + 1
    Ho2, Wo2 = Ho // 2, Wo // 2          # PyTorch MaxPool2d floor semantics
    G = N * Ho2 * Wo2                    # rows of the pooled output
    K = KH * KW * Cin
    Kp = _round_up(K, 64)                # MXU-friendly contraction
    Cp = _round_up(Cout, LANE)           # lane-dense output

    x_p = jnp.pad(
        x_nhwc, ((0, 0), (padding, padding), (padding, padding), (0, 0))
    ).astype(jnp.bfloat16)

    # Per pool-quadrant im2col slabs: quadrant q=(ph,pw), row (n, ho2, wo2),
    # column (kh, kw, cin)  ->  x_p[n, 2*ho2+ph+kh, 2*wo2+pw+kw, cin].
    quarters = []
    for ph in range(2):
        for pw in range(2):
            cols = []
            for kh in range(KH):
                for kw in range(KW):
                    cols.append(
                        x_p[:, ph + kh: ph + kh + 2 * Ho2: 2,
                               pw + kw: pw + kw + 2 * Wo2: 2, :])
            quarters.append(jnp.concatenate(cols, axis=-1).reshape(G, K))
    patches = jnp.stack(quarters, axis=0)                      # (4, G, K)
    if Kp != K:
        patches = jnp.pad(patches, ((0, 0), (0, 0), (0, Kp - K)))

    # Weights in (kh, kw, cin) x cout order, padded to (Kp, Cp).
    w_mat = jnp.transpose(w_oihw, (2, 3, 1, 0)).reshape(K, Cout)
    w_mat = jnp.pad(w_mat, ((0, Kp - K), (0, Cp - Cout))).astype(jnp.bfloat16)
    b_row = jnp.pad(bias.astype(jnp.float32), (0, Cp - Cout)).reshape(1, Cp)

    # Two parallel M tiles (v7x dual-TensorCore), full-M fallback otherwise.
    n_tiles = 2 if G % 16 == 0 else 1
    tg = G // n_tiles

    out = pl.pallas_call(
        _conv_pool_kernel,
        out_shape=jax.ShapeDtypeStruct((G, Cp), jnp.bfloat16),
        grid=(n_tiles,),
        in_specs=[
            pl.BlockSpec((4, tg, Kp), lambda i: (0, i, 0)),
            pl.BlockSpec((Kp, Cp), lambda i: (0, 0)),
            pl.BlockSpec((1, Cp), lambda i: (0, 0)),
        ],
        out_specs=pl.BlockSpec((tg, Cp), lambda i: (i, 0)),
        compiler_params=pltpu.CompilerParams(
            dimension_semantics=("parallel",)),
    )(patches, w_mat, b_row)

    return out[:, :Cout].reshape(N, Ho2, Wo2, Cout)            # NHWC, bf16


# ---------------------------------------------------------------------------
# Kernel 2: fused fc1 -> relu -> fc2 -> relu -> fc3 in one VMEM block.
# ---------------------------------------------------------------------------
def _fc_stack_kernel(x_ref, w1_ref, b1_ref, w2_ref, b2_ref, w3_ref, b3_ref,
                     o_ref):
    h = jnp.dot(x_ref[...], w1_ref[...], preferred_element_type=jnp.float32)
    h = jnp.maximum(h + b1_ref[...], 0.0).astype(jnp.bfloat16)
    h = jnp.dot(h, w2_ref[...], preferred_element_type=jnp.float32)
    h = jnp.maximum(h + b2_ref[...], 0.0).astype(jnp.bfloat16)
    o_ref[...] = (jnp.dot(h, w3_ref[...], preferred_element_type=jnp.float32)
                  + b3_ref[...])


def fc_stack(flat, w1, b1, w2, b2, w3, b3):
    M, K1 = flat.shape
    H1, H2, Dout = w1.shape[1], w2.shape[1], w3.shape[1]
    Mp = _round_up(max(M, 8), 8)          # pad batch to a full sublane group
    Dp = _round_up(Dout, LANE)            # lane-dense final output

    x = jnp.pad(flat, ((0, Mp - M), (0, 0))).astype(jnp.bfloat16)
    w1b = w1.astype(jnp.bfloat16)
    w2b = w2.astype(jnp.bfloat16)
    w3b = jnp.pad(w3, ((0, 0), (0, Dp - Dout))).astype(jnp.bfloat16)
    b1r = b1.astype(jnp.float32).reshape(1, H1)
    b2r = b2.astype(jnp.float32).reshape(1, H2)
    b3r = jnp.pad(b3.astype(jnp.float32), (0, Dp - Dout)).reshape(1, Dp)

    out = pl.pallas_call(
        _fc_stack_kernel,
        out_shape=jax.ShapeDtypeStruct((Mp, Dp), jnp.float32),
        grid=(1,),
        in_specs=[
            pl.BlockSpec((Mp, K1), lambda i: (0, 0)),
            pl.BlockSpec((K1, H1), lambda i: (0, 0)),
            pl.BlockSpec((1, H1), lambda i: (0, 0)),
            pl.BlockSpec((H1, H2), lambda i: (0, 0)),
            pl.BlockSpec((1, H2), lambda i: (0, 0)),
            pl.BlockSpec((H2, Dp), lambda i: (0, 0)),
            pl.BlockSpec((1, Dp), lambda i: (0, 0)),
        ],
        out_specs=pl.BlockSpec((Mp, Dp), lambda i: (0, 0)),
        compiler_params=pltpu.CompilerParams(
            dimension_semantics=("arbitrary",)),
    )(x, w1b, b1r, w2b, b2r, w3b, b3r)
    return out[:M, :Dout]


# ---------------------------------------------------------------------------
# Full forward pass
# ---------------------------------------------------------------------------
def cnn_forward(x, params):
    x = jnp.transpose(x, (0, 2, 3, 1))                          # NCHW -> NHWC
    y = conv_relu_pool(x, params["conv1_w"], params["conv1_b"], padding=1)
    y = conv_relu_pool(y, params["conv2_w"], params["conv2_b"], padding=1)
    y = jnp.transpose(y, (0, 3, 1, 2))                          # PyTorch flatten order
    flat = y.reshape(y.shape[0], -1)
    return fc_stack(flat,
                    params["fc1_w"], params["fc1_b"],
                    params["fc2_w"], params["fc2_b"],
                    params["fc3_w"], params["fc3_b"])


if __name__ == "__main__":
    key = jax.random.PRNGKey(0)
    ks = jax.random.split(key, 12)

    # small input consistent with the architecture (see NOTE at top)
    N, H, W = 2, 53, 61
    # conv1: 48x56 -> pool: 24x28 -> conv2: 24x28 -> pool: 12x14
    H2, W2 = 12, 14
    fc1_in = 16 * H2 * W2

    x = jax.random.normal(ks[0], (N, 3, H, W), jnp.float32)

    params = {
        "conv1_w": 0.05 * jax.random.normal(ks[1], (6, 3, 8, 8), jnp.float32),
        "conv1_b": 0.01 * jax.random.normal(ks[2], (6,), jnp.float32),
        "conv2_w": 0.05 * jax.random.normal(ks[3], (16, 6, 3, 3), jnp.float32),
        "conv2_b": 0.01 * jax.random.normal(ks[4], (16,), jnp.float32),
        # stored as (in_features, out_features) for x @ W
        "fc1_w": 0.02 * jax.random.normal(ks[5], (fc1_in, 256), jnp.float32),
        "fc1_b": 0.01 * jax.random.normal(ks[6], (256,), jnp.float32),
        "fc2_w": 0.05 * jax.random.normal(ks[7], (256, 128), jnp.float32),
        "fc2_b": 0.01 * jax.random.normal(ks[8], (128,), jnp.float32),
        "fc3_w": 0.05 * jax.random.normal(ks[9], (128, 10), jnp.float32),
        "fc3_b": 0.01 * jax.random.normal(ks[10], (10,), jnp.float32),
    }

    out = jax.jit(cnn_forward)(x, params)
    out = jax.block_until_ready(out)
    assert out.shape == (N, 10), out.shape
    assert out.dtype == jnp.float32
    assert bool(jnp.all(jnp.isfinite(out)))
    print("KERNEL_OK")
</pallas_src>

<mosaic_0001>
module attributes {stable_mosaic.version = 11 : i64} {
  func.func @_conv_pool_kernel(%arg0: i32, %arg1: memref<4x672x192xbf16, #tpu.memory_space<vmem>>, %arg2: memref<192x128xbf16, #tpu.memory_space<vmem>>, %arg3: memref<1x128xf32, #tpu.memory_space<vmem>>, %arg4: memref<672x128xbf16, #tpu.memory_space<vmem>>) attributes {dimension_semantics = [#tpu.dimension_semantics<parallel>], iteration_bounds = array<i64: 2>, scalar_prefetch = 0 : i64, scratch_operands = 0 : i64, tpu.core_type = #tpu.core_type<tc>, window_params = [{transform_indices = @transform_0, window_bounds = array<i64: 4, 672, 192>}, {pipeline_mode = #tpu.pipeline_mode<synchronous>, transform_indices = @transform_1, window_bounds = array<i64: 192, 128>}, {pipeline_mode = #tpu.pipeline_mode<synchronous>, transform_indices = @transform_2, window_bounds = array<i64: 1, 128>}, {transform_indices = @transform_3, window_bounds = array<i64: 672, 128>}]} {
    %c0 = arith.constant 0 : index
    %c0_0 = arith.constant 0 : index
    %0 = vector.load %arg2[%c0, %c0_0] : memref<192x128xbf16, #tpu.memory_space<vmem>>, vector<192x128xbf16>
    %c0_1 = arith.constant 0 : index
    %c0_2 = arith.constant 0 : index
    %c0_3 = arith.constant 0 : index
    %1 = vector.load %arg1[%c0_1, %c0_2, %c0_3] : memref<4x672x192xbf16, #tpu.memory_space<vmem>>, vector<1x672x192xbf16>
    %2 = vector.shape_cast %1 : vector<1x672x192xbf16> to vector<672x192xbf16>
    %cst = arith.constant dense<0.000000e+00> : vector<672x128xf32>
    %3 = tpu.matmul %2, %0, %cst {dimension_numbers = #tpu.dot_dimension_numbers<[1], [0], [0], [1], [0, 0, 1, 1], [], []>} : vector<672x192xbf16>, vector<192x128xbf16>, vector<672x128xf32> -> vector<672x128xf32>
    %c1 = arith.constant 1 : index
    %c0_4 = arith.constant 0 : index
    %c0_5 = arith.constant 0 : index
    %4 = vector.load %arg1[%c1, %c0_4, %c0_5] : memref<4x672x192xbf16, #tpu.memory_space<vmem>>, vector<1x672x192xbf16>
    %5 = vector.shape_cast %4 : vector<1x672x192xbf16> to vector<672x192xbf16>
    %cst_6 = arith.constant dense<0.000000e+00> : vector<672x128xf32>
    %6 = tpu.matmul %5, %0, %cst_6 {dimension_numbers = #tpu.dot_dimension_numbers<[1], [0], [0], [1], [0, 0, 1, 1], [], []>} : vector<672x192xbf16>, vector<192x128xbf16>, vector<672x128xf32> -> vector<672x128xf32>
    %7 = arith.maximumf %3, %6 : vector<672x128xf32>
    %c2 = arith.constant 2 : index
    %c0_7 = arith.constant 0 : index
    %c0_8 = arith.constant 0 : index
    %8 = vector.load %arg1[%c2, %c0_7, %c0_8] : memref<4x672x192xbf16, #tpu.memory_space<vmem>>, vector<1x672x192xbf16>
    %9 = vector.shape_cast %8 : vector<1x672x192xbf16> to vector<672x192xbf16>
    %cst_9 = arith.constant dense<0.000000e+00> : vector<672x128xf32>
    %10 = tpu.matmul %9, %0, %cst_9 {dimension_numbers = #tpu.dot_dimension_numbers<[1], [0], [0], [1], [0, 0, 1, 1], [], []>} : vector<672x192xbf16>, vector<192x128xbf16>, vector<672x128xf32> -> vector<672x128xf32>
    %11 = arith.maximumf %7, %10 : vector<672x128xf32>
    %c3 = arith.constant 3 : index
    %c0_10 = arith.constant 0 : index
    %c0_11 = arith.constant 0 : index
    %12 = vector.load %arg1[%c3, %c0_10, %c0_11] : memref<4x672x192xbf16, #tpu.memory_space<vmem>>, vector<1x672x192xbf16>
    %13 = vector.shape_cast %12 : vector<1x672x192xbf16> to vector<672x192xbf16>
    %cst_12 = arith.constant dense<0.000000e+00> : vector<672x128xf32>
    %14 = tpu.matmul %13, %0, %cst_12 {dimension_numbers = #tpu.dot_dimension_numbers<[1], [0], [0], [1], [0, 0, 1, 1], [], []>} : vector<672x192xbf16>, vector<192x128xbf16>, vector<672x128xf32> -> vector<672x128xf32>
    %15 = arith.maximumf %11, %14 : vector<672x128xf32>
    %c0_13 = arith.constant 0 : index
    %c0_14 = arith.constant 0 : index
    %16 = vector.load %arg3[%c0_13, %c0_14] : memref<1x128xf32, #tpu.memory_space<vmem>>, vector<1x128xf32>
    %17 = vector.broadcast %16 : vector<1x128xf32> to vector<672x128xf32>
    %18 = arith.addf %15, %17 : vector<672x128xf32>
    %cst_15 = arith.constant 0.000000e+00 : f32
    %19 = vector.broadcast %cst_15 : f32 to vector<672x128xf32>
    %20 = arith.maximumf %18, %19 : vector<672x128xf32>
    %21 = arith.truncf %20 : vector<672x128xf32> to vector<672x128xbf16>
    %c0_16 = arith.constant 0 : index
    %c0_17 = arith.constant 0 : index
    %22 = vector.load %arg4[%c0_16, %c0_17] : memref<672x128xbf16, #tpu.memory_space<vmem>>, vector<672x128xbf16>
    tpu.vector_store %arg4[%c0_16, %c0_17], %21 {strides = array<i32>} : memref<672x128xbf16, #tpu.memory_space<vmem>>, vector<672x128xbf16>,
    return
  }
  func.func @transform_0(%arg0: i32) -> (i32, i32, i32) {
    %c0_i32 = arith.constant 0 : i32
    %c0_i32_0 = arith.constant 0 : i32
    %c0_i32_1 = arith.constant 0 : i32
    return %c0_i32, %arg0, %c0_i32_0 : i32, i32, i32
  }
  func.func @transform_1(%arg0: i32) -> (i32, i32) {
    %c0_i32 = arith.constant 0 : i32
    %c0_i32_0 = arith.constant 0 : i32
    %c0_i32_1 = arith.constant 0 : i32
    return %c0_i32, %c0_i32_0 : i32, i32
  }
  func.func @transform_2(%arg0: i32) -> (i32, i32) {
    %c0_i32 = arith.constant 0 : i32
    %c0_i32_0 = arith.constant 0 : i32
    %c0_i32_1 = arith.constant 0 : i32
    return %c0_i32, %c0_i32_0 : i32, i32
  }
  func.func @transform_3(%arg0: i32) -> (i32, i32) {
    %c0_i32 = arith.constant 0 : i32
    %c0_i32_0 = arith.constant 0 : i32
    return %arg0, %c0_i32 : i32, i32
  }
}

module attributes {stable_mosaic.version = 11 : i64} {
  func.func @_conv_pool_kernel(%arg0: i32, %arg1: memref<4x168x64xbf16, #tpu.memory_space<vmem>>, %arg2: memref<64x128xbf16, #tpu.memory_space<vmem>>, %arg3: memref<1x128xf32, #tpu.memory_space<vmem>>, %arg4: memref<168x128xbf16, #tpu.memory_space<vmem>>) attributes {dimension_semantics = [#tpu.dimension_semantics<parallel>], iteration_bounds = array<i64: 2>, scalar_prefetch = 0 : i64, scratch_operands = 0 : i64, tpu.core_type = #tpu.core_type<tc>, window_params = [{transform_indices = @transform_0, window_bounds = array<i64: 4, 168, 64>}, {pipeline_mode = #tpu.pipeline_mode<synchronous>, transform_indices = @transform_1, window_bounds = array<i64: 64, 128>}, {pipeline_mode = #tpu.pipeline_mode<synchronous>, transform_indices = @transform_2, window_bounds = array<i64: 1, 128>}, {transform_indices = @transform_3, window_bounds = array<i64: 168, 128>}]} {
    %c0 = arith.constant 0 : index
    %c0_0 = arith.constant 0 : index
    %0 = vector.load %arg2[%c0, %c0_0] : memref<64x128xbf16, #tpu.memory_space<vmem>>, vector<64x128xbf16>
    %c0_1 = arith.constant 0 : index
    %c0_2 = arith.constant 0 : index
    %c0_3 = arith.constant 0 : index
    %1 = vector.load %arg1[%c0_1, %c0_2, %c0_3] : memref<4x168x64xbf16, #tpu.memory_space<vmem>>, vector<1x168x64xbf16>
    %2 = vector.shape_cast %1 : vector<1x168x64xbf16> to vector<168x64xbf16>
    %cst = arith.constant dense<0.000000e+00> : vector<168x128xf32>
    %3 = tpu.matmul %2, %0, %cst {dimension_numbers = #tpu.dot_dimension_numbers<[1], [0], [0], [1], [0, 0, 1, 1], [], []>} : vector<168x64xbf16>, vector<64x128xbf16>, vector<168x128xf32> -> vector<168x128xf32>
    %c1 = arith.constant 1 : index
    %c0_4 = arith.constant 0 : index
    %c0_5 = arith.constant 0 : index
    %4 = vector.load %arg1[%c1, %c0_4, %c0_5] : memref<4x168x64xbf16, #tpu.memory_space<vmem>>, vector<1x168x64xbf16>
    %5 = vector.shape_cast %4 : vector<1x168x64xbf16> to vector<168x64xbf16>
    %cst_6 = arith.constant dense<0.000000e+00> : vector<168x128xf32>
    %6 = tpu.matmul %5, %0, %cst_6 {dimension_numbers = #tpu.dot_dimension_numbers<[1], [0], [0], [1], [0, 0, 1, 1], [], []>} : vector<168x64xbf16>, vector<64x128xbf16>, vector<168x128xf32> -> vector<168x128xf32>
    %7 = arith.maximumf %3, %6 : vector<168x128xf32>
    %c2 = arith.constant 2 : index
    %c0_7 = arith.constant 0 : index
    %c0_8 = arith.constant 0 : index
    %8 = vector.load %arg1[%c2, %c0_7, %c0_8] : memref<4x168x64xbf16, #tpu.memory_space<vmem>>, vector<1x168x64xbf16>
    %9 = vector.shape_cast %8 : vector<1x168x64xbf16> to vector<168x64xbf16>
    %cst_9 = arith.constant dense<0.000000e+00> : vector<168x128xf32>
    %10 = tpu.matmul %9, %0, %cst_9 {dimension_numbers = #tpu.dot_dimension_numbers<[1], [0], [0], [1], [0, 0, 1, 1], [], []>} : vector<168x64xbf16>, vector<64x128xbf16>, vector<168x128xf32> -> vector<168x128xf32>
    %11 = arith.maximumf %7, %10 : vector<168x128xf32>
    %c3 = arith.constant 3 : index
    %c0_10 = arith.constant 0 : index
    %c0_11 = arith.constant 0 : index
    %12 = vector.load %arg1[%c3, %c0_10, %c0_11] : memref<4x168x64xbf16, #tpu.memory_space<vmem>>, vector<1x168x64xbf16>
    %13 = vector.shape_cast %12 : vector<1x168x64xbf16> to vector<168x64xbf16>
    %cst_12 = arith.constant dense<0.000000e+00> : vector<168x128xf32>
    %14 = tpu.matmul %13, %0, %cst_12 {dimension_numbers = #tpu.dot_dimension_numbers<[1], [0], [0], [1], [0, 0, 1, 1], [], []>} : vector<168x64xbf16>, vector<64x128xbf16>, vector<168x128xf32> -> vector<168x128xf32>
    %15 = arith.maximumf %11, %14 : vector<168x128xf32>
    %c0_13 = arith.constant 0 : index
    %c0_14 = arith.constant 0 : index
    %16 = vector.load %arg3[%c0_13, %c0_14] : memref<1x128xf32, #tpu.memory_space<vmem>>, vector<1x128xf32>
    %17 = vector.broadcast %16 : vector<1x128xf32> to vector<168x128xf32>
    %18 = arith.addf %15, %17 : vector<168x128xf32>
    %cst_15 = arith.constant 0.000000e+00 : f32
    %19 = vector.broadcast %cst_15 : f32 to vector<168x128xf32>
    %20 = arith.maximumf %18, %19 : vector<168x128xf32>
    %21 = arith.truncf %20 : vector<168x128xf32> to vector<168x128xbf16>
    %c0_16 = arith.constant 0 : index
    %c0_17 = arith.constant 0 : index
    %22 = vector.load %arg4[%c0_16, %c0_17] : memref<168x128xbf16, #tpu.memory_space<vmem>>, vector<168x128xbf16>
    tpu.vector_store %arg4[%c0_16, %c0_17], %21 {strides = array<i32>} : memref<168x128xbf16, #tpu.memory_space<vmem>>, vector<168x128xbf16>,
    return
  }
  func.func @transform_0(%arg0: i32) -> (i32, i32, i32) {
    %c0_i32 = arith.constant 0 : i32
    %c0_i32_0 = arith.constant 0 : i32
    %c0_i32_1 = arith.constant 0 : i32
    return %c0_i32, %arg0, %c0_i32_0 : i32, i32, i32
  }
  func.func @transform_1(%arg0: i32) -> (i32, i32) {
    %c0_i32 = arith.constant 0 : i32
    %c0_i32_0 = arith.constant 0 : i32
    %c0_i32_1 = arith.constant 0 : i32
    return %c0_i32, %c0_i32_0 : i32, i32
  }
  func.func @transform_2(%arg0: i32) -> (i32, i32) {
    %c0_i32 = arith.constant 0 : i32
    %c0_i32_0 = arith.constant 0 : i32
    %c0_i32_1 = arith.constant 0 : i32
    return %c0_i32, %c0_i32_0 : i32, i32
  }
  func.func @transform_3(%arg0: i32) -> (i32, i32) {
    %c0_i32 = arith.constant 0 : i32
    %c0_i32_0 = arith.constant 0 : i32
    return %arg0, %c0_i32 : i32, i32
  }
}

module attributes {stable_mosaic.version = 11 : i64} {
  func.func @_fc_stack_kernel(%arg0: i32, %arg1: memref<8x2688xbf16, #tpu.memory_space<vmem>>, %arg2: memref<2688x256xbf16, #tpu.memory_space<vmem>>, %arg3: memref<1x256xf32, #tpu.memory_space<vmem>>, %arg4: memref<256x128xbf16, #tpu.memory_space<vmem>>, %arg5: memref<1x128xf32, #tpu.memory_space<vmem>>, %arg6: memref<128x128xbf16, #tpu.memory_space<vmem>>, %arg7: memref<1x128xf32, #tpu.memory_space<vmem>>, %arg8: memref<8x128xf32, #tpu.memory_space<vmem>>) attributes {dimension_semantics = [#tpu.dimension_semantics<arbitrary>], iteration_bounds = array<i64: 1>, scalar_prefetch = 0 : i64, scratch_operands = 0 : i64, tpu.core_type = #tpu.core_type<tc>, window_params = [{pipeline_mode = #tpu.pipeline_mode<synchronous>, transform_indices = @transform_0, window_bounds = array<i64: 8, 2688>}, {pipeline_mode = #tpu.pipeline_mode<synchronous>, transform_indices = @transform_1, window_bounds = array<i64: 2688, 256>}, {pipeline_mode = #tpu.pipeline_mode<synchronous>, transform_indices = @transform_2, window_bounds = array<i64: 1, 256>}, {pipeline_mode = #tpu.pipeline_mode<synchronous>, transform_indices = @transform_3, window_bounds = array<i64: 256, 128>}, {pipeline_mode = #tpu.pipeline_mode<synchronous>, transform_indices = @transform_4, window_bounds = array<i64: 1, 128>}, {pipeline_mode = #tpu.pipeline_mode<synchronous>, transform_indices = @transform_5, window_bounds = array<i64: 128, 128>}, {pipeline_mode = #tpu.pipeline_mode<synchronous>, transform_indices = @transform_6, window_bounds = array<i64: 1, 128>}, {pipeline_mode = #tpu.pipeline_mode<synchronous>, transform_indices = @transform_7, window_bounds = array<i64: 8, 128>}]} {
    %c0 = arith.constant 0 : index
    %c0_0 = arith.constant 0 : index
    %0 = vector.load %arg1[%c0, %c0_0] : memref<8x2688xbf16, #tpu.memory_space<vmem>>, vector<8x2688xbf16>
    %c0_1 = arith.constant 0 : index
    %c0_2 = arith.constant 0 : index
    %1 = vector.load %arg2[%c0_1, %c0_2] : memref<2688x256xbf16, #tpu.memory_space<vmem>>, vector<2688x256xbf16>
    %cst = arith.constant dense<0.000000e+00> : vector<8x256xf32>
    %2 = tpu.matmul %0, %1, %cst {dimension_numbers = #tpu.dot_dimension_numbers<[1], [0], [0], [1], [0, 0, 1, 1], [], []>} : vector<8x2688xbf16>, vector<2688x256xbf16>, vector<8x256xf32> -> vector<8x256xf32>
    %c0_3 = arith.constant 0 : index
    %c0_4 = arith.constant 0 : index
    %3 = vector.load %arg3[%c0_3, %c0_4] : memref<1x256xf32, #tpu.memory_space<vmem>>, vector<1x256xf32>
    %4 = vector.broadcast %3 : vector<1x256xf32> to vector<8x256xf32>
    %5 = arith.addf %2, %4 : vector<8x256xf32>
    %cst_5 = arith.constant 0.000000e+00 : f32
    %6 = vector.broadcast %cst_5 : f32 to vector<8x256xf32>
    %7 = arith.maximumf %5, %6 : vector<8x256xf32>
    %8 = arith.truncf %7 : vector<8x256xf32> to vector<8x256xbf16>
    %c0_6 = arith.constant 0 : index
    %c0_7 = arith.constant 0 : index
    %9 = vector.load %arg4[%c0_6, %c0_7] : memref<256x128xbf16, #tpu.memory_space<vmem>>, vector<256x128xbf16>
    %cst_8 = arith.constant dense<0.000000e+00> : vector<8x128xf32>
    %10 = tpu.matmul %8, %9, %cst_8 {dimension_numbers = #tpu.dot_dimension_numbers<[1], [0], [0], [1], [0, 0, 1, 1], [], []>} : vector<8x256xbf16>, vector<256x128xbf16>, vector<8x128xf32> -> vector<8x128xf32>
    %c0_9 = arith.constant 0 : index
    %c0_10 = arith.constant 0 : index
    %11 = vector.load %arg5[%c0_9, %c0_10] : memref<1x128xf32, #tpu.memory_space<vmem>>, vector<1x128xf32>
    %12 = vector.broadcast %11 : vector<1x128xf32> to vector<8x128xf32>
    %13 = arith.addf %10, %12 : vector<8x128xf32>
    %cst_11 = arith.constant 0.000000e+00 : f32
    %14 = vector.broadcast %cst_11 : f32 to vector<8x128xf32>
    %15 = arith.maximumf %13, %14 : vector<8x128xf32>
    %16 = arith.truncf %15 : vector<8x128xf32> to vector<8x128xbf16>
    %c0_12 = arith.constant 0 : index
    %c0_13 = arith.constant 0 : index
    %17 = vector.load %arg6[%c0_12, %c0_13] : memref<128x128xbf16, #tpu.memory_space<vmem>>, vector<128x128xbf16>
    %cst_14 = arith.constant dense<0.000000e+00> : vector<8x128xf32>
    %18 = tpu.matmul %16, %17, %cst_14 {dimension_numbers = #tpu.dot_dimension_numbers<[1], [0], [0], [1], [0, 0, 1, 1], [], []>} : vector<8x128xbf16>, vector<128x128xbf16>, vector<8x128xf32> -> vector<8x128xf32>
    %c0_15 = arith.constant 0 : index
    %c0_16 = arith.constant 0 : index
    %19 = vector.load %arg7[%c0_15, %c0_16] : memref<1x128xf32, #tpu.memory_space<vmem>>, vector<1x128xf32>
    %20 = vector.broadcast %19 : vector<1x128xf32> to vector<8x128xf32>
    %21 = arith.addf %18, %20 : vector<8x128xf32>
    %c0_17 = arith.constant 0 : index
    %c0_18 = arith.constant 0 : index
    %22 = vector.load %arg8[%c0_17, %c0_18] : memref<8x128xf32, #tpu.memory_space<vmem>>, vector<8x128xf32>
    tpu.vector_store %arg8[%c0_17, %c0_18], %21 {strides = array<i32>} : memref<8x128xf32, #tpu.memory_space<vmem>>, vector<8x128xf32>,
    return
  }
  func.func @transform_0(%arg0: i32) -> (i32, i32) {
    %c0_i32 = arith.constant 0 : i32
    %c0_i32_0 = arith.constant 0 : i32
    %c0_i32_1 = arith.constant 0 : i32
    return %c0_i32, %c0_i32_0 : i32, i32
  }
  func.func @transform_1(%arg0: i32) -> (i32, i32) {
    %c0_i32 = arith.constant 0 : i32
    %c0_i32_0 = arith.constant 0 : i32
    %c0_i32_1 = arith.constant 0 : i32
    return %c0_i32, %c0_i32_0 : i32, i32
  }
  func.func @transform_2(%arg0: i32) -> (i32, i32) {
    %c0_i32 = arith.constant 0 : i32
    %c0_i32_0 = arith.constant 0 : i32
    %c0_i32_1 = arith.constant 0 : i32
    return %c0_i32, %c0_i32_0 : i32, i32
  }
  func.func @transform_3(%arg0: i32) -> (i32, i32) {
    %c0_i32 = arith.constant 0 : i32
    %c0_i32_0 = arith.constant 0 : i32
    %c0_i32_1 = arith.constant 0 : i32
    return %c0_i32, %c0_i32_0 : i32, i32
  }
  func.func @transform_4(%arg0: i32) -> (i32, i32) {
    %c0_i32 = arith.constant 0 : i32
    %c0_i32_0 = arith.constant 0 : i32
    %c0_i32_1 = arith.constant 0 : i32
    return %c0_i32, %c0_i32_0 : i32, i32
  }
  func.func @transform_5(%arg0: i32) -> (i32, i32) {
    %c0_i32 = arith.constant 0 : i32
    %c0_i32_0 = arith.constant 0 : i32
    %c0_i32_1 = arith.constant 0 : i32
    return %c0_i32, %c0_i32_0 : i32, i32
  }
  func.func @transform_6(%arg0: i32) -> (i32, i32) {
    %c0_i32 = arith.constant 0 : i32
    %c0_i32_0 = arith.constant 0 : i32
    %c0_i32_1 = arith.constant 0 : i32
    return %c0_i32, %c0_i32_0 : i32, i32
  }
  func.func @transform_7(%arg0: i32) -> (i32, i32) {
    %c0_i32 = arith.constant 0 : i32
    %c0_i32_0 = arith.constant 0 : i32
    %c0_i32_1 = arith.constant 0 : i32
    return %c0_i32, %c0_i32_0 : i32, i32
  }
}

</mosaic_0001>

<bundles_post_ra>
// kernel: cnn_forward.3
= control target key start
LH: loop header
LB: loop body
LE: loop exit
PB: predicated region body
PF: predicated region fallthrough
CT: control target
= control target key end

     0   :  { %s8177_s12 = smov 0   ;;  %s8179_s13 = smov 0   ;;  %s10462_s0 = inlined_call_operand.vmem [shape: bf16[4,1344,192], index: 0, kind: input, shape index: {}]   ;;  %s10463_s1 = inlined_call_operand.vmem [shape: bf16[192,128], index: 1, kind: input, shape index: {}]   ;;  %s10464_s2 = inlined_call_operand.vmem [shape: f32[1,128], index: 2, kind: input, shape index: {}]   ;;  %s10465_s3 = inlined_call_operand.vmem [shape: bf16[1344,128], index: 3, kind: output, shape index: {}]  }
   0x1   :  { %s8181_s14 = smov 0  }
   0x2 LB: > { %s6387_s15 = sadd.s32 4294967295, %s8154_s14   ;;  %s8194_s16 = sadd.s32 1, %s8154_s14   ;;  %s8154_s14 = sphi %s8181_s14, %s10918_s14   ;;  %s8150_s13 = sphi %s8179_s13, %s10917_s13   ;;  %s8146_s12 = sphi %s8177_s12, %s10916_s12  }
   0x3   : > { %s17_s17 = ssub.s32 %s8154_s14, %s8194_s16  ;;  %s20_s18 = sadd.s32 1, %s8150_s13 }
   0x4   : > { %p18_p0 = scmp.eq.s32.totalorder %s17_s17, 0  ;;  %p27_p1 = scmp.ne.s32.totalorder %s8150_s13, %s8146_s12 }
   0x5   : > { %p28_p2 = scmp.eq.s32.totalorder %s8154_s14, 0  ;;  %p6390_p4 = scmp.ge.s32.totalorder %s8154_s14, 2 }
   0x6   : > { %s8203_s19 = scalar_select %p18_p0, %s8150_s13, %s20_s18  }
   0x7   : > { %p29_p3 = por %p28_p2, %p27_p1  ;;  %127 = sbr.rel (%p6390_p4) target bundleno = 187 (0xbb), region = 24 }
   0xe   : > { %130 = sbr.rel (!%p29_p3) target bundleno = 187 (0xbb), region = 28  ;;  %s132_s20 = sand.u32 (%p29_p3), 1, %s8150_s13  }
   0xf   : > { %s7546_s21 = smul.u32 (%p29_p3), 672, %s8154_s14 }
  0x10   : > { %s7588_s22 = smul.u32 (%p29_p3), 2688, %s132_s20 }
  0x11   : > { %s8211_s25 = scalar_lea.vmem (%p29_p3), %s10462_s0, %s7546_s21 }
  0x12   : > { %v836_v0 = vld [vmem:[%s8211_s25] sm:$0xff] (%p29_p3)  ;;  %v838_v1 = vld [vmem:[%s8211_s25 + $0x8] sm:$0xff] (%p29_p3)  ;;  %v840_v2 = vld [vmem:[%s8211_s25 + $0x10] sm:$0xff] (%p29_p3)  ;;  %s8216_s26 = scalar_lea.vmem (%p29_p3), [#allocation2], %s7588_s22 }
  0x13   : > { %837 = vst [vmem:[%s8216_s26] sm:$0xff] (%p29_p3), %v836_v0  ;;  %839 = vst [vmem:[%s8216_s26 + $0x8] sm:$0xff] (%p29_p3), %v838_v1  ;;  %v842_v3 = vld [vmem:[%s8211_s25 + $0x18] sm:$0xff] (%p29_p3)  ;;  %v844_v4 = vld [vmem:[%s8211_s25 + $0x20] sm:$0xff] (%p29_p3) }
  0x14   : > { %841 = vst [vmem:[%s8216_s26 + $0x10] sm:$0xff] (%p29_p3), %v840_v2  ;;  %v846_v5 = vld [vmem:[%s8211_s25 + $0x28] sm:$0xff] (%p29_p3)  ;;  %843 = vst [vmem:[%s8216_s26 + $0x18] sm:$0xff] (%p29_p3), %v842_v3  ;;  %v848_v6 = vld [vmem:[%s8211_s25 + $0x30] sm:$0xff] (%p29_p3) }
  0x15   : > { %845 = vst [vmem:[%s8216_s26 + $0x20] sm:$0xff] %v844_v4  ;;  %847 = vst [vmem:[%s8216_s26 + $0x28] sm:$0xff] %v846_v5  ;;  %v850_v7 = vld [vmem:[%s8211_s25 + $0x38] sm:$0xff]  ;;  %v852_v8 = vld [vmem:[%s8211_s25 + $0x40] sm:$0xff] }
  0x16   : > { %849 = vst [vmem:[%s8216_s26 + $0x30] sm:$0xff] %v848_v6  ;;  %851 = vst [vmem:[%s8216_s26 + $0x38] sm:$0xff] %v850_v7  ;;  %v854_v9 = vld [vmem:[%s8211_s25 + $0x48] sm:$0xff]  ;;  %v856_v10 = vld [vmem:[%s8211_s25 + $0x50] sm:$0xff] }
  0x17   : > { %853 = vst [vmem:[%s8216_s26 + $0x40] sm:$0xff] %v852_v8  ;;  %v858_v11 = vld [vmem:[%s8211_s25 + $0x58] sm:$0xff]  ;;  %855 = vst [vmem:[%s8216_s26 + $0x48] sm:$0xff] %v854_v9  ;;  %v860_v12 = vld [vmem:[%s8211_s25 + $0x60] sm:$0xff] }
  0x18   : > { %857 = vst [vmem:[%s8216_s26 + $0x50] sm:$0xff] %v856_v10  ;;  %859 = vst [vmem:[%s8216_s26 + $0x58] sm:$0xff] %v858_v11  ;;  %v862_v13 = vld [vmem:[%s8211_s25 + $0x68] sm:$0xff]  ;;  %v864_v14 = vld [vmem:[%s8211_s25 + $0x70] sm:$0xff] }
  0x19   : > { %861 = vst [vmem:[%s8216_s26 + $0x60] sm:$0xff] %v860_v12  ;;  %863 = vst [vmem:[%s8216_s26 + $0x68] sm:$0xff] %v862_v13  ;;  %v866_v15 = vld [vmem:[%s8211_s25 + $0x78] sm:$0xff]  ;;  %v868_v16 = vld [vmem:[%s8211_s25 + $0x80] sm:$0xff] }
  0x1a   : > { %865 = vst [vmem:[%s8216_s26 + $0x70] sm:$0xff] %v864_v14  ;;  %v870_v17 = vld [vmem:[%s8211_s25 + $0x88] sm:$0xff]  ;;  %867 = vst [vmem:[%s8216_s26 + $0x78] sm:$0xff] %v866_v15  ;;  %v872_v18 = vld [vmem:[%s8211_s25 + $0x90] sm:$0xff] }
  0x1b   : > { %869 = vst [vmem:[%s8216_s26 + $0x80] sm:$0xff] %v868_v16  ;;  %871 = vst [vmem:[%s8216_s26 + $0x88] sm:$0xff] %v870_v17  ;;  %v874_v19 = vld [vmem:[%s8211_s25 + $0x98] sm:$0xff]  ;;  %v876_v20 = vld [vmem:[%s8211_s25 + $0xa0] sm:$0xff] }
  0x1c   : > { %873 = vst [vmem:[%s8216_s26 + $0x90] sm:$0xff] %v872_v18  ;;  %875 = vst [vmem:[%s8216_s26 + $0x98] sm:$0xff] %v874_v19  ;;  %v878_v21 = vld [vmem:[%s8211_s25 + $0xa8] sm:$0xff]  ;;  %v880_v22 = vld [vmem:[%s8211_s25 + $0xb0] sm:$0xff] }
  0x1d   : > { %877 = vst [vmem:[%s8216_s26 + $0xa0] sm:$0xff] %v876_v20  ;;  %v882_v23 = vld [vmem:[%s8211_s25 + $0xb8] sm:$0xff]  ;;  %879 = vst [vmem:[%s8216_s26 + $0xa8] sm:$0xff] %v878_v21  ;;  %v884_v24 = vld [vmem:[%s8211_s25 + $0xc0] sm:$0xff] }
  0x1e   : > { %881 = vst [vmem:[%s8216_s26 + $0xb0] sm:$0xff] %v880_v22  ;;  %883 = vst [vmem:[%s8216_s26 + $0xb8] sm:$0xff] %v882_v23  ;;  %v886_v25 = vld [vmem:[%s8211_s25 + $0xc8] sm:$0xff]  ;;  %v888_v26 = vld [vmem:[%s8211_s25 + $0xd0] sm:$0xff] }
  0x1f   : > { %885 = vst [vmem:[%s8216_s26 + $0xc0] sm:$0xff] %v884_v24  ;;  %887 = vst [vmem:[%s8216_s26 + $0xc8] sm:$0xff] %v886_v25  ;;  %v890_v27 = vld [vmem:[%s8211_s25 + $0xd8] sm:$0xff]  ;;  %v892_v28 = vld [vmem:[%s8211_s25 + $0xe0] sm:$0xff] }
  0x20   : > { %889 = vst [vmem:[%s8216_s26 + $0xd0] sm:$0xff] %v888_v26  ;;  %v894_v29 = vld [vmem:[%s8211_s25 + $0xe8] sm:$0xff]  ;;  %891 = vst [vmem:[%s8216_s26 + $0xd8] sm:$0xff] %v890_v27  ;;  %v896_v30 = vld [vmem:[%s8211_s25 + $0xf0] sm:$0xff] }
  0x21   : > { %893 = vst [vmem:[%s8216_s26 + $0xe0] sm:$0xff] %v892_v28  ;;  %895 = vst [vmem:[%s8216_s26 + $0xe8] sm:$0xff] %v894_v29  ;;  %v898_v31 = vld [vmem:[%s8211_s25 + $0xf8] sm:$0xff]  ;;  %v900_v32 = vld [vmem:[%s8211_s25 + $0x100] sm:$0xff] }
  0x22   : > { %897 = vst [vmem:[%s8216_s26 + $0xf0] sm:$0xff] %v896_v30  ;;  %899 = vst [vmem:[%s8216_s26 + $0xf8] sm:$0xff] %v898_v31  ;;  %v902_v33 = vld [vmem:[%s8211_s25 + $0x108] sm:$0xff]  ;;  %v904_v34 = vld [vmem:[%s8211_s25 + $0x110] sm:$0xff] }
  0x23   : > { %901 = vst [vmem:[%s8216_s26 + $0x100] sm:$0xff] %v900_v32  ;;  %v906_v35 = vld [vmem:[%s8211_s25 + $0x118] sm:$0xff]  ;;  %903 = vst [vmem:[%s8216_s26 + $0x108] sm:$0xff] %v902_v33  ;;  %v908_v36 = vld [vmem:[%s8211_s25 + $0x120] sm:$0xff] }
  0x24   : > { %905 = vst [vmem:[%s8216_s26 + $0x110] sm:$0xff] %v904_v34  ;;  %907 = vst [vmem:[%s8216_s26 + $0x118] sm:$0xff] %v906_v35  ;;  %v910_v37 = vld [vmem:[%s8211_s25 + $0x128] sm:$0xff]  ;;  %v912_v38 = vld [vmem:[%s8211_s25 + $0x130] sm:$0xff] }
  0x25   : > { %909 = vst [vmem:[%s8216_s26 + $0x120] sm:$0xff] %v908_v36  ;;  %911 = vst [vmem:[%s8216_s26 + $0x128] sm:$0xff] %v910_v37  ;;  %v914_v39 = vld [vmem:[%s8211_s25 + $0x138] sm:$0xff]  ;;  %v916_v40 = vld [vmem:[%s8211_s25 + $0x140] sm:$0xff] }
  0x26   : > { %913 = vst [vmem:[%s8216_s26 + $0x130] sm:$0xff] %v912_v38  ;;  %v918_v41 = vld [vmem:[%s8211_s25 + $0x148] sm:$0xff]  ;;  %915 = vst [vmem:[%s8216_s26 + $0x138] sm:$0xff] %v914_v39  ;;  %v920_v42 = vld [vmem:[%s8211_s25 + $0x150] sm:$0xff] }
  0x27   : > { %917 = vst [vmem:[%s8216_s26 + $0x140] sm:$0xff] %v916_v40  ;;  %919 = vst [vmem:[%s8216_s26 + $0x148] sm:$0xff] %v918_v41  ;;  %v922_v43 = vld [vmem:[%s8211_s25 + $0x158] sm:$0xff]  ;;  %v924_v44 = vld [vmem:[%s8211_s25 + $0x160] sm:$0xff] }
  0x28   : > { %921 = vst [vmem:[%s8216_s26 + $0x150] sm:$0xff] %v920_v42  ;;  %923 = vst [vmem:[%s8216_s26 + $0x158] sm:$0xff] %v922_v43  ;;  %v926_v45 = vld [vmem:[%s8211_s25 + $0x168] sm:$0xff]  ;;  %v928_v46 = vld [vmem:[%s8211_s25 + $0x170] sm:$0xff] }
  0x29   : > { %925 = vst [vmem:[%s8216_s26 + $0x160] sm:$0xff] %v924_v44  ;;  %v930_v47 = vld [vmem:[%s8211_s25 + $0x178] sm:$0xff]  ;;  %927 = vst [vmem:[%s8216_s26 + $0x168] sm:$0xff] %v926_v45  ;;  %v932_v48 = vld [vmem:[%s8211_s25 + $0x180] sm:$0xff] }
  0x2a   : > { %929 = vst [vmem:[%s8216_s26 + $0x170] sm:$0xff] %v928_v46  ;;  %931 = vst [vmem:[%s8216_s26 + $0x178] sm:$0xff] %v930_v47  ;;  %v934_v49 = vld [vmem:[%s8211_s25 + $0x188] sm:$0xff]  ;;  %v936_v50 = vld [vmem:[%s8211_s25 + $0x190] sm:$0xff] }
  0x2b   : > { %933 = vst [vmem:[%s8216_s26 + $0x180] sm:$0xff] %v932_v48  ;;  %935 = vst [vmem:[%s8216_s26 + $0x188] sm:$0xff] %v934_v49  ;;  %v938_v51 = vld [vmem:[%s8211_s25 + $0x198] sm:$0xff]  ;;  %v940_v52 = vld [vmem:[%s8211_s25 + $0x1a0] sm:$0xff] }
  0x2c   : > { %937 = vst [vmem:[%s8216_s26 + $0x190] sm:$0xff] %v936_v50  ;;  %v942_v53 = vld [vmem:[%s8211_s25 + $0x1a8] sm:$0xff]  ;;  %939 = vst [vmem:[%s8216_s26 + $0x198] sm:$0xff] %v938_v51  ;;  %v944_v54 = vld [vmem:[%s8211_s25 + $0x1b0] sm:$0xff] }
  0x2d   : > { %941 = vst [vmem:[%s8216_s26 + $0x1a0] sm:$0xff] %v940_v52  ;;  %943 = vst [vmem:[%s8216_s26 + $0x1a8] sm:$0xff] %v942_v53  ;;  %v946_v55 = vld [vmem:[%s8211_s25 + $0x1b8] sm:$0xff]  ;;  %v948_v56 = vld [vmem:[%s8211_s25 + $0x1c0] sm:$0xff] }
  0x2e   : > { %945 = vst [vmem:[%s8216_s26 + $0x1b0] sm:$0xff] %v944_v54  ;;  %947 = vst [vmem:[%s8216_s26 + $0x1b8] sm:$0xff] %v946_v55  ;;  %v950_v57 = vld [vmem:[%s8211_s25 + $0x1c8] sm:$0xff]  ;;  %v952_v58 = vld [vmem:[%s8211_s25 + $0x1d0] sm:$0xff] }
  0x2f   : > { %949 = vst [vmem:[%s8216_s26 + $0x1c0] sm:$0xff] %v948_v56  ;;  %v954_v59 = vld [vmem:[%s8211_s25 + $0x1d8] sm:$0xff]  ;;  %951 = vst [vmem:[%s8216_s26 + $0x1c8] sm:$0xff] %v950_v57  ;;  %v956_v60 = vld [vmem:[%s8211_s25 + $0x1e0] sm:$0xff] }
  0x30   : > { %953 = vst [vmem:[%s8216_s26 + $0x1d0] sm:$0xff] %v952_v58  ;;  %955 = vst [vmem:[%s8216_s26 + $0x1d8] sm:$0xff] %v954_v59  ;;  %v958_v61 = vld [vmem:[%s8211_s25 + $0x1e8] sm:$0xff]  ;;  %v960_v62 = vld [vmem:[%s8211_s25 + $0x1f0] sm:$0xff] }
  0x31   : > { %957 = vst [vmem:[%s8216_s26 + $0x1e0] sm:$0xff] %v956_v60  ;;  %959 = vst [vmem:[%s8216_s26 + $0x1e8] sm:$0xff] %v958_v61  ;;  %v962_v63 = vld [vmem:[%s8211_s25 + $0x1f8] sm:$0xff]  ;;  %v964_v0 = vld [vmem:[%s8211_s25 + $0x200] sm:$0xff] }
  0x32   : > { %961 = vst [vmem:[%s8216_s26 + $0x1f0] sm:$0xff] %v960_v62  ;;  %v966_v1 = vld [vmem:[%s8211_s25 + $0x208] sm:$0xff]  ;;  %963 = vst [vmem:[%s8216_s26 + $0x1f8] sm:$0xff] %v962_v63  ;;  %v968_v2 = vld [vmem:[%s8211_s25 + $0x210] sm:$0xff] }
  0x33   : > { %965 = vst [vmem:[%s8216_s26 + $0x200] sm:$0xff] %v964_v0  ;;  %967 = vst [vmem:[%s8216_s26 + $0x208] sm:$0xff] %v966_v1  ;;  %v970_v3 = vld [vmem:[%s8211_s25 + $0x218] sm:$0xff]  ;;  %v972_v4 = vld [vmem:[%s8211_s25 + $0x220] sm:$0xff] }
  0x34   : > { %969 = vst [vmem:[%s8216_s26 + $0x210] sm:$0xff] %v968_v2  ;;  %971 = vst [vmem:[%s8216_s26 + $0x218] sm:$0xff] %v970_v3  ;;  %v974_v5 = vld [vmem:[%s8211_s25 + $0x228] sm:$0xff]  ;;  %v976_v6 = vld [vmem:[%s8211_s25 + $0x230] sm:$0xff] }
  0x35   : > { %973 = vst [vmem:[%s8216_s26 + $0x220] sm:$0xff] %v972_v4  ;;  %v978_v7 = vld [vmem:[%s8211_s25 + $0x238] sm:$0xff]  ;;  %975 = vst [vmem:[%s8216_s26 + $0x228] sm:$0xff] %v974_v5  ;;  %v980_v8 = vld [vmem:[%s8211_s25 + $0x240] sm:$0xff] }
  0x36   : > { %977 = vst [vmem:[%s8216_s26 + $0x230] sm:$0xff] %v976_v6  ;;  %979 = vst [vmem:[%s8216_s26 + $0x238] sm:$0xff] %v978_v7  ;;  %v982_v9 = vld [vmem:[%s8211_s25 + $0x248] sm:$0xff]  ;;  %v984_v10 = vld [vmem:[%s8211_s25 + $0x250] sm:$0xff] }
  0x37   : > { %981 = vst [vmem:[%s8216_s26 + $0x240] sm:$0xff] %v980_v8  ;;  %983 = vst [vmem:[%s8216_s26 + $0x248] sm:$0xff] %v982_v9  ;;  %v986_v11 = vld [vmem:[%s8211_s25 + $0x258] sm:$0xff]  ;;  %v988_v12 = vld [vmem:[%s8211_s25 + $0x260] sm:$0xff] }
  0x38   : > { %985 = vst [vmem:[%s8216_s26 + $0x250] sm:$0xff] %v984_v10  ;;  %v990_v13 = vld [vmem:[%s8211_s25 + $0x268] sm:$0xff]  ;;  %987 = vst [vmem:[%s8216_s26 + $0x258] sm:$0xff] %v986_v11  ;;  %v992_v14 = vld [vmem:[%s8211_s25 + $0x270] sm:$0xff] }
  0x39   : > { %989 = vst [vmem:[%s8216_s26 + $0x260] sm:$0xff] %v988_v12  ;;  %991 = vst [vmem:[%s8216_s26 + $0x268] sm:$0xff] %v990_v13  ;;  %v994_v15 = vld [vmem:[%s8211_s25 + $0x278] sm:$0xff]  ;;  %v996_v16 = vld [vmem:[%s8211_s25 + $0x280] sm:$0xff] }
  0x3a   : > { %993 = vst [vmem:[%s8216_s26 + $0x270] sm:$0xff] %v992_v14  ;;  %995 = vst [vmem:[%s8216_s26 + $0x278] sm:$0xff] %v994_v15  ;;  %v998_v17 = vld [vmem:[%s8211_s25 + $0x288] sm:$0xff]  ;;  %v1000_v18 = vld [vmem:[%s8211_s25 + $0x290] sm:$0xff] }
  0x3b   : > { %997 = vst [vmem:[%s8216_s26 + $0x280] sm:$0xff] %v996_v16  ;;  %v1002_v19 = vld [vmem:[%s8211_s25 + $0x298] sm:$0xff]  ;;  %999 = vst [vmem:[%s8216_s26 + $0x288] sm:$0xff] %v998_v17  ;;  %v1004_v20 = vld [vmem:[%s8211_s25 + $0x540] sm:$0xff] }
  0x3c   : > { %1001 = vst [vmem:[%s8216_s26 + $0x290] sm:$0xff] %v1000_v18  ;;  %1003 = vst [vmem:[%s8216_s26 + $0x298] sm:$0xff] %v1002_v19  ;;  %v1006_v21 = vld [vmem:[%s8211_s25 + $0x548] sm:$0xff]  ;;  %v1008_v22 = vld [vmem:[%s8211_s25 + $0x550] sm:$0xff] }
  0x3d   : > { %1005 = vst [vmem:[%s8216_s26 + $0x2a0] sm:$0xff] %v1004_v20  ;;  %1007 = vst [vmem:[%s8216_s26 + $0x2a8] sm:$0xff] %v1006_v21  ;;  %v1010_v23 = vld [vmem:[%s8211_s25 + $0x558] sm:$0xff]  ;;  %v1012_v24 = vld [vmem:[%s8211_s25 + $0x560] sm:$0xff] }
  0x3e   : > { %1009 = vst [vmem:[%s8216_s26 + $0x2b0] sm:$0xff] %v1008_v22  ;;  %v1014_v25 = vld [vmem:[%s8211_s25 + $0x568] sm:$0xff]  ;;  %1011 = vst [vmem:[%s8216_s26 + $0x2b8] sm:$0xff] %v1010_v23  ;;  %v1016_v26 = vld [vmem:[%s8211_s25 + $0x570] sm:$0xff] }
  0x3f   : > { %1013 = vst [vmem:[%s8216_s26 + $0x2c0] sm:$0xff] %v1012_v24  ;;  %1015 = vst [vmem:[%s8216_s26 + $0x2c8] sm:$0xff] %v1014_v25  ;;  %v1018_v27 = vld [vmem:[%s8211_s25 + $0x578] sm:$0xff]  ;;  %v1020_v28 = vld [vmem:[%s8211_s25 + $0x580] sm:$0xff] }
  0x40   : > { %1017 = vst [vmem:[%s8216_s26 + $0x2d0] sm:$0xff] %v1016_v26  ;;  %1019 = vst [vmem:[%s8216_s26 + $0x2d8] sm:$0xff] %v1018_v27  ;;  %v1022_v29 = vld [vmem:[%s8211_s25 + $0x588] sm:$0xff]  ;;  %v1024_v30 = vld [vmem:[%s8211_s25 + $0x590] sm:$0xff] }
  0x41   : > { %1021 = vst [vmem:[%s8216_s26 + $0x2e0] sm:$0xff] %v1020_v28  ;;  %v1026_v31 = vld [vmem:[%s8211_s25 + $0x598] sm:$0xff]  ;;  %1023 = vst [vmem:[%s8216_s26 + $0x2e8] sm:$0xff] %v1022_v29  ;;  %v1028_v32 = vld [vmem:[%s8211_s25 + $0x5a0] sm:$0xff] }
  0x42   : > { %1025 = vst [vmem:[%s8216_s26 + $0x2f0] sm:$0xff] %v1024_v30  ;;  %1027 = vst [vmem:[%s8216_s26 + $0x2f8] sm:$0xff] %v1026_v31  ;;  %v1030_v33 = vld [vmem:[%s8211_s25 + $0x5a8] sm:$0xff]  ;;  %v1032_v34 = vld [vmem:[%s8211_s25 + $0x5b0] sm:$0xff] }
  0x43   : > { %1029 = vst [vmem:[%s8216_s26 + $0x300] sm:$0xff] %v1028_v32  ;;  %1031 = vst [vmem:[%s8216_s26 + $0x308] sm:$0xff] %v1030_v33  ;;  %v1034_v35 = vld [vmem:[%s8211_s25 + $0x5b8] sm:$0xff]  ;;  %v1036_v36 = vld [vmem:[%s8211_s25 + $0x5c0] sm:$0xff] }
  0x44   : > { %1033 = vst [vmem:[%s8216_s26 + $0x310] sm:$0xff] %v1032_v34  ;;  %v1038_v37 = vld [vmem:[%s8211_s25 + $0x5c8] sm:$0xff]  ;;  %1035 = vst [vmem:[%s8216_s26 + $0x318] sm:$0xff] %v1034_v35  ;;  %v1040_v38 = vld [vmem:[%s8211_s25 + $0x5d0] sm:$0xff] }
  0x45   : > { %1037 = vst [vmem:[%s8216_s26 + $0x320] sm:$0xff] %v1036_v36  ;;  %1039 = vst [vmem:[%s8216_s26 + $0x328] sm:$0xff] %v1038_v37  ;;  %v1042_v39 = vld [vmem:[%s8211_s25 + $0x5d8] sm:$0xff]  ;;  %v1044_v40 = vld [vmem:[%s8211_s25 + $0x5e0] sm:$0xff] }
  0x46   : > { %1041 = vst [vmem:[%s8216_s26 + $0x330] sm:$0xff] %v1040_v38  ;;  %1043 = vst [vmem:[%s8216_s26 + $0x338] sm:$0xff] %v1042_v39  ;;  %v1046_v41 = vld [vmem:[%s8211_s25 + $0x5e8] sm:$0xff]  ;;  %v1048_v42 = vld [vmem:[%s8211_s25 + $0x5f0] sm:$0xff] }
  0x47   : > { %1045 = vst [vmem:[%s8216_s26 + $0x340] sm:$0xff] %v1044_v40  ;;  %v1050_v43 = vld [vmem:[%s8211_s25 + $0x5f8] sm:$0xff]  ;;  %1047 = vst [vmem:[%s8216_s26 + $0x348] sm:$0xff] %v1046_v41  ;;  %v1052_v44 = vld [vmem:[%s8211_s25 + $0x600] sm:$0xff] }
  0x48   : > { %1049 = vst [vmem:[%s8216_s26 + $0x350] sm:$0xff] %v1048_v42  ;;  %1051 = vst [vmem:[%s8216_s26 + $0x358] sm:$0xff] %v1050_v43  ;;  %v1054_v45 = vld [vmem:[%s8211_s25 + $0x608] sm:$0xff]  ;;  %v1056_v46 = vld [vmem:[%s8211_s25 + $0x610] sm:$0xff] }
  0x49   : > { %1053 = vst [vmem:[%s8216_s26 + $0x360] sm:$0xff] %v1052_v44  ;;  %1055 = vst [vmem:[%s8216_s26 + $0x368] sm:$0xff] %v1054_v45  ;;  %v1058_v47 = vld [vmem:[%s8211_s25 + $0x618] sm:$0xff]  ;;  %v1060_v48 = vld [vmem:[%s8211_s25 + $0x620] sm:$0xff] }
  0x4a   : > { %1057 = vst [vmem:[%s8216_s26 + $0x370] sm:$0xff] %v1056_v46  ;;  %v1062_v49 = vld [vmem:[%s8211_s25 + $0x628] sm:$0xff]  ;;  %1059 = vst [vmem:[%s8216_s26 + $0x378] sm:$0xff] %v1058_v47  ;;  %v1064_v50 = vld [vmem:[%s8211_s25 + $0x630] sm:$0xff] }
  0x4b   : > { %1061 = vst [vmem:[%s8216_s26 + $0x380] sm:$0xff] %v1060_v48  ;;  %1063 = vst [vmem:[%s8216_s26 + $0x388] sm:$0xff] %v1062_v49  ;;  %v1066_v51 = vld [vmem:[%s8211_s25 + $0x638] sm:$0xff]  ;;  %v1068_v52 = vld [vmem:[%s8211_s25 + $0x640] sm:$0xff] }
  0x4c   : > { %1065 = vst [vmem:[%s8216_s26 + $0x390] sm:$0xff] %v1064_v50  ;;  %1067 = vst [vmem:[%s8216_s26 + $0x398] sm:$0xff] %v1066_v51  ;;  %v1070_v53 = vld [vmem:[%s8211_s25 + $0x648] sm:$0xff]  ;;  %v1072_v54 = vld [vmem:[%s8211_s25 + $0x650] sm:$0xff] }
  0x4d   : > { %1069 = vst [vmem:[%s8216_s26 + $0x3a0] sm:$0xff] %v1068_v52  ;;  %v1074_v55 = vld [vmem:[%s8211_s25 + $0x658] sm:$0xff]  ;;  %1071 = vst [vmem:[%s8216_s26 + $0x3a8] sm:$0xff] %v1070_v53  ;;  %v1076_v56 = vld [vmem:[%s8211_s25 + $0x660] sm:$0xff] }
  0x4e   : > { %1073 = vst [vmem:[%s8216_s26 + $0x3b0] sm:$0xff] %v1072_v54  ;;  %1075 = vst [vmem:[%s8216_s26 + $0x3b8] sm:$0xff] %v1074_v55  ;;  %v1078_v57 = vld [vmem:[%s8211_s25 + $0x668] sm:$0xff]  ;;  %v1080_v58 = vld [vmem:[%s8211_s25 + $0x670] sm:$0xff] }
  0x4f   : > { %1077 = vst [vmem:[%s8216_s26 + $0x3c0] sm:$0xff] %v1076_v56  ;;  %1079 = vst [vmem:[%s8216_s26 + $0x3c8] sm:$0xff] %v1078_v57  ;;  %v1082_v59 = vld [vmem:[%s8211_s25 + $0x678] sm:$0xff]  ;;  %v1084_v60 = vld [vmem:[%s8211_s25 + $0x680] sm:$0xff] }
  0x50   : > { %1081 = vst [vmem:[%s8216_s26 + $0x3d0] sm:$0xff] %v1080_v58  ;;  %v1086_v61 = vld [vmem:[%s8211_s25 + $0x688] sm:$0xff]  ;;  %1083 = vst [vmem:[%s8216_s26 + $0x3d8] sm:$0xff] %v1082_v59  ;;  %v1088_v62 = vld [vmem:[%s8211_s25 + $0x690] sm:$0xff] }
  0x51   : > { %1085 = vst [vmem:[%s8216_s26 + $0x3e0] sm:$0xff] %v1084_v60  ;;  %1087 = vst [vmem:[%s8216_s26 + $0x3e8] sm:$0xff] %v1086_v61  ;;  %v1090_v63 = vld [vmem:[%s8211_s25 + $0x698] sm:$0xff]  ;;  %v1092_v0 = vld [vmem:[%s8211_s25 + $0x6a0] sm:$0xff] }
  0x52   : > { %1089 = vst [vmem:[%s8216_s26 + $0x3f0] sm:$0xff] %v1088_v62  ;;  %1091 = vst [vmem:[%s8216_s26 + $0x3f8] sm:$0xff] %v1090_v63  ;;  %v1094_v1 = vld [vmem:[%s8211_s25 + $0x6a8] sm:$0xff]  ;;  %v1096_v2 = vld [vmem:[%s8211_s25 + $0x6b0] sm:$0xff] }
  0x53   : > { %1093 = vst [vmem:[%s8216_s26 + $0x400] sm:$0xff] %v1092_v0  ;;  %v1098_v3 = vld [vmem:[%s8211_s25 + $0x6b8] sm:$0xff]  ;;  %1095 = vst [vmem:[%s8216_s26 + $0x408] sm:$0xff] %v1094_v1  ;;  %v1100_v4 = vld [vmem:[%s8211_s25 + $0x6c0] sm:$0xff] }
  0x54   : > { %1097 = vst [vmem:[%s8216_s26 + $0x410] sm:$0xff] %v1096_v2  ;;  %1099 = vst [vmem:[%s8216_s26 + $0x418] sm:$0xff] %v1098_v3  ;;  %v1102_v5 = vld [vmem:[%s8211_s25 + $0x6c8] sm:$0xff]  ;;  %v1104_v6 = vld [vmem:[%s8211_s25 + $0x6d0] sm:$0xff] }
  0x55   : > { %1101 = vst [vmem:[%s8216_s26 + $0x420] sm:$0xff] %v1100_v4  ;;  %1103 = vst [vmem:[%s8216_s26 + $0x428] sm:$0xff] %v1102_v5  ;;  %v1106_v7 = vld [vmem:[%s8211_s25 + $0x6d8] sm:$0xff]  ;;  %v1108_v8 = vld [vmem:[%s8211_s25 + $0x6e0] sm:$0xff] }
  0x56   : > { %1105 = vst [vmem:[%s8216_s26 + $0x430] sm:$0xff] %v1104_v6  ;;  %v1110_v9 = vld [vmem:[%s8211_s25 + $0x6e8] sm:$0xff]  ;;  %1107 = vst [vmem:[%s8216_s26 + $0x438] sm:$0xff] %v1106_v7  ;;  %v1112_v10 = vld [vmem:[%s8211_s25 + $0x6f0] sm:$0xff] }
  0x57   : > { %1109 = vst [vmem:[%s8216_s26 + $0x440] sm:$0xff] %v1108_v8  ;;  %1111 = vst [vmem:[%s8216_s26 + $0x448] sm:$0xff] %v1110_v9  ;;  %v1114_v11 = vld [vmem:[%s8211_s25 + $0x6f8] sm:$0xff]  ;;  %v1116_v12 = vld [vmem:[%s8211_s25 + $0x700] sm:$0xff] }
  0x58   : > { %1113 = vst [vmem:[%s8216_s26 + $0x450] sm:$0xff] %v1112_v10  ;;  %1115 = vst [vmem:[%s8216_s26 + $0x458] sm:$0xff] %v1114_v11  ;;  %v1118_v13 = vld [vmem:[%s8211_s25 + $0x708] sm:$0xff]  ;;  %v1120_v14 = vld [vmem:[%s8211_s25 + $0x710] sm:$0xff] }
  0x59   : > { %1117 = vst [vmem:[%s8216_s26 + $0x460] sm:$0xff] %v1116_v12  ;;  %v1122_v15 = vld [vmem:[%s8211_s25 + $0x718] sm:$0xff]  ;;  %1119 = vst [vmem:[%s8216_s26 + $0x468] sm:$0xff] %v1118_v13  ;;  %v1124_v16 = vld [vmem:[%s8211_s25 + $0x720] sm:$0xff] }
  0x5a   : > { %1121 = vst [vmem:[%s8216_s26 + $0x470] sm:$0xff] %v1120_v14  ;;  %1123 = vst [vmem:[%s8216_s26 + $0x478] sm:$0xff] %v1122_v15  ;;  %v1126_v17 = vld [vmem:[%s8211_s25 + $0x728] sm:$0xff]  ;;  %v1128_v18 = vld [vmem:[%s8211_s25 + $0x730] sm:$0xff] }
  0x5b   : > { %1125 = vst [vmem:[%s8216_s26 + $0x480] sm:$0xff] %v1124_v16  ;;  %1127 = vst [vmem:[%s8216_s26 + $0x488] sm:$0xff] %v1126_v17  ;;  %v1130_v19 = vld [vmem:[%s8211_s25 + $0x738] sm:$0xff]  ;;  %v1132_v20 = vld [vmem:[%s8211_s25 + $0x740] sm:$0xff] }
  0x5c   : > { %1129 = vst [vmem:[%s8216_s26 + $0x490] sm:$0xff] %v1128_v18  ;;  %v1134_v21 = vld [vmem:[%s8211_s25 + $0x748] sm:$0xff]  ;;  %1131 = vst [vmem:[%s8216_s26 + $0x498] sm:$0xff] %v1130_v19  ;;  %v1136_v22 = vld [vmem:[%s8211_s25 + $0x750] sm:$0xff] }
  0x5d   : > { %1133 = vst [vmem:[%s8216_s26 + $0x4a0] sm:$0xff] %v1132_v20  ;;  %1135 = vst [vmem:[%s8216_s26 + $0x4a8] sm:$0xff] %v1134_v21  ;;  %v1138_v23 = vld [vmem:[%s8211_s25 + $0x758] sm:$0xff]  ;;  %v1140_v24 = vld [vmem:[%s8211_s25 + $0x760] sm:$0xff] }
  0x5e   : > { %1137 = vst [vmem:[%s8216_s26 + $0x4b0] sm:$0xff] %v1136_v22  ;;  %1139 = vst [vmem:[%s8216_s26 + $0x4b8] sm:$0xff] %v1138_v23  ;;  %v1142_v25 = vld [vmem:[%s8211_s25 + $0x768] sm:$0xff]  ;;  %v1144_v26 = vld [vmem:[%s8211_s25 + $0x770] sm:$0xff] }
  0x5f   : > { %1141 = vst [vmem:[%s8216_s26 + $0x4c0] sm:$0xff] %v1140_v24  ;;  %v1146_v27 = vld [vmem:[%s8211_s25 + $0x778] sm:$0xff]  ;;  %1143 = vst [vmem:[%s8216_s26 + $0x4c8] sm:$0xff] %v1142_v25  ;;  %v1148_v28 = vld [vmem:[%s8211_s25 + $0x780] sm:$0xff] }
  0x60   : > { %1145 = vst [vmem:[%s8216_s26 + $0x4d0] sm:$0xff] %v1144_v26  ;;  %1147 = vst [vmem:[%s8216_s26 + $0x4d8] sm:$0xff] %v1146_v27  ;;  %v1150_v29 = vld [vmem:[%s8211_s25 + $0x788] sm:$0xff]  ;;  %v1152_v30 = vld [vmem:[%s8211_s25 + $0x790] sm:$0xff] }
  0x61   : > { %1149 = vst [vmem:[%s8216_s26 + $0x4e0] sm:$0xff] %v1148_v28  ;;  %1151 = vst [vmem:[%s8216_s26 + $0x4e8] sm:$0xff] %v1150_v29  ;;  %v1154_v31 = vld [vmem:[%s8211_s25 + $0x798] sm:$0xff]  ;;  %v1156_v32 = vld [vmem:[%s8211_s25 + $0x7a0] sm:$0xff] }
  0x62   : > { %1153 = vst [vmem:[%s8216_s26 + $0x4f0] sm:$0xff] %v1152_v30  ;;  %v1158_v33 = vld [vmem:[%s8211_s25 + $0x7a8] sm:$0xff]  ;;  %1155 = vst [vmem:[%s8216_s26 + $0x4f8] sm:$0xff] %v1154_v31  ;;  %v1160_v34 = vld [vmem:[%s8211_s25 + $0x7b0] sm:$0xff] }
  0x63   : > { %1157 = vst [vmem:[%s8216_s26 + $0x500] sm:$0xff] %v1156_v32  ;;  %1159 = vst [vmem:[%s8216_s26 + $0x508] sm:$0xff] %v1158_v33  ;;  %v1162_v35 = vld [vmem:[%s8211_s25 + $0x7b8] sm:$0xff]  ;;  %v1164_v36 = vld [vmem:[%s8211_s25 + $0x7c0] sm:$0xff] }
  0x64   : > { %1161 = vst [vmem:[%s8216_s26 + $0x510] sm:$0xff] %v1160_v34  ;;  %1163 = vst [vmem:[%s8216_s26 + $0x518] sm:$0xff] %v1162_v35  ;;  %v1166_v37 = vld [vmem:[%s8211_s25 + $0x7c8] sm:$0xff]  ;;  %v1168_v38 = vld [vmem:[%s8211_s25 + $0x7d0] sm:$0xff] }
  0x65   : > { %1165 = vst [vmem:[%s8216_s26 + $0x520] sm:$0xff] %v1164_v36  ;;  %v1170_v39 = vld [vmem:[%s8211_s25 + $0x7d8] sm:$0xff]  ;;  %1167 = vst [vmem:[%s8216_s26 + $0x528] sm:$0xff] %v1166_v37  ;;  %v1172_v40 = vld [vmem:[%s8211_s25 + $0xa80] sm:$0xff] }
  0x66   : > { %1169 = vst [vmem:[%s8216_s26 + $0x530] sm:$0xff] %v1168_v38  ;;  %1171 = vst [vmem:[%s8216_s26 + $0x538] sm:$0xff] %v1170_v39  ;;  %v1174_v41 = vld [vmem:[%s8211_s25 + $0xa88] sm:$0xff]  ;;  %v1176_v42 = vld [vmem:[%s8211_s25 + $0xa90] sm:$0xff] }
  0x67   : > { %1173 = vst [vmem:[%s8216_s26 + $0x540] sm:$0xff] %v1172_v40  ;;  %1175 = vst [vmem:[%s8216_s26 + $0x548] sm:$0xff] %v1174_v41  ;;  %v1178_v43 = vld [vmem:[%s8211_s25 + $0xa98] sm:$0xff]  ;;  %v1180_v44 = vld [vmem:[%s8211_s25 + $0xaa0] sm:$0xff] }
  0x68   : > { %1177 = vst [vmem:[%s8216_s26 + $0x550] sm:$0xff] %v1176_v42  ;;  %v1182_v45 = vld [vmem:[%s8211_s25 + $0xaa8] sm:$0xff]  ;;  %1179 = vst [vmem:[%s8216_s26 + $0x558] sm:$0xff] %v1178_v43  ;;  %v1184_v46 = vld [vmem:[%s8211_s25 + $0xab0] sm:$0xff] }
  0x69   : > { %1181 = vst [vmem:[%s8216_s26 + $0x560] sm:$0xff] %v1180_v44  ;;  %1183 = vst [vmem:[%s8216_s26 + $0x568] sm:$0xff] %v1182_v45  ;;  %v1186_v47 = vld [vmem:[%s8211_s25 + $0xab8] sm:$0xff]  ;;  %v1188_v48 = vld [vmem:[%s8211_s25 + $0xac0] sm:$0xff] }
  0x6a   : > { %1185 = vst [vmem:[%s8216_s26 + $0x570] sm:$0xff] %v1184_v46  ;;  %1187 = vst [vmem:[%s8216_s26 + $0x578] sm:$0xff] %v1186_v47  ;;  %v1190_v49 = vld [vmem:[%s8211_s25 + $0xac8] sm:$0xff]  ;;  %v1192_v50 = vld [vmem:[%s8211_s25 + $0xad0] sm:$0xff] }
  0x6b   : > { %1189 = vst [vmem:[%s8216_s26 + $0x580] sm:$0xff] %v1188_v48  ;;  %v1194_v51 = vld [vmem:[%s8211_s25 + $0xad8] sm:$0xff]  ;;  %1191 = vst [vmem:[%s8216_s26 + $0x588] sm:$0xff] %v1190_v49  ;;  %v1196_v52 = vld [vmem:[%s8211_s25 + $0xae0] sm:$0xff] }
  0x6c   : > { %1193 = vst [vmem:[%s8216_s26 + $0x590] sm:$0xff] %v1192_v50  ;;  %1195 = vst [vmem:[%s8216_s26 + $0x598] sm:$0xff] %v1194_v51  ;;  %v1198_v53 = vld [vmem:[%s8211_s25 + $0xae8] sm:$0xff]  ;;  %v1200_v54 = vld [vmem:[%s8211_s25 + $0xaf0] sm:$0xff] }
  0x6d   : > { %1197 = vst [vmem:[%s8216_s26 + $0x5a0] sm:$0xff] %v1196_v52  ;;  %1199 = vst [vmem:[%s8216_s26 + $0x5a8] sm:$0xff] %v1198_v53  ;;  %v1202_v55 = vld [vmem:[%s8211_s25 + $0xaf8] sm:$0xff]  ;;  %v1204_v56 = vld [vmem:[%s8211_s25 + $0xb00] sm:$0xff] }
  0x6e   : > { %1201 = vst [vmem:[%s8216_s26 + $0x5b0] sm:$0xff] %v1200_v54  ;;  %v1206_v57 = vld [vmem:[%s8211_s25 + $0xb08] sm:$0xff]  ;;  %1203 = vst [vmem:[%s8216_s26 + $0x5b8] sm:$0xff] %v1202_v55  ;;  %v1208_v58 = vld [vmem:[%s8211_s25 + $0xb10] sm:$0xff] }
  0x6f   : > { %1205 = vst [vmem:[%s8216_s26 + $0x5c0] sm:$0xff] %v1204_v56  ;;  %1207 = vst [vmem:[%s8216_s26 + $0x5c8] sm:$0xff] %v1206_v57  ;;  %v1210_v59 = vld [vmem:[%s8211_s25 + $0xb18] sm:$0xff]  ;;  %v1212_v60 = vld [vmem:[%s8211_s25 + $0xb20] sm:$0xff] }
  0x70   : > { %1209 = vst [vmem:[%s8216_s26 + $0x5d0] sm:$0xff] %v1208_v58  ;;  %1211 = vst [vmem:[%s8216_s26 + $0x5d8] sm:$0xff] %v1210_v59  ;;  %v1214_v61 = vld [vmem:[%s8211_s25 + $0xb28] sm:$0xff]  ;;  %v1216_v62 = vld [vmem:[%s8211_s25 + $0xb30] sm:$0xff] }
  0x71   : > { %1213 = vst [vmem:[%s8216_s26 + $0x5e0] sm:$0xff] %v1212_v60  ;;  %v1218_v63 = vld [vmem:[%s8211_s25 + $0xb38] sm:$0xff]  ;;  %1215 = vst [vmem:[%s8216_s26 + $0x5e8] sm:$0xff] %v1214_v61  ;;  %v1220_v0 = vld [vmem:[%s8211_s25 + $0xb40] sm:$0xff] }
  0x72   : > { %1217 = vst [vmem:[%s8216_s26 + $0x5f0] sm:$0xff] %v1216_v62  ;;  %1219 = vst [vmem:[%s8216_s26 + $0x5f8] sm:$0xff] %v1218_v63  ;;  %v1222_v1 = vld [vmem:[%s8211_s25 + $0xb48] sm:$0xff]  ;;  %v1224_v2 = vld [vmem:[%s8211_s25 + $0xb50] sm:$0xff] }
  0x73   : > { %1221 = vst [vmem:[%s8216_s26 + $0x600] sm:$0xff] %v1220_v0  ;;  %1223 = vst [vmem:[%s8216_s26 + $0x608] sm:$0xff] %v1222_v1  ;;  %v1226_v3 = vld [vmem:[%s8211_s25 + $0xb58] sm:$0xff]  ;;  %v1228_v4 = vld [vmem:[%s8211_s25 + $0xb60] sm:$0xff] }
  0x74   : > { %1225 = vst [vmem:[%s8216_s26 + $0x610] sm:$0xff] %v1224_v2  ;;  %v1230_v5 = vld [vmem:[%s8211_s25 + $0xb68] sm:$0xff]  ;;  %1227 = vst [vmem:[%s8216_s26 + $0x618] sm:$0xff] %v1226_v3  ;;  %v1232_v6 = vld [vmem:[%s8211_s25 + $0xb70] sm:$0xff] }
  0x75   : > { %1229 = vst [vmem:[%s8216_s26 + $0x620] sm:$0xff] %v1228_v4  ;;  %1231 = vst [vmem:[%s8216_s26 + $0x628] sm:$0xff] %v1230_v5  ;;  %v1234_v7 = vld [vmem:[%s8211_s25 + $0xb78] sm:$0xff]  ;;  %v1236_v8 = vld [vmem:[%s8211_s25 + $0xb80] sm:$0xff] }
  0x76   : > { %1233 = vst [vmem:[%s8216_s26 + $0x630] sm:$0xff] %v1232_v6  ;;  %1235 = vst [vmem:[%s8216_s26 + $0x638] sm:$0xff] %v1234_v7  ;;  %v1238_v9 = vld [vmem:[%s8211_s25 + $0xb88] sm:$0xff]  ;;  %v1240_v10 = vld [vmem:[%s8211_s25 + $0xb90] sm:$0xff] }
  0x77   : > { %1237 = vst [vmem:[%s8216_s26 + $0x640] sm:$0xff] %v1236_v8  ;;  %v1242_v11 = vld [vmem:[%s8211_s25 + $0xb98] sm:$0xff]  ;;  %1239 = vst [vmem:[%s8216_s26 + $0x648] sm:$0xff] %v1238_v9  ;;  %v1244_v12 = vld [vmem:[%s8211_s25 + $0xba0] sm:$0xff] }
  0x78   : > { %1241 = vst [vmem:[%s8216_s26 + $0x650] sm:$0xff] %v1240_v10  ;;  %1243 = vst [vmem:[%s8216_s26 + $0x658] sm:$0xff] %v1242_v11  ;;  %v1246_v13 = vld [vmem:[%s8211_s25 + $0xba8] sm:$0xff]  ;;  %v1248_v14 = vld [vmem:[%s8211_s25 + $0xbb0] sm:$0xff] }
  0x79   : > { %1245 = vst [vmem:[%s8216_s26 + $0x660] sm:$0xff] %v1244_v12  ;;  %1247 = vst [vmem:[%s8216_s26 + $0x668] sm:$0xff] %v1246_v13  ;;  %v1250_v15 = vld [vmem:[%s8211_s25 + $0xbb8] sm:$0xff]  ;;  %v1252_v16 = vld [vmem:[%s8211_s25 + $0xbc0] sm:$0xff] }
  0x7a   : > { %1249 = vst [vmem:[%s8216_s26 + $0x670] sm:$0xff] %v1248_v14  ;;  %v1254_v17 = vld [vmem:[%s8211_s25 + $0xbc8] sm:$0xff]  ;;  %1251 = vst [vmem:[%s8216_s26 + $0x678] sm:$0xff] %v1250_v15  ;;  %v1256_v18 = vld [vmem:[%s8211_s25 + $0xbd0] sm:$0xff] }
  0x7b   : > { %1253 = vst [vmem:[%s8216_s26 + $0x680] sm:$0xff] %v1252_v16  ;;  %1255 = vst [vmem:[%s8216_s26 + $0x688] sm:$0xff] %v1254_v17  ;;  %v1258_v19 = vld [vmem:[%s8211_s25 + $0xbd8] sm:$0xff]  ;;  %v1260_v20 = vld [vmem:[%s8211_s25 + $0xbe0] sm:$0xff] }
  0x7c   : > { %1257 = vst [vmem:[%s8216_s26 + $0x690] sm:$0xff] %v1256_v18  ;;  %1259 = vst [vmem:[%s8216_s26 + $0x698] sm:$0xff] %v1258_v19  ;;  %v1262_v21 = vld [vmem:[%s8211_s25 + $0xbe8] sm:$0xff]  ;;  %v1264_v22 = vld [vmem:[%s8211_s25 + $0xbf0] sm:$0xff] }
  0x7d   : > { %1261 = vst [vmem:[%s8216_s26 + $0x6a0] sm:$0xff] %v1260_v20  ;;  %v1266_v23 = vld [vmem:[%s8211_s25 + $0xbf8] sm:$0xff]  ;;  %1263 = vst [vmem:[%s8216_s26 + $0x6a8] sm:$0xff] %v1262_v21  ;;  %v1268_v24 = vld [vmem:[%s8211_s25 + $0xc00] sm:$0xff] }
  0x7e   : > { %1265 = vst [vmem:[%s8216_s26 + $0x6b0] sm:$0xff] %v1264_v22  ;;  %1267 = vst [vmem:[%s8216_s26 + $0x6b8] sm:$0xff] %v1266_v23  ;;  %v1270_v25 = vld [vmem:[%s8211_s25 + $0xc08] sm:$0xff]  ;;  %v1272_v26 = vld [vmem:[%s8211_s25 + $0xc10] sm:$0xff] }
  0x7f   : > { %1269 = vst [vmem:[%s8216_s26 + $0x6c0] sm:$0xff] %v1268_v24  ;;  %1271 = vst [vmem:[%s8216_s26 + $0x6c8] sm:$0xff] %v1270_v25  ;;  %v1274_v27 = vld [vmem:[%s8211_s25 + $0xc18] sm:$0xff]  ;;  %v1276_v28 = vld [vmem:[%s8211_s25 + $0xc20] sm:$0xff] }
  0x80   : > { %1273 = vst [vmem:[%s8216_s26 + $0x6d0] sm:$0xff] %v1272_v26  ;;  %v1278_v29 = vld [vmem:[%s8211_s25 + $0xc28] sm:$0xff]  ;;  %1275 = vst [vmem:[%s8216_s26 + $0x6d8] sm:$0xff] %v1274_v27  ;;  %v1280_v30 = vld [vmem:[%s8211_s25 + $0xc30] sm:$0xff] }
  0x81   : > { %1277 = vst [vmem:[%s8216_s26 + $0x6e0] sm:$0xff] %v1276_v28  ;;  %1279 = vst [vmem:[%s8216_s26 + $0x6e8] sm:$0xff] %v1278_v29  ;;  %v1282_v31 = vld [vmem:[%s8211_s25 + $0xc38] sm:$0xff]  ;;  %v1284_v32 = vld [vmem:[%s8211_s25 + $0xc40] sm:$0xff] }
  0x82   : > { %1281 = vst [vmem:[%s8216_s26 + $0x6f0] sm:$0xff] %v1280_v30  ;;  %1283 = vst [vmem:[%s8216_s26 + $0x6f8] sm:$0xff] %v1282_v31  ;;  %v1286_v33 = vld [vmem:[%s8211_s25 + $0xc48] sm:$0xff]  ;;  %v1288_v34 = vld [vmem:[%s8211_s25 + $0xc50] sm:$0xff] }
  0x83   : > { %1285 = vst [vmem:[%s8216_s26 + $0x700] sm:$0xff] %v1284_v32  ;;  %v1290_v35 = vld [vmem:[%s8211_s25 + $0xc58] sm:$0xff]  ;;  %1287 = vst [vmem:[%s8216_s26 + $0x708] sm:$0xff] %v1286_v33  ;;  %v1292_v36 = vld [vmem:[%s8211_s25 + $0xc60] sm:$0xff] }
  0x84   : > { %1289 = vst [vmem:[%s8216_s26 + $0x710] sm:$0xff] %v1288_v34  ;;  %1291 = vst [vmem:[%s8216_s26 + $0x718] sm:$0xff] %v1290_v35  ;;  %v1294_v37 = vld [vmem:[%s8211_s25 + $0xc68] sm:$0xff]  ;;  %v1296_v38 = vld [vmem:[%s8211_s25 + $0xc70] sm:$0xff] }
  0x85   : > { %1293 = vst [vmem:[%s8216_s26 + $0x720] sm:$0xff] %v1292_v36  ;;  %1295 = vst [vmem:[%s8216_s26 + $0x728] sm:$0xff] %v1294_v37  ;;  %v1298_v39 = vld [vmem:[%s8211_s25 + $0xc78] sm:$0xff]  ;;  %v1300_v40 = vld [vmem:[%s8211_s25 + $0xc80] sm:$0xff] }
  0x86   : > { %1297 = vst [vmem:[%s8216_s26 + $0x730] sm:$0xff] %v1296_v38  ;;  %v1302_v41 = vld [vmem:[%s8211_s25 + $0xc88] sm:$0xff]  ;;  %1299 = vst [vmem:[%s8216_s26 + $0x738] sm:$0xff] %v1298_v39  ;;  %v1304_v42 = vld [vmem:[%s8211_s25 + $0xc90] sm:$0xff] }
  0x87   : > { %1301 = vst [vmem:[%s8216_s26 + $0x740] sm:$0xff] %v1300_v40  ;;  %1303 = vst [vmem:[%s8216_s26 + $0x748] sm:$0xff] %v1302_v41  ;;  %v1306_v43 = vld [vmem:[%s8211_s25 + $0xc98] sm:$0xff]  ;;  %v1308_v44 = vld [vmem:[%s8211_s25 + $0xca0] sm:$0xff] }
  0x88   : > { %1305 = vst [vmem:[%s8216_s26 + $0x750] sm:$0xff] %v1304_v42  ;;  %1307 = vst [vmem:[%s8216_s26 + $0x758] sm:$0xff] %v1306_v43  ;;  %v1310_v45 = vld [vmem:[%s8211_s25 + $0xca8] sm:$0xff]  ;;  %v1312_v46 = vld [vmem:[%s8211_s25 + $0xcb0] sm:$0xff] }
  0x89   : > { %1309 = vst [vmem:[%s8216_s26 + $0x760] sm:$0xff] %v1308_v44  ;;  %v1314_v47 = vld [vmem:[%s8211_s25 + $0xcb8] sm:$0xff]  ;;  %1311 = vst [vmem:[%s8216_s26 + $0x768] sm:$0xff] %v1310_v45  ;;  %v1316_v48 = vld [vmem:[%s8211_s25 + $0xcc0] sm:$0xff] }
  0x8a   : > { %1313 = vst [vmem:[%s8216_s26 + $0x770] sm:$0xff] %v1312_v46  ;;  %1315 = vst [vmem:[%s8216_s26 + $0x778] sm:$0xff] %v1314_v47  ;;  %v1318_v49 = vld [vmem:[%s8211_s25 + $0xcc8] sm:$0xff]  ;;  %v1320_v50 = vld [vmem:[%s8211_s25 + $0xcd0] sm:$0xff] }
  0x8b   : > { %1317 = vst [vmem:[%s8216_s26 + $0x780] sm:$0xff] %v1316_v48  ;;  %1319 = vst [vmem:[%s8216_s26 + $0x788] sm:$0xff] %v1318_v49  ;;  %v1322_v51 = vld [vmem:[%s8211_s25 + $0xcd8] sm:$0xff]  ;;  %v1324_v52 = vld [vmem:[%s8211_s25 + $0xce0] sm:$0xff] }
  0x8c   : > { %1321 = vst [vmem:[%s8216_s26 + $0x790] sm:$0xff] %v1320_v50  ;;  %v1326_v53 = vld [vmem:[%s8211_s25 + $0xce8] sm:$0xff]  ;;  %1323 = vst [vmem:[%s8216_s26 + $0x798] sm:$0xff] %v1322_v51  ;;  %v1328_v54 = vld [vmem:[%s8211_s25 + $0xcf0] sm:$0xff] }
  0x8d   : > { %1325 = vst [vmem:[%s8216_s26 + $0x7a0] sm:$0xff] %v1324_v52  ;;  %1327 = vst [vmem:[%s8216_s26 + $0x7a8] sm:$0xff] %v1326_v53  ;;  %v1330_v55 = vld [vmem:[%s8211_s25 + $0xcf8] sm:$0xff]  ;;  %v1332_v56 = vld [vmem:[%s8211_s25 + $0xd00] sm:$0xff] }
  0x8e   : > { %1329 = vst [vmem:[%s8216_s26 + $0x7b0] sm:$0xff] %v1328_v54  ;;  %1331 = vst [vmem:[%s8216_s26 + $0x7b8] sm:$0xff] %v1330_v55  ;;  %v1334_v57 = vld [vmem:[%s8211_s25 + $0xd08] sm:$0xff]  ;;  %v1336_v58 = vld [vmem:[%s8211_s25 + $0xd10] sm:$0xff] }
  0x8f   : > { %1333 = vst [vmem:[%s8216_s26 + $0x7c0] sm:$0xff] %v1332_v56  ;;  %v1338_v59 = vld [vmem:[%s8211_s25 + $0xd18] sm:$0xff]  ;;  %1335 = vst [vmem:[%s8216_s26 + $0x7c8] sm:$0xff] %v1334_v57  ;;  %v1340_v60 = vld [vmem:[%s8211_s25 + $0xfc0] sm:$0xff] }
  0x90   : > { %1337 = vst [vmem:[%s8216_s26 + $0x7d0] sm:$0xff] %v1336_v58  ;;  %1339 = vst [vmem:[%s8216_s26 + $0x7d8] sm:$0xff] %v1338_v59  ;;  %v1342_v61 = vld [vmem:[%s8211_s25 + $0xfc8] sm:$0xff]  ;;  %v1344_v62 = vld [vmem:[%s8211_s25 + $0xfd0] sm:$0xff] }
  0x91   : > { %1341 = vst [vmem:[%s8216_s26 + $0x7e0] sm:$0xff] %v1340_v60  ;;  %1343 = vst [vmem:[%s8216_s26 + $0x7e8] sm:$0xff] %v1342_v61  ;;  %v1346_v63 = vld [vmem:[%s8211_s25 + $0xfd8] sm:$0xff]  ;;  %v1348_v0 = vld [vmem:[%s8211_s25 + $0xfe0] sm:$0xff] }
  0x92   : > { %1345 = vst [vmem:[%s8216_s26 + $0x7f0] sm:$0xff] %v1344_v62  ;;  %v1350_v1 = vld [vmem:[%s8211_s25 + $0xfe8] sm:$0xff]  ;;  %1347 = vst [vmem:[%s8216_s26 + $0x7f8] sm:$0xff] %v1346_v63  ;;  %v1352_v2 = vld [vmem:[%s8211_s25 + $0xff0] sm:$0xff] }
  0x93   : > { %1349 = vst [vmem:[%s8216_s26 + $0x800] sm:$0xff] %v1348_v0  ;;  %1351 = vst [vmem:[%s8216_s26 + $0x808] sm:$0xff] %v1350_v1  ;;  %v1354_v3 = vld [vmem:[%s8211_s25 + $0xff8] sm:$0xff]  ;;  %v1356_v4 = vld [vmem:[%s8211_s25 + $0x1000] sm:$0xff] }
  0x94   : > { %1353 = vst [vmem:[%s8216_s26 + $0x810] sm:$0xff] %v1352_v2  ;;  %1355 = vst [vmem:[%s8216_s26 + $0x818] sm:$0xff] %v1354_v3  ;;  %v1358_v5 = vld [vmem:[%s8211_s25 + $0x1008] sm:$0xff]  ;;  %v1360_v6 = vld [vmem:[%s8211_s25 + $0x1010] sm:$0xff] }
  0x95   : > { %1357 = vst [vmem:[%s8216_s26 + $0x820] sm:$0xff] %v1356_v4  ;;  %v1362_v7 = vld [vmem:[%s8211_s25 + $0x1018] sm:$0xff]  ;;  %1359 = vst [vmem:[%s8216_s26 + $0x828] sm:$0xff] %v1358_v5  ;;  %v1364_v8 = vld [vmem:[%s8211_s25 + $0x1020] sm:$0xff] }
  0x96   : > { %1361 = vst [vmem:[%s8216_s26 + $0x830] sm:$0xff] %v1360_v6  ;;  %1363 = vst [vmem:[%s8216_s26 + $0x838] sm:$0xff] %v1362_v7  ;;  %v1366_v9 = vld [vmem:[%s8211_s25 + $0x1028] sm:$0xff]  ;;  %v1368_v10 = vld [vmem:[%s8211_s25 + $0x1030] sm:$0xff] }
  0x97   : > { %1365 = vst [vmem:[%s8216_s26 + $0x840] sm:$0xff] %v1364_v8  ;;  %1367 = vst [vmem:[%s8216_s26 + $0x848] sm:$0xff] %v1366_v9  ;;  %v1370_v11 = vld [vmem:[%s8211_s25 + $0x1038] sm:$0xff]  ;;  %v1372_v12 = vld [vmem:[%s8211_s25 + $0x1040] sm:$0xff] }
  0x98   : > { %1369 = vst [vmem:[%s8216_s26 + $0x850] sm:$0xff] %v1368_v10  ;;  %v1374_v13 = vld [vmem:[%s8211_s25 + $0x1048] sm:$0xff]  ;;  %1371 = vst [vmem:[%s8216_s26 + $0x858] sm:$0xff] %v1370_v11  ;;  %v1376_v14 = vld [vmem:[%s8211_s25 + $0x1050] sm:$0xff] }
  0x99   : > { %1373 = vst [vmem:[%s8216_s26 + $0x860] sm:$0xff] %v1372_v12  ;;  %1375 = vst [vmem:[%s8216_s26 + $0x868] sm:$0xff] %v1374_v13  ;;  %v1378_v15 = vld [vmem:[%s8211_s25 + $0x1058] sm:$0xff]  ;;  %v1380_v16 = vld [vmem:[%s8211_s25 + $0x1060] sm:$0xff] }
  0x9a   : > { %1377 = vst [vmem:[%s8216_s26 + $0x870] sm:$0xff] %v1376_v14  ;;  %1379 = vst [vmem:[%s8216_s26 + $0x878] sm:$0xff] %v1378_v15  ;;  %v1382_v17 = vld [vmem:[%s8211_s25 + $0x1068] sm:$0xff]  ;;  %v1384_v18 = vld [vmem:[%s8211_s25 + $0x1070] sm:$0xff] }
  0x9b   : > { %1381 = vst [vmem:[%s8216_s26 + $0x880] sm:$0xff] %v1380_v16  ;;  %v1386_v19 = vld [vmem:[%s8211_s25 + $0x1078] sm:$0xff]  ;;  %1383 = vst [vmem:[%s8216_s26 + $0x888] sm:$0xff] %v1382_v17  ;;  %v1388_v20 = vld [vmem:[%s8211_s25 + $0x1080] sm:$0xff] }
  0x9c   : > { %1385 = vst [vmem:[%s8216_s26 + $0x890] sm:$0xff] %v1384_v18  ;;  %1387 = vst [vmem:[%s8216_s26 + $0x898] sm:$0xff] %v1386_v19  ;;  %v1390_v21 = vld [vmem:[%s8211_s25 + $0x1088] sm:$0xff]  ;;  %v1392_v22 = vld [vmem:[%s8211_s25 + $0x1090] sm:$0xff] }
  0x9d   : > { %1389 = vst [vmem:[%s8216_s26 + $0x8a0] sm:$0xff] %v1388_v20  ;;  %1391 = vst [vmem:[%s8216_s26 + $0x8a8] sm:$0xff] %v1390_v21  ;;  %v1394_v23 = vld [vmem:[%s8211_s25 + $0x1098] sm:$0xff]  ;;  %v1396_v24 = vld [vmem:[%s8211_s25 + $0x10a0] sm:$0xff] }
  0x9e   : > { %1393 = vst [vmem:[%s8216_s26 + $0x8b0] sm:$0xff] %v1392_v22  ;;  %v1398_v25 = vld [vmem:[%s8211_s25 + $0x10a8] sm:$0xff]  ;;  %1395 = vst [vmem:[%s8216_s26 + $0x8b8] sm:$0xff] %v1394_v23  ;;  %v1400_v26 = vld [vmem:[%s8211_s25 + $0x10b0] sm:$0xff] }
  0x9f   : > { %1397 = vst [vmem:[%s8216_s26 + $0x8c0] sm:$0xff] %v1396_v24  ;;  %1399 = vst [vmem:[%s8216_s26 + $0x8c8] sm:$0xff] %v1398_v25  ;;  %v1402_v27 = vld [vmem:[%s8211_s25 + $0x10b8] sm:$0xff]  ;;  %v1404_v28 = vld [vmem:[%s8211_s25 + $0x10c0] sm:$0xff] }
  0xa0   : > { %1401 = vst [vmem:[%s8216_s26 + $0x8d0] sm:$0xff] %v1400_v26  ;;  %1403 = vst [vmem:[%s8216_s26 + $0x8d8] sm:$0xff] %v1402_v27  ;;  %v1406_v29 = vld [vmem:[%s8211_s25 + $0x10c8] sm:$0xff]  ;;  %v1408_v30 = vld [vmem:[%s8211_s25 + $0x10d0] sm:$0xff] }
  0xa1   : > { %1405 = vst [vmem:[%s8216_s26 + $0x8e0] sm:$0xff] %v1404_v28  ;;  %v1410_v31 = vld [vmem:[%s8211_s25 + $0x10d8] sm:$0xff]  ;;  %1407 = vst [vmem:[%s8216_s26 + $0x8e8] sm:$0xff] %v1406_v29  ;;  %v1412_v32 = vld [vmem:[%s8211_s25 + $0x10e0] sm:$0xff] }
  0xa2   : > { %1409 = vst [vmem:[%s8216_s26 + $0x8f0] sm:$0xff] %v1408_v30  ;;  %1411 = vst [vmem:[%s8216_s26 + $0x8f8] sm:$0xff] %v1410_v31  ;;  %v1414_v33 = vld [vmem:[%s8211_s25 + $0x10e8] sm:$0xff]  ;;  %v1416_v34 = vld [vmem:[%s8211_s25 + $0x10f0] sm:$0xff] }
  0xa3   : > { %1413 = vst [vmem:[%s8216_s26 + $0x900] sm:$0xff] %v1412_v32  ;;  %1415 = vst [vmem:[%s8216_s26 + $0x908] sm:$0xff] %v1414_v33  ;;  %v1418_v35 = vld [vmem:[%s8211_s25 + $0x10f8] sm:$0xff]  ;;  %v1420_v36 = vld [vmem:[%s8211_s25 + $0x1100] sm:$0xff] }
  0xa4   : > { %1417 = vst [vmem:[%s8216_s26 + $0x910] sm:$0xff] %v1416_v34  ;;  %v1422_v37 = vld [vmem:[%s8211_s25 + $0x1108] sm:$0xff]  ;;  %1419 = vst [vmem:[%s8216_s26 + $0x918] sm:$0xff] %v1418_v35  ;;  %v1424_v38 = vld [vmem:[%s8211_s25 + $0x1110] sm:$0xff] }
  0xa5   : > { %1421 = vst [vmem:[%s8216_s26 + $0x920] sm:$0xff] %v1420_v36  ;;  %1423 = vst [vmem:[%s8216_s26 + $0x928] sm:$0xff] %v1422_v37  ;;  %v1426_v39 = vld [vmem:[%s8211_s25 + $0x1118] sm:$0xff]  ;;  %v1428_v40 = vld [vmem:[%s8211_s25 + $0x1120] sm:$0xff] }
  0xa6   : > { %1425 = vst [vmem:[%s8216_s26 + $0x930] sm:$0xff] %v1424_v38  ;;  %1427 = vst [vmem:[%s8216_s26 + $0x938] sm:$0xff] %v1426_v39  ;;  %v1430_v41 = vld [vmem:[%s8211_s25 + $0x1128] sm:$0xff]  ;;  %v1432_v42 = vld [vmem:[%s8211_s25 + $0x1130] sm:$0xff] }
  0xa7   : > { %1429 = vst [vmem:[%s8216_s26 + $0x940] sm:$0xff] %v1428_v40  ;;  %v1434_v43 = vld [vmem:[%s8211_s25 + $0x1138] sm:$0xff]  ;;  %1431 = vst [vmem:[%s8216_s26 + $0x948] sm:$0xff] %v1430_v41  ;;  %v1436_v44 = vld [vmem:[%s8211_s25 + $0x1140] sm:$0xff] }
  0xa8   : > { %1433 = vst [vmem:[%s8216_s26 + $0x950] sm:$0xff] %v1432_v42  ;;  %1435 = vst [vmem:[%s8216_s26 + $0x958] sm:$0xff] %v1434_v43  ;;  %v1438_v45 = vld [vmem:[%s8211_s25 + $0x1148] sm:$0xff]  ;;  %v1440_v46 = vld [vmem:[%s8211_s25 + $0x1150] sm:$0xff] }
  0xa9   : > { %1437 = vst [vmem:[%s8216_s26 + $0x960] sm:$0xff] %v1436_v44  ;;  %1439 = vst [vmem:[%s8216_s26 + $0x968] sm:$0xff] %v1438_v45  ;;  %v1442_v47 = vld [vmem:[%s8211_s25 + $0x1158] sm:$0xff]  ;;  %v1444_v48 = vld [vmem:[%s8211_s25 + $0x1160] sm:$0xff] }
  0xaa   : > { %1441 = vst [vmem:[%s8216_s26 + $0x970] sm:$0xff] %v1440_v46  ;;  %v1446_v49 = vld [vmem:[%s8211_s25 + $0x1168] sm:$0xff]  ;;  %1443 = vst [vmem:[%s8216_s26 + $0x978] sm:$0xff] %v1442_v47  ;;  %v1448_v50 = vld [vmem:[%s8211_s25 + $0x1170] sm:$0xff] }
  0xab   : > { %1445 = vst [vmem:[%s8216_s26 + $0x980] sm:$0xff] %v1444_v48  ;;  %1447 = vst [vmem:[%s8216_s26 + $0x988] sm:$0xff] %v1446_v49  ;;  %v1450_v51 = vld [vmem:[%s8211_s25 + $0x1178] sm:$0xff]  ;;  %v1452_v52 = vld [vmem:[%s8211_s25 + $0x1180] sm:$0xff] }
  0xac   : > { %1449 = vst [vmem:[%s8216_s26 + $0x990] sm:$0xff] %v1448_v50  ;;  %1451 = vst [vmem:[%s8216_s26 + $0x998] sm:$0xff] %v1450_v51  ;;  %v1454_v53 = vld [vmem:[%s8211_s25 + $0x1188] sm:$0xff]  ;;  %v1456_v54 = vld [vmem:[%s8211_s25 + $0x1190] sm:$0xff] }
  0xad   : > { %1453 = vst [vmem:[%s8216_s26 + $0x9a0] sm:$0xff] %v1452_v52  ;;  %v1458_v55 = vld [vmem:[%s8211_s25 + $0x1198] sm:$0xff]  ;;  %1455 = vst [vmem:[%s8216_s26 + $0x9a8] sm:$0xff] %v1454_v53  ;;  %v1460_v56 = vld [vmem:[%s8211_s25 + $0x11a0] sm:$0xff] }
  0xae   : > { %1457 = vst [vmem:[%s8216_s26 + $0x9b0] sm:$0xff] %v1456_v54  ;;  %1459 = vst [vmem:[%s8216_s26 + $0x9b8] sm:$0xff] %v1458_v55  ;;  %v1462_v57 = vld [vmem:[%s8211_s25 + $0x11a8] sm:$0xff]  ;;  %v1464_v58 = vld [vmem:[%s8211_s25 + $0x11b0] sm:$0xff] }
  0xaf   : > { %1461 = vst [vmem:[%s8216_s26 + $0x9c0] sm:$0xff] %v1460_v56  ;;  %1463 = vst [vmem:[%s8216_s26 + $0x9c8] sm:$0xff] %v1462_v57  ;;  %v1466_v59 = vld [vmem:[%s8211_s25 + $0x11b8] sm:$0xff]  ;;  %v1468_v60 = vld [vmem:[%s8211_s25 + $0x11c0] sm:$0xff] }
  0xb0   : > { %1465 = vst [vmem:[%s8216_s26 + $0x9d0] sm:$0xff] %v1464_v58  ;;  %v1470_v61 = vld [vmem:[%s8211_s25 + $0x11c8] sm:$0xff]  ;;  %1467 = vst [vmem:[%s8216_s26 + $0x9d8] sm:$0xff] %v1466_v59  ;;  %v1472_v62 = vld [vmem:[%s8211_s25 + $0x11d0] sm:$0xff] }
  0xb1   : > { %1469 = vst [vmem:[%s8216_s26 + $0x9e0] sm:$0xff] %v1468_v60  ;;  %1471 = vst [vmem:[%s8216_s26 + $0x9e8] sm:$0xff] %v1470_v61  ;;  %v1474_v63 = vld [vmem:[%s8211_s25 + $0x11d8] sm:$0xff]  ;;  %v1476_v0 = vld [vmem:[%s8211_s25 + $0x11e0] sm:$0xff] }
  0xb2   : > { %1473 = vst [vmem:[%s8216_s26 + $0x9f0] sm:$0xff] %v1472_v62  ;;  %1475 = vst [vmem:[%s8216_s26 + $0x9f8] sm:$0xff] %v1474_v63  ;;  %v1478_v1 = vld [vmem:[%s8211_s25 + $0x11e8] sm:$0xff]  ;;  %v1480_v2 = vld [vmem:[%s8211_s25 + $0x11f0] sm:$0xff] }
  0xb3   : > { %1477 = vst [vmem:[%s8216_s26 + $0xa00] sm:$0xff] %v1476_v0  ;;  %v1482_v3 = vld [vmem:[%s8211_s25 + $0x11f8] sm:$0xff]  ;;  %1479 = vst [vmem:[%s8216_s26 + $0xa08] sm:$0xff] %v1478_v1  ;;  %v1484_v4 = vld [vmem:[%s8211_s25 + $0x1200] sm:$0xff] }
  0xb4   : > { %1481 = vst [vmem:[%s8216_s26 + $0xa10] sm:$0xff] %v1480_v2  ;;  %1483 = vst [vmem:[%s8216_s26 + $0xa18] sm:$0xff] %v1482_v3  ;;  %v1486_v5 = vld [vmem:[%s8211_s25 + $0x1208] sm:$0xff]  ;;  %v1488_v6 = vld [vmem:[%s8211_s25 + $0x1210] sm:$0xff] }
  0xb5   : > { %1485 = vst [vmem:[%s8216_s26 + $0xa20] sm:$0xff] %v1484_v4  ;;  %1487 = vst [vmem:[%s8216_s26 + $0xa28] sm:$0xff] %v1486_v5  ;;  %v1490_v7 = vld [vmem:[%s8211_s25 + $0x1218] sm:$0xff]  ;;  %v1492_v8 = vld [vmem:[%s8211_s25 + $0x1220] sm:$0xff] }
  0xb6   : > { %1489 = vst [vmem:[%s8216_s26 + $0xa30] sm:$0xff] %v1488_v6  ;;  %v1494_v9 = vld [vmem:[%s8211_s25 + $0x1228] sm:$0xff]  ;;  %1491 = vst [vmem:[%s8216_s26 + $0xa38] sm:$0xff] %v1490_v7  ;;  %v1496_v10 = vld [vmem:[%s8211_s25 + $0x1230] sm:$0xff] }
  0xb7   : > { %1493 = vst [vmem:[%s8216_s26 + $0xa40] sm:$0xff] %v1492_v8  ;;  %1495 = vst [vmem:[%s8216_s26 + $0xa48] sm:$0xff] %v1494_v9  ;;  %v1498_v11 = vld [vmem:[%s8211_s25 + $0x1238] sm:$0xff]  ;;  %v1500_v12 = vld [vmem:[%s8211_s25 + $0x1240] sm:$0xff] }
  0xb8   : > { %1497 = vst [vmem:[%s8216_s26 + $0xa50] sm:$0xff] %v1496_v10  ;;  %1499 = vst [vmem:[%s8216_s26 + $0xa58] sm:$0xff] %v1498_v11  ;;  %v1502_v13 = vld [vmem:[%s8211_s25 + $0x1248] sm:$0xff]  ;;  %v1504_v14 = vld [vmem:[%s8211_s25 + $0x1250] sm:$0xff] }
  0xb9   : > { %1501 = vst [vmem:[%s8216_s26 + $0xa60] sm:$0xff] %v1500_v12  ;;  %v1506_v15 = vld [vmem:[%s8211_s25 + $0x1258] sm:$0xff]  ;;  %1503 = vst [vmem:[%s8216_s26 + $0xa68] sm:$0xff] %v1502_v13 }
  0xba   : > { %1505 = vst [vmem:[%s8216_s26 + $0xa70] sm:$0xff] %v1504_v14  ;;  %1507 = vst [vmem:[%s8216_s26 + $0xa78] sm:$0xff] %v1506_v15 }
  0xbb PF: > { %p6393_p5 = scmp.ge.s32.totalorder %s8154_s14, 1  ;;  %p1512_p6 = scmp.lt.s32.totalorder %s8154_s14, 3 }
  0xbd   : > { %p1513_p7 = pnand %p6393_p5, %p1512_p6 }
  0xbf   : > { %1516 = sbr.rel (%p1513_p7) target bundleno = 1136 (0x470), region = 66 }
  0xc6   : > { %v8892_v16 = vld [vmem:[%s10463_s1] sm:$0xff]   ;;  %v8156_v17 = vmov 0   ;;  %v8901_v18 = vld [vmem:[%s10463_s1 + $0x8] sm:$0xff]   ;;  %s1519_s4 = sand.u32 1, %s8146_s12   ;;  %v8911_v19 = vld [vmem:[%s10463_s1 + $0x10] sm:$0xff]   ;;  %vm2108_vm0 = vcmask 523264  }
  0xc7   : > { %2235 = vmatprep.subr.bf16.mxu0 %v8156_v17  ;;  %3193 = vmatprep.subr.bf16.mxu1 %v8156_v17  ;;  %s7589_s7 = smul.u32 2688, %s1519_s4  ;;  %v8920_v20 = vld [vmem:[%s10463_s1 + $0x18] sm:$0xff]   ;;  %v8932_v22 = vld [vmem:[%s10463_s1 + $0x20] sm:$0xff]   ;;  %v8944_v24 = vld [vmem:[%s10463_s1 + $0x28] sm:$0xff]  }
  0xc8   : > { %2236 = vmatpush1.bf16.msra.mxu0 %v8892_v16  ;;  %3194 = vmatpush1.bf16.msra.mxu1 %v8892_v16  ;;  %v8953_v25 = vld [vmem:[%s10463_s1 + $0x30] sm:$0xff]   ;;  %v8962_v26 = vld [vmem:[%s10463_s1 + $0x38] sm:$0xff]   ;;  %v8971_v27 = vld [vmem:[%s10463_s1 + $0x40] sm:$0xff]   ;;  %s1543_s5 = smul.u32 84, %s6387_s15 }
  0xc9   : > { %2237 = vmatprep.subr.bf16.mxu0 %v8156_v17  ;;  %3195 = vmatprep.subr.bf16.mxu1 %v8156_v17  ;;  %s8924_s10 = scalar_lea.vmem [#allocation2], %s7589_s7  ;;  %v8980_v28 = vld [vmem:[%s10463_s1 + $0x48] sm:$0xff]   ;;  %v8989_v29 = vld [vmem:[%s10463_s1 + $0x50] sm:$0xff]   ;;  %v8998_v30 = vld [vmem:[%s10463_s1 + $0x58] sm:$0xff]  }
  0xca   : > { %v7629_v21 = vld [vmem:[%s8924_s10 + $0x4] ss:$8 sps:$4 sm:$0xff]   ;;  %v7627_v31 = vld [vmem:[%s8924_s10] ss:$8 sps:$4 sm:$0xff]   ;;  %v7633_v33 = vld [vmem:[%s8924_s10 + $0x14] ss:$8 sps:$4 sm:$0xff]  }
  0xcb   : > { %v7632_v23 = vld [vmem:[%s8924_s10 + $0x2a4] ss:$8 sps:$4 sm:$0xff]   ;;  %6491 = vmatprep.mubr.msk.bf16.mxu0 %vm2108_vm0, %v7629_v21  ;;  %v7630_v32 = vld [vmem:[%s8924_s10 + $0x2a0] ss:$8 sps:$4 sm:$0xff]   ;;  %v7635_v34 = vld [vmem:[%s8924_s10 + $0x2b4] ss:$8 sps:$4 sm:$0xff]  }
  0xcc   : > { %2238 = vmatpush1.bf16.msra.mxu0 %v8901_v18  ;;  %3196 = vmatpush1.bf16.msra.mxu1 %v8901_v18  ;;  %v7637_v35 = vld [vmem:[%s8924_s10 + $0x10] ss:$8 sps:$4 sm:$0xff]   ;;  %v7639_v37 = vld [vmem:[%s8924_s10 + $0x24] ss:$8 sps:$4 sm:$0xff]   ;;  %v7643_v39 = vld [vmem:[%s8924_s10 + $0x20] ss:$8 sps:$4 sm:$0xff]  }
  0xcd   : > { %2239 = vmatprep.subr.bf16.mxu0 %v8156_v17  ;;  %3197 = vmatprep.subr.bf16.mxu1 %v8156_v17  ;;  %v7638_v36 = vld [vmem:[%s8924_s10 + $0x2b0] ss:$8 sps:$4 sm:$0xff]   ;;  %v7641_v38 = vld [vmem:[%s8924_s10 + $0x2c4] ss:$8 sps:$4 sm:$0xff]   ;;  %v7644_v40 = vld [vmem:[%s8924_s10 + $0x2c0] ss:$8 sps:$4 sm:$0xff]  }
  0xce   : > { %6701 = vmatprep.mubr.msk.bf16.mxu1 %vm2108_vm0, %v7632_v23  ;;  %v7645_v41 = vld [vmem:[%s8924_s10 + $0x34] ss:$8 sps:$4 sm:$0xff]   ;;  %v7649_v43 = vld [vmem:[%s8924_s10 + $0x30] ss:$8 sps:$4 sm:$0xff]   ;;  %v7651_v45 = vld [vmem:[%s8924_s10 + $0x44] ss:$8 sps:$4 sm:$0xff]  }
  0xcf   : > { %v7647_v42 = vld [vmem:[%s8924_s10 + $0x2d4] ss:$8 sps:$4 sm:$0xff]   ;;  %v7650_v44 = vld [vmem:[%s8924_s10 + $0x2d0] ss:$8 sps:$4 sm:$0xff]   ;;  %v7653_v46 = vld [vmem:[%s8924_s10 + $0x2e4] ss:$8 sps:$4 sm:$0xff]  }
  0xd0   : > { %2240 = vmatpush1.bf16.msra.mxu0 %v8911_v19  ;;  %3198 = vmatpush1.bf16.msra.mxu1 %v8911_v19  ;;  %v7655_v47 = vld [vmem:[%s8924_s10 + $0x40] ss:$8 sps:$4 sm:$0xff]   ;;  %v7657_v49 = vld [vmem:[%s8924_s10 + $0x54] ss:$8 sps:$4 sm:$0xff]   ;;  %v7661_v51 = vld [vmem:[%s8924_s10 + $0x50] ss:$8 sps:$4 sm:$0xff]  }
  0xd1   : > { %2241 = vmatprep.subr.bf16.mxu0 %v8156_v17  ;;  %3199 = vmatprep.subr.bf16.mxu1 %v8156_v17  ;;  %v7656_v48 = vld [vmem:[%s8924_s10 + $0x2e0] ss:$8 sps:$4 sm:$0xff]   ;;  %v7659_v50 = vld [vmem:[%s8924_s10 + $0x2f4] ss:$8 sps:$4 sm:$0xff]   ;;  %v7662_v52 = vld [vmem:[%s8924_s10 + $0x2f0] ss:$8 sps:$4 sm:$0xff]  }
  0xd2   : > { %v7663_v53 = vld [vmem:[%s8924_s10 + $0x64] ss:$8 sps:$4 sm:$0xff]   ;;  %v7667_v55 = vld [vmem:[%s8924_s10 + $0x60] ss:$8 sps:$4 sm:$0xff]   ;;  %v7669_v57 = vld [vmem:[%s8924_s10 + $0x74] ss:$8 sps:$4 sm:$0xff]  }
  0xd3   : > { %v7665_v54 = vld [vmem:[%s8924_s10 + $0x304] ss:$8 sps:$4 sm:$0xff]   ;;  %v7668_v56 = vld [vmem:[%s8924_s10 + $0x300] ss:$8 sps:$4 sm:$0xff]   ;;  %v7671_v58 = vld [vmem:[%s8924_s10 + $0x314] ss:$8 sps:$4 sm:$0xff]  }
  0xd4   : > { %2242 = vmatpush1.bf16.msra.mxu0 %v8920_v20  ;;  %3200 = vmatpush1.bf16.msra.mxu1 %v8920_v20  ;;  %v7673_v59 = vld [vmem:[%s8924_s10 + $0x70] ss:$8 sps:$4 sm:$0xff]   ;;  %v7675_v61 = vld [vmem:[%s8924_s10 + $0x84] ss:$8 sps:$4 sm:$0xff]   ;;  %v7679_v63 = vld [vmem:[%s8924_s10 + $0x80] ss:$8 sps:$4 sm:$0xff]  }
  0xd5   : > { %2243 = vmatprep.subr.bf16.mxu0 %v8156_v17  ;;  %3201 = vmatprep.subr.bf16.mxu1 %v8156_v17  ;;  %v7674_v60 = vld [vmem:[%s8924_s10 + $0x310] ss:$8 sps:$4 sm:$0xff]   ;;  %v7677_v62 = vld [vmem:[%s8924_s10 + $0x324] ss:$8 sps:$4 sm:$0xff]   ;;  %v7680_v0 = vld [vmem:[%s8924_s10 + $0x320] ss:$8 sps:$4 sm:$0xff]  }
  0xd6   : > { %v7681_v1 = vld [vmem:[%s8924_s10 + $0x94] ss:$8 sps:$4 sm:$0xff]   ;;  %v7685_v3 = vld [vmem:[%s8924_s10 + $0x90] ss:$8 sps:$4 sm:$0xff]   ;;  %v7687_v5 = vld [vmem:[%s8924_s10 + $0xa4] ss:$8 sps:$4 sm:$0xff]  }
  0xd7   : > { %v7683_v2 = vld [vmem:[%s8924_s10 + $0x334] ss:$8 sps:$4 sm:$0xff]   ;;  %v7686_v4 = vld [vmem:[%s8924_s10 + $0x330] ss:$8 sps:$4 sm:$0xff]   ;;  %v7689_v6 = vld [vmem:[%s8924_s10 + $0x344] ss:$8 sps:$4 sm:$0xff]  }
  0xd8   : > { %2244 = vmatpush1.bf16.msra.mxu0 %v8932_v22  ;;  %3202 = vmatpush1.bf16.msra.mxu1 %v8932_v22  ;;  %v7691_v7 = vld [vmem:[%s8924_s10 + $0xa0] ss:$8 sps:$4 sm:$0xff]   ;;  %v7693_v9 = vld [vmem:[%s8924_s10 + $0xb4] ss:$8 sps:$4 sm:$0xff]   ;;  %v7697_v11 = vld [vmem:[%s8924_s10 + $0xb0] ss:$8 sps:$4 sm:$0xff]  }
  0xd9   : > { %2245 = vmatprep.subr.bf16.mxu0 %v8156_v17  ;;  %3203 = vmatprep.subr.bf16.mxu1 %v8156_v17  ;;  %v7692_v8 = vld [vmem:[%s8924_s10 + $0x340] ss:$8 sps:$4 sm:$0xff]   ;;  %v7695_v10 = vld [vmem:[%s8924_s10 + $0x354] ss:$8 sps:$4 sm:$0xff]   ;;  %v7698_v12 = vld [vmem:[%s8924_s10 + $0x350] ss:$8 sps:$4 sm:$0xff]  }
  0xda   : > { %v7699_v13 = vld [vmem:[%s8924_s10 + $0xc4] ss:$8 sps:$4 sm:$0xff]   ;;  %v7703_v15 = vld [vmem:[%s8924_s10 + $0xc0] ss:$8 sps:$4 sm:$0xff]   ;;  %p1544_p8 = scmp.lt.s32.totalorder %s1543_s5, 167 }
  0xdb   : > { %v7701_v14 = vld [vmem:[%s8924_s10 + $0x364] ss:$8 sps:$4 sm:$0xff]   ;;  %v7715_v23 = vld [vmem:[%s8924_s10 + $0xe0] ss:$8 sps:$4 sm:$0xff]  }
  0xdc   : > { %2246 = vmatpush1.bf16.msra.mxu0 %v8944_v24  ;;  %3204 = vmatpush1.bf16.msra.mxu1 %v8944_v24  ;;  %v7711_v21 = vld [vmem:[%s8924_s10 + $0xe4] ss:$8 sps:$4 sm:$0xff]   ;;  %s10920_s5 = smov (!%p1544_p8, %s1543_s5), 167 }
  0xdd   : > { %2247 = vmatprep.subr.bf16.mxu0 %v8156_v17  ;;  %3205 = vmatprep.subr.bf16.mxu1 %v8156_v17  ;;  %s6394_s14 = sshll.u32 %s10920_s5, 2 }
  0xde   : > { %s10000_s9 = scalar_lea.vmem %s10465_s3, %s6394_s14 }
  0xe0   : > { %2248 = vmatpush1.bf16.msra.mxu0 %v8953_v25  ;;  %3206 = vmatpush1.bf16.msra.mxu1 %v8953_v25 }
  0xe1   : > { %2249 = vmatprep.subr.bf16.mxu0 %v8156_v17  ;;  %3207 = vmatprep.subr.bf16.mxu1 %v8156_v17 }
  0xe4   : > { %2250 = vmatpush1.bf16.msra.mxu0 %v8962_v26  ;;  %3208 = vmatpush1.bf16.msra.mxu1 %v8962_v26 }
  0xe5   : > { %2251 = vmatprep.subr.bf16.mxu0 %v8156_v17  ;;  %3209 = vmatprep.subr.bf16.mxu1 %v8156_v17 }
  0xe8   : > { %2252 = vmatpush1.bf16.msra.mxu0 %v8971_v27  ;;  %3210 = vmatpush1.bf16.msra.mxu1 %v8971_v27 }
  0xe9   : > { %2253 = vmatprep.subr.bf16.mxu0 %v8156_v17  ;;  %3211 = vmatprep.subr.bf16.mxu1 %v8156_v17 }
  0xec   : > { %2254 = vmatpush1.bf16.msra.mxu0 %v8980_v28  ;;  %3212 = vmatpush1.bf16.msra.mxu1 %v8980_v28 }
  0xed   : > { %2255 = vmatprep.subr.bf16.mxu0 %v8156_v17  ;;  %3213 = vmatprep.subr.bf16.mxu1 %v8156_v17 }
  0xf0   : > { %2256 = vmatpush1.bf16.msra.mxu0 %v8989_v29  ;;  %3214 = vmatpush1.bf16.msra.mxu1 %v8989_v29 }
  0xf1   : > { %2257 = vmatprep.subr.bf16.mxu0 %v8156_v17  ;;  %3215 = vmatprep.subr.bf16.mxu1 %v8156_v17 }
  0xf4   : > { %2258 = vmatpush1.bf16.msra.mxu0 %v8998_v30  ;;  %3216 = vmatpush1.bf16.msra.mxu1 %v8998_v30 }
  0xf5   : > { %4235 = vmatprep.subr.bf16.mxu0 %v8156_v17  ;;  %5277 = vmatprep.subr.bf16.mxu1 %v8156_v17 }
  0xf7   : > { %2268 = vmatmul.mubr.bf16.vlgmr.msra.gmra.mrb[0].mxu0 %v7627_v31  ;;  %3226 = vmatmul.mubr.bf16.vlgmr.msra.gmra.mrb[0].mxu1 %v7630_v32  ;;  %v7727_v31 = vld [vmem:[%s8924_s10 + $0x100] ss:$8 sps:$4 sm:$0xff]  }
  0xf8   : > { %4236 = vmatpush1.bf16.msra.mxu0 %v8892_v16  ;;  %5278 = vmatpush1.bf16.msra.mxu1 %v8892_v16  ;;  %v7704_v16 = vld [vmem:[%s8924_s10 + $0x360] ss:$8 sps:$4 sm:$0xff]  }
  0xf9   : > { %6492 = vmatprep.mubr.msk.bf16.mxu0 %vm2108_vm0, %v7633_v33  ;;  %6702 = vmatprep.mubr.msk.bf16.mxu1 %vm2108_vm0, %v7635_v34  ;;  %v7728_v32 = vld [vmem:[%s8924_s10 + $0x3a0] ss:$8 sps:$4 sm:$0xff]   ;;  %v7729_v33 = vld [vmem:[%s8924_s10 + $0x114] ss:$8 sps:$4 sm:$0xff]  }
  0xfa   : > { %4237 = vmatprep.subr.bf16.mxu0 %v8156_v17  ;;  %5279 = vmatprep.subr.bf16.mxu1 %v8156_v17  ;;  %v7731_v34 = vld [vmem:[%s8924_s10 + $0x3b4] ss:$8 sps:$4 sm:$0xff]  }
  0xfc   : > { %4238 = vmatpush1.bf16.msra.mxu0 %v8901_v18  ;;  %5280 = vmatpush1.bf16.msra.mxu1 %v8901_v18  ;;  %v7707_v18 = vld [vmem:[%s8924_s10 + $0x374] ss:$8 sps:$4 sm:$0xff]  }
  0xfd   : > { %4239 = vmatprep.subr.bf16.mxu0 %v8156_v17  ;;  %5281 = vmatprep.subr.bf16.mxu1 %v8156_v17 }
  0xff   : > { %2276 = vmatmul.mubr.bf16.gmra.mrb[4].mxu0 %v7637_v35  ;;  %3234 = vmatmul.mubr.bf16.gmra.mrb[4].mxu1 %v7638_v36  ;;  %v7733_v35 = vld [vmem:[%s8924_s10 + $0x110] ss:$8 sps:$4 sm:$0xff]  }
 0x100   : > { %6493 = vmatprep.mubr.msk.bf16.mxu0 %vm2108_vm0, %v7639_v37  ;;  %6703 = vmatprep.mubr.msk.bf16.mxu1 %vm2108_vm0, %v7641_v38  ;;  %v7734_v36 = vld [vmem:[%s8924_s10 + $0x3b0] ss:$8 sps:$4 sm:$0xff]   ;;  %v7735_v37 = vld [vmem:[%s8924_s10 + $0x124] ss:$8 sps:$4 sm:$0xff]  }
 0x101   : > { %4240 = vmatpush1.bf16.msra.mxu0 %v8911_v19  ;;  %5282 = vmatpush1.bf16.msra.mxu1 %v8911_v19  ;;  %v7709_v19 = vld [vmem:[%s8924_s10 + $0xd0] ss:$8 sps:$4 sm:$0xff]   ;;  %v7737_v38 = vld [vmem:[%s8924_s10 + $0x3c4] ss:$8 sps:$4 sm:$0xff]  }
 0x102   : > { %4241 = vmatprep.subr.bf16.mxu0 %v8156_v17  ;;  %5283 = vmatprep.subr.bf16.mxu1 %v8156_v17 }
 0x105   : > { %4242 = vmatpush1.bf16.msra.mxu0 %v8920_v20  ;;  %5284 = vmatpush1.bf16.msra.mxu1 %v8920_v20  ;;  %v7710_v20 = vld [vmem:[%s8924_s10 + $0x370] ss:$8 sps:$4 sm:$0xff]  }
 0x106   : > { %4243 = vmatprep.subr.bf16.mxu0 %v8156_v17  ;;  %5285 = vmatprep.subr.bf16.mxu1 %v8156_v17 }
 0x107   : > { %2284 = vmatmul.mubr.bf16.gmra.mrb[8].mxu0 %v7643_v39  ;;  %3242 = vmatmul.mubr.bf16.gmra.mrb[8].mxu1 %v7644_v40  ;;  %v7739_v39 = vld [vmem:[%s8924_s10 + $0x120] ss:$8 sps:$4 sm:$0xff]  }
 0x108   : > { %6494 = vmatprep.mubr.msk.bf16.mxu0 %vm2108_vm0, %v7645_v41  ;;  %6704 = vmatprep.mubr.msk.bf16.mxu1 %vm2108_vm0, %v7647_v42  ;;  %v7740_v40 = vld [vmem:[%s8924_s10 + $0x3c0] ss:$8 sps:$4 sm:$0xff]   ;;  %v7741_v41 = vld [vmem:[%s8924_s10 + $0x134] ss:$8 sps:$4 sm:$0xff]  }
 0x109   : > { %4244 = vmatpush1.bf16.msra.mxu0 %v8932_v22  ;;  %5286 = vmatpush1.bf16.msra.mxu1 %v8932_v22  ;;  %v7713_v22 = vld [vmem:[%s8924_s10 + $0x384] ss:$8 sps:$4 sm:$0xff]   ;;  %v7743_v42 = vld [vmem:[%s8924_s10 + $0x3d4] ss:$8 sps:$4 sm:$0xff]  }
 0x10a   : > { %4245 = vmatprep.subr.bf16.mxu0 %v8156_v17  ;;  %5287 = vmatprep.subr.bf16.mxu1 %v8156_v17 }
 0x10d   : > { %4246 = vmatpush1.bf16.msra.mxu0 %v8944_v24  ;;  %5288 = vmatpush1.bf16.msra.mxu1 %v8944_v24  ;;  %v7716_v24 = vld [vmem:[%s8924_s10 + $0x380] ss:$8 sps:$4 sm:$0xff]  }
 0x10e   : > { %4247 = vmatprep.subr.bf16.mxu0 %v8156_v17  ;;  %5289 = vmatprep.subr.bf16.mxu1 %v8156_v17 }
 0x10f   : > { %2292 = vmatmul.mubr.bf16.gmra.mrb[12].mxu0 %v7649_v43  ;;  %3250 = vmatmul.mubr.bf16.gmra.mrb[12].mxu1 %v7650_v44  ;;  %v7745_v43 = vld [vmem:[%s8924_s10 + $0x130] ss:$8 sps:$4 sm:$0xff]  }
 0x110   : > { %6495 = vmatprep.mubr.msk.bf16.mxu0 %vm2108_vm0, %v7651_v45  ;;  %6705 = vmatprep.mubr.msk.bf16.mxu1 %vm2108_vm0, %v7653_v46  ;;  %v7746_v44 = vld [vmem:[%s8924_s10 + $0x3d0] ss:$8 sps:$4 sm:$0xff]   ;;  %v7747_v45 = vld [vmem:[%s8924_s10 + $0x144] ss:$8 sps:$4 sm:$0xff]  }
 0x111   : > { %4248 = vmatpush1.bf16.msra.mxu0 %v8953_v25  ;;  %5290 = vmatpush1.bf16.msra.mxu1 %v8953_v25  ;;  %v7717_v25 = vld [vmem:[%s8924_s10 + $0xf4] ss:$8 sps:$4 sm:$0xff]   ;;  %v7749_v46 = vld [vmem:[%s8924_s10 + $0x3e4] ss:$8 sps:$4 sm:$0xff]  }
 0x112   : > { %4249 = vmatprep.subr.bf16.mxu0 %v8156_v17  ;;  %5291 = vmatprep.subr.bf16.mxu1 %v8156_v17 }
 0x115   : > { %4250 = vmatpush1.bf16.msra.mxu0 %v8962_v26  ;;  %5292 = vmatpush1.bf16.msra.mxu1 %v8962_v26  ;;  %v7719_v26 = vld [vmem:[%s8924_s10 + $0x394] ss:$8 sps:$4 sm:$0xff]  }
 0x116   : > { %4251 = vmatprep.subr.bf16.mxu0 %v8156_v17  ;;  %5293 = vmatprep.subr.bf16.mxu1 %v8156_v17 }
 0x117   : > { %2300 = vmatmul.mubr.bf16.gmra.mrb[16].mxu0 %v7655_v47  ;;  %3258 = vmatmul.mubr.bf16.gmra.mrb[16].mxu1 %v7656_v48  ;;  %v7751_v47 = vld [vmem:[%s8924_s10 + $0x140] ss:$8 sps:$4 sm:$0xff]  }
 0x118   : > { %6496 = vmatprep.mubr.msk.bf16.mxu0 %vm2108_vm0, %v7657_v49  ;;  %6706 = vmatprep.mubr.msk.bf16.mxu1 %vm2108_vm0, %v7659_v50  ;;  %v7752_v48 = vld [vmem:[%s8924_s10 + $0x3e0] ss:$8 sps:$4 sm:$0xff]   ;;  %v7753_v49 = vld [vmem:[%s8924_s10 + $0x154] ss:$8 sps:$4 sm:$0xff]  }
 0x119   : > { %4252 = vmatpush1.bf16.msra.mxu0 %v8971_v27  ;;  %5294 = vmatpush1.bf16.msra.mxu1 %v8971_v27  ;;  %v7721_v27 = vld [vmem:[%s8924_s10 + $0xf0] ss:$8 sps:$4 sm:$0xff]   ;;  %v7755_v50 = vld [vmem:[%s8924_s10 + $0x3f4] ss:$8 sps:$4 sm:$0xff]  }
 0x11a   : > { %4253 = vmatprep.subr.bf16.mxu0 %v8156_v17  ;;  %5295 = vmatprep.subr.bf16.mxu1 %v8156_v17 }
 0x11d   : > { %4254 = vmatpush1.bf16.msra.mxu0 %v8980_v28  ;;  %5296 = vmatpush1.bf16.msra.mxu1 %v8980_v28  ;;  %v7722_v28 = vld [vmem:[%s8924_s10 + $0x390] ss:$8 sps:$4 sm:$0xff]  }
 0x11e   : > { %4255 = vmatprep.subr.bf16.mxu0 %v8156_v17  ;;  %5297 = vmatprep.subr.bf16.mxu1 %v8156_v17 }
 0x11f   : > { %2308 = vmatmul.mubr.bf16.gmra.mrb[20].mxu0 %v7661_v51  ;;  %3266 = vmatmul.mubr.bf16.gmra.mrb[20].mxu1 %v7662_v52  ;;  %v7757_v51 = vld [vmem:[%s8924_s10 + $0x150] ss:$8 sps:$4 sm:$0xff]  }
 0x120   : > { %6497 = vmatprep.mubr.msk.bf16.mxu0 %vm2108_vm0, %v7663_v53  ;;  %6707 = vmatprep.mubr.msk.bf16.mxu1 %vm2108_vm0, %v7665_v54  ;;  %v7758_v52 = vld [vmem:[%s8924_s10 + $0x3f0] ss:$8 sps:$4 sm:$0xff]   ;;  %v7759_v53 = vld [vmem:[%s8924_s10 + $0x164] ss:$8 sps:$4 sm:$0xff]  }
 0x121   : > { %4256 = vmatpush1.bf16.msra.mxu0 %v8989_v29  ;;  %5298 = vmatpush1.bf16.msra.mxu1 %v8989_v29  ;;  %v7723_v29 = vld [vmem:[%s8924_s10 + $0x104] ss:$8 sps:$4 sm:$0xff]  }
 0x122   : > { %4257 = vmatprep.subr.bf16.mxu0 %v8156_v17  ;;  %5299 = vmatprep.subr.bf16.mxu1 %v8156_v17  ;;  %v7705_v17 = vld [vmem:[%s8924_s10 + $0xd4] ss:$8 sps:$4 sm:$0xff]   ;;  %v7761_v54 = vld [vmem:[%s8924_s10 + $0x404] ss:$8 sps:$4 sm:$0xff]  }
 0x125   : > { %4258 = vmatpush1.bf16.msra.mxu0 %v8998_v30  ;;  %5300 = vmatpush1.bf16.msra.mxu1 %v8998_v30  ;;  %v7725_v30 = vld [vmem:[%s8924_s10 + $0x3a4] ss:$8 sps:$4 sm:$0xff]  }
 0x127   : > { %2316 = vmatmul.mubr.bf16.gmra.mrb[24].mxu0 %v7667_v55  ;;  %3274 = vmatmul.mubr.bf16.gmra.mrb[24].mxu1 %v7668_v56  ;;  %v7763_v55 = vld [vmem:[%s8924_s10 + $0x160] ss:$8 sps:$4 sm:$0xff]  }
 0x128   : > { %6498 = vmatprep.mubr.msk.bf16.mxu0 %vm2108_vm0, %v7669_v57  ;;  %6708 = vmatprep.mubr.msk.bf16.mxu1 %vm2108_vm0, %v7671_v58  ;;  %v7764_v56 = vld [vmem:[%s8924_s10 + $0x400] ss:$8 sps:$4 sm:$0xff]   ;;  %v7765_v57 = vld [vmem:[%s8924_s10 + $0x174] ss:$8 sps:$4 sm:$0xff]  }
 0x129   : > { %v7767_v58 = vld [vmem:[%s8924_s10 + $0x414] ss:$8 sps:$4 sm:$0xff]  }
 0x12f   : > { %2324 = vmatmul.mubr.bf16.gmra.mrb[28].mxu0 %v7673_v59  ;;  %3282 = vmatmul.mubr.bf16.gmra.mrb[28].mxu1 %v7674_v60  ;;  %v7769_v59 = vld [vmem:[%s8924_s10 + $0x170] ss:$8 sps:$4 sm:$0xff]  }
 0x130   : > { %6499 = vmatprep.mubr.msk.bf16.mxu0 %vm2108_vm0, %v7675_v61  ;;  %6709 = vmatprep.mubr.msk.bf16.mxu1 %vm2108_vm0, %v7677_v62  ;;  %v7770_v60 = vld [vmem:[%s8924_s10 + $0x410] ss:$8 sps:$4 sm:$0xff]   ;;  %v7771_v61 = vld [vmem:[%s8924_s10 + $0x184] ss:$8 sps:$4 sm:$0xff]  }
 0x131   : > { %v7773_v62 = vld [vmem:[%s8924_s10 + $0x424] ss:$8 sps:$4 sm:$0xff]  }
 0x137   : > { %2332 = vmatmul.mubr.bf16.gmra.mrb[32].mxu0 %v7679_v63  ;;  %3290 = vmatmul.mubr.bf16.gmra.mrb[32].mxu1 %v7680_v0  ;;  %v7775_v63 = vld [vmem:[%s8924_s10 + $0x180] ss:$8 sps:$4 sm:$0xff]  }
 0x138   : > { %6500 = vmatprep.mubr.msk.bf16.mxu0 %vm2108_vm0, %v7681_v1  ;;  %6710 = vmatprep.mubr.msk.bf16.mxu1 %vm2108_vm0, %v7683_v2  ;;  %v7776_v0 = vld [vmem:[%s8924_s10 + $0x420] ss:$8 sps:$4 sm:$0xff]   ;;  %v7777_v1 = vld [vmem:[%s8924_s10 + $0x194] ss:$8 sps:$4 sm:$0xff]  }
 0x139   : > { %v7779_v2 = vld [vmem:[%s8924_s10 + $0x434] ss:$8 sps:$4 sm:$0xff]  }
 0x13f   : > { %2340 = vmatmul.mubr.bf16.gmra.mrb[36].mxu0 %v7685_v3  ;;  %3298 = vmatmul.mubr.bf16.gmra.mrb[36].mxu1 %v7686_v4  ;;  %v7781_v3 = vld [vmem:[%s8924_s10 + $0x190] ss:$8 sps:$4 sm:$0xff]  }
 0x140   : > { %6501 = vmatprep.mubr.msk.bf16.mxu0 %vm2108_vm0, %v7687_v5  ;;  %6711 = vmatprep.mubr.msk.bf16.mxu1 %vm2108_vm0, %v7689_v6  ;;  %v7782_v4 = vld [vmem:[%s8924_s10 + $0x430] ss:$8 sps:$4 sm:$0xff]   ;;  %v7783_v5 = vld [vmem:[%s8924_s10 + $0x1a4] ss:$8 sps:$4 sm:$0xff]  }
 0x141   : > { %v7785_v6 = vld [vmem:[%s8924_s10 + $0x444] ss:$8 sps:$4 sm:$0xff]  }
 0x147   : > { %2348 = vmatmul.mubr.bf16.gmra.mrb[40].mxu0 %v7691_v7  ;;  %3306 = vmatmul.mubr.bf16.gmra.mrb[40].mxu1 %v7692_v8  ;;  %v7787_v7 = vld [vmem:[%s8924_s10 + $0x1a0] ss:$8 sps:$4 sm:$0xff]  }
 0x148   : > { %6502 = vmatprep.mubr.msk.bf16.mxu0 %vm2108_vm0, %v7693_v9  ;;  %6712 = vmatprep.mubr.msk.bf16.mxu1 %vm2108_vm0, %v7695_v10  ;;  %v7788_v8 = vld [vmem:[%s8924_s10 + $0x440] ss:$8 sps:$4 sm:$0xff]   ;;  %v7789_v9 = vld [vmem:[%s8924_s10 + $0x1b4] ss:$8 sps:$4 sm:$0xff]  }
 0x149   : > { %v7791_v10 = vld [vmem:[%s8924_s10 + $0x454] ss:$8 sps:$4 sm:$0xff]  }
 0x14f   : > { %2356 = vmatmul.mubr.bf16.gmra.mrb[44].mxu0 %v7697_v11  ;;  %3314 = vmatmul.mubr.bf16.gmra.mrb[44].mxu1 %v7698_v12 }
 0x150   : > { %6503 = vmatprep.mubr.msk.bf16.mxu0 %vm2108_vm0, %v7699_v13  ;;  %6713 = vmatprep.mubr.msk.bf16.mxu1 %vm2108_vm0, %v7701_v14 }
 0x157   : > { %2364 = vmatmul.mubr.bf16.gmra.mrb[48].mxu0 %v7703_v15  ;;  %3322 = vmatmul.mubr.bf16.gmra.mrb[48].mxu1 %v7704_v16  ;;  %v7793_v15 = vld [vmem:[%s8924_s10 + $0x1b0] ss:$8 sps:$4 sm:$0xff]  }
 0x158   : > { %6504 = vmatprep.mubr.msk.bf16.mxu0 %vm2108_vm0, %v7705_v17  ;;  %6714 = vmatprep.mubr.msk.bf16.mxu1 %vm2108_vm0, %v7707_v18  ;;  %v7794_v16 = vld [vmem:[%s8924_s10 + $0x450] ss:$8 sps:$4 sm:$0xff]   ;;  %v7871_v17 = vld [vmem:[%s8924_s10 + $0x280] ss:$8 sps:$4 sm:$0xff]  }
 0x15f   : > { %2372 = vmatmul.mubr.bf16.gmra.mrb[52].mxu0 %v7709_v19  ;;  %3330 = vmatmul.mubr.bf16.gmra.mrb[52].mxu1 %v7710_v20  ;;  %v7795_v20 = vld [vmem:[%s8924_s10 + $0x1c4] ss:$8 sps:$4 sm:$0xff]  }
 0x160   : > { %6505 = vmatprep.mubr.msk.bf16.mxu0 %vm2108_vm0, %v7711_v21  ;;  %6715 = vmatprep.mubr.msk.bf16.mxu1 %vm2108_vm0, %v7713_v22  ;;  %v7797_v21 = vld [vmem:[%s8924_s10 + $0x464] ss:$8 sps:$4 sm:$0xff]  }
 0x167   : > { %2380 = vmatmul.mubr.bf16.gmra.mrb[56].mxu0 %v7715_v23  ;;  %3338 = vmatmul.mubr.bf16.gmra.mrb[56].mxu1 %v7716_v24 }
 0x168   : > { %6506 = vmatprep.mubr.msk.bf16.mxu0 %vm2108_vm0, %v7717_v25  ;;  %6716 = vmatprep.mubr.msk.bf16.mxu1 %vm2108_vm0, %v7719_v26 }
 0x16f   : > { %2388 = vmatmul.mubr.bf16.gmra.mrb[60].mxu0 %v7721_v27  ;;  %3346 = vmatmul.mubr.bf16.gmra.mrb[60].mxu1 %v7722_v28 }
 0x170   : > { %6507 = vmatprep.mubr.msk.bf16.mxu0 %vm2108_vm0, %v7723_v29  ;;  %6717 = vmatprep.mubr.msk.bf16.mxu1 %vm2108_vm0, %v7725_v30  ;;  %v7799_v29 = vld [vmem:[%s8924_s10 + $0x1c0] ss:$8 sps:$4 sm:$0xff]  }
 0x171   : > { %v7800_v30 = vld [vmem:[%s8924_s10 + $0x460] ss:$8 sps:$4 sm:$0xff]  }
 0x177   : > { %2396 = vmatmul.mubr.bf16.gmra.mrb[64].mxu0 %v7727_v31  ;;  %3354 = vmatmul.mubr.bf16.gmra.mrb[64].mxu1 %v7728_v32 }
 0x178   : > { %6508 = vmatprep.mubr.msk.bf16.mxu0 %vm2108_vm0, %v7729_v33  ;;  %6718 = vmatprep.mubr.msk.bf16.mxu1 %vm2108_vm0, %v7731_v34  ;;  %v7801_v34 = vld [vmem:[%s8924_s10 + $0x1d4] ss:$8 sps:$4 sm:$0xff]  }
 0x17f   : > { %2404 = vmatmul.mubr.bf16.gmra.mrb[68].mxu0 %v7733_v35  ;;  %3362 = vmatmul.mubr.bf16.gmra.mrb[68].mxu1 %v7734_v36  ;;  %v7803_v35 = vld [vmem:[%s8924_s10 + $0x474] ss:$8 sps:$4 sm:$0xff]  }
 0x180   : > { %6509 = vmatprep.mubr.msk.bf16.mxu0 %vm2108_vm0, %v7735_v37  ;;  %6719 = vmatprep.mubr.msk.bf16.mxu1 %vm2108_vm0, %v7737_v38 }
 0x187   : > { %2412 = vmatmul.mubr.bf16.gmra.mrb[72].mxu0 %v7739_v39  ;;  %3370 = vmatmul.mubr.bf16.gmra.mrb[72].mxu1 %v7740_v40 }
 0x188   : > { %6510 = vmatprep.mubr.msk.bf16.mxu0 %vm2108_vm0, %v7741_v41  ;;  %6720 = vmatprep.mubr.msk.bf16.mxu1 %vm2108_vm0, %v7743_v42 }
 0x18f   : > { %2420 = vmatmul.mubr.bf16.gmra.mrb[76].mxu0 %v7745_v43  ;;  %3378 = vmatmul.mubr.bf16.gmra.mrb[76].mxu1 %v7746_v44  ;;  %v7805_v43 = vld [vmem:[%s8924_s10 + $0x1d0] ss:$8 sps:$4 sm:$0xff]  }
 0x190   : > { %6511 = vmatprep.mubr.msk.bf16.mxu0 %vm2108_vm0, %v7747_v45  ;;  %6721 = vmatprep.mubr.msk.bf16.mxu1 %vm2108_vm0, %v7749_v46  ;;  %v7806_v44 = vld [vmem:[%s8924_s10 + $0x470] ss:$8 sps:$4 sm:$0xff]  }
 0x191   : > { %v7865_v45 = vld [vmem:[%s8924_s10 + $0x270] ss:$8 sps:$4 sm:$0xff]  }
 0x197   : > { %2428 = vmatmul.mubr.bf16.gmra.mrb[80].mxu0 %v7751_v47  ;;  %3386 = vmatmul.mubr.bf16.gmra.mrb[80].mxu1 %v7752_v48  ;;  %v7807_v48 = vld [vmem:[%s8924_s10 + $0x1e4] ss:$8 sps:$4 sm:$0xff]  }
 0x198   : > { %6512 = vmatprep.mubr.msk.bf16.mxu0 %vm2108_vm0, %v7753_v49  ;;  %6722 = vmatprep.mubr.msk.bf16.mxu1 %vm2108_vm0, %v7755_v50  ;;  %v7809_v49 = vld [vmem:[%s8924_s10 + $0x484] ss:$8 sps:$4 sm:$0xff]  }
 0x19f   : > { %2436 = vmatmul.mubr.bf16.gmra.mrb[84].mxu0 %v7757_v51  ;;  %3394 = vmatmul.mubr.bf16.gmra.mrb[84].mxu1 %v7758_v52 }
 0x1a0   : > { %6513 = vmatprep.mubr.msk.bf16.mxu0 %vm2108_vm0, %v7759_v53  ;;  %6723 = vmatprep.mubr.msk.bf16.mxu1 %vm2108_vm0, %v7761_v54 }
 0x1a7   : > { %2444 = vmatmul.mubr.bf16.gmra.mrb[88].mxu0 %v7763_v55  ;;  %3402 = vmatmul.mubr.bf16.gmra.mrb[88].mxu1 %v7764_v56 }
 0x1a8   : > { %6514 = vmatprep.mubr.msk.bf16.mxu0 %vm2108_vm0, %v7765_v57  ;;  %6724 = vmatprep.mubr.msk.bf16.mxu1 %vm2108_vm0, %v7767_v58  ;;  %v7811_v57 = vld [vmem:[%s8924_s10 + $0x1e0] ss:$8 sps:$4 sm:$0xff]  }
 0x1a9   : > { %v7812_v58 = vld [vmem:[%s8924_s10 + $0x480] ss:$8 sps:$4 sm:$0xff]  }
 0x1af   : > { %2452 = vmatmul.mubr.bf16.gmra.mrb[92].mxu0 %v7769_v59  ;;  %3410 = vmatmul.mubr.bf16.gmra.mrb[92].mxu1 %v7770_v60 }
 0x1b0   : > { %6515 = vmatprep.mubr.msk.bf16.mxu0 %vm2108_vm0, %v7771_v61  ;;  %6725 = vmatprep.mubr.msk.bf16.mxu1 %vm2108_vm0, %v7773_v62  ;;  %v7813_v62 = vld [vmem:[%s8924_s10 + $0x1f4] ss:$8 sps:$4 sm:$0xff]  }
 0x1b7   : > { %2460 = vmatmul.mubr.bf16.gmra.mrb[96].mxu0 %v7775_v63  ;;  %3418 = vmatmul.mubr.bf16.gmra.mrb[96].mxu1 %v7776_v0  ;;  %v7815_v63 = vld [vmem:[%s8924_s10 + $0x494] ss:$8 sps:$4 sm:$0xff]  }
 0x1b8   : > { %6516 = vmatprep.mubr.msk.bf16.mxu0 %vm2108_vm0, %v7777_v1  ;;  %6726 = vmatprep.mubr.msk.bf16.mxu1 %vm2108_vm0, %v7779_v2 }
 0x1bf   : > { %2468 = vmatmul.mubr.bf16.gmra.mrb[100].mxu0 %v7781_v3  ;;  %3426 = vmatmul.mubr.bf16.gmra.mrb[100].mxu1 %v7782_v4 }
 0x1c0   : > { %6517 = vmatprep.mubr.msk.bf16.mxu0 %vm2108_vm0, %v7783_v5  ;;  %6727 = vmatprep.mubr.msk.bf16.mxu1 %vm2108_vm0, %v7785_v6 }
 0x1c7   : > { %2476 = vmatmul.mubr.bf16.gmra.mrb[104].mxu0 %v7787_v7  ;;  %3434 = vmatmul.mubr.bf16.gmra.mrb[104].mxu1 %v7788_v8  ;;  %v7817_v7 = vld [vmem:[%s8924_s10 + $0x1f0] ss:$8 sps:$4 sm:$0xff]  }
 0x1c8   : > { %6518 = vmatprep.mubr.msk.bf16.mxu0 %vm2108_vm0, %v7789_v9  ;;  %6728 = vmatprep.mubr.msk.bf16.mxu1 %vm2108_vm0, %v7791_v10  ;;  %v7818_v8 = vld [vmem:[%s8924_s10 + $0x490] ss:$8 sps:$4 sm:$0xff]   ;;  %v7859_v9 = vld [vmem:[%s8924_s10 + $0x260] ss:$8 sps:$4 sm:$0xff]  }
 0x1ca   : > { %v9214_v11 = vpop.f32.mrb[0].mxu0  ;;  %v9216_v12 = vpop.f32.mrb[0].mxu1 }
 0x1cb   : > { %v2271_v13 = vpop.f32.mrb[1].mxu0  ;;  %v3229_v14 = vpop.f32.mrb[1].mxu1 }
 0x1cc   : > { %v9222_v18 = vpop.f32.mrb[2].mxu0  ;;  %v9224_v19 = vpop.f32.mrb[2].mxu1  ;;  %v7819_v14 = vld [vmem:[%s8924_s10 + $0x204] ss:$8 sps:$4 sm:$0xff]  }
 0x1cd   : > { %v2274_v22 = vpop.f32.mrb[3].mxu0  ;;  %v3232_v23 = vpop.f32.mrb[3].mxu1 }
 0x1cf   : > { %2484 = vmatmul.mubr.bf16.gmra.mrb[108].mxu0 %v7793_v15  ;;  %3442 = vmatmul.mubr.bf16.gmra.mrb[108].mxu1 %v7794_v16  ;;  %v7821_v15 = vld [vmem:[%s8924_s10 + $0x4a4] ss:$8 sps:$4 sm:$0xff]  }
 0x1d0   : > { %6519 = vmatprep.mubr.msk.bf16.mxu0 %vm2108_vm0, %v7795_v20  ;;  %6729 = vmatprep.mubr.msk.bf16.mxu1 %vm2108_vm0, %v7797_v21 }
 0x1d2   : > { %v9232_v25 = vpop.f32.mrb[4].mxu0  ;;  %v9234_v26 = vpop.f32.mrb[4].mxu1 }
 0x1d3   : > { %v2279_v27 = vpop.f32.mrb[5].mxu0  ;;  %v3237_v28 = vpop.f32.mrb[5].mxu1 }
 0x1d4   : > { %v9240_v32 = vpop.f32.mrb[6].mxu0  ;;  %v9242_v33 = vpop.f32.mrb[6].mxu1 }
 0x1d5   : > { %v2282_v36 = vpop.f32.mrb[7].mxu0  ;;  %v3240_v37 = vpop.f32.mrb[7].mxu1 }
 0x1d6   : > { %v7825_v37 = vld [vmem:[%s8924_s10 + $0x214] ss:$8 sps:$4 sm:$0xff]  }
 0x1d7   : > { %2492 = vmatmul.mubr.bf16.gmra.mrb[112].mxu0 %v7799_v29  ;;  %3450 = vmatmul.mubr.bf16.gmra.mrb[112].mxu1 %v7800_v30  ;;  %v7823_v29 = vld [vmem:[%s8924_s10 + $0x200] ss:$8 sps:$4 sm:$0xff]  }
 0x1d8   : > { %6520 = vmatprep.mubr.msk.bf16.mxu0 %vm2108_vm0, %v7801_v34  ;;  %6730 = vmatprep.mubr.msk.bf16.mxu1 %vm2108_vm0, %v7803_v35  ;;  %v7824_v30 = vld [vmem:[%s8924_s10 + $0x4a0] ss:$8 sps:$4 sm:$0xff]  }
 0x1da   : > { %v9250_v39 = vpop.f32.mrb[8].mxu0  ;;  %v9252_v40 = vpop.f32.mrb[8].mxu1 }
 0x1db   : > { %v2287_v41 = vpop.f32.mrb[9].mxu0  ;;  %v3245_v42 = vpop.f32.mrb[9].mxu1 }
 0x1dc   : > { %v9258_v46 = vpop.f32.mrb[10].mxu0  ;;  %v9260_v47 = vpop.f32.mrb[10].mxu1  ;;  %v7827_v41 = vld [vmem:[%s8924_s10 + $0x4b4] ss:$8 sps:$4 sm:$0xff]  }
 0x1dd   : > { %v2290_v50 = vpop.f32.mrb[11].mxu0  ;;  %v3248_v51 = vpop.f32.mrb[11].mxu1 }
 0x1df   : > { %2500 = vmatmul.mubr.bf16.gmra.mrb[116].mxu0 %v7805_v43  ;;  %3458 = vmatmul.mubr.bf16.gmra.mrb[116].mxu1 %v7806_v44 }
 0x1e0   : > { %6521 = vmatprep.mubr.msk.bf16.mxu0 %vm2108_vm0, %v7807_v48  ;;  %6731 = vmatprep.mubr.msk.bf16.mxu1 %vm2108_vm0, %v7809_v49 }
 0x1e2   : > { %v9268_v53 = vpop.f32.mrb[12].mxu0  ;;  %v9270_v54 = vpop.f32.mrb[12].mxu1 }
 0x1e3   : > { %v2295_v55 = vpop.f32.mrb[13].mxu0  ;;  %v3253_v56 = vpop.f32.mrb[13].mxu1 }
 0x1e4   : > { %v9276_v60 = vpop.f32.mrb[14].mxu0  ;;  %v9278_v61 = vpop.f32.mrb[14].mxu1  ;;  %v7829_v55 = vld [vmem:[%s8924_s10 + $0x210] ss:$8 sps:$4 sm:$0xff]  }
 0x1e5   : > { %v2298_v0 = vpop.f32.mrb[15].mxu0  ;;  %v3256_v1 = vpop.f32.mrb[15].mxu1  ;;  %v7830_v56 = vld [vmem:[%s8924_s10 + $0x4b0] ss:$8 sps:$4 sm:$0xff]  }
 0x1e6   : > { %v7833_v0 = vld [vmem:[%s8924_s10 + $0x4c4] ss:$8 sps:$4 sm:$0xff]  }
 0x1e7   : > { %2508 = vmatmul.mubr.bf16.gmra.mrb[120].mxu0 %v7811_v57  ;;  %3466 = vmatmul.mubr.bf16.gmra.mrb[120].mxu1 %v7812_v58  ;;  %v7853_v57 = vld [vmem:[%s8924_s10 + $0x250] ss:$8 sps:$4 sm:$0xff]  }
 0x1e8   : > { %6522 = vmatprep.mubr.msk.bf16.mxu0 %vm2108_vm0, %v7813_v62  ;;  %6732 = vmatprep.mubr.msk.bf16.mxu1 %vm2108_vm0, %v7815_v63  ;;  %v7831_v63 = vld [vmem:[%s8924_s10 + $0x224] ss:$8 sps:$4 sm:$0xff]  }
 0x1ea   : > { %v9286_v3 = vpop.f32.mrb[16].mxu0  ;;  %v9288_v4 = vpop.f32.mrb[16].mxu1 }
 0x1eb   : > { %v2303_v5 = vpop.f32.mrb[17].mxu0  ;;  %v3261_v6 = vpop.f32.mrb[17].mxu1 }
 0x1ec   : > { %v9294_v10 = vpop.f32.mrb[18].mxu0  ;;  %v9296_v13 = vpop.f32.mrb[18].mxu1 }
 0x1ed   : > { %v2306_v16 = vpop.f32.mrb[19].mxu0  ;;  %v3264_v20 = vpop.f32.mrb[19].mxu1 }
 0x1ee   : > { %v7835_v16 = vld [vmem:[%s8924_s10 + $0x220] ss:$8 sps:$4 sm:$0xff]  }
 0x1ef   : > { %2516 = vmatmul.mubr.bf16.gmra.mrb[124].mxu0 %v7817_v7  ;;  %3474 = vmatmul.mubr.bf16.gmra.mrb[124].mxu1 %v7818_v8  ;;  %v7836_v20 = vld [vmem:[%s8924_s10 + $0x4c0] ss:$8 sps:$4 sm:$0xff]  }
 0x1f0   : > { %6523 = vmatprep.mubr.msk.bf16.mxu0 %vm2108_vm0, %v7819_v14  ;;  %6733 = vmatprep.mubr.msk.bf16.mxu1 %vm2108_vm0, %v7821_v15 }
 0x1f2   : > { %v9304_v22 = vpop.f32.mrb[20].mxu0  ;;  %v9306_v23 = vpop.f32.mrb[20].mxu1 }
 0x1f3   : > { %v2311_v27 = vpop.f32.mrb[21].mxu0  ;;  %v3269_v28 = vpop.f32.mrb[21].mxu1 }
 0x1f4   : > { %v9312_v35 = vpop.f32.mrb[22].mxu0  ;;  %v9314_v36 = vpop.f32.mrb[22].mxu1 }
 0x1f5   : > { %v2314_v42 = vpop.f32.mrb[23].mxu0  ;;  %v3272_v43 = vpop.f32.mrb[23].mxu1 }
 0x1f7   : > { %2524 = vmatmul.mubr.bf16.gmra.mrb[128].mxu0 %v7823_v29  ;;  %3482 = vmatmul.mubr.bf16.gmra.mrb[128].mxu1 %v7824_v30  ;;  %v7837_v30 = vld [vmem:[%s8924_s10 + $0x234] ss:$8 sps:$4 sm:$0xff]  }
 0x1f8   : > { %6524 = vmatprep.mubr.msk.bf16.mxu0 %vm2108_vm0, %v7825_v37  ;;  %6734 = vmatprep.mubr.msk.bf16.mxu1 %vm2108_vm0, %v7827_v41  ;;  %v7839_v37 = vld [vmem:[%s8924_s10 + $0x4d4] ss:$8 sps:$4 sm:$0xff]  }
 0x1fa   : > { %v9322_v48 = vpop.f32.mrb[24].mxu0  ;;  %v9324_v49 = vpop.f32.mrb[24].mxu1 }
 0x1fb   : > { %v2319_v50 = vpop.f32.mrb[25].mxu0  ;;  %v3277_v51 = vpop.f32.mrb[25].mxu1 }
 0x1fc   : > { %v9330_v58 = vpop.f32.mrb[26].mxu0  ;;  %v9332_v62 = vpop.f32.mrb[26].mxu1 }
 0x1fd   : > { %v2322_v1 = vpop.f32.mrb[27].mxu0  ;;  %v3280_v5 = vpop.f32.mrb[27].mxu1 }
 0x1fe   : > { %v7847_v1 = vld [vmem:[%s8924_s10 + $0x240] ss:$8 sps:$4 sm:$0xff]  }
 0x1ff   : > { %2532 = vmatmul.mubr.bf16.gmra.mrb[132].mxu0 %v7829_v55  ;;  %3490 = vmatmul.mubr.bf16.gmra.mrb[132].mxu1 %v7830_v56 }
 0x200   : > { %6525 = vmatprep.mubr.msk.bf16.mxu0 %vm2108_vm0, %v7831_v63  ;;  %6735 = vmatprep.mubr.msk.bf16.mxu1 %vm2108_vm0, %v7833_v0  ;;  %v7841_v63 = vld [vmem:[%s8924_s10 + $0x230] ss:$8 sps:$4 sm:$0xff]  }
 0x201   : > { %v7842_v0 = vld [vmem:[%s8924_s10 + $0x4d0] ss:$8 sps:$4 sm:$0xff]  }
 0x202   : > { %v9340_v7 = vpop.f32.mrb[28].mxu0  ;;  %v9342_v8 = vpop.f32.mrb[28].mxu1 }
 0x203   : > { %v2327_v14 = vpop.f32.mrb[29].mxu0  ;;  %v3285_v15 = vpop.f32.mrb[29].mxu1 }
 0x204   : > { %v9348_v28 = vpop.f32.mrb[30].mxu0  ;;  %v9350_v29 = vpop.f32.mrb[30].mxu1  ;;  %v7843_v15 = vld [vmem:[%s8924_s10 + $0x244] ss:$8 sps:$4 sm:$0xff]  }
 0x205   : > { %v2330_v41 = vpop.f32.mrb[31].mxu0  ;;  %v3288_v42 = vpop.f32.mrb[31].mxu1 }
 0x207   : > { %2540 = vmatmul.mubr.bf16.gmra.mrb[136].mxu0 %v7835_v16  ;;  %3498 = vmatmul.mubr.bf16.gmra.mrb[136].mxu1 %v7836_v20  ;;  %v7845_v16 = vld [vmem:[%s8924_s10 + $0x4e4] ss:$8 sps:$4 sm:$0xff]  }
 0x208   : > { %6526 = vmatprep.mubr.msk.bf16.mxu0 %vm2108_vm0, %v7837_v30  ;;  %6736 = vmatprep.mubr.msk.bf16.mxu1 %vm2108_vm0, %v7839_v37 }
 0x20a   : > { %v9358_v50 = vpop.f32.mrb[32].mxu0  ;;  %v9360_v51 = vpop.f32.mrb[32].mxu1 }
 0x20b   : > { %v2335_v55 = vpop.f32.mrb[33].mxu0  ;;  %v3293_v56 = vpop.f32.mrb[33].mxu1 }
 0x20c   : > { %v9366_v5 = vpop.f32.mrb[34].mxu0  ;;  %v9368_v14 = vpop.f32.mrb[34].mxu1 }
 0x20d   : > { %v2338_v20 = vpop.f32.mrb[35].mxu0  ;;  %v3296_v30 = vpop.f32.mrb[35].mxu1 }
 0x20e   : > { %v7848_v20 = vld [vmem:[%s8924_s10 + $0x4e0] ss:$8 sps:$4 sm:$0xff]  }
 0x20f   : > { %2548 = vmatmul.mubr.bf16.gmra.mrb[140].mxu0 %v7841_v63  ;;  %3506 = vmatmul.mubr.bf16.gmra.mrb[140].mxu1 %v7842_v0  ;;  %v7849_v0 = vld [vmem:[%s8924_s10 + $0x254] ss:$8 sps:$4 sm:$0xff]  }
 0x210   : > { %6527 = vmatprep.mubr.msk.bf16.mxu0 %vm2108_vm0, %v7843_v15  ;;  %6737 = vmatprep.mubr.msk.bf16.mxu1 %vm2108_vm0, %v7845_v16  ;;  %v7851_v15 = vld [vmem:[%s8924_s10 + $0x4f4] ss:$8 sps:$4 sm:$0xff]  }
 0x212   : > { %v9376_v41 = vpop.f32.mrb[36].mxu0  ;;  %v9378_v42 = vpop.f32.mrb[36].mxu1 }
 0x213   : > { %v2343_v55 = vpop.f32.mrb[37].mxu0  ;;  %v3301_v56 = vpop.f32.mrb[37].mxu1 }
 0x214   : > { %v9384_v43 = vpop.f32.mrb[38].mxu0  ;;  %v9386_v63 = vpop.f32.mrb[38].mxu1 }
 0x215   : > { %v2346_v16 = vpop.f32.mrb[39].mxu0  ;;  %v3304_v37 = vpop.f32.mrb[39].mxu1 }
 0x216   : > { %v7854_v16 = vld [vmem:[%s8924_s10 + $0x4f0] ss:$8 sps:$4 sm:$0xff]  }
 0x217   : > { %2556 = vmatmul.mubr.bf16.gmra.mrb[144].mxu0 %v7847_v1  ;;  %3514 = vmatmul.mubr.bf16.gmra.mrb[144].mxu1 %v7848_v20  ;;  %v7855_v20 = vld [vmem:[%s8924_s10 + $0x264] ss:$8 sps:$4 sm:$0xff]  }
 0x218   : > { %6528 = vmatprep.mubr.msk.bf16.mxu0 %vm2108_vm0, %v7849_v0  ;;  %6738 = vmatprep.mubr.msk.bf16.mxu1 %vm2108_vm0, %v7851_v15  ;;  %v7857_v0 = vld [vmem:[%s8924_s10 + $0x504] ss:$8 sps:$4 sm:$0xff]  }
 0x21a   : > { %v9394_v56 = vpop.f32.mrb[40].mxu0  ;;  %v9396_v30 = vpop.f32.mrb[40].mxu1 }
 0x21b   : > { %v2351_v27 = vpop.f32.mrb[41].mxu0  ;;  %v3309_v6 = vpop.f32.mrb[41].mxu1 }
 0x21c   : > { %v9402_v44 = vpop.f32.mrb[42].mxu0  ;;  %v9404_v1 = vpop.f32.mrb[42].mxu1 }
 0x21d   : > { %v2354_v15 = vpop.f32.mrb[43].mxu0  ;;  %v3312_v55 = vpop.f32.mrb[43].mxu1 }
 0x21e   : > { %v7860_v15 = vld [vmem:[%s8924_s10 + $0x500] ss:$8 sps:$4 sm:$0xff]  }
 0x21f   : > { %2564 = vmatmul.mubr.bf16.gmra.mrb[148].mxu0 %v7853_v57  ;;  %3522 = vmatmul.mubr.bf16.gmra.mrb[148].mxu1 %v7854_v16  ;;  %v7861_v16 = vld [vmem:[%s8924_s10 + $0x274] ss:$8 sps:$4 sm:$0xff]  }
 0x220   : > { %6529 = vmatprep.mubr.msk.bf16.mxu0 %vm2108_vm0, %v7855_v20  ;;  %6739 = vmatprep.mubr.msk.bf16.mxu1 %vm2108_vm0, %v7857_v0  ;;  %v7863_v20 = vld [vmem:[%s8924_s10 + $0x514] ss:$8 sps:$4 sm:$0xff]  }
 0x222   : > { %v9412_v27 = vpop.f32.mrb[44].mxu0  ;;  %v9414_v37 = vpop.f32.mrb[44].mxu1 }
 0x223   : > { %v2359_v34 = vpop.f32.mrb[45].mxu0  ;;  %v3317_v21 = vpop.f32.mrb[45].mxu1 }
 0x224   : > { %v9420_v2 = vpop.f32.mrb[46].mxu0  ;;  %v9422_v57 = vpop.f32.mrb[46].mxu1 }
 0x225   : > { %10588 = vst [vmem:[#allocation3_spill] sm:$0xff] %v9420_v2  ;;  %10589 = vst [vmem:[#allocation4_spill] sm:$0xff] %v9422_v57  ;;  %v2362_v0 = vpop.f32.mrb[47].mxu0  ;;  %v3320_v6 = vpop.f32.mrb[47].mxu1 }
 0x226   : > { %v7866_v0 = vld [vmem:[%s8924_s10 + $0x510] ss:$8 sps:$4 sm:$0xff]  }
 0x227   : > { %2572 = vmatmul.mubr.bf16.gmra.mrb[152].mxu0 %v7859_v9  ;;  %3530 = vmatmul.mubr.bf16.gmra.mrb[152].mxu1 %v7860_v15  ;;  %v7867_v15 = vld [vmem:[%s8924_s10 + $0x284] ss:$8 sps:$4 sm:$0xff]  }
 0x228   : > { %6530 = vmatprep.mubr.msk.bf16.mxu0 %vm2108_vm0, %v7861_v16  ;;  %6740 = vmatprep.mubr.msk.bf16.mxu1 %vm2108_vm0, %v7863_v20  ;;  %v7869_v16 = vld [vmem:[%s8924_s10 + $0x524] ss:$8 sps:$4 sm:$0xff]  }
 0x22a   : > { %v9430_v34 = vpop.f32.mrb[48].mxu0  ;;  %v9432_v55 = vpop.f32.mrb[48].mxu1 }
 0x22b   : > { %10590 = vst [vmem:[#allocation5_spill] sm:$0xff] %v9430_v34  ;;  %10591 = vst [vmem:[#allocation6_spill] sm:$0xff] %v9432_v55  ;;  %v2367_v59 = vpop.f32.mrb[49].mxu0  ;;  %v3325_v52 = vpop.f32.mrb[49].mxu1 }
 0x22c   : > { %v9438_v38 = vpop.f32.mrb[50].mxu0  ;;  %v9440_v9 = vpop.f32.mrb[50].mxu1 }
 0x22d   : > { %10592 = vst [vmem:[#allocation7_spill] sm:$0xff] %v9438_v38  ;;  %10593 = vst [vmem:[#allocation8_spill] sm:$0xff] %v9440_v9  ;;  %v2370_v20 = vpop.f32.mrb[51].mxu0  ;;  %v3328_v21 = vpop.f32.mrb[51].mxu1  ;;  %v7877_v9 = vld [vmem:[%s8924_s10 + $0x290] ss:$8 sps:$4 sm:$0xff]  }
 0x22e   : > { %v7872_v20 = vld [vmem:[%s8924_s10 + $0x520] ss:$8 sps:$4 sm:$0xff]  }
 0x22f   : > { %2580 = vmatmul.mubr.bf16.gmra.mrb[156].mxu0 %v7865_v45  ;;  %3538 = vmatmul.mubr.bf16.gmra.mrb[156].mxu1 %v7866_v0  ;;  %v7873_v0 = vld [vmem:[%s8924_s10 + $0x294] ss:$8 sps:$4 sm:$0xff]  }
 0x230   : > { %6531 = vmatprep.mubr.msk.bf16.mxu0 %vm2108_vm0, %v7867_v15  ;;  %6741 = vmatprep.mubr.msk.bf16.mxu1 %vm2108_vm0, %v7869_v16  ;;  %v7875_v15 = vld [vmem:[%s8924_s10 + $0x534] ss:$8 sps:$4 sm:$0xff]  }
 0x232   : > { %v9448_v59 = vpop.f32.mrb[52].mxu0  ;;  %v9450_v6 = vpop.f32.mrb[52].mxu1 }
 0x233   : > { %10594 = vst [vmem:[#allocation9_spill] sm:$0xff] %v9448_v59  ;;  %10595 = vst [vmem:[#allocation10_spill] sm:$0xff] %v9450_v6  ;;  %v2375_v31 = vpop.f32.mrb[53].mxu0  ;;  %v3333_v24 = vpop.f32.mrb[53].mxu1 }
 0x234   : > { %v9456_v55 = vpop.f32.mrb[54].mxu0  ;;  %v9458_v45 = vpop.f32.mrb[54].mxu1 }
 0x235   : > { %10596 = vst [vmem:[#allocation11_spill] sm:$0xff] %v9456_v55  ;;  %10597 = vst [vmem:[#allocation12_spill] sm:$0xff] %v9458_v45  ;;  %v2378_v16 = vpop.f32.mrb[55].mxu0  ;;  %v3336_v52 = vpop.f32.mrb[55].mxu1  ;;  %v7879_v45 = vld [vmem:[%s8924_s10 + $0x540] ss:$8 sps:$4 sm:$0xff]  }
 0x236   : > { %v7878_v16 = vld [vmem:[%s8924_s10 + $0x530] ss:$8 sps:$4 sm:$0xff]  }
 0x237   : > { %2588 = vmatmul.mubr.bf16.gmra.mrb[160].mxu0 %v7871_v17  ;;  %3546 = vmatmul.mubr.bf16.gmra.mrb[160].mxu1 %v7872_v20  ;;  %v7881_v20 = vld [vmem:[%s8924_s10 + $0x544] ss:$8 sps:$4 sm:$0xff]  }
 0x238   : > { %6532 = vmatprep.mubr.msk.bf16.mxu0 %vm2108_vm0, %v7873_v0  ;;  %6742 = vmatprep.mubr.msk.bf16.mxu1 %vm2108_vm0, %v7875_v15  ;;  %v7884_v0 = vld [vmem:[%s8924_s10 + $0x7e4] ss:$8 sps:$4 sm:$0xff]  }
 0x23a   : > { %v9466_v31 = vpop.f32.mrb[56].mxu0  ;;  %v9468_v21 = vpop.f32.mrb[56].mxu1 }
 0x23b   : > { %10598 = vst [vmem:[#allocation13_spill] sm:$0xff] %v9466_v31  ;;  %10599 = vst [vmem:[#allocation14_spill] sm:$0xff] %v9468_v21  ;;  %v2383_v6 = vpop.f32.mrb[57].mxu0  ;;  %v3341_v59 = vpop.f32.mrb[57].mxu1 }
 0x23c   : > { %v9474_v38 = vpop.f32.mrb[58].mxu0  ;;  %v9476_v17 = vpop.f32.mrb[58].mxu1 }
 0x23d   : > { %10600 = vst [vmem:[#allocation15_spill] sm:$0xff] %v9474_v38  ;;  %10601 = vst [vmem:[#allocation16_spill] sm:$0xff] %v9476_v17  ;;  %v2386_v15 = vpop.f32.mrb[59].mxu0  ;;  %v3344_v24 = vpop.f32.mrb[59].mxu1  ;;  %v7889_v17 = vld [vmem:[%s8924_s10 + $0x550] ss:$8 sps:$4 sm:$0xff]  }
 0x23e   : > { %v7882_v15 = vld [vmem:[%s8924_s10 + $0x7e0] ss:$8 sps:$4 sm:$0xff]  }
 0x23f   : > { %2596 = vmatmul.mubr.bf16.gmra.mrb[164].mxu0 %v7877_v9  ;;  %3554 = vmatmul.mubr.bf16.gmra.mrb[164].mxu1 %v7878_v16  ;;  %v7885_v16 = vld [vmem:[%s8924_s10 + $0x554] ss:$8 sps:$4 sm:$0xff]  }
 0x240   : > { %6911 = vmatprep.mubr.msk.bf16.mxu0 %vm2108_vm0, %v7881_v20  ;;  %7121 = vmatprep.mubr.msk.bf16.mxu1 %vm2108_vm0, %v7884_v0  ;;  %v7887_v20 = vld [vmem:[%s8924_s10 + $0x7f4] ss:$8 sps:$4 sm:$0xff]  }
 0x242   : > { %v9484_v59 = vpop.f32.mrb[60].mxu0  ;;  %v9486_v52 = vpop.f32.mrb[60].mxu1 }
 0x243   : > { %10602 = vst [vmem:[#allocation17_spill] sm:$0xff] %v9484_v59  ;;  %10603 = vst [vmem:[#allocation18_spill] sm:$0xff] %v9486_v52  ;;  %v2391_v21 = vpop.f32.mrb[61].mxu0  ;;  %v3349_v31 = vpop.f32.mrb[61].mxu1 }
 0x244   : > { %v9492_v55 = vpop.f32.mrb[62].mxu0  ;;  %v9494_v9 = vpop.f32.mrb[62].mxu1 }
 0x245   : > { %10604 = vst [vmem:[#allocation19_spill] sm:$0xff] %v9492_v55  ;;  %10605 = vst [vmem:[#allocation20_spill] sm:$0xff] %v9494_v9  ;;  %v2394_v0 = vpop.f32.mrb[63].mxu0  ;;  %v3352_v6 = vpop.f32.mrb[63].mxu1  ;;  %v7895_v9 = vld [vmem:[%s8924_s10 + $0x560] ss:$8 sps:$4 sm:$0xff]  }
 0x246   : > { %v7890_v0 = vld [vmem:[%s8924_s10 + $0x7f0] ss:$8 sps:$4 sm:$0xff]  }
 0x247   : > { %4268 = vmatmul.mubr.bf16.vlgmr.msra.gmra.mrb[168].mxu0 %v7879_v45  ;;  %5310 = vmatmul.mubr.bf16.vlgmr.msra.gmra.mrb[168].mxu1 %v7882_v15  ;;  %v7891_v15 = vld [vmem:[%s8924_s10 + $0x564] ss:$8 sps:$4 sm:$0xff]  }
 0x248   : > { %6912 = vmatprep.mubr.msk.bf16.mxu0 %vm2108_vm0, %v7885_v16  ;;  %7122 = vmatprep.mubr.msk.bf16.mxu1 %vm2108_vm0, %v7887_v20  ;;  %v7893_v16 = vld [vmem:[%s8924_s10 + $0x804] ss:$8 sps:$4 sm:$0xff]  }
 0x24a   : > { %v9502_v31 = vpop.f32.mrb[64].mxu0  ;;  %v9504_v24 = vpop.f32.mrb[64].mxu1 }
 0x24b   : > { %10606 = vst [vmem:[#allocation21_spill] sm:$0xff] %v9502_v31  ;;  %10607 = vst [vmem:[#allocation22_spill] sm:$0xff] %v9504_v24  ;;  %v2399_v52 = vpop.f32.mrb[65].mxu0  ;;  %v3357_v59 = vpop.f32.mrb[65].mxu1 }
 0x24c   : > { %v9510_v38 = vpop.f32.mrb[66].mxu0  ;;  %v9512_v45 = vpop.f32.mrb[66].mxu1 }
 0x24d   : > { %10608 = vst [vmem:[#allocation23_spill] sm:$0xff] %v9510_v38  ;;  %10609 = vst [vmem:[#allocation24_spill] sm:$0xff] %v9512_v45  ;;  %v2402_v20 = vpop.f32.mrb[67].mxu0  ;;  %v3360_v21 = vpop.f32.mrb[67].mxu1  ;;  %v7901_v45 = vld [vmem:[%s8924_s10 + $0x570] ss:$8 sps:$4 sm:$0xff]  }
 0x24e   : > { %v7896_v20 = vld [vmem:[%s8924_s10 + $0x800] ss:$8 sps:$4 sm:$0xff]  }
 0x24f   : > { %4276 = vmatmul.mubr.bf16.gmra.mrb[172].mxu0 %v7889_v17  ;;  %5318 = vmatmul.mubr.bf16.gmra.mrb[172].mxu1 %v7890_v0  ;;  %v7897_v0 = vld [vmem:[%s8924_s10 + $0x574] ss:$8 sps:$4 sm:$0xff]  }
 0x250   : > { %6913 = vmatprep.mubr.msk.bf16.mxu0 %vm2108_vm0, %v7891_v15  ;;  %7123 = vmatprep.mubr.msk.bf16.mxu1 %vm2108_vm0, %v7893_v16  ;;  %v7899_v15 = vld [vmem:[%s8924_s10 + $0x814] ss:$8 sps:$4 sm:$0xff]  }
 0x252   : > { %v9520_v59 = vpop.f32.mrb[68].mxu0  ;;  %v9522_v6 = vpop.f32.mrb[68].mxu1 }
 0x253   : > { %10610 = vst [vmem:[#allocation25_spill] sm:$0xff] %v9520_v59  ;;  %10611 = vst [vmem:[#allocation26_spill] sm:$0xff] %v9522_v6  ;;  %v2407_v24 = vpop.f32.mrb[69].mxu0  ;;  %v3365_v31 = vpop.f32.mrb[69].mxu1 }
 0x254   : > { %v9528_v55 = vpop.f32.mrb[70].mxu0  ;;  %v9530_v17 = vpop.f32.mrb[70].mxu1 }
 0x255   : > { %10612 = vst [vmem:[#allocation27_spill] sm:$0xff] %v9528_v55  ;;  %10613 = vst [vmem:[#allocation28_spill] sm:$0xff] %v9530_v17  ;;  %v2410_v16 = vpop.f32.mrb[71].mxu0  ;;  %v3368_v52 = vpop.f32.mrb[71].mxu1  ;;  %v7907_v17 = vld [vmem:[%s8924_s10 + $0x580] ss:$8 sps:$4 sm:$0xff]  }
 0x256   : > { %v7902_v16 = vld [vmem:[%s8924_s10 + $0x810] ss:$8 sps:$4 sm:$0xff]  }
 0x257   : > { %4284 = vmatmul.mubr.bf16.gmra.mrb[176].mxu0 %v7895_v9  ;;  %5326 = vmatmul.mubr.bf16.gmra.mrb[176].mxu1 %v7896_v20  ;;  %v7903_v20 = vld [vmem:[%s8924_s10 + $0x584] ss:$8 sps:$4 sm:$0xff]  }
 0x258   : > { %6914 = vmatprep.mubr.msk.bf16.mxu0 %vm2108_vm0, %v7897_v0  ;;  %7124 = vmatprep.mubr.msk.bf16.mxu1 %vm2108_vm0, %v7899_v15  ;;  %v7905_v0 = vld [vmem:[%s8924_s10 + $0x824] ss:$8 sps:$4 sm:$0xff]  }
 0x25a   : > { %v9538_v31 = vpop.f32.mrb[72].mxu0  ;;  %v9540_v21 = vpop.f32.mrb[72].mxu1 }
 0x25b   : > { %10614 = vst [vmem:[#allocation29_spill] sm:$0xff] %v9538_v31  ;;  %10615 = vst [vmem:[#allocation30_spill] sm:$0xff] %v9540_v21  ;;  %v2415_v6 = vpop.f32.mrb[73].mxu0  ;;  %v3373_v59 = vpop.f32.mrb[73].mxu1 }
 0x25c   : > { %v9546_v38 = vpop.f32.mrb[74].mxu0  ;;  %v9548_v9 = vpop.f32.mrb[74].mxu1 }
 0x25d   : > { %10616 = vst [vmem:[#allocation31_spill] sm:$0xff] %v9546_v38  ;;  %10617 = vst [vmem:[#allocation32_spill] sm:$0xff] %v9548_v9  ;;  %v2418_v15 = vpop.f32.mrb[75].mxu0  ;;  %v3376_v24 = vpop.f32.mrb[75].mxu1  ;;  %v7914_v9 = vld [vmem:[%s8924_s10 + $0x830] ss:$8 sps:$4 sm:$0xff]  }
 0x25e   : > { %v7908_v15 = vld [vmem:[%s8924_s10 + $0x820] ss:$8 sps:$4 sm:$0xff]  }
 0x25f   : > { %4292 = vmatmul.mubr.bf16.gmra.mrb[180].mxu0 %v7901_v45  ;;  %5334 = vmatmul.mubr.bf16.gmra.mrb[180].mxu1 %v7902_v16  ;;  %v7909_v16 = vld [vmem:[%s8924_s10 + $0x594] ss:$8 sps:$4 sm:$0xff]  }
 0x260   : > { %6915 = vmatprep.mubr.msk.bf16.mxu0 %vm2108_vm0, %v7903_v20  ;;  %7125 = vmatprep.mubr.msk.bf16.mxu1 %vm2108_vm0, %v7905_v0  ;;  %v7911_v20 = vld [vmem:[%s8924_s10 + $0x834] ss:$8 sps:$4 sm:$0xff]  }
 0x262   : > { %v9556_v59 = vpop.f32.mrb[76].mxu0  ;;  %v9558_v52 = vpop.f32.mrb[76].mxu1 }
 0x263   : > { %10618 = vst [vmem:[#allocation33_spill] sm:$0xff] %v9556_v59  ;;  %10619 = vst [vmem:[#allocation34_spill] sm:$0xff] %v9558_v52  ;;  %v2423_v21 = vpop.f32.mrb[77].mxu0  ;;  %v3381_v31 = vpop.f32.mrb[77].mxu1 }
 0x264   : > { %v9564_v55 = vpop.f32.mrb[78].mxu0  ;;  %v9566_v45 = vpop.f32.mrb[78].mxu1 }
 0x265   : > { %10620 = vst [vmem:[#allocation35_spill] sm:$0xff] %v9564_v55  ;;  %10621 = vst [vmem:[#allocation36_spill] sm:$0xff] %v9566_v45  ;;  %v2426_v0 = vpop.f32.mrb[79].mxu0  ;;  %v3384_v6 = vpop.f32.mrb[79].mxu1  ;;  %v10711_v55 = vmax.f32 %v9222_v18, %v9224_v19 }
 0x266   : > { %v7913_v6 = vld [vmem:[%s8924_s10 + $0x590] ss:$8 sps:$4 sm:$0xff]  }
 0x267   : > { %4300 = vmatmul.mubr.bf16.gmra.mrb[184].mxu0 %v7907_v17  ;;  %5342 = vmatmul.mubr.bf16.gmra.mrb[184].mxu1 %v7908_v15  ;;  %v7915_v15 = vld [vmem:[%s8924_s10 + $0x5a4] ss:$8 sps:$4 sm:$0xff]  }
 0x268   : > { %6916 = vmatprep.mubr.msk.bf16.mxu0 %vm2108_vm0, %v7909_v16  ;;  %7126 = vmatprep.mubr.msk.bf16.mxu1 %vm2108_vm0, %v7911_v20  ;;  %v7917_v16 = vld [vmem:[%s8924_s10 + $0x844] ss:$8 sps:$4 sm:$0xff]   ;;  %v7919_v20 = vld [vmem:[%s8924_s10 + $0x5a0] ss:$8 sps:$4 sm:$0xff]  }
 0x26a   : > { %v9574_v31 = vpop.f32.mrb[80].mxu0  ;;  %v9576_v24 = vpop.f32.mrb[80].mxu1 }
 0x26b   : > { %10622 = vst [vmem:[#allocation37_spill] sm:$0xff] %v9574_v31  ;;  %10623 = vst [vmem:[#allocation38_spill] sm:$0xff] %v9576_v24  ;;  %v2431_v0 = vpop.f32.mrb[81].mxu0  ;;  %v3389_v59 = vpop.f32.mrb[81].mxu1 }
 0x26c   : > { %v9582_v38 = vpop.f32.mrb[82].mxu0  ;;  %v9584_v17 = vpop.f32.mrb[82].mxu1 }
 0x26d   : > { %10624 = vst [vmem:[#allocation39_spill] sm:$0xff] %v9582_v38  ;;  %10625 = vst [vmem:[#allocation40_spill] sm:$0xff] %v9584_v17  ;;  %v2434_v21 = vpop.f32.mrb[83].mxu0  ;;  %v3392_v45 = vpop.f32.mrb[83].mxu1  ;;  %v7920_v17 = vld [vmem:[%s8924_s10 + $0x840] ss:$8 sps:$4 sm:$0xff]  }
 0x26f   : > { %4308 = vmatmul.mubr.bf16.gmra.mrb[188].mxu0 %v7913_v6  ;;  %5350 = vmatmul.mubr.bf16.gmra.mrb[188].mxu1 %v7914_v9  ;;  %v7921_v9 = vld [vmem:[%s8924_s10 + $0x5b4] ss:$8 sps:$4 sm:$0xff]  }
 0x270   : > { %6917 = vmatprep.mubr.msk.bf16.mxu0 %vm2108_vm0, %v7915_v15  ;;  %7127 = vmatprep.mubr.msk.bf16.mxu1 %vm2108_vm0, %v7917_v16  ;;  %v7923_v6 = vld [vmem:[%s8924_s10 + $0x854] ss:$8 sps:$4 sm:$0xff]   ;;  %v7925_v15 = vld [vmem:[%s8924_s10 + $0x5b0] ss:$8 sps:$4 sm:$0xff]  }
 0x272   : > { %v9592_v59 = vpop.f32.mrb[84].mxu0  ;;  %v9594_v0 = vpop.f32.mrb[84].mxu1 }
 0x273   : > { %10626 = vst [vmem:[#allocation41_spill] sm:$0xff] %v9592_v59  ;;  %10627 = vst [vmem:[#allocation42_spill] sm:$0xff] %v9594_v0  ;;  %v2439_v24 = vpop.f32.mrb[85].mxu0  ;;  %v3397_v31 = vpop.f32.mrb[85].mxu1 }
 0x274   : > { %v9600_v21 = vpop.f32.mrb[86].mxu0  ;;  %v9602_v45 = vpop.f32.mrb[86].mxu1 }
 0x275   : > { %10628 = vst [vmem:[#allocation43_spill] sm:$0xff] %v9600_v21  ;;  %10629 = vst [vmem:[#allocation44_spill] sm:$0xff] %v9602_v45  ;;  %v2442_v16 = vpop.f32.mrb[87].mxu0  ;;  %v3400_v38 = vpop.f32.mrb[87].mxu1  ;;  %v7926_v45 = vld [vmem:[%s8924_s10 + $0x850] ss:$8 sps:$4 sm:$0xff]  }
 0x277   : > { %4316 = vmatmul.mubr.bf16.gmra.mrb[192].mxu0 %v7919_v20  ;;  %5358 = vmatmul.mubr.bf16.gmra.mrb[192].mxu1 %v7920_v17  ;;  %v7927_v17 = vld [vmem:[%s8924_s10 + $0x5c4] ss:$8 sps:$4 sm:$0xff]  }
 0x278   : > { %6918 = vmatprep.mubr.msk.bf16.mxu0 %vm2108_vm0, %v7921_v9  ;;  %7128 = vmatprep.mubr.msk.bf16.mxu1 %vm2108_vm0, %v7923_v6  ;;  %v7929_v20 = vld [vmem:[%s8924_s10 + $0x864] ss:$8 sps:$4 sm:$0xff]   ;;  %v7931_v9 = vld [vmem:[%s8924_s10 + $0x5c0] ss:$8 sps:$4 sm:$0xff]  }
 0x27a   : > { %v9610_v24 = vpop.f32.mrb[88].mxu0  ;;  %v9612_v31 = vpop.f32.mrb[88].mxu1 }
 0x27b   : > { %10630 = vst [vmem:[#allocation45_spill] sm:$0xff] %v9610_v24  ;;  %10631 = vst [vmem:[#allocation46_spill] sm:$0xff] %v9612_v31  ;;  %v2447_v0 = vpop.f32.mrb[89].mxu0  ;;  %v3405_v59 = vpop.f32.mrb[89].mxu1 }
 0x27c   : > { %v9618_v16 = vpop.f32.mrb[90].mxu0  ;;  %v9620_v38 = vpop.f32.mrb[90].mxu1 }
 0x27d   : > { %10632 = vst [vmem:[#allocation47_spill] sm:$0xff] %v9618_v16  ;;  %10633 = vst [vmem:[#allocation48_spill] sm:$0xff] %v9620_v38  ;;  %v2450_v6 = vpop.f32.mrb[91].mxu0  ;;  %v3408_v21 = vpop.f32.mrb[91].mxu1  ;;  %v7932_v38 = vld [vmem:[%s8924_s10 + $0x860] ss:$8 sps:$4 sm:$0xff]  }
 0x27f   : > { %4324 = vmatmul.mubr.bf16.gmra.mrb[196].mxu0 %v7925_v15  ;;  %5366 = vmatmul.mubr.bf16.gmra.mrb[196].mxu1 %v7926_v45  ;;  %v7933_v45 = vld [vmem:[%s8924_s10 + $0x5d4] ss:$8 sps:$4 sm:$0xff]  }
 0x280   : > { %6919 = vmatprep.mubr.msk.bf16.mxu0 %vm2108_vm0, %v7927_v17  ;;  %7129 = vmatprep.mubr.msk.bf16.mxu1 %vm2108_vm0, %v7929_v20  ;;  %v7935_v15 = vld [vmem:[%s8924_s10 + $0x874] ss:$8 sps:$4 sm:$0xff]   ;;  %v7937_v17 = vld [vmem:[%s8924_s10 + $0x5d0] ss:$8 sps:$4 sm:$0xff]  }
 0x282   : > { %v9628_v59 = vpop.f32.mrb[92].mxu0  ;;  %v9630_v0 = vpop.f32.mrb[92].mxu1 }
 0x283   : > { %10634 = vst [vmem:[#allocation49_spill] sm:$0xff] %v9628_v59  ;;  %10635 = vst [vmem:[#allocation50_spill] sm:$0xff] %v9630_v0  ;;  %v2455_v31 = vpop.f32.mrb[93].mxu0  ;;  %v3413_v24 = vpop.f32.mrb[93].mxu1 }
 0x284   : > { %v9636_v6 = vpop.f32.mrb[94].mxu0  ;;  %v9638_v21 = vpop.f32.mrb[94].mxu1 }
 0x285   : > { %10636 = vst [vmem:[#allocation51_spill] sm:$0xff] %v9636_v6  ;;  %10637 = vst [vmem:[#allocation52_spill] sm:$0xff] %v9638_v21  ;;  %v2458_v20 = vpop.f32.mrb[95].mxu0  ;;  %v3416_v16 = vpop.f32.mrb[95].mxu1  ;;  %v7938_v21 = vld [vmem:[%s8924_s10 + $0x870] ss:$8 sps:$4 sm:$0xff]  }
 0x287   : > { %4332 = vmatmul.mubr.bf16.gmra.mrb[200].mxu0 %v7931_v9  ;;  %5374 = vmatmul.mubr.bf16.gmra.mrb[200].mxu1 %v7932_v38  ;;  %v7939_v38 = vld [vmem:[%s8924_s10 + $0x5e4] ss:$8 sps:$4 sm:$0xff]  }
 0x288   : > { %6920 = vmatprep.mubr.msk.bf16.mxu0 %vm2108_vm0, %v7933_v45  ;;  %7130 = vmatprep.mubr.msk.bf16.mxu1 %vm2108_vm0, %v7935_v15  ;;  %v7941_v9 = vld [vmem:[%s8924_s10 + $0x884] ss:$8 sps:$4 sm:$0xff]   ;;  %v7943_v45 = vld [vmem:[%s8924_s10 + $0x5e0] ss:$8 sps:$4 sm:$0xff]  }
 0x28a   : > { %v9646_v24 = vpop.f32.mrb[96].mxu0  ;;  %v9648_v31 = vpop.f32.mrb[96].mxu1 }
 0x28b   : > { %10638 = vst [vmem:[#allocation53_spill] sm:$0xff] %v9646_v24  ;;  %10639 = vst [vmem:[#allocation54_spill] sm:$0xff] %v9648_v31  ;;  %v2463_v0 = vpop.f32.mrb[97].mxu0  ;;  %v3421_v59 = vpop.f32.mrb[97].mxu1 }
 0x28c   : > { %v9654_v20 = vpop.f32.mrb[98].mxu0  ;;  %v9656_v16 = vpop.f32.mrb[98].mxu1 }
 0x28d   : > { %10640 = vst [vmem:[#allocation55_spill] sm:$0xff] %v9654_v20  ;;  %10641 = vst [vmem:[#allocation56_spill] sm:$0xff] %v9656_v16  ;;  %v2466_v15 = vpop.f32.mrb[99].mxu0  ;;  %v3424_v6 = vpop.f32.mrb[99].mxu1  ;;  %v7944_v16 = vld [vmem:[%s8924_s10 + $0x880] ss:$8 sps:$4 sm:$0xff]  }
 0x28f   : > { %4340 = vmatmul.mubr.bf16.gmra.mrb[204].mxu0 %v7937_v17  ;;  %5382 = vmatmul.mubr.bf16.gmra.mrb[204].mxu1 %v7938_v21  ;;  %v7945_v21 = vld [vmem:[%s8924_s10 + $0x5f4] ss:$8 sps:$4 sm:$0xff]  }
 0x290   : > { %6921 = vmatprep.mubr.msk.bf16.mxu0 %vm2108_vm0, %v7939_v38  ;;  %7131 = vmatprep.mubr.msk.bf16.mxu1 %vm2108_vm0, %v7941_v9  ;;  %v7947_v17 = vld [vmem:[%s8924_s10 + $0x894] ss:$8 sps:$4 sm:$0xff]   ;;  %v7949_v38 = vld [vmem:[%s8924_s10 + $0x5f0] ss:$8 sps:$4 sm:$0xff]  }
 0x292   : > { %v9664_v59 = vpop.f32.mrb[100].mxu0  ;;  %v9666_v0 = vpop.f32.mrb[100].mxu1 }
 0x293   : > { %10642 = vst [vmem:[#allocation57_spill] sm:$0xff] %v9664_v59  ;;  %10643 = vst [vmem:[#allocation58_spill] sm:$0xff] %v9666_v0  ;;  %v2471_v31 = vpop.f32.mrb[101].mxu0  ;;  %v3429_v24 = vpop.f32.mrb[101].mxu1 }
 0x294   : > { %v9672_v15 = vpop.f32.mrb[102].mxu0  ;;  %v9674_v6 = vpop.f32.mrb[102].mxu1 }
 0x295   : > { %10644 = vst [vmem:[#allocation59_spill] sm:$0xff] %v9672_v15  ;;  %10645 = vst [vmem:[#allocation60_spill] sm:$0xff] %v9674_v6  ;;  %v2474_v9 = vpop.f32.mrb[103].mxu0  ;;  %v3432_v20 = vpop.f32.mrb[103].mxu1  ;;  %v7950_v6 = vld [vmem:[%s8924_s10 + $0x890] ss:$8 sps:$4 sm:$0xff]  }
 0x297   : > { %4348 = vmatmul.mubr.bf16.gmra.mrb[208].mxu0 %v7943_v45  ;;  %5390 = vmatmul.mubr.bf16.gmra.mrb[208].mxu1 %v7944_v16  ;;  %v7951_v16 = vld [vmem:[%s8924_s10 + $0x604] ss:$8 sps:$4 sm:$0xff]  }
 0x298   : > { %6922 = vmatprep.mubr.msk.bf16.mxu0 %vm2108_vm0, %v7945_v21  ;;  %7132 = vmatprep.mubr.msk.bf16.mxu1 %vm2108_vm0, %v7947_v17  ;;  %v7953_v45 = vld [vmem:[%s8924_s10 + $0x8a4] ss:$8 sps:$4 sm:$0xff]   ;;  %v7955_v21 = vld [vmem:[%s8924_s10 + $0x600] ss:$8 sps:$4 sm:$0xff]  }
 0x29a   : > { %v9682_v24 = vpop.f32.mrb[104].mxu0  ;;  %v9684_v31 = vpop.f32.mrb[104].mxu1 }
 0x29b   : > { %10646 = vst [vmem:[#allocation61_spill] sm:$0xff] %v9682_v24  ;;  %10647 = vst [vmem:[#allocation62_spill] sm:$0xff] %v9684_v31  ;;  %v2479_v0 = vpop.f32.mrb[105].mxu0  ;;  %v3437_v59 = vpop.f32.mrb[105].mxu1 }
 0x29c   : > { %v9690_v9 = vpop.f32.mrb[106].mxu0  ;;  %v9692_v20 = vpop.f32.mrb[106].mxu1 }
 0x29d   : > { %10648 = vst [vmem:[#allocation63_spill] sm:$0xff] %v9690_v9  ;;  %10649 = vst [vmem:[#allocation64_spill] sm:$0xff] %v9692_v20  ;;  %v2482_v17 = vpop.f32.mrb[107].mxu0  ;;  %v3440_v15 = vpop.f32.mrb[107].mxu1  ;;  %v7956_v20 = vld [vmem:[%s8924_s10 + $0x8a0] ss:$8 sps:$4 sm:$0xff]  }
 0x29f   : > { %4356 = vmatmul.mubr.bf16.gmra.mrb[212].mxu0 %v7949_v38  ;;  %5398 = vmatmul.mubr.bf16.gmra.mrb[212].mxu1 %v7950_v6  ;;  %v7957_v6 = vld [vmem:[%s8924_s10 + $0x614] ss:$8 sps:$4 sm:$0xff]  }
 0x2a0   : > { %6923 = vmatprep.mubr.msk.bf16.mxu0 %vm2108_vm0, %v7951_v16  ;;  %7133 = vmatprep.mubr.msk.bf16.mxu1 %vm2108_vm0, %v7953_v45  ;;  %v7959_v38 = vld [vmem:[%s8924_s10 + $0x8b4] ss:$8 sps:$4 sm:$0xff]   ;;  %v7961_v16 = vld [vmem:[%s8924_s10 + $0x610] ss:$8 sps:$4 sm:$0xff]  }
 0x2a2   : > { %v9700_v59 = vpop.f32.mrb[108].mxu0  ;;  %v9702_v0 = vpop.f32.mrb[108].mxu1 }
 0x2a3   : > { %10650 = vst [vmem:[#allocation65_spill] sm:$0xff] %v9700_v59  ;;  %10651 = vst [vmem:[#allocation66_spill] sm:$0xff] %v9702_v0  ;;  %v2487_v31 = vpop.f32.mrb[109].mxu0  ;;  %v3445_v24 = vpop.f32.mrb[109].mxu1 }
 0x2a4   : > { %v9708_v17 = vpop.f32.mrb[110].mxu0  ;;  %v9710_v15 = vpop.f32.mrb[110].mxu1 }
 0x2a5   : > { %10652 = vst [vmem:[#allocation67_spill] sm:$0xff] %v9708_v17  ;;  %10653 = vst [vmem:[#allocation68_spill] sm:$0xff] %v9710_v15  ;;  %v2490_v45 = vpop.f32.mrb[111].mxu0  ;;  %v3448_v9 = vpop.f32.mrb[111].mxu1  ;;  %v7962_v15 = vld [vmem:[%s8924_s10 + $0x8b0] ss:$8 sps:$4 sm:$0xff]  }
 0x2a7   : > { %4364 = vmatmul.mubr.bf16.gmra.mrb[216].mxu0 %v7955_v21  ;;  %5406 = vmatmul.mubr.bf16.gmra.mrb[216].mxu1 %v7956_v20  ;;  %v7963_v20 = vld [vmem:[%s8924_s10 + $0x624] ss:$8 sps:$4 sm:$0xff]  }
 0x2a8   : > { %6924 = vmatprep.mubr.msk.bf16.mxu0 %vm2108_vm0, %v7957_v6  ;;  %7134 = vmatprep.mubr.msk.bf16.mxu1 %vm2108_vm0, %v7959_v38  ;;  %v7965_v21 = vld [vmem:[%s8924_s10 + $0x8c4] ss:$8 sps:$4 sm:$0xff]   ;;  %v7967_v6 = vld [vmem:[%s8924_s10 + $0x620] ss:$8 sps:$4 sm:$0xff]  }
 0x2aa   : > { %v9718_v24 = vpop.f32.mrb[112].mxu0  ;;  %v9720_v31 = vpop.f32.mrb[112].mxu1 }
 0x2ab   : > { %10654 = vst [vmem:[#allocation69_spill] sm:$0xff] %v9718_v24  ;;  %10655 = vst [vmem:[#allocation70_spill] sm:$0xff] %v9720_v31  ;;  %v2495_v0 = vpop.f32.mrb[113].mxu0  ;;  %v3453_v59 = vpop.f32.mrb[113].mxu1 }
 0x2ac   : > { %v9726_v45 = vpop.f32.mrb[114].mxu0  ;;  %v9728_v9 = vpop.f32.mrb[114].mxu1 }
 0x2ad   : > { %10656 = vst [vmem:[#allocation71_spill] sm:$0xff] %v9726_v45  ;;  %10657 = vst [vmem:[#allocation72_spill] sm:$0xff] %v9728_v9  ;;  %v2498_v38 = vpop.f32.mrb[115].mxu0  ;;  %v3456_v17 = vpop.f32.mrb[115].mxu1  ;;  %v7968_v9 = vld [vmem:[%s8924_s10 + $0x8c0] ss:$8 sps:$4 sm:$0xff]  }
 0x2af   : > { %4372 = vmatmul.mubr.bf16.gmra.mrb[220].mxu0 %v7961_v16  ;;  %5414 = vmatmul.mubr.bf16.gmra.mrb[220].mxu1 %v7962_v15  ;;  %v7969_v15 = vld [vmem:[%s8924_s10 + $0x634] ss:$8 sps:$4 sm:$0xff]  }
 0x2b0   : > { %6925 = vmatprep.mubr.msk.bf16.mxu0 %vm2108_vm0, %v7963_v20  ;;  %7135 = vmatprep.mubr.msk.bf16.mxu1 %vm2108_vm0, %v7965_v21  ;;  %v7971_v16 = vld [vmem:[%s8924_s10 + $0x8d4] ss:$8 sps:$4 sm:$0xff]   ;;  %v7973_v20 = vld [vmem:[%s8924_s10 + $0x630] ss:$8 sps:$4 sm:$0xff]  }
 0x2b2   : > { %v9736_v59 = vpop.f32.mrb[116].mxu0  ;;  %v9738_v0 = vpop.f32.mrb[116].mxu1 }
 0x2b3   : > { %10658 = vst [vmem:[#allocation73_spill] sm:$0xff] %v9736_v59  ;;  %10659 = vst [vmem:[#allocation74_spill] sm:$0xff] %v9738_v0  ;;  %v2503_v31 = vpop.f32.mrb[117].mxu0  ;;  %v3461_v24 = vpop.f32.mrb[117].mxu1 }
 0x2b4   : > { %v9744_v38 = vpop.f32.mrb[118].mxu0  ;;  %v9746_v17 = vpop.f32.mrb[118].mxu1 }
 0x2b5   : > { %10660 = vst [vmem:[#allocation75_spill] sm:$0xff] %v9744_v38  ;;  %10661 = vst [vmem:[#allocation76_spill] sm:$0xff] %v9746_v17  ;;  %v2506_v21 = vpop.f32.mrb[119].mxu0  ;;  %v3464_v45 = vpop.f32.mrb[119].mxu1  ;;  %v7974_v17 = vld [vmem:[%s8924_s10 + $0x8d0] ss:$8 sps:$4 sm:$0xff]  }
 0x2b7   : > { %4380 = vmatmul.mubr.bf16.gmra.mrb[224].mxu0 %v7967_v6  ;;  %5422 = vmatmul.mubr.bf16.gmra.mrb[224].mxu1 %v7968_v9  ;;  %v7975_v9 = vld [vmem:[%s8924_s10 + $0x644] ss:$8 sps:$4 sm:$0xff]  }
 0x2b8   : > { %6926 = vmatprep.mubr.msk.bf16.mxu0 %vm2108_vm0, %v7969_v15  ;;  %7136 = vmatprep.mubr.msk.bf16.mxu1 %vm2108_vm0, %v7971_v16  ;;  %v7977_v6 = vld [vmem:[%s8924_s10 + $0x8e4] ss:$8 sps:$4 sm:$0xff]   ;;  %v7979_v15 = vld [vmem:[%s8924_s10 + $0x640] ss:$8 sps:$4 sm:$0xff]  }
 0x2ba   : > { %v9754_v24 = vpop.f32.mrb[120].mxu0  ;;  %v9756_v31 = vpop.f32.mrb[120].mxu1 }
 0x2bb   : > { %10662 = vst [vmem:[#allocation77_spill] sm:$0xff] %v9754_v24  ;;  %10663 = vst [vmem:[#allocation78_spill] sm:$0xff] %v9756_v31  ;;  %v2511_v0 = vpop.f32.mrb[121].mxu0  ;;  %v3469_v59 = vpop.f32.mrb[121].mxu1 }
 0x2bc   : > { %v9762_v21 = vpop.f32.mrb[122].mxu0  ;;  %v9764_v45 = vpop.f32.mrb[122].mxu1 }
 0x2bd   : > { %10664 = vst [vmem:[#allocation79_spill] sm:$0xff] %v9762_v21  ;;  %10665 = vst [vmem:[#allocation80_spill] sm:$0xff] %v9764_v45  ;;  %v2514_v16 = vpop.f32.mrb[123].mxu0  ;;  %v3472_v38 = vpop.f32.mrb[123].mxu1  ;;  %v7980_v45 = vld [vmem:[%s8924_s10 + $0x8e0] ss:$8 sps:$4 sm:$0xff]  }
 0x2bf   : > { %4388 = vmatmul.mubr.bf16.gmra.mrb[228].mxu0 %v7973_v20  ;;  %5430 = vmatmul.mubr.bf16.gmra.mrb[228].mxu1 %v7974_v17  ;;  %v7981_v17 = vld [vmem:[%s8924_s10 + $0x654] ss:$8 sps:$4 sm:$0xff]  }
 0x2c0   : > { %6927 = vmatprep.mubr.msk.bf16.mxu0 %vm2108_vm0, %v7975_v9  ;;  %7137 = vmatprep.mubr.msk.bf16.mxu1 %vm2108_vm0, %v7977_v6  ;;  %v7983_v20 = vld [vmem:[%s8924_s10 + $0x8f4] ss:$8 sps:$4 sm:$0xff]   ;;  %v7985_v9 = vld [vmem:[%s8924_s10 + $0x650] ss:$8 sps:$4 sm:$0xff]  }
 0x2c2   : > { %v9772_v59 = vpop.f32.mrb[124].mxu0  ;;  %v9774_v0 = vpop.f32.mrb[124].mxu1 }
 0x2c3   : > { %10666 = vst [vmem:[#allocation81_spill] sm:$0xff] %v9772_v59  ;;  %10667 = vst [vmem:[#allocation82_spill] sm:$0xff] %v9774_v0  ;;  %v2519_v31 = vpop.f32.mrb[125].mxu0  ;;  %v3477_v24 = vpop.f32.mrb[125].mxu1 }
 0x2c4   : > { %v9780_v16 = vpop.f32.mrb[126].mxu0  ;;  %v9782_v38 = vpop.f32.mrb[126].mxu1 }
 0x2c5   : > { %10668 = vst [vmem:[#allocation83_spill] sm:$0xff] %v9780_v16  ;;  %10669 = vst [vmem:[#allocation84_spill] sm:$0xff] %v9782_v38  ;;  %v2522_v6 = vpop.f32.mrb[127].mxu0  ;;  %v3480_v21 = vpop.f32.mrb[127].mxu1  ;;  %v7986_v38 = vld [vmem:[%s8924_s10 + $0x8f0] ss:$8 sps:$4 sm:$0xff]  }
 0x2c7   : > { %4396 = vmatmul.mubr.bf16.gmra.mrb[232].mxu0 %v7979_v15  ;;  %5438 = vmatmul.mubr.bf16.gmra.mrb[232].mxu1 %v7980_v45  ;;  %v7987_v45 = vld [vmem:[%s8924_s10 + $0x664] ss:$8 sps:$4 sm:$0xff]  }
 0x2c8   : > { %6928 = vmatprep.mubr.msk.bf16.mxu0 %vm2108_vm0, %v7981_v17  ;;  %7138 = vmatprep.mubr.msk.bf16.mxu1 %vm2108_vm0, %v7983_v20  ;;  %v7989_v15 = vld [vmem:[%s8924_s10 + $0x904] ss:$8 sps:$4 sm:$0xff]   ;;  %v7991_v17 = vld [vmem:[%s8924_s10 + $0x660] ss:$8 sps:$4 sm:$0xff]  }
 0x2ca   : > { %v9790_v24 = vpop.f32.mrb[128].mxu0  ;;  %v9792_v31 = vpop.f32.mrb[128].mxu1 }
 0x2cb   : > { %10670 = vst [vmem:[#allocation85_spill] sm:$0xff] %v9790_v24  ;;  %10671 = vst [vmem:[#allocation86_spill] sm:$0xff] %v9792_v31  ;;  %v2527_v0 = vpop.f32.mrb[129].mxu0  ;;  %v3485_v59 = vpop.f32.mrb[129].mxu1 }
 0x2cc   : > { %v9798_v6 = vpop.f32.mrb[130].mxu0  ;;  %v9800_v21 = vpop.f32.mrb[130].mxu1 }
 0x2cd   : > { %10672 = vst [vmem:[#allocation87_spill] sm:$0xff] %v9798_v6  ;;  %10673 = vst [vmem:[#allocation88_spill] sm:$0xff] %v9800_v21  ;;  %v2530_v20 = vpop.f32.mrb[131].mxu0  ;;  %v3488_v16 = vpop.f32.mrb[131].mxu1  ;;  %v7992_v21 = vld [vmem:[%s8924_s10 + $0x900] ss:$8 sps:$4 sm:$0xff]  }
 0x2cf   : > { %4404 = vmatmul.mubr.bf16.gmra.mrb[236].mxu0 %v7985_v9  ;;  %5446 = vmatmul.mubr.bf16.gmra.mrb[236].mxu1 %v7986_v38  ;;  %v7993_v38 = vld [vmem:[%s8924_s10 + $0x674] ss:$8 sps:$4 sm:$0xff]  }
 0x2d0   : > { %6929 = vmatprep.mubr.msk.bf16.mxu0 %vm2108_vm0, %v7987_v45  ;;  %7139 = vmatprep.mubr.msk.bf16.mxu1 %vm2108_vm0, %v7989_v15  ;;  %v7995_v9 = vld [vmem:[%s8924_s10 + $0x914] ss:$8 sps:$4 sm:$0xff]   ;;  %v7997_v45 = vld [vmem:[%s8924_s10 + $0x670] ss:$8 sps:$4 sm:$0xff]  }
 0x2d2   : > { %v9808_v59 = vpop.f32.mrb[132].mxu0  ;;  %v9810_v0 = vpop.f32.mrb[132].mxu1 }
 0x2d3   : > { %10674 = vst [vmem:[#allocation89_spill] sm:$0xff] %v9808_v59  ;;  %10675 = vst [vmem:[#allocation90_spill] sm:$0xff] %v9810_v0  ;;  %v2535_v31 = vpop.f32.mrb[133].mxu0  ;;  %v3493_v24 = vpop.f32.mrb[133].mxu1 }
 0x2d4   : > { %v9816_v20 = vpop.f32.mrb[134].mxu0  ;;  %v9818_v16 = vpop.f32.mrb[134].mxu1 }
 0x2d5   : > { %10676 = vst [vmem:[#allocation91_spill] sm:$0xff] %v9816_v20  ;;  %10677 = vst [vmem:[#allocation92_spill] sm:$0xff] %v9818_v16  ;;  %v2538_v15 = vpop.f32.mrb[135].mxu0  ;;  %v3496_v6 = vpop.f32.mrb[135].mxu1  ;;  %v7998_v16 = vld [vmem:[%s8924_s10 + $0x910] ss:$8 sps:$4 sm:$0xff]  }
 0x2d7   : > { %4412 = vmatmul.mubr.bf16.gmra.mrb[240].mxu0 %v7991_v17  ;;  %5454 = vmatmul.mubr.bf16.gmra.mrb[240].mxu1 %v7992_v21  ;;  %v7999_v21 = vld [vmem:[%s8924_s10 + $0x684] ss:$8 sps:$4 sm:$0xff]  }
 0x2d8   : > { %6930 = vmatprep.mubr.msk.bf16.mxu0 %vm2108_vm0, %v7993_v38  ;;  %7140 = vmatprep.mubr.msk.bf16.mxu1 %vm2108_vm0, %v7995_v9  ;;  %v8001_v17 = vld [vmem:[%s8924_s10 + $0x924] ss:$8 sps:$4 sm:$0xff]   ;;  %v8003_v38 = vld [vmem:[%s8924_s10 + $0x680] ss:$8 sps:$4 sm:$0xff]  }
 0x2da   : > { %v9826_v24 = vpop.f32.mrb[136].mxu0  ;;  %v9828_v31 = vpop.f32.mrb[136].mxu1 }
 0x2db   : > { %10678 = vst [vmem:[#allocation93_spill] sm:$0xff] %v9826_v24  ;;  %10679 = vst [vmem:[#allocation94_spill] sm:$0xff] %v9828_v31  ;;  %v2543_v0 = vpop.f32.mrb[137].mxu0  ;;  %v3501_v59 = vpop.f32.mrb[137].mxu1 }
 0x2dc   : > { %v9834_v15 = vpop.f32.mrb[138].mxu0  ;;  %v9836_v6 = vpop.f32.mrb[138].mxu1 }
 0x2dd   : > { %10680 = vst [vmem:[#allocation95_spill] sm:$0xff] %v9834_v15  ;;  %10681 = vst [vmem:[#allocation96_spill] sm:$0xff] %v9836_v6  ;;  %v2546_v9 = vpop.f32.mrb[139].mxu0  ;;  %v3504_v20 = vpop.f32.mrb[139].mxu1  ;;  %v8004_v6 = vld [vmem:[%s8924_s10 + $0x920] ss:$8 sps:$4 sm:$0xff]  }
 0x2df   : > { %4420 = vmatmul.mubr.bf16.gmra.mrb[244].mxu0 %v7997_v45  ;;  %5462 = vmatmul.mubr.bf16.gmra.mrb[244].mxu1 %v7998_v16  ;;  %v8005_v16 = vld [vmem:[%s8924_s10 + $0x694] ss:$8 sps:$4 sm:$0xff]  }
 0x2e0   : > { %6931 = vmatprep.mubr.msk.bf16.mxu0 %vm2108_vm0, %v7999_v21  ;;  %7141 = vmatprep.mubr.msk.bf16.mxu1 %vm2108_vm0, %v8001_v17  ;;  %v8007_v45 = vld [vmem:[%s8924_s10 + $0x934] ss:$8 sps:$4 sm:$0xff]   ;;  %v8009_v21 = vld [vmem:[%s8924_s10 + $0x690] ss:$8 sps:$4 sm:$0xff]  }
 0x2e2   : > { %v9844_v59 = vpop.f32.mrb[140].mxu0  ;;  %v9846_v0 = vpop.f32.mrb[140].mxu1 }
 0x2e3   : > { %10682 = vst [vmem:[#allocation97_spill] sm:$0xff] %v9844_v59  ;;  %10683 = vst [vmem:[#allocation98_spill] sm:$0xff] %v9846_v0  ;;  %v2551_v31 = vpop.f32.mrb[141].mxu0  ;;  %v3509_v24 = vpop.f32.mrb[141].mxu1 }
 0x2e4   : > { %v9852_v9 = vpop.f32.mrb[142].mxu0  ;;  %v9854_v20 = vpop.f32.mrb[142].mxu1 }
 0x2e5   : > { %10684 = vst [vmem:[#allocation99_spill] sm:$0xff] %v9852_v9  ;;  %10685 = vst [vmem:[#allocation100_spill] sm:$0xff] %v9854_v20  ;;  %v2554_v17 = vpop.f32.mrb[143].mxu0  ;;  %v3512_v15 = vpop.f32.mrb[143].mxu1  ;;  %v8010_v20 = vld [vmem:[%s8924_s10 + $0x930] ss:$8 sps:$4 sm:$0xff]  }
 0x2e7   : > { %4428 = vmatmul.mubr.bf16.gmra.mrb[248].mxu0 %v8003_v38  ;;  %5470 = vmatmul.mubr.bf16.gmra.mrb[248].mxu1 %v8004_v6  ;;  %v8013_v6 = vld [vmem:[%s8924_s10 + $0x6a4] ss:$8 sps:$4 sm:$0xff]  }
 0x2e8   : > { %6932 = vmatprep.mubr.msk.bf16.mxu0 %vm2108_vm0, %v8005_v16  ;;  %7142 = vmatprep.mubr.msk.bf16.mxu1 %vm2108_vm0, %v8007_v45  ;;  %v8016_v38 = vld [vmem:[%s8924_s10 + $0x944] ss:$8 sps:$4 sm:$0xff]   ;;  %v8011_v16 = vld [vmem:[%s8924_s10 + $0x6a0] ss:$8 sps:$4 sm:$0xff]  }
 0x2ea   : > { %v9862_v24 = vpop.f32.mrb[144].mxu0  ;;  %v9864_v31 = vpop.f32.mrb[144].mxu1 }
 0x2eb   : > { %10686 = vst [vmem:[#allocation101_spill] sm:$0xff] %v9862_v24  ;;  %10687 = vst [vmem:[#allocation102_spill] sm:$0xff] %v9864_v31  ;;  %v2559_v0 = vpop.f32.mrb[145].mxu0  ;;  %v3517_v59 = vpop.f32.mrb[145].mxu1 }
 0x2ec   : > { %v9870_v17 = vpop.f32.mrb[146].mxu0  ;;  %v9872_v15 = vpop.f32.mrb[146].mxu1 }
 0x2ed   : > { %10688 = vst [vmem:[#allocation103_spill] sm:$0xff] %v9870_v17  ;;  %10689 = vst [vmem:[#allocation104_spill] sm:$0xff] %v9872_v15  ;;  %v2562_v45 = vpop.f32.mrb[147].mxu0  ;;  %v3520_v9 = vpop.f32.mrb[147].mxu1  ;;  %v8014_v15 = vld [vmem:[%s8924_s10 + $0x940] ss:$8 sps:$4 sm:$0xff]  }
 0x2ef   : > { %4436 = vmatmul.mubr.bf16.gmra.mrb[252].mxu0 %v8009_v21  ;;  %5478 = vmatmul.mubr.bf16.gmra.mrb[252].mxu1 %v8010_v20  ;;  %v8019_v20 = vld [vmem:[%s8924_s10 + $0x6b4] ss:$8 sps:$4 sm:$0xff]  }
 0x2f0   : > { %6933 = vmatprep.mubr.msk.bf16.mxu0 %vm2108_vm0, %v8013_v6  ;;  %7143 = vmatprep.mubr.msk.bf16.mxu1 %vm2108_vm0, %v8016_v38  ;;  %v8022_v21 = vld [vmem:[%s8924_s10 + $0x954] ss:$8 sps:$4 sm:$0xff]   ;;  %v8017_v6 = vld [vmem:[%s8924_s10 + $0x6b0] ss:$8 sps:$4 sm:$0xff]  }
 0x2f2   : > { %v9880_v59 = vpop.f32.mrb[148].mxu0  ;;  %v9882_v0 = vpop.f32.mrb[148].mxu1 }
 0x2f3   : > { %10690 = vst [vmem:[#allocation105_spill] sm:$0xff] %v9880_v59  ;;  %10691 = vst [vmem:[#allocation106_spill] sm:$0xff] %v9882_v0  ;;  %v2567_v31 = vpop.f32.mrb[149].mxu0  ;;  %v3525_v24 = vpop.f32.mrb[149].mxu1 }
 0x2f4   : > { %v9888_v45 = vpop.f32.mrb[150].mxu0  ;;  %v9890_v9 = vpop.f32.mrb[150].mxu1 }
 0x2f5   : > { %10692 = vst [vmem:[#allocation107_spill] sm:$0xff] %v9888_v45  ;;  %10693 = vst [vmem:[#allocation108_spill] sm:$0xff] %v9890_v9  ;;  %v2570_v38 = vpop.f32.mrb[151].mxu0  ;;  %v3528_v17 = vpop.f32.mrb[151].mxu1  ;;  %v8020_v9 = vld [vmem:[%s8924_s10 + $0x950] ss:$8 sps:$4 sm:$0xff]  }
 0x2f7   : > { %4444 = vmatmul.mubr.bf16.gmra.mrb[0].mxu0 %v8011_v16  ;;  %5486 = vmatmul.mubr.bf16.gmra.mrb[0].mxu1 %v8014_v15  ;;  %v8025_v15 = vld [vmem:[%s8924_s10 + $0x6c4] ss:$8 sps:$4 sm:$0xff]  }
 0x2f8   : > { %6934 = vmatprep.mubr.msk.bf16.mxu0 %vm2108_vm0, %v8019_v20  ;;  %7144 = vmatprep.mubr.msk.bf16.mxu1 %vm2108_vm0, %v8022_v21  ;;  %v8028_v16 = vld [vmem:[%s8924_s10 + $0x964] ss:$8 sps:$4 sm:$0xff]   ;;  %v8023_v20 = vld [vmem:[%s8924_s10 + $0x6c0] ss:$8 sps:$4 sm:$0xff]  }
 0x2fa   : > { %v9898_v24 = vpop.f32.mrb[152].mxu0  ;;  %v9900_v31 = vpop.f32.mrb[152].mxu1 }
 0x2fb   : > { %10694 = vst [vmem:[#allocation109_spill] sm:$0xff] %v9898_v24  ;;  %10695 = vst [vmem:[#allocation110_spill] sm:$0xff] %v9900_v31  ;;  %v2575_v0 = vpop.f32.mrb[153].mxu0  ;;  %v3533_v59 = vpop.f32.mrb[153].mxu1 }
 0x2fc   : > { %v9906_v38 = vpop.f32.mrb[154].mxu0  ;;  %v9908_v17 = vpop.f32.mrb[154].mxu1 }
 0x2fd   : > { %10696 = vst [vmem:[#allocation111_spill] sm:$0xff] %v9906_v38  ;;  %10697 = vst [vmem:[#allocation112_spill] sm:$0xff] %v9908_v17  ;;  %v2578_v21 = vpop.f32.mrb[155].mxu0  ;;  %v3536_v45 = vpop.f32.mrb[155].mxu1  ;;  %v8026_v17 = vld [vmem:[%s8924_s10 + $0x960] ss:$8 sps:$4 sm:$0xff]  }
 0x2ff   : > { %4452 = vmatmul.mubr.bf16.gmra.mrb[4].mxu0 %v8017_v6  ;;  %5494 = vmatmul.mubr.bf16.gmra.mrb[4].mxu1 %v8020_v9  ;;  %v8031_v9 = vld [vmem:[%s8924_s10 + $0x6d4] ss:$8 sps:$4 sm:$0xff]  }
 0x300   : > { %6935 = vmatprep.mubr.msk.bf16.mxu0 %vm2108_vm0, %v8025_v15  ;;  %7145 = vmatprep.mubr.msk.bf16.mxu1 %vm2108_vm0, %v8028_v16  ;;  %v8034_v6 = vld [vmem:[%s8924_s10 + $0x974] ss:$8 sps:$4 sm:$0xff]   ;;  %v8029_v15 = vld [vmem:[%s8924_s10 + $0x6d0] ss:$8 sps:$4 sm:$0xff]  }
 0x302   : > { %v9916_v59 = vpop.f32.mrb[156].mxu0  ;;  %v9918_v0 = vpop.f32.mrb[156].mxu1 }
 0x303   : > { %10698 = vst [vmem:[#allocation113_spill] sm:$0xff] %v9916_v59  ;;  %10699 = vst [vmem:[#allocation114_spill] sm:$0xff] %v9918_v0  ;;  %v2583_v31 = vpop.f32.mrb[157].mxu0  ;;  %v3541_v24 = vpop.f32.mrb[157].mxu1 }
 0x304   : > { %v9924_v21 = vpop.f32.mrb[158].mxu0  ;;  %v9926_v45 = vpop.f32.mrb[158].mxu1 }
 0x305   : > { %10700 = vst [vmem:[#allocation115_spill] sm:$0xff] %v9924_v21  ;;  %10701 = vst [vmem:[#allocation116_spill] sm:$0xff] %v9926_v45  ;;  %v2586_v16 = vpop.f32.mrb[159].mxu0  ;;  %v3544_v38 = vpop.f32.mrb[159].mxu1  ;;  %v8032_v45 = vld [vmem:[%s8924_s10 + $0x970] ss:$8 sps:$4 sm:$0xff]  }
 0x307   : > { %4460 = vmatmul.mubr.bf16.gmra.mrb[8].mxu0 %v8023_v20  ;;  %5502 = vmatmul.mubr.bf16.gmra.mrb[8].mxu1 %v8026_v17  ;;  %v8037_v17 = vld [vmem:[%s8924_s10 + $0x6e4] ss:$8 sps:$4 sm:$0xff]  }
 0x308   : > { %6936 = vmatprep.mubr.msk.bf16.mxu0 %vm2108_vm0, %v8031_v9  ;;  %7146 = vmatprep.mubr.msk.bf16.mxu1 %vm2108_vm0, %v8034_v6  ;;  %v8040_v20 = vld [vmem:[%s8924_s10 + $0x984] ss:$8 sps:$4 sm:$0xff]  }
 0x30a   : > { %v9934_v24 = vpop.f32.mrb[160].mxu0  ;;  %v9936_v31 = vpop.f32.mrb[160].mxu1 }
 0x30b   : > { %10702 = vst [vmem:[#allocation117_spill] sm:$0xff] %v9934_v24  ;;  %10703 = vst [vmem:[#allocation118_spill] sm:$0xff] %v9936_v31  ;;  %v2591_v0 = vpop.f32.mrb[161].mxu0  ;;  %v3549_v59 = vpop.f32.mrb[161].mxu1 }
 0x30c   : > { %v9942_v16 = vpop.f32.mrb[162].mxu0  ;;  %v9944_v38 = vpop.f32.mrb[162].mxu1 }
 0x30d   : > { %10704 = vst [vmem:[#allocation119_spill] sm:$0xff] %v9942_v16  ;;  %10705 = vst [vmem:[#allocation120_spill] sm:$0xff] %v9944_v38  ;;  %v2594_v6 = vpop.f32.mrb[163].mxu0  ;;  %v3552_v21 = vpop.f32.mrb[163].mxu1  ;;  %v8035_v38 = vld [vmem:[%s8924_s10 + $0x6e0] ss:$8 sps:$4 sm:$0xff]  }
 0x30e   : > { %v8038_v6 = vld [vmem:[%s8924_s10 + $0x980] ss:$8 sps:$4 sm:$0xff]  }
 0x30f   : > { %4468 = vmatmul.mubr.bf16.gmra.mrb[12].mxu0 %v8029_v15  ;;  %5510 = vmatmul.mubr.bf16.gmra.mrb[12].mxu1 %v8032_v45  ;;  %v8043_v45 = vld [vmem:[%s8924_s10 + $0x6f4] ss:$8 sps:$4 sm:$0xff]  }
 0x310   : > { %6937 = vmatprep.mubr.msk.bf16.mxu0 %vm2108_vm0, %v8037_v17  ;;  %7147 = vmatprep.mubr.msk.bf16.mxu1 %vm2108_vm0, %v8040_v20  ;;  %v8046_v15 = vld [vmem:[%s8924_s10 + $0x994] ss:$8 sps:$4 sm:$0xff]   ;;  %v9975_v17 = vld [vmem:[%s10464_s2] ss:$0 sm:$0xff] }
 0x312   : > { %v9952_v59 = vpop.f32.mrb[164].mxu0  ;;  %v9954_v0 = vpop.f32.mrb[164].mxu1 }
 0x313   : > { %10706 = vst [vmem:[#allocation121_spill] sm:$0xff] %v9952_v59  ;;  %10707 = vst [vmem:[#allocation122_spill] sm:$0xff] %v9954_v0  ;;  %v2599_v31 = vpop.f32.mrb[165].mxu0  ;;  %v3557_v9 = vpop.f32.mrb[165].mxu1  ;;  %v8049_v0 = vld [vmem:[%s8924_s10 + $0x704] ss:$8 sps:$4 sm:$0xff]  }
 0x314   : > { %v9960_v16 = vpop.f32.mrb[166].mxu0  ;;  %v9962_v21 = vpop.f32.mrb[166].mxu1 }
 0x315   : > { %10708 = vst [vmem:[#allocation123_spill] sm:$0xff] %v9960_v16  ;;  %10709 = vst [vmem:[#allocation124_spill] sm:$0xff] %v9962_v21  ;;  %v2602_v20 = vpop.f32.mrb[167].mxu0  ;;  %v3560_v24 = vpop.f32.mrb[167].mxu1  ;;  %v8041_v21 = vld [vmem:[%s8924_s10 + $0x6f0] ss:$8 sps:$4 sm:$0xff]  }
 0x316   : > { %v10710_v24 = vmax.f32 %v9214_v11, %v9216_v12 }
 0x317   : > { %4476 = vmatmul.mubr.bf16.gmra.mrb[16].mxu0 %v8035_v38  ;;  %5518 = vmatmul.mubr.bf16.gmra.mrb[16].mxu1 %v8038_v6  ;;  %v8044_v6 = vld [vmem:[%s8924_s10 + $0x990] ss:$8 sps:$4 sm:$0xff]  }
 0x318   : > { %6938 = vmatprep.mubr.msk.bf16.mxu0 %vm2108_vm0, %v8043_v45  ;;  %7148 = vmatprep.mubr.msk.bf16.mxu1 %vm2108_vm0, %v8046_v15  ;;  %v8052_v15 = vld [vmem:[%s8924_s10 + $0x9a4] ss:$8 sps:$4 sm:$0xff]  }
 0x31a   : > { %v4269_v31 = vpop.f32.mrb[168].mxu0  ;;  %v5311_v9 = vpop.f32.mrb[168].mxu1 }
 0x31b   : > { %v4604_v20 = vmax.f32 %v10710_v24, %v4269_v31  ;;  %v4271_v52 = vpop.f32.mrb[169].mxu0  ;;  %v5313_v38 = vpop.f32.mrb[169].mxu1  ;;  %v8050_v31 = vld [vmem:[%s8924_s10 + $0x9a0] ss:$8 sps:$4 sm:$0xff]   ;;  %v8055_v24 = vld [vmem:[%s8924_s10 + $0x714] ss:$8 sps:$4 sm:$0xff]  }
 0x31c   : > { %v4272_v16 = vpop.f32.mrb[170].mxu0  ;;  %v5314_v45 = vpop.f32.mrb[170].mxu1  ;;  %v8047_v52 = vld [vmem:[%s8924_s10 + $0x700] ss:$8 sps:$4 sm:$0xff]  }
 0x31d   : > { %v5646_v59 = vmax.f32 %v4604_v20, %v5311_v9  ;;  %v4605_v34 = vmax.f32 %v10711_v55, %v4272_v16  ;;  %v4274_v57 = vpop.f32.mrb[171].mxu0  ;;  %v5316_v2 = vpop.f32.mrb[171].mxu1  ;;  %v10712_v16 = vmax.f32 %v9232_v25, %v9234_v26  ;;  %v8058_v20 = vld [vmem:[%s8924_s10 + $0x9b4] ss:$8 sps:$4 sm:$0xff]   ;;  %v10713_v25 = vmax.f32 %v9240_v32, %v9242_v33  ;;  %v8053_v33 = vld [vmem:[%s8924_s10 + $0x710] ss:$8 sps:$4 sm:$0xff]  }
 0x31f   : > { %v5737_v11 = vadd.f32 %v9975_v17, %v5646_v59  ;;  %v5647_v12 = vmax.f32 %v4605_v34, %v5314_v45  ;;  %4484 = vmatmul.mubr.bf16.gmra.mrb[20].mxu0 %v8041_v21  ;;  %5526 = vmatmul.mubr.bf16.gmra.mrb[20].mxu1 %v8044_v6 }
 0x320   : > { %6939 = vmatprep.mubr.msk.bf16.mxu0 %vm2108_vm0, %v8049_v0  ;;  %7149 = vmatprep.mubr.msk.bf16.mxu1 %vm2108_vm0, %v8052_v15 }
 0x321   : > { %v5738_v18 = vadd.f32 %v9975_v17, %v5647_v12  ;;  %v5821_v57 = vmax.f32 %v5737_v11, 0.0 }
 0x322   : > { %v4277_v19 = vpop.f32.mrb[172].mxu0  ;;  %v5319_v55 = vpop.f32.mrb[172].mxu1 }
 0x323   : > { %v5822_v2 = vmax.f32 %v5738_v18, 0.0  ;;  %v4606_v34 = vmax.f32 %v10712_v16, %v4277_v19  ;;  %v4279_v59 = vpop.f32.mrb[173].mxu0  ;;  %v5321_v21 = vpop.f32.mrb[173].mxu1 }
 0x324   : > { %v4280_v0 = vpop.f32.mrb[174].mxu0  ;;  %v5322_v9 = vpop.f32.mrb[174].mxu1  ;;  %v8056_v59 = vld [vmem:[%s8924_s10 + $0x9b0] ss:$8 sps:$4 sm:$0xff]  }
 0x325   : > { %v7339_v38 = vpack.c.bf16 %v5822_v2, %v5821_v57  ;;  %v5648_v6 = vmax.f32 %v4606_v34, %v5319_v55  ;;  %v4607_v26 = vmax.f32 %v10713_v25, %v4280_v0  ;;  %v4282_v45 = vpop.f32.mrb[175].mxu0  ;;  %v5324_v15 = vpop.f32.mrb[175].mxu1  ;;  %v10714_v2 = vmax.f32 %v9250_v39, %v9252_v40  ;;  %v8061_v0 = vld [vmem:[%s8924_s10 + $0x724] ss:$8 sps:$4 sm:$0xff]  }
 0x327   : > { %7340 = vst [vmem:[%s10000_s9] sm:$0xff] %v7339_v38   ;;  %v5739_v11 = vadd.f32 %v9975_v17, %v5648_v6  ;;  %v5649_v12 = vmax.f32 %v4607_v26, %v5322_v9  ;;  %4492 = vmatmul.mubr.bf16.gmra.mrb[24].mxu0 %v8047_v52  ;;  %5534 = vmatmul.mubr.bf16.gmra.mrb[24].mxu1 %v8050_v31  ;;  %v8064_v9 = vld [vmem:[%s8924_s10 + $0x9c4] ss:$8 sps:$4 sm:$0xff]  }
 0x328   : > { %6940 = vmatprep.mubr.msk.bf16.mxu0 %vm2108_vm0, %v8055_v24  ;;  %7150 = vmatprep.mubr.msk.bf16.mxu1 %vm2108_vm0, %v8058_v20  ;;  %v10715_v38 = vmax.f32 %v9258_v46, %v9260_v47  ;;  %v8059_v47 = vld [vmem:[%s8924_s10 + $0x720] ss:$8 sps:$4 sm:$0xff]  }
 0x329   : > { %v5740_v18 = vadd.f32 %v9975_v17, %v5649_v12  ;;  %v5823_v55 = vmax.f32 %v5739_v11, 0.0 }
 0x32a   : > { %v4285_v19 = vpop.f32.mrb[176].mxu0  ;;  %v5327_v32 = vpop.f32.mrb[176].mxu1 }
 0x32b   : > { %v5824_v57 = vmax.f32 %v5740_v18, 0.0  ;;  %v4608_v16 = vmax.f32 %v10714_v2, %v4285_v19  ;;  %v4287_v52 = vpop.f32.mrb[177].mxu0  ;;  %v5329_v34 = vpop.f32.mrb[177].mxu1  ;;  %v10716_v18 = vmax.f32 %v9268_v53, %v9270_v54 }
 0x32c   : > { %v4288_v21 = vpop.f32.mrb[178].mxu0  ;;  %v5330_v31 = vpop.f32.mrb[178].mxu1  ;;  %v8070_v52 = vld [vmem:[%s8924_s10 + $0x9d4] ss:$8 sps:$4 sm:$0xff]  }
 0x32d   : > { %v7344_v24 = vpack.c.bf16 %v5824_v57, %v5823_v55  ;;  %v5650_v20 = vmax.f32 %v4608_v16, %v5327_v32  ;;  %v4609_v6 = vmax.f32 %v10715_v38, %v4288_v21  ;;  %v4290_v25 = vpop.f32.mrb[179].mxu0  ;;  %v5332_v26 = vpop.f32.mrb[179].mxu1  ;;  %v8062_v55 = vld [vmem:[%s8924_s10 + $0x9c0] ss:$8 sps:$4 sm:$0xff]   ;;  %v8067_v16 = vld [vmem:[%s8924_s10 + $0x734] ss:$8 sps:$4 sm:$0xff]   ;;  %v10717_v21 = vmax.f32 %v9276_v60, %v9278_v61 }
 0x32e   : > { %v8065_v61 = vld [vmem:[%s8924_s10 + $0x730] ss:$8 sps:$4 sm:$0xff]   ;;  %v10718_v25 = vmax.f32 %v9286_v3, %v9288_v4 }
 0x32f   : > { %7547 = vst [vmem:[%s10000_s9 + $0x8] sm:$0xff] %v7344_v24   ;;  %v5741_v39 = vadd.f32 %v9975_v17, %v5650_v20  ;;  %v5651_v40 = vmax.f32 %v4609_v6, %v5330_v31  ;;  %4500 = vmatmul.mubr.bf16.gmra.mrb[28].mxu0 %v8053_v33  ;;  %5542 = vmatmul.mubr.bf16.gmra.mrb[28].mxu1 %v8056_v59 }
 0x330   : > { %6941 = vmatprep.mubr.msk.bf16.mxu0 %vm2108_vm0, %v8061_v0  ;;  %7151 = vmatprep.mubr.msk.bf16.mxu1 %vm2108_vm0, %v8064_v9 }
 0x331   : > { %v5742_v45 = vadd.f32 %v9975_v17, %v5651_v40  ;;  %v5825_v11 = vmax.f32 %v5741_v39, 0.0 }
 0x332   : > { %v4293_v15 = vpop.f32.mrb[180].mxu0  ;;  %v5335_v46 = vpop.f32.mrb[180].mxu1 }
 0x333   : > { %v5826_v12 = vmax.f32 %v5742_v45, 0.0  ;;  %v4610_v19 = vmax.f32 %v10716_v18, %v4293_v15  ;;  %v4295_v32 = vpop.f32.mrb[181].mxu0  ;;  %v5337_v33 = vpop.f32.mrb[181].mxu1  ;;  %v8068_v45 = vld [vmem:[%s8924_s10 + $0x9d0] ss:$8 sps:$4 sm:$0xff]  }
 0x334   : > { %v4296_v57 = vpop.f32.mrb[182].mxu0  ;;  %v5338_v2 = vpop.f32.mrb[182].mxu1 }
 0x335   : > { %v7349_v34 = vpack.c.bf16 %v5826_v12, %v5825_v11  ;;  %v5652_v59 = vmax.f32 %v4610_v19, %v5335_v46  ;;  %v4611_v31 = vmax.f32 %v10717_v21, %v4296_v57  ;;  %v4298_v0 = vpop.f32.mrb[183].mxu0  ;;  %v5340_v9 = vpop.f32.mrb[183].mxu1  ;;  %v8076_v11 = vld [vmem:[%s8924_s10 + $0x9e4] ss:$8 sps:$4 sm:$0xff]   ;;  %v10719_v19 = vmax.f32 %v9294_v10, %v9296_v13  ;;  %v8071_v13 = vld [vmem:[%s8924_s10 + $0x740] ss:$8 sps:$4 sm:$0xff]  }
 0x336   : > { %v8074_v0 = vld [vmem:[%s8924_s10 + $0x9e0] ss:$8 sps:$4 sm:$0xff]  }
 0x337   : > { %7548 = vst [vmem:[%s10000_s9 + $0x10] sm:$0xff] %v7349_v34   ;;  %v5743_v53 = vadd.f32 %v9975_v17, %v5652_v59  ;;  %v5653_v54 = vmax.f32 %v4611_v31, %v5338_v2  ;;  %4508 = vmatmul.mubr.bf16.gmra.mrb[32].mxu0 %v8059_v47  ;;  %5550 = vmatmul.mubr.bf16.gmra.mrb[32].mxu1 %v8062_v55  ;;  %v8073_v47 = vld [vmem:[%s8924_s10 + $0x744] ss:$8 sps:$4 sm:$0xff]  }
 0x338   : > { %6942 = vmatprep.mubr.msk.bf16.mxu0 %vm2108_vm0, %v8067_v16  ;;  %7152 = vmatprep.mubr.msk.bf16.mxu1 %vm2108_vm0, %v8070_v52  ;;  %v10720_v34 = vmax.f32 %v9304_v22, %v9306_v23 }
 0x339   : > { %v5744_v24 = vadd.f32 %v9975_v17, %v5653_v54  ;;  %v5827_v38 = vmax.f32 %v5743_v53, 0.0  ;;  %v8079_v54 = vld [vmem:[%s8924_s10 + $0x754] ss:$8 sps:$4 sm:$0xff]  }
 0x33a   : > { %v4301_v20 = vpop.f32.mrb[184].mxu0  ;;  %v5343_v60 = vpop.f32.mrb[184].mxu1 }
 0x33b   : > { %v5828_v6 = vmax.f32 %v5744_v24, 0.0  ;;  %v4612_v26 = vmax.f32 %v10718_v25, %v4301_v20  ;;  %v4303_v39 = vpop.f32.mrb[185].mxu0  ;;  %v5345_v40 = vpop.f32.mrb[185].mxu1  ;;  %v8082_v24 = vld [vmem:[%s8924_s10 + $0x9f4] ss:$8 sps:$4 sm:$0xff]  }
 0x33c   : > { %v4304_v15 = vpop.f32.mrb[186].mxu0  ;;  %v5346_v46 = vpop.f32.mrb[186].mxu1 }
 0x33d   : > { %v7354_v12 = vpack.c.bf16 %v5828_v6, %v5827_v38  ;;  %v5654_v18 = vmax.f32 %v4612_v26, %v5343_v60  ;;  %v4613_v32 = vmax.f32 %v10719_v19, %v4304_v15  ;;  %v4306_v33 = vpop.f32.mrb[187].mxu0  ;;  %v5348_v55 = vpop.f32.mrb[187].mxu1  ;;  %v10722_v15 = vmax.f32 %v9322_v48, %v9324_v49 }
 0x33e   : > { %v8088_v33 = vld [vmem:[%s8924_s10 + $0xa04] ss:$8 sps:$4 sm:$0xff]  }
 0x33f   : > { %7549 = vst [vmem:[%s10000_s9 + $0x18] sm:$0xff] %v7354_v12   ;;  %v5745_v3 = vadd.f32 %v9975_v17, %v5654_v18  ;;  %v5655_v4 = vmax.f32 %v4613_v32, %v5346_v46  ;;  %4516 = vmatmul.mubr.bf16.gmra.mrb[36].mxu0 %v8065_v61  ;;  %5558 = vmatmul.mubr.bf16.gmra.mrb[36].mxu1 %v8068_v45  ;;  %v8080_v12 = vld [vmem:[%s8924_s10 + $0x9f0] ss:$8 sps:$4 sm:$0xff]   ;;  %v8085_v32 = vld [vmem:[%s8924_s10 + $0x764] ss:$8 sps:$4 sm:$0xff]  }
 0x340   : > { %6943 = vmatprep.mubr.msk.bf16.mxu0 %vm2108_vm0, %v8073_v47  ;;  %7153 = vmatprep.mubr.msk.bf16.mxu1 %vm2108_vm0, %v8076_v11  ;;  %v10721_v61 = vmax.f32 %v9312_v35, %v9314_v36  ;;  %v8077_v36 = vld [vmem:[%s8924_s10 + $0x750] ss:$8 sps:$4 sm:$0xff]  }
 0x341   : > { %v5746_v57 = vadd.f32 %v9975_v17, %v5655_v4  ;;  %v5829_v16 = vmax.f32 %v5745_v3, 0.0  ;;  %v10723_v4 = vmax.f32 %v9330_v58, %v9332_v62  ;;  %v8083_v62 = vld [vmem:[%s8924_s10 + $0x760] ss:$8 sps:$4 sm:$0xff]  }
 0x342   : > { %v4309_v2 = vpop.f32.mrb[188].mxu0  ;;  %v5351_v10 = vpop.f32.mrb[188].mxu1 }
 0x343   : > { %v5830_v52 = vmax.f32 %v5746_v57, 0.0  ;;  %v4614_v59 = vmax.f32 %v10720_v34, %v4309_v2  ;;  %v4311_v21 = vpop.f32.mrb[189].mxu0  ;;  %v5353_v31 = vpop.f32.mrb[189].mxu1 }
 0x344   : > { %v4312_v9 = vpop.f32.mrb[190].mxu0  ;;  %v5354_v53 = vpop.f32.mrb[190].mxu1 }
 0x345   : > { %v7359_v20 = vpack.c.bf16 %v5830_v52, %v5829_v16  ;;  %v5656_v60 = vmax.f32 %v4614_v59, %v5351_v10  ;;  %v4615_v38 = vmax.f32 %v10721_v61, %v4312_v9  ;;  %v4314_v6 = vpop.f32.mrb[191].mxu0  ;;  %v5356_v25 = vpop.f32.mrb[191].mxu1  ;;  %v10724_v59 = vmax.f32 %v9340_v7, %v9342_v8  ;;  %v8086_v9 = vld [vmem:[%s8924_s10 + $0xa00] ss:$8 sps:$4 sm:$0xff]  }
 0x347   : > { %7550 = vst [vmem:[%s10000_s9 + $0x20] sm:$0xff] %v7359_v20   ;;  %v5747_v22 = vadd.f32 %v9975_v17, %v5656_v60  ;;  %v5657_v23 = vmax.f32 %v4615_v38, %v5354_v53  ;;  %4524 = vmatmul.mubr.bf16.gmra.mrb[40].mxu0 %v8071_v13  ;;  %5566 = vmatmul.mubr.bf16.gmra.mrb[40].mxu1 %v8074_v0  ;;  %v8094_v20 = vld [vmem:[%s8924_s10 + $0xa14] ss:$8 sps:$4 sm:$0xff]  }
 0x348   : > { %6944 = vmatprep.mubr.msk.bf16.mxu0 %vm2108_vm0, %v8079_v54  ;;  %7154 = vmatprep.mubr.msk.bf16.mxu1 %vm2108_vm0, %v8082_v24  ;;  %v8091_v24 = vld [vmem:[%s8924_s10 + $0x774] ss:$8 sps:$4 sm:$0xff]   ;;  %v10725_v38 = vmax.f32 %v9348_v28, %v9350_v29  ;;  %v8089_v29 = vld [vmem:[%s8924_s10 + $0x770] ss:$8 sps:$4 sm:$0xff]  }
 0x349   : > { %v5748_v26 = vadd.f32 %v9975_v17, %v5657_v23  ;;  %v5831_v40 = vmax.f32 %v5747_v22, 0.0 }
 0x34a   : > { %v4317_v39 = vpop.f32.mrb[192].mxu0  ;;  %v5359_v35 = vpop.f32.mrb[192].mxu1 }
 0x34b   : > { %v5832_v45 = vmax.f32 %v5748_v26, 0.0  ;;  %v4616_v46 = vmax.f32 %v10722_v15, %v4317_v39  ;;  %v4319_v47 = vpop.f32.mrb[193].mxu0  ;;  %v5361_v11 = vpop.f32.mrb[193].mxu1 }
 0x34c   : > { %v4320_v18 = vpop.f32.mrb[194].mxu0  ;;  %v5362_v19 = vpop.f32.mrb[194].mxu1 }
 0x34d   : > { %v7364_v55 = vpack.c.bf16 %v5832_v45, %v5831_v40  ;;  %v5658_v3 = vmax.f32 %v4616_v46, %v5359_v35  ;;  %v4617_v57 = vmax.f32 %v10723_v4, %v4320_v18  ;;  %v4322_v2 = vpop.f32.mrb[195].mxu0  ;;  %v5364_v10 = vpop.f32.mrb[195].mxu1  ;;  %v8092_v46 = vld [vmem:[%s8924_s10 + $0xa10] ss:$8 sps:$4 sm:$0xff]   ;;  %v8100_v18 = vld [vmem:[%s8924_s10 + $0xa24] ss:$8 sps:$4 sm:$0xff]  }
 0x34f   : > { %7551 = vst [vmem:[%s10000_s9 + $0x28] sm:$0xff] %v7364_v55   ;;  %v5749_v48 = vadd.f32 %v9975_v17, %v5658_v3  ;;  %v5659_v49 = vmax.f32 %v4617_v57, %v5362_v19  ;;  %4532 = vmatmul.mubr.bf16.gmra.mrb[44].mxu0 %v8077_v36  ;;  %5574 = vmatmul.mubr.bf16.gmra.mrb[44].mxu1 %v8080_v12  ;;  %v8097_v12 = vld [vmem:[%s8924_s10 + $0x784] ss:$8 sps:$4 sm:$0xff]  }
 0x350   : > { %6945 = vmatprep.mubr.msk.bf16.mxu0 %vm2108_vm0, %v8085_v32  ;;  %7155 = vmatprep.mubr.msk.bf16.mxu1 %vm2108_vm0, %v8088_v33  ;;  %v10726_v36 = vmax.f32 %v9358_v50, %v9360_v51  ;;  %v10727_v33 = vmax.f32 %v9366_v5, %v9368_v14  ;;  %v8095_v14 = vld [vmem:[%s8924_s10 + $0x780] ss:$8 sps:$4 sm:$0xff]  }
 0x351   : > { %v5750_v13 = vadd.f32 %v9975_v17, %v5659_v49  ;;  %v5833_v52 = vmax.f32 %v5749_v48, 0.0  ;;  %v10728_v49 = vmax.f32 %v9376_v41, %v9378_v42 }
 0x352   : > { %v4325_v16 = vpop.f32.mrb[196].mxu0  ;;  %v5367_v58 = vpop.f32.mrb[196].mxu1 }
 0x353   : > { %v5834_v34 = vmax.f32 %v5750_v13, 0.0  ;;  %v4618_v21 = vmax.f32 %v10724_v59, %v4325_v16  ;;  %v4327_v31 = vpop.f32.mrb[197].mxu0  ;;  %v5369_v0 = vpop.f32.mrb[197].mxu1  ;;  %v8103_v59 = vld [vmem:[%s8924_s10 + $0x794] ss:$8 sps:$4 sm:$0xff]  }
 0x354   : > { %v4328_v53 = vpop.f32.mrb[198].mxu0  ;;  %v5370_v54 = vpop.f32.mrb[198].mxu1 }
 0x355   : > { %v7369_v60 = vpack.c.bf16 %v5834_v34, %v5833_v52  ;;  %v5660_v61 = vmax.f32 %v4618_v21, %v5367_v58  ;;  %v4619_v6 = vmax.f32 %v10725_v38, %v4328_v53  ;;  %v4330_v25 = vpop.f32.mrb[199].mxu0  ;;  %v5372_v22 = vpop.f32.mrb[199].mxu1  ;;  %v8106_v21 = vld [vmem:[%s8924_s10 + $0xa34] ss:$8 sps:$4 sm:$0xff]  }
 0x357   : > { %7552 = vst [vmem:[%s10000_s9 + $0x30] sm:$0xff] %v7369_v60   ;;  %v5751_v7 = vadd.f32 %v9975_v17, %v5660_v61  ;;  %v5661_v8 = vmax.f32 %v4619_v6, %v5370_v54  ;;  %4540 = vmatmul.mubr.bf16.gmra.mrb[48].mxu0 %v8083_v62  ;;  %5582 = vmatmul.mubr.bf16.gmra.mrb[48].mxu1 %v8086_v9  ;;  %v8098_v62 = vld [vmem:[%s8924_s10 + $0xa20] ss:$8 sps:$4 sm:$0xff]  }
 0x358   : > { %6946 = vmatprep.mubr.msk.bf16.mxu0 %vm2108_vm0, %v8091_v24  ;;  %7156 = vmatprep.mubr.msk.bf16.mxu1 %vm2108_vm0, %v8094_v20  ;;  %v10729_v9 = vmax.f32 %v9384_v43, %v9386_v63  ;;  %v8101_v63 = vld [vmem:[%s8924_s10 + $0x790] ss:$8 sps:$4 sm:$0xff]   ;;  %v10730_v6 = vmax.f32 %v9394_v56, %v9396_v30 }
 0x359   : > { %v5752_v23 = vadd.f32 %v9975_v17, %v5661_v8  ;;  %v5835_v39 = vmax.f32 %v5751_v7, 0.0  ;;  %v8104_v8 = vld [vmem:[%s8924_s10 + $0xa30] ss:$8 sps:$4 sm:$0xff]  }
 0x35a   : > { %v4333_v26 = vpop.f32.mrb[200].mxu0  ;;  %v5375_v28 = vpop.f32.mrb[200].mxu1 }
 0x35b   : > { %v5836_v35 = vmax.f32 %v5752_v23, 0.0  ;;  %v4620_v40 = vmax.f32 %v10726_v36, %v4333_v26  ;;  %v4335_v45 = vpop.f32.mrb[201].mxu0  ;;  %v5377_v15 = vpop.f32.mrb[201].mxu1  ;;  %v10731_v36 = vmax.f32 %v9402_v44, %v9404_v1  ;;  %v8107_v1 = vld [vmem:[%s8924_s10 + $0x7a0] ss:$8 sps:$4 sm:$0xff]  }
 0x35c   : > { %v4336_v47 = vpop.f32.mrb[202].mxu0  ;;  %v5378_v11 = vpop.f32.mrb[202].mxu1 }
 0x35d   : > { %v7374_v19 = vpack.c.bf16 %v5836_v35, %v5835_v39  ;;  %v5662_v32 = vmax.f32 %v4620_v40, %v5375_v28  ;;  %v4621_v55 = vmax.f32 %v10727_v33, %v4336_v47  ;;  %v4338_v3 = vpop.f32.mrb[203].mxu0  ;;  %v5380_v4 = vpop.f32.mrb[203].mxu1  ;;  %v8109_v28 = vld [vmem:[%s8924_s10 + $0x7a4] ss:$8 sps:$4 sm:$0xff]  }
 0x35f   : > { %7553 = vst [vmem:[%s10000_s9 + $0x38] sm:$0xff] %v7374_v19   ;;  %v5753_v50 = vadd.f32 %v9975_v17, %v5662_v32  ;;  %v5663_v51 = vmax.f32 %v4621_v55, %v5378_v11  ;;  %4548 = vmatmul.mubr.bf16.gmra.mrb[52].mxu0 %v8089_v29  ;;  %5590 = vmatmul.mubr.bf16.gmra.mrb[52].mxu1 %v8092_v46  ;;  %v8112_v29 = vld [vmem:[%s8924_s10 + $0xa44] ss:$8 sps:$4 sm:$0xff]   ;;  %v8110_v55 = vld [vmem:[%s8924_s10 + $0xa40] ss:$8 sps:$4 sm:$0xff]  }
 0x360   : > { %6947 = vmatprep.mubr.msk.bf16.mxu0 %vm2108_vm0, %v8097_v12  ;;  %7157 = vmatprep.mubr.msk.bf16.mxu1 %vm2108_vm0, %v8100_v18  ;;  %v10732_v18 = vmax.f32 %v9412_v27, %v9414_v37 }
 0x361   : > { %v5754_v57 = vadd.f32 %v9975_v17, %v5663_v51  ;;  %v5837_v10 = vmax.f32 %v5753_v50, 0.0  ;;  %v8115_v50 = vld [vmem:[%s8924_s10 + $0x7b4] ss:$8 sps:$4 sm:$0xff]  }
 0x362   : > { %v4341_v2 = vpop.f32.mrb[204].mxu0  ;;  %v5383_v5 = vpop.f32.mrb[204].mxu1  ;;  %v8118_v51 = vld [vmem:[%s8924_s10 + $0xa54] ss:$8 sps:$4 sm:$0xff]  }
 0x363   : > { %v5838_v48 = vmax.f32 %v5754_v57, 0.0  ;;  %v4622_v13 = vmax.f32 %v10728_v49, %v4341_v2  ;;  %v4343_v16 = vpop.f32.mrb[205].mxu0  ;;  %v5385_v58 = vpop.f32.mrb[205].mxu1 }
 0x364   : > { %v4344_v52 = vpop.f32.mrb[206].mxu0  ;;  %v5386_v34 = vpop.f32.mrb[206].mxu1 }
 0x365   : > { %v7379_v31 = vpack.c.bf16 %v5838_v48, %v5837_v10  ;;  %v5664_v0 = vmax.f32 %v4622_v13, %v5383_v5  ;;  %v4623_v53 = vmax.f32 %v10729_v9, %v4344_v52  ;;  %v4346_v54 = vpop.f32.mrb[207].mxu0  ;;  %v5388_v24 = vpop.f32.mrb[207].mxu1  ;;  %v10733_v5 = vld [vmem:[#allocation3_spill] sm:$0xff]  ;;  %v8113_v52 = vld [vmem:[%s8924_s10 + $0x7b0] ss:$8 sps:$4 sm:$0xff]  }
 0x366   : > { %v8116_v24 = vld [vmem:[%s8924_s10 + $0xa50] ss:$8 sps:$4 sm:$0xff]  }
 0x367   : > { %7554 = vst [vmem:[%s10000_s9 + $0x40] sm:$0xff] %v7379_v31   ;;  %v5755_v41 = vadd.f32 %v9975_v17, %v5664_v0  ;;  %v5665_v42 = vmax.f32 %v4623_v53, %v5386_v34  ;;  %4556 = vmatmul.mubr.bf16.gmra.mrb[56].mxu0 %v8095_v14  ;;  %5598 = vmatmul.mubr.bf16.gmra.mrb[56].mxu1 %v8098_v62  ;;  %v10734_v14 = vld [vmem:[#allocation4_spill] sm:$0xff]  ;;  %v10737_v31 = vld [vmem:[#allocation6_spill] sm:$0xff] }
 0x368   : > { %6948 = vmatprep.mubr.msk.bf16.mxu0 %vm2108_vm0, %v8103_v59  ;;  %7158 = vmatprep.mubr.msk.bf16.mxu1 %vm2108_vm0, %v8106_v21  ;;  %v10735_v10 = vmax.f32 %v10733_v5, %v10734_v14  ;;  %v10736_v21 = vld [vmem:[#allocation5_spill] sm:$0xff] }
 0x369   : > { %v5756_v20 = vadd.f32 %v9975_v17, %v5665_v42  ;;  %v5839_v61 = vmax.f32 %v5755_v41, 0.0  ;;  %v10738_v0 = vmax.f32 %v10736_v21, %v10737_v31 }
 0x36a   : > { %v4349_v60 = vpop.f32.mrb[208].mxu0  ;;  %v5391_v43 = vpop.f32.mrb[208].mxu1 }
 0x36b   : > { %v5840_v38 = vmax.f32 %v5756_v20, 0.0  ;;  %v4624_v25 = vmax.f32 %v10730_v6, %v4349_v60  ;;  %v4351_v22 = vpop.f32.mrb[209].mxu0  ;;  %v5393_v7 = vpop.f32.mrb[209].mxu1  ;;  %v8121_v20 = vld [vmem:[%s8924_s10 + $0x7c4] ss:$8 sps:$4 sm:$0xff]  }
 0x36c   : > { %v4352_v23 = vpop.f32.mrb[210].mxu0  ;;  %v5394_v26 = vpop.f32.mrb[210].mxu1  ;;  %v8124_v60 = vld [vmem:[%s8924_s10 + $0xa64] ss:$8 sps:$4 sm:$0xff]  }
 0x36d   : > { %v7384_v39 = vpack.c.bf16 %v5840_v38, %v5839_v61  ;;  %v5666_v35 = vmax.f32 %v4624_v25, %v5391_v43  ;;  %v4625_v40 = vmax.f32 %v10731_v36, %v4352_v23  ;;  %v4354_v45 = vpop.f32.mrb[211].mxu0  ;;  %v5396_v15 = vpop.f32.mrb[211].mxu1  ;;  %v10739_v61 = vld [vmem:[#allocation7_spill] sm:$0xff]  ;;  %v10740_v38 = vld [vmem:[#allocation8_spill] sm:$0xff] }
 0x36e   : > { %v10741_v6 = vmax.f32 %v10739_v61, %v10740_v38  ;;  %v10743_v45 = vld [vmem:[#allocation10_spill] sm:$0xff] }
 0x36f   : > { %7555 = vst [vmem:[%s10000_s9 + $0x48] sm:$0xff] %v7384_v39   ;;  %v5757_v30 = vadd.f32 %v9975_v17, %v5666_v35  ;;  %v5667_v56 = vmax.f32 %v4625_v40, %v5394_v26  ;;  %4564 = vmatmul.mubr.bf16.gmra.mrb[60].mxu0 %v8101_v63  ;;  %5606 = vmatmul.mubr.bf16.gmra.mrb[60].mxu1 %v8104_v8  ;;  %v8119_v39 = vld [vmem:[%s8924_s10 + $0x7c0] ss:$8 sps:$4 sm:$0xff]   ;;  %v10742_v40 = vld [vmem:[#allocation9_spill] sm:$0xff] }
 0x370   : > { %6949 = vmatprep.mubr.msk.bf16.mxu0 %vm2108_vm0, %v8109_v28  ;;  %7159 = vmatprep.mubr.msk.bf16.mxu1 %vm2108_vm0, %v8112_v29  ;;  %v10744_v15 = vmax.f32 %v10742_v40, %v10743_v45 }
 0x371   : > { %v5758_v46 = vadd.f32 %v9975_v17, %v5667_v56  ;;  %v5841_v11 = vmax.f32 %v5757_v30, 0.0 }
 0x372   : > { %v4357_v47 = vpop.f32.mrb[212].mxu0  ;;  %v5399_v44 = vpop.f32.mrb[212].mxu1 }
 0x373   : > { %v5842_v12 = vmax.f32 %v5758_v46, 0.0  ;;  %v4626_v19 = vmax.f32 %v10732_v18, %v4357_v47  ;;  %v4359_v32 = vpop.f32.mrb[213].mxu0  ;;  %v5401_v33 = vpop.f32.mrb[213].mxu1  ;;  %v8122_v47 = vld [vmem:[%s8924_s10 + $0xa60] ss:$8 sps:$4 sm:$0xff]  }
 0x374   : > { %v4360_v3 = vpop.f32.mrb[214].mxu0  ;;  %v5402_v4 = vpop.f32.mrb[214].mxu1  ;;  %v10745_v32 = vld [vmem:[#allocation11_spill] sm:$0xff]  ;;  %v10746_v33 = vld [vmem:[#allocation12_spill] sm:$0xff] }
 0x375   : > { %v7389_v57 = vpack.c.bf16 %v5842_v12, %v5841_v11  ;;  %v5668_v2 = vmax.f32 %v4626_v19, %v5399_v44  ;;  %v4627_v48 = vmax.f32 %v10735_v10, %v4360_v3  ;;  %v4362_v49 = vpop.f32.mrb[215].mxu0  ;;  %v5404_v13 = vpop.f32.mrb[215].mxu1  ;;  %v8127_v11 = vld [vmem:[%s8924_s10 + $0x7d4] ss:$8 sps:$4 sm:$0xff]   ;;  %v8125_v10 = vld [vmem:[%s8924_s10 + $0x7d0] ss:$8 sps:$4 sm:$0xff]  }
 0x376   : > { %v8130_v12 = vld [vmem:[%s8924_s10 + $0xa74] ss:$8 sps:$4 sm:$0xff]  }
 0x377   : > { %7556 = vst [vmem:[%s10000_s9 + $0x50] sm:$0xff] %v7389_v57   ;;  %v5759_v37 = vadd.f32 %v9975_v17, %v5668_v2  ;;  %v5669_v27 = vmax.f32 %v4627_v48, %v5402_v4  ;;  %4572 = vmatmul.mubr.bf16.gmra.mrb[64].mxu0 %v8107_v1  ;;  %5614 = vmatmul.mubr.bf16.gmra.mrb[64].mxu1 %v8110_v55  ;;  %v10748_v13 = vld [vmem:[#allocation13_spill] sm:$0xff] }
 0x378   : > { %6950 = vmatprep.mubr.msk.bf16.mxu0 %vm2108_vm0, %v8115_v50  ;;  %7160 = vmatprep.mubr.msk.bf16.mxu1 %vm2108_vm0, %v8118_v51  ;;  %v10747_v55 = vmax.f32 %v10745_v32, %v10746_v33 }
 0x379   : > { %v5760_v16 = vadd.f32 %v9975_v17, %v5669_v27  ;;  %v5843_v34 = vmax.f32 %v5759_v37, 0.0  ;;  %v10749_v37 = vld [vmem:[#allocation14_spill] sm:$0xff] }
 0x37a   : > { %v4365_v58 = vpop.f32.mrb[216].mxu0  ;;  %v5407_v62 = vpop.f32.mrb[216].mxu1  ;;  %v10750_v27 = vmax.f32 %v10748_v13, %v10749_v37 }
 0x37b   : > { %v5844_v59 = vmax.f32 %v5760_v16, 0.0  ;;  %v4628_v9 = vmax.f32 %v10738_v0, %v4365_v58  ;;  %v4367_v53 = vpop.f32.mrb[217].mxu0  ;;  %v5409_v54 = vpop.f32.mrb[217].mxu1  ;;  %v10751_v0 = vld [vmem:[#allocation15_spill] sm:$0xff] }
 0x37c   : > { %v4368_v41 = vpop.f32.mrb[218].mxu0  ;;  %v5410_v42 = vpop.f32.mrb[218].mxu1 }
 0x37d   : > { %v7394_v43 = vpack.c.bf16 %v5844_v59, %v5843_v34  ;;  %v5670_v63 = vmax.f32 %v4628_v9, %v5407_v62  ;;  %v4629_v25 = vmax.f32 %v10741_v6, %v4368_v41  ;;  %v4370_v22 = vpop.f32.mrb[219].mxu0  ;;  %v5412_v7 = vpop.f32.mrb[219].mxu1  ;;  %v10752_v9 = vld [vmem:[#allocation16_spill] sm:$0xff]  ;;  %v10754_v6 = vld [vmem:[#allocation17_spill] sm:$0xff] }
 0x37e   : > { %v10753_v53 = vmax.f32 %v10751_v0, %v10752_v9 }
 0x37f   : > { %7557 = vst [vmem:[%s10000_s9 + $0x58] sm:$0xff] %v7394_v43   ;;  %v5761_v8 = vadd.f32 %v9975_v17, %v5670_v63  ;;  %v5671_v23 = vmax.f32 %v4629_v25, %v5410_v42  ;;  %4580 = vmatmul.mubr.bf16.gmra.mrb[68].mxu0 %v8113_v52  ;;  %5622 = vmatmul.mubr.bf16.gmra.mrb[68].mxu1 %v8116_v24  ;;  %v8128_v52 = vld [vmem:[%s8924_s10 + $0xa70] ss:$8 sps:$4 sm:$0xff]  }
 0x380   : > { %6951 = vmatprep.mubr.msk.bf16.mxu0 %vm2108_vm0, %v8121_v20  ;;  %7161 = vmatprep.mubr.msk.bf16.mxu1 %vm2108_vm0, %v8124_v60  ;;  %v10755_v25 = vld [vmem:[#allocation18_spill] sm:$0xff] }
 0x381   : > { %v5762_v26 = vadd.f32 %v9975_v17, %v5671_v23  ;;  %v5845_v35 = vmax.f32 %v5761_v8, 0.0  ;;  %v10756_v22 = vmax.f32 %v10754_v6, %v10755_v25 }
 0x382   : > { %v4373_v28 = vpop.f32.mrb[220].mxu0  ;;  %v5415_v29 = vpop.f32.mrb[220].mxu1 }
 0x383   : > { %v5846_v36 = vmax.f32 %v5762_v26, 0.0  ;;  %v4630_v30 = vmax.f32 %v10744_v15, %v4373_v28  ;;  %v4375_v56 = vpop.f32.mrb[221].mxu0  ;;  %v5417_v46 = vpop.f32.mrb[221].mxu1 }
 0x384   : > { %v4376_v44 = vpop.f32.mrb[222].mxu0  ;;  %v5418_v1 = vpop.f32.mrb[222].mxu1 }
 0x385   : > { %v7399_v18 = vpack.c.bf16 %v5846_v36, %v5845_v35  ;;  %v5672_v19 = vmax.f32 %v4630_v30, %v5415_v29  ;;  %v4631_v3 = vmax.f32 %v10747_v55, %v4376_v44  ;;  %v4378_v4 = vpop.f32.mrb[223].mxu0  ;;  %v5420_v50 = vpop.f32.mrb[223].mxu1  ;;  %v10757_v35 = vld [vmem:[#allocation19_spill] sm:$0xff]  ;;  %v10758_v36 = vld [vmem:[#allocation20_spill] sm:$0xff] }
 0x386   : > { %v10759_v40 = vmax.f32 %v10757_v35, %v10758_v36 }
 0x387   : > { %7558 = vst [vmem:[%s10000_s9 + $0x60] sm:$0xff] %v7399_v18   ;;  %v5763_v51 = vadd.f32 %v9975_v17, %v5672_v19  ;;  %v5673_v57 = vmax.f32 %v4631_v3, %v5418_v1  ;;  %4588 = vmatmul.mubr.bf16.gmra.mrb[72].mxu0 %v8119_v39  ;;  %5630 = vmatmul.mubr.bf16.gmra.mrb[72].mxu1 %v8122_v47  ;;  %v10760_v18 = vld [vmem:[#allocation21_spill] sm:$0xff]  ;;  %v10761_v19 = vld [vmem:[#allocation22_spill] sm:$0xff] }
 0x388   : > { %6952 = vmatprep.mubr.msk.bf16.mxu0 %vm2108_vm0, %v8127_v11  ;;  %7162 = vmatprep.mubr.msk.bf16.mxu1 %vm2108_vm0, %v8130_v12  ;;  %v10762_v32 = vmax.f32 %v10760_v18, %v10761_v19 }
 0x389   : > { %v5764_v2 = vadd.f32 %v9975_v17, %v5673_v57  ;;  %v5847_v48 = vmax.f32 %v5763_v51, 0.0 }
 0x38a   : > { %v4381_v5 = vpop.f32.mrb[224].mxu0  ;;  %v5423_v14 = vpop.f32.mrb[224].mxu1 }
 0x38b   : > { %v5848_v49 = vmax.f32 %v5764_v2, 0.0  ;;  %v4632_v16 = vmax.f32 %v10750_v27, %v4381_v5  ;;  %v4383_v58 = vpop.f32.mrb[225].mxu0  ;;  %v5425_v62 = vpop.f32.mrb[225].mxu1  ;;  %v10763_v2 = vld [vmem:[#allocation23_spill] sm:$0xff]  ;;  %v10764_v5 = vld [vmem:[#allocation24_spill] sm:$0xff] }
 0x38c   : > { %v4384_v34 = vpop.f32.mrb[226].mxu0  ;;  %v5426_v59 = vpop.f32.mrb[226].mxu1 }
 0x38d   : > { %v7404_v21 = vpack.c.bf16 %v5848_v49, %v5847_v48  ;;  %v5674_v31 = vmax.f32 %v4632_v16, %v5423_v14  ;;  %v4633_v54 = vmax.f32 %v10753_v53, %v4384_v34  ;;  %v4386_v24 = vpop.f32.mrb[227].mxu0  ;;  %v5428_v41 = vpop.f32.mrb[227].mxu1  ;;  %v10765_v14 = vmax.f32 %v10763_v2, %v10764_v5  ;;  %v10766_v34 = vld [vmem:[#allocation25_spill] sm:$0xff] }
 0x38f   : > { %7559 = vst [vmem:[%s10000_s9 + $0x68] sm:$0xff] %v7404_v21   ;;  %v5765_v42 = vadd.f32 %v9975_v17, %v5674_v31  ;;  %v5675_v20 = vmax.f32 %v4633_v54, %v5426_v59  ;;  %4596 = vmatmul.mubr.bf16.gmra.mrb[76].mxu0 %v8125_v10  ;;  %5638 = vmatmul.mubr.bf16.gmra.mrb[76].mxu1 %v8128_v52  ;;  %v10767_v59 = vld [vmem:[#allocation26_spill] sm:$0xff] }
 0x390   : > { %v10768_v21 = vmax.f32 %v10766_v34, %v10767_v59 }
 0x391   : > { %v5766_v60 = vadd.f32 %v9975_v17, %v5675_v20  ;;  %v5849_v61 = vmax.f32 %v5765_v42, 0.0  ;;  %v10769_v42 = vld [vmem:[#allocation27_spill] sm:$0xff]  ;;  %v10770_v20 = vld [vmem:[#allocation28_spill] sm:$0xff] }
 0x392   : > { %v4389_v43 = vpop.f32.mrb[228].mxu0  ;;  %v5431_v63 = vpop.f32.mrb[228].mxu1 }
 0x393   : > { %v5850_v38 = vmax.f32 %v5766_v60, 0.0  ;;  %v4634_v7 = vmax.f32 %v10756_v22, %v4389_v43  ;;  %v4391_v8 = vpop.f32.mrb[229].mxu0  ;;  %v5433_v23 = vpop.f32.mrb[229].mxu1  ;;  %v10771_v60 = vmax.f32 %v10769_v42, %v10770_v20 }
 0x394   : > { %v4392_v26 = vpop.f32.mrb[230].mxu0  ;;  %v5434_v28 = vpop.f32.mrb[230].mxu1 }
 0x395   : > { %v7409_v29 = vpack.c.bf16 %v5850_v38, %v5849_v61  ;;  %v5676_v39 = vmax.f32 %v4634_v7, %v5431_v63  ;;  %v4635_v45 = vmax.f32 %v10759_v40, %v4392_v26  ;;  %v4394_v15 = vpop.f32.mrb[231].mxu0  ;;  %v5436_v30 = vpop.f32.mrb[231].mxu1  ;;  %v10772_v26 = vld [vmem:[#allocation29_spill] sm:$0xff] }
 0x397   : > { %7560 = vst [vmem:[%s10000_s9 + $0x70] sm:$0xff] %v7409_v29   ;;  %v5767_v56 = vadd.f32 %v9975_v17, %v5676_v39  ;;  %v5677_v46 = vmax.f32 %v4635_v45, %v5434_v28  ;;  %v10773_v28 = vld [vmem:[#allocation30_spill] sm:$0xff] }
 0x398   : > { %v10774_v29 = vmax.f32 %v10772_v26, %v10773_v28 }
 0x399   : > { %v5768_v47 = vadd.f32 %v9975_v17, %v5677_v46  ;;  %v5851_v11 = vmax.f32 %v5767_v56, 0.0  ;;  %v10775_v56 = vld [vmem:[#allocation31_spill] sm:$0xff]  ;;  %v10776_v46 = vld [vmem:[#allocation32_spill] sm:$0xff] }
 0x39a   : > { %v4397_v44 = vpop.f32.mrb[232].mxu0  ;;  %v5439_v1 = vpop.f32.mrb[232].mxu1 }
 0x39b   : > { %v5852_v12 = vmax.f32 %v5768_v47, 0.0  ;;  %v4636_v33 = vmax.f32 %v10762_v32, %v4397_v44  ;;  %v4399_v55 = vpop.f32.mrb[233].mxu0  ;;  %v5441_v3 = vpop.f32.mrb[233].mxu1  ;;  %v10777_v47 = vmax.f32 %v10775_v56, %v10776_v46 }
 0x39c   : > { %v4400_v4 = vpop.f32.mrb[234].mxu0  ;;  %v5442_v50 = vpop.f32.mrb[234].mxu1 }
 0x39d   : > { %v7414_v51 = vpack.c.bf16 %v5852_v12, %v5851_v11  ;;  %v5678_v57 = vmax.f32 %v4636_v33, %v5439_v1  ;;  %v4637_v10 = vmax.f32 %v10765_v14, %v4400_v4  ;;  %v4402_v48 = vpop.f32.mrb[235].mxu0  ;;  %v5444_v49 = vpop.f32.mrb[235].mxu1  ;;  %v10778_v4 = vld [vmem:[#allocation33_spill] sm:$0xff] }
 0x39f   : > { %7561 = vst [vmem:[%s10000_s9 + $0x78] sm:$0xff] %v7414_v51   ;;  %v5769_v13 = vadd.f32 %v9975_v17, %v5678_v57  ;;  %v5679_v37 = vmax.f32 %v4637_v10, %v5442_v50  ;;  %v10779_v50 = vld [vmem:[#allocation34_spill] sm:$0xff] }
 0x3a0   : > { %v10780_v51 = vmax.f32 %v10778_v4, %v10779_v50 }
 0x3a1   : > { %v5770_v27 = vadd.f32 %v9975_v17, %v5679_v37  ;;  %v5853_v62 = vmax.f32 %v5769_v13, 0.0  ;;  %v10781_v13 = vld [vmem:[#allocation35_spill] sm:$0xff]  ;;  %v10782_v37 = vld [vmem:[#allocation36_spill] sm:$0xff] }
 0x3a2   : > { %v4405_v16 = vpop.f32.mrb[236].mxu0  ;;  %v5447_v58 = vpop.f32.mrb[236].mxu1 }
 0x3a3   : > { %v5854_v52 = vmax.f32 %v5770_v27, 0.0  ;;  %v4638_v31 = vmax.f32 %v10768_v21, %v4405_v16  ;;  %v4407_v0 = vpop.f32.mrb[237].mxu0  ;;  %v5449_v9 = vpop.f32.mrb[237].mxu1  ;;  %v10783_v27 = vmax.f32 %v10781_v13, %v10782_v37 }
 0x3a4   : > { %v4408_v53 = vpop.f32.mrb[238].mxu0  ;;  %v5450_v54 = vpop.f32.mrb[238].mxu1 }
 0x3a5   : > { %v7419_v24 = vpack.c.bf16 %v5854_v52, %v5853_v62  ;;  %v5680_v41 = vmax.f32 %v4638_v31, %v5447_v58  ;;  %v4639_v43 = vmax.f32 %v10771_v60, %v4408_v53  ;;  %v4410_v63 = vpop.f32.mrb[239].mxu0  ;;  %v5452_v61 = vpop.f32.mrb[239].mxu1  ;;  %v10784_v53 = vld [vmem:[#allocation37_spill] sm:$0xff] }
 0x3a7   : > { %7562 = vst [vmem:[%s10000_s9 + $0x80] sm:$0xff] %v7419_v24   ;;  %v5771_v38 = vadd.f32 %v9975_v17, %v5680_v41  ;;  %v5681_v6 = vmax.f32 %v4639_v43, %v5450_v54  ;;  %v10785_v54 = vld [vmem:[#allocation38_spill] sm:$0xff] }
 0x3a8   : > { %v10786_v24 = vmax.f32 %v10784_v53, %v10785_v54 }
 0x3a9   : > { %v5772_v25 = vadd.f32 %v9975_v17, %v5681_v6  ;;  %v5855_v8 = vmax.f32 %v5771_v38, 0.0  ;;  %v10787_v38 = vld [vmem:[#allocation39_spill] sm:$0xff]  ;;  %v10788_v6 = vld [vmem:[#allocation40_spill] sm:$0xff] }
 0x3aa   : > { %v4413_v22 = vpop.f32.mrb[240].mxu0  ;;  %v5455_v7 = vpop.f32.mrb[240].mxu1 }
 0x3ab   : > { %v5856_v23 = vmax.f32 %v5772_v25, 0.0  ;;  %v4640_v39 = vmax.f32 %v10774_v29, %v4413_v22  ;;  %v4415_v35 = vpop.f32.mrb[241].mxu0  ;;  %v5457_v36 = vpop.f32.mrb[241].mxu1  ;;  %v10789_v25 = vmax.f32 %v10787_v38, %v10788_v6 }
 0x3ac   : > { %v4416_v40 = vpop.f32.mrb[242].mxu0  ;;  %v5458_v45 = vpop.f32.mrb[242].mxu1 }
 0x3ad   : > { %v7424_v15 = vpack.c.bf16 %v5856_v23, %v5855_v8  ;;  %v5682_v30 = vmax.f32 %v4640_v39, %v5455_v7  ;;  %v4641_v44 = vmax.f32 %v10777_v47, %v4416_v40  ;;  %v4418_v1 = vpop.f32.mrb[243].mxu0  ;;  %v5460_v11 = vpop.f32.mrb[243].mxu1  ;;  %v10790_v40 = vld [vmem:[#allocation41_spill] sm:$0xff] }
 0x3af   : > { %7563 = vst [vmem:[%s10000_s9 + $0x88] sm:$0xff] %v7424_v15   ;;  %v5773_v12 = vadd.f32 %v9975_v17, %v5682_v30  ;;  %v5683_v18 = vmax.f32 %v4641_v44, %v5458_v45  ;;  %v10791_v45 = vld [vmem:[#allocation42_spill] sm:$0xff] }
 0x3b0   : > { %v10792_v15 = vmax.f32 %v10790_v40, %v10791_v45 }
 0x3b1   : > { %v5774_v19 = vadd.f32 %v9975_v17, %v5683_v18  ;;  %v5857_v55 = vmax.f32 %v5773_v12, 0.0  ;;  %v10793_v12 = vld [vmem:[#allocation43_spill] sm:$0xff]  ;;  %v10794_v18 = vld [vmem:[#allocation44_spill] sm:$0xff] }
 0x3b2   : > { %v4421_v32 = vpop.f32.mrb[244].mxu0  ;;  %v5463_v33 = vpop.f32.mrb[244].mxu1 }
 0x3b3   : > { %v5858_v3 = vmax.f32 %v5774_v19, 0.0  ;;  %v4642_v57 = vmax.f32 %v10780_v51, %v4421_v32  ;;  %v4423_v2 = vpop.f32.mrb[245].mxu0  ;;  %v5465_v5 = vpop.f32.mrb[245].mxu1  ;;  %v10795_v19 = vmax.f32 %v10793_v12, %v10794_v18 }
 0x3b4   : > { %v4424_v14 = vpop.f32.mrb[246].mxu0  ;;  %v5466_v10 = vpop.f32.mrb[246].mxu1 }
 0x3b5   : > { %v7429_v48 = vpack.c.bf16 %v5858_v3, %v5857_v55  ;;  %v5684_v49 = vmax.f32 %v4642_v57, %v5463_v33  ;;  %v4643_v16 = vmax.f32 %v10783_v27, %v4424_v14  ;;  %v4426_v58 = vpop.f32.mrb[247].mxu0  ;;  %v5468_v62 = vpop.f32.mrb[247].mxu1  ;;  %v10796_v14 = vld [vmem:[#allocation45_spill] sm:$0xff] }
 0x3b7   : > { %7564 = vst [vmem:[%s10000_s9 + $0x90] sm:$0xff] %v7429_v48   ;;  %v5775_v52 = vadd.f32 %v9975_v17, %v5684_v49  ;;  %v5685_v34 = vmax.f32 %v4643_v16, %v5466_v10  ;;  %v10797_v10 = vld [vmem:[#allocation46_spill] sm:$0xff] }
 0x3b8   : > { %v10798_v48 = vmax.f32 %v10796_v14, %v10797_v10 }
 0x3b9   : > { %v5776_v59 = vadd.f32 %v9975_v17, %v5685_v34  ;;  %v5859_v0 = vmax.f32 %v5775_v52, 0.0  ;;  %v10799_v52 = vld [vmem:[#allocation47_spill] sm:$0xff]  ;;  %v10800_v34 = vld [vmem:[#allocation48_spill] sm:$0xff] }
 0x3ba   : > { %v4429_v21 = vpop.f32.mrb[248].mxu0  ;;  %v5471_v31 = vpop.f32.mrb[248].mxu1 }
 0x3bb   : > { %v5860_v9 = vmax.f32 %v5776_v59, 0.0  ;;  %v4644_v41 = vmax.f32 %v10786_v24, %v4429_v21  ;;  %v4431_v42 = vpop.f32.mrb[249].mxu0  ;;  %v5473_v20 = vpop.f32.mrb[249].mxu1  ;;  %v10801_v59 = vmax.f32 %v10799_v52, %v10800_v34 }
 0x3bc   : > { %v4432_v60 = vpop.f32.mrb[250].mxu0  ;;  %v5474_v43 = vpop.f32.mrb[250].mxu1 }
 0x3bd   : > { %v7434_v63 = vpack.c.bf16 %v5860_v9, %v5859_v0  ;;  %v5686_v61 = vmax.f32 %v4644_v41, %v5471_v31  ;;  %v4645_v22 = vmax.f32 %v10789_v25, %v4432_v60  ;;  %v4434_v7 = vpop.f32.mrb[251].mxu0  ;;  %v5476_v8 = vpop.f32.mrb[251].mxu1  ;;  %v10276_v0 = vld [vmem:[%s10464_s2] ss:$0 sm:$0xff]  ;;  %v10802_v60 = vld [vmem:[#allocation49_spill] sm:$0xff] }
 0x3bf   : > { %7565 = vst [vmem:[%s10000_s9 + $0x98] sm:$0xff] %v7434_v63   ;;  %v5777_v23 = vadd.f32 %v9975_v17, %v5686_v61  ;;  %v5687_v26 = vmax.f32 %v4645_v22, %v5474_v43  ;;  %v10803_v43 = vld [vmem:[#allocation50_spill] sm:$0xff] }
 0x3c0   : > { %v10804_v63 = vmax.f32 %v10802_v60, %v10803_v43 }
 0x3c1   : > { %v5778_v28 = vadd.f32 %v9975_v17, %v5687_v26  ;;  %v5861_v35 = vmax.f32 %v5777_v23, 0.0  ;;  %v10805_v23 = vld [vmem:[#allocation51_spill] sm:$0xff]  ;;  %v10806_v26 = vld [vmem:[#allocation52_spill] sm:$0xff] }
 0x3c2   : > { %v4437_v29 = vpop.f32.mrb[252].mxu0  ;;  %v5479_v39 = vpop.f32.mrb[252].mxu1 }
 0x3c3   : > { %v5862_v36 = vmax.f32 %v5778_v28, 0.0  ;;  %v4646_v30 = vmax.f32 %v10792_v15, %v4437_v29  ;;  %v4439_v56 = vpop.f32.mrb[253].mxu0  ;;  %v5481_v46 = vpop.f32.mrb[253].mxu1  ;;  %v10807_v28 = vmax.f32 %v10805_v23, %v10806_v26 }
 0x3c4   : > { %v4440_v47 = vpop.f32.mrb[254].mxu0  ;;  %v5482_v44 = vpop.f32.mrb[254].mxu1 }
 0x3c5   : > { %v7439_v1 = vpack.c.bf16 %v5862_v36, %v5861_v35  ;;  %v5688_v11 = vmax.f32 %v4646_v30, %v5479_v39  ;;  %v4647_v32 = vmax.f32 %v10795_v19, %v4440_v47  ;;  %v4442_v33 = vpop.f32.mrb[255].mxu0  ;;  %v5484_v55 = vpop.f32.mrb[255].mxu1  ;;  %v10808_v47 = vld [vmem:[#allocation53_spill] sm:$0xff] }
 0x3c7   : > { %7566 = vst [vmem:[%s10000_s9 + $0xa0] sm:$0xff] %v7439_v1   ;;  %v5779_v3 = vadd.f32 %v9975_v17, %v5688_v11  ;;  %v5689_v4 = vmax.f32 %v4647_v32, %v5482_v44  ;;  %v10809_v44 = vld [vmem:[#allocation54_spill] sm:$0xff] }
 0x3c8   : > { %v10810_v1 = vmax.f32 %v10808_v47, %v10809_v44 }
 0x3c9   : > { %v5780_v50 = vadd.f32 %v9975_v17, %v5689_v4  ;;  %v5863_v2 = vmax.f32 %v5779_v3, 0.0  ;;  %v10811_v3 = vld [vmem:[#allocation55_spill] sm:$0xff]  ;;  %v10812_v4 = vld [vmem:[#allocation56_spill] sm:$0xff] }
 0x3ca   : > { %v4445_v51 = vpop.f32.mrb[0].mxu0  ;;  %v5487_v57 = vpop.f32.mrb[0].mxu1 }
 0x3cb   : > { %v5864_v5 = vmax.f32 %v5780_v50, 0.0  ;;  %v4648_v49 = vmax.f32 %v10798_v48, %v4445_v51  ;;  %v4447_v13 = vpop.f32.mrb[1].mxu0  ;;  %v5489_v37 = vpop.f32.mrb[1].mxu1  ;;  %v10813_v50 = vmax.f32 %v10811_v3, %v10812_v4 }
 0x3cc   : > { %v4448_v27 = vpop.f32.mrb[2].mxu0  ;;  %v5490_v16 = vpop.f32.mrb[2].mxu1 }
 0x3cd   : > { %v7444_v58 = vpack.c.bf16 %v5864_v5, %v5863_v2  ;;  %v5690_v62 = vmax.f32 %v4648_v49, %v5487_v57  ;;  %v4649_v21 = vmax.f32 %v10801_v59, %v4448_v27  ;;  %v4450_v31 = vpop.f32.mrb[3].mxu0  ;;  %v5492_v17 = vpop.f32.mrb[3].mxu1  ;;  %v10814_v27 = vld [vmem:[#allocation57_spill] sm:$0xff] }
 0x3cf   : > { %7567 = vst [vmem:[%s10000_s9 + $0xa8] sm:$0xff] %v7444_v58   ;;  %v5781_v9 = vadd.f32 %v10276_v0, %v5690_v62  ;;  %v5691_v53 = vmax.f32 %v4649_v21, %v5490_v16  ;;  %v10815_v16 = vld [vmem:[#allocation58_spill] sm:$0xff] }
 0x3d0   : > { %v10816_v58 = vmax.f32 %v10814_v27, %v10815_v16 }
 0x3d1   : > { %v5782_v54 = vadd.f32 %v10276_v0, %v5691_v53  ;;  %v5865_v42 = vmax.f32 %v5781_v9, 0.0  ;;  %v10817_v9 = vld [vmem:[#allocation59_spill] sm:$0xff]  ;;  %v10818_v53 = vld [vmem:[#allocation60_spill] sm:$0xff] }
 0x3d2   : > { %v4453_v24 = vpop.f32.mrb[4].mxu0  ;;  %v5495_v41 = vpop.f32.mrb[4].mxu1 }
 0x3d3   : > { %v5866_v20 = vmax.f32 %v5782_v54, 0.0  ;;  %v4650_v61 = vmax.f32 %v10804_v63, %v4453_v24  ;;  %v4455_v38 = vpop.f32.mrb[5].mxu0  ;;  %v5497_v6 = vpop.f32.mrb[5].mxu1  ;;  %v10819_v54 = vmax.f32 %v10817_v9, %v10818_v53 }
 0x3d4   : > { %v4456_v25 = vpop.f32.mrb[6].mxu0  ;;  %v5498_v22 = vpop.f32.mrb[6].mxu1 }
 0x3d5   : > { %v7449_v7 = vpack.c.bf16 %v5866_v20, %v5865_v42  ;;  %v5692_v8 = vmax.f32 %v4650_v61, %v5495_v41  ;;  %v4651_v29 = vmax.f32 %v10807_v28, %v4456_v25  ;;  %v4458_v39 = vpop.f32.mrb[7].mxu0  ;;  %v5500_v35 = vpop.f32.mrb[7].mxu1  ;;  %v10820_v25 = vld [vmem:[#allocation61_spill] sm:$0xff] }
 0x3d7   : > { %7568 = vst [vmem:[%s10000_s9 + $0xb0] sm:$0xff] %v7449_v7   ;;  %v5783_v36 = vadd.f32 %v10276_v0, %v5692_v8  ;;  %v5693_v40 = vmax.f32 %v4651_v29, %v5498_v22  ;;  %v10821_v22 = vld [vmem:[#allocation62_spill] sm:$0xff] }
 0x3d8   : > { %v10822_v7 = vmax.f32 %v10820_v25, %v10821_v22 }
 0x3d9   : > { %v5784_v45 = vadd.f32 %v10276_v0, %v5693_v40  ;;  %v5867_v56 = vmax.f32 %v5783_v36, 0.0  ;;  %v10823_v36 = vld [vmem:[#allocation63_spill] sm:$0xff]  ;;  %v10824_v40 = vld [vmem:[#allocation64_spill] sm:$0xff] }
 0x3da   : > { %v4461_v15 = vpop.f32.mrb[8].mxu0  ;;  %v5503_v30 = vpop.f32.mrb[8].mxu1 }
 0x3db   : > { %v5868_v46 = vmax.f32 %v5784_v45, 0.0  ;;  %v4652_v11 = vmax.f32 %v10810_v1, %v4461_v15  ;;  %v4463_v12 = vpop.f32.mrb[9].mxu0  ;;  %v5505_v18 = vpop.f32.mrb[9].mxu1  ;;  %v10825_v45 = vmax.f32 %v10823_v36, %v10824_v40 }
 0x3dc   : > { %v4464_v19 = vpop.f32.mrb[10].mxu0  ;;  %v5506_v32 = vpop.f32.mrb[10].mxu1 }
 0x3dd   : > { %v7454_v33 = vpack.c.bf16 %v5868_v46, %v5867_v56  ;;  %v5694_v55 = vmax.f32 %v4652_v11, %v5503_v30  ;;  %v4653_v51 = vmax.f32 %v10813_v50, %v4464_v19  ;;  %v4466_v57 = vpop.f32.mrb[11].mxu0  ;;  %v5508_v2 = vpop.f32.mrb[11].mxu1  ;;  %v10826_v19 = vld [vmem:[#allocation65_spill] sm:$0xff] }
 0x3df   : > { %7569 = vst [vmem:[%s10000_s9 + $0xb8] sm:$0xff] %v7454_v33   ;;  %v5785_v5 = vadd.f32 %v10276_v0, %v5694_v55  ;;  %v5695_v14 = vmax.f32 %v4653_v51, %v5506_v32  ;;  %v10827_v32 = vld [vmem:[#allocation66_spill] sm:$0xff] }
 0x3e0   : > { %v10828_v33 = vmax.f32 %v10826_v19, %v10827_v32 }
 0x3e1   : > { %v5786_v10 = vadd.f32 %v10276_v0, %v5695_v14  ;;  %v5869_v13 = vmax.f32 %v5785_v5, 0.0  ;;  %v10829_v5 = vld [vmem:[#allocation67_spill] sm:$0xff]  ;;  %v10830_v14 = vld [vmem:[#allocation68_spill] sm:$0xff] }
 0x3e2   : > { %v4469_v48 = vpop.f32.mrb[12].mxu0  ;;  %v5511_v49 = vpop.f32.mrb[12].mxu1 }
 0x3e3   : > { %v5870_v37 = vmax.f32 %v5786_v10, 0.0  ;;  %v4654_v62 = vmax.f32 %v10816_v58, %v4469_v48  ;;  %v4471_v52 = vpop.f32.mrb[13].mxu0  ;;  %v5513_v34 = vpop.f32.mrb[13].mxu1  ;;  %v10831_v10 = vmax.f32 %v10829_v5, %v10830_v14 }
 0x3e4   : > { %v4472_v59 = vpop.f32.mrb[14].mxu0  ;;  %v5514_v21 = vpop.f32.mrb[14].mxu1 }
 0x3e5   : > { %v7459_v31 = vpack.c.bf16 %v5870_v37, %v5869_v13  ;;  %v5696_v17 = vmax.f32 %v4654_v62, %v5511_v49  ;;  %v4655_v24 = vmax.f32 %v10819_v54, %v4472_v59  ;;  %v4474_v41 = vpop.f32.mrb[15].mxu0  ;;  %v5516_v42 = vpop.f32.mrb[15].mxu1  ;;  %v10832_v59 = vld [vmem:[#allocation69_spill] sm:$0xff] }
 0x3e7   : > { %7570 = vst [vmem:[%s10000_s9 + $0xc0] sm:$0xff] %v7459_v31   ;;  %v5787_v20 = vadd.f32 %v10276_v0, %v5696_v17  ;;  %v5697_v60 = vmax.f32 %v4655_v24, %v5514_v21  ;;  %v10833_v21 = vld [vmem:[#allocation70_spill] sm:$0xff] }
 0x3e8   : > { %v10834_v31 = vmax.f32 %v10832_v59, %v10833_v21 }
 0x3e9   : > { %v5788_v43 = vadd.f32 %v10276_v0, %v5697_v60  ;;  %v5871_v38 = vmax.f32 %v5787_v20, 0.0  ;;  %v10835_v20 = vld [vmem:[#allocation71_spill] sm:$0xff]  ;;  %v10836_v60 = vld [vmem:[#allocation72_spill] sm:$0xff] }
 0x3ea   : > { %v4477_v63 = vpop.f32.mrb[16].mxu0  ;;  %v5519_v61 = vpop.f32.mrb[16].mxu1 }
 0x3eb   : > { %v5872_v6 = vmax.f32 %v5788_v43, 0.0  ;;  %v4656_v8 = vmax.f32 %v10822_v7, %v4477_v63  ;;  %v4479_v23 = vpop.f32.mrb[17].mxu0  ;;  %v5521_v26 = vpop.f32.mrb[17].mxu1  ;;  %v10837_v43 = vmax.f32 %v10835_v20, %v10836_v60 }
 0x3ec   : > { %v4480_v28 = vpop.f32.mrb[18].mxu0  ;;  %v5522_v29 = vpop.f32.mrb[18].mxu1 }
 0x3ed   : > { %v7464_v39 = vpack.c.bf16 %v5872_v6, %v5871_v38  ;;  %v5698_v35 = vmax.f32 %v4656_v8, %v5519_v61  ;;  %v4657_v15 = vmax.f32 %v10825_v45, %v4480_v28  ;;  %v4482_v30 = vpop.f32.mrb[19].mxu0  ;;  %v5524_v56 = vpop.f32.mrb[19].mxu1  ;;  %v10838_v28 = vld [vmem:[#allocation73_spill] sm:$0xff] }
 0x3ef   : > { %7571 = vst [vmem:[%s10000_s9 + $0xc8] sm:$0xff] %v7464_v39   ;;  %v5789_v46 = vadd.f32 %v10276_v0, %v5698_v35  ;;  %v5699_v47 = vmax.f32 %v4657_v15, %v5522_v29  ;;  %v10839_v29 = vld [vmem:[#allocation74_spill] sm:$0xff] }
 0x3f0   : > { %v10840_v39 = vmax.f32 %v10838_v28, %v10839_v29 }
 0x3f1   : > { %v5790_v44 = vadd.f32 %v10276_v0, %v5699_v47  ;;  %v5873_v12 = vmax.f32 %v5789_v46, 0.0  ;;  %v10841_v46 = vld [vmem:[#allocation75_spill] sm:$0xff]  ;;  %v10842_v47 = vld [vmem:[#allocation76_spill] sm:$0xff] }
 0x3f2   : > { %v4485_v1 = vpop.f32.mrb[20].mxu0  ;;  %v5527_v11 = vpop.f32.mrb[20].mxu1 }
 0x3f3   : > { %v5874_v18 = vmax.f32 %v5790_v44, 0.0  ;;  %v4658_v55 = vmax.f32 %v10828_v33, %v4485_v1  ;;  %v4487_v3 = vpop.f32.mrb[21].mxu0  ;;  %v5529_v4 = vpop.f32.mrb[21].mxu1  ;;  %v10843_v44 = vmax.f32 %v10841_v46, %v10842_v47 }
 0x3f4   : > { %v4488_v50 = vpop.f32.mrb[22].mxu0  ;;  %v5530_v51 = vpop.f32.mrb[22].mxu1 }
 0x3f5   : > { %v7469_v57 = vpack.c.bf16 %v5874_v18, %v5873_v12  ;;  %v5700_v2 = vmax.f32 %v4658_v55, %v5527_v11  ;;  %v4659_v48 = vmax.f32 %v10831_v10, %v4488_v50  ;;  %v4490_v49 = vpop.f32.mrb[23].mxu0  ;;  %v5532_v13 = vpop.f32.mrb[23].mxu1  ;;  %v10844_v50 = vld [vmem:[#allocation77_spill] sm:$0xff] }
 0x3f7   : > { %7572 = vst [vmem:[%s10000_s9 + $0xd0] sm:$0xff] %v7469_v57   ;;  %v5791_v37 = vadd.f32 %v10276_v0, %v5700_v2  ;;  %v5701_v27 = vmax.f32 %v4659_v48, %v5530_v51  ;;  %v10845_v51 = vld [vmem:[#allocation78_spill] sm:$0xff] }
 0x3f8   : > { %v10846_v57 = vmax.f32 %v10844_v50, %v10845_v51 }
 0x3f9   : > { %v5792_v16 = vadd.f32 %v10276_v0, %v5701_v27  ;;  %v5875_v52 = vmax.f32 %v5791_v37, 0.0  ;;  %v10847_v37 = vld [vmem:[#allocation79_spill] sm:$0xff]  ;;  %v10848_v27 = vld [vmem:[#allocation80_spill] sm:$0xff] }
 0x3fa   : > { %v4493_v58 = vpop.f32.mrb[24].mxu0  ;;  %v5535_v62 = vpop.f32.mrb[24].mxu1 }
 0x3fb   : > { %v5876_v34 = vmax.f32 %v5792_v16, 0.0  ;;  %v4660_v17 = vmax.f32 %v10834_v31, %v4493_v58  ;;  %v4495_v9 = vpop.f32.mrb[25].mxu0  ;;  %v5537_v53 = vpop.f32.mrb[25].mxu1  ;;  %v10849_v16 = vmax.f32 %v10847_v37, %v10848_v27 }
 0x3fc   : > { %v4496_v54 = vpop.f32.mrb[26].mxu0  ;;  %v5538_v24 = vpop.f32.mrb[26].mxu1 }
 0x3fd   : > { %v7474_v41 = vpack.c.bf16 %v5876_v34, %v5875_v52  ;;  %v5702_v42 = vmax.f32 %v4660_v17, %v5535_v62  ;;  %v4661_v63 = vmax.f32 %v10837_v43, %v4496_v54  ;;  %v4498_v61 = vpop.f32.mrb[27].mxu0  ;;  %v5540_v38 = vpop.f32.mrb[27].mxu1  ;;  %v10850_v54 = vld [vmem:[#allocation81_spill] sm:$0xff] }
 0x3ff   : > { %7573 = vst [vmem:[%s10000_s9 + $0xd8] sm:$0xff] %v7474_v41   ;;  %v5793_v6 = vadd.f32 %v10276_v0, %v5702_v42  ;;  %v5703_v25 = vmax.f32 %v4661_v63, %v5538_v24  ;;  %v10851_v24 = vld [vmem:[#allocation82_spill] sm:$0xff] }
 0x400   : > { %v10852_v41 = vmax.f32 %v10850_v54, %v10851_v24 }
 0x401   : > { %v5794_v22 = vadd.f32 %v10276_v0, %v5703_v25  ;;  %v5877_v23 = vmax.f32 %v5793_v6, 0.0  ;;  %v10853_v6 = vld [vmem:[#allocation83_spill] sm:$0xff]  ;;  %v10854_v25 = vld [vmem:[#allocation84_spill] sm:$0xff] }
 0x402   : > { %v4501_v7 = vpop.f32.mrb[28].mxu0  ;;  %v5543_v8 = vpop.f32.mrb[28].mxu1 }
 0x403   : > { %v5878_v26 = vmax.f32 %v5794_v22, 0.0  ;;  %v4662_v35 = vmax.f32 %v10840_v39, %v4501_v7  ;;  %v4503_v36 = vpop.f32.mrb[29].mxu0  ;;  %v5545_v40 = vpop.f32.mrb[29].mxu1  ;;  %v10855_v22 = vmax.f32 %v10853_v6, %v10854_v25 }
 0x404   : > { %v4504_v45 = vpop.f32.mrb[30].mxu0  ;;  %v5546_v15 = vpop.f32.mrb[30].mxu1 }
 0x405   : > { %v7479_v30 = vpack.c.bf16 %v5878_v26, %v5877_v23  ;;  %v5704_v56 = vmax.f32 %v4662_v35, %v5543_v8  ;;  %v4663_v1 = vmax.f32 %v10843_v44, %v4504_v45  ;;  %v4506_v11 = vpop.f32.mrb[31].mxu0  ;;  %v5548_v12 = vpop.f32.mrb[31].mxu1  ;;  %v10856_v45 = vld [vmem:[#allocation85_spill] sm:$0xff] }
 0x407   : > { %7574 = vst [vmem:[%s10000_s9 + $0xe0] sm:$0xff] %v7479_v30   ;;  %v5795_v18 = vadd.f32 %v10276_v0, %v5704_v56  ;;  %v5705_v19 = vmax.f32 %v4663_v1, %v5546_v15  ;;  %v10857_v15 = vld [vmem:[#allocation86_spill] sm:$0xff] }
 0x408   : > { %v10858_v30 = vmax.f32 %v10856_v45, %v10857_v15 }
 0x409   : > { %v5796_v32 = vadd.f32 %v10276_v0, %v5705_v19  ;;  %v5879_v3 = vmax.f32 %v5795_v18, 0.0  ;;  %v10859_v18 = vld [vmem:[#allocation87_spill] sm:$0xff]  ;;  %v10860_v19 = vld [vmem:[#allocation88_spill] sm:$0xff] }
 0x40a   : > { %v4509_v33 = vpop.f32.mrb[32].mxu0  ;;  %v5551_v55 = vpop.f32.mrb[32].mxu1 }
 0x40b   : > { %v5880_v4 = vmax.f32 %v5796_v32, 0.0  ;;  %v4664_v2 = vmax.f32 %v10846_v57, %v4509_v33  ;;  %v4511_v5 = vpop.f32.mrb[33].mxu0  ;;  %v5553_v14 = vpop.f32.mrb[33].mxu1  ;;  %v10861_v32 = vmax.f32 %v10859_v18, %v10860_v19 }
 0x40c   : > { %v4512_v10 = vpop.f32.mrb[34].mxu0  ;;  %v5554_v48 = vpop.f32.mrb[34].mxu1 }
 0x40d   : > { %v7484_v49 = vpack.c.bf16 %v5880_v4, %v5879_v3  ;;  %v5706_v13 = vmax.f32 %v4664_v2, %v5551_v55  ;;  %v4665_v58 = vmax.f32 %v10849_v16, %v4512_v10  ;;  %v4514_v62 = vpop.f32.mrb[35].mxu0  ;;  %v5556_v52 = vpop.f32.mrb[35].mxu1  ;;  %v10862_v10 = vld [vmem:[#allocation89_spill] sm:$0xff] }
 0x40f   : > { %7575 = vst [vmem:[%s10000_s9 + $0xe8] sm:$0xff] %v7484_v49   ;;  %v5797_v34 = vadd.f32 %v10276_v0, %v5706_v13  ;;  %v5707_v59 = vmax.f32 %v4665_v58, %v5554_v48  ;;  %v10863_v48 = vld [vmem:[#allocation90_spill] sm:$0xff] }
 0x410   : > { %v10864_v49 = vmax.f32 %v10862_v10, %v10863_v48 }
 0x411   : > { %v5798_v21 = vadd.f32 %v10276_v0, %v5707_v59  ;;  %v5881_v9 = vmax.f32 %v5797_v34, 0.0  ;;  %v10865_v34 = vld [vmem:[#allocation91_spill] sm:$0xff]  ;;  %v10866_v59 = vld [vmem:[#allocation92_spill] sm:$0xff] }
 0x412   : > { %v4517_v31 = vpop.f32.mrb[36].mxu0  ;;  %v5559_v17 = vpop.f32.mrb[36].mxu1 }
 0x413   : > { %v5882_v53 = vmax.f32 %v5798_v21, 0.0  ;;  %v4666_v42 = vmax.f32 %v10852_v41, %v4517_v31  ;;  %v4519_v20 = vpop.f32.mrb[37].mxu0  ;;  %v5561_v60 = vpop.f32.mrb[37].mxu1  ;;  %v10867_v21 = vmax.f32 %v10865_v34, %v10866_v59 }
 0x414   : > { %v4520_v43 = vpop.f32.mrb[38].mxu0  ;;  %v5562_v63 = vpop.f32.mrb[38].mxu1 }
 0x415   : > { %v7489_v61 = vpack.c.bf16 %v5882_v53, %v5881_v9  ;;  %v5708_v38 = vmax.f32 %v4666_v42, %v5559_v17  ;;  %v4667_v7 = vmax.f32 %v10855_v22, %v4520_v43  ;;  %v4522_v8 = vpop.f32.mrb[39].mxu0  ;;  %v5564_v23 = vpop.f32.mrb[39].mxu1  ;;  %v10868_v43 = vld [vmem:[#allocation93_spill] sm:$0xff] }
 0x417   : > { %7576 = vst [vmem:[%s10000_s9 + $0xf0] sm:$0xff] %v7489_v61   ;;  %v5799_v26 = vadd.f32 %v10276_v0, %v5708_v38  ;;  %v5709_v28 = vmax.f32 %v4667_v7, %v5562_v63  ;;  %v10869_v63 = vld [vmem:[#allocation94_spill] sm:$0xff] }
 0x418   : > { %v10870_v61 = vmax.f32 %v10868_v43, %v10869_v63 }
 0x419   : > { %v5800_v29 = vadd.f32 %v10276_v0, %v5709_v28  ;;  %v5883_v36 = vmax.f32 %v5799_v26, 0.0  ;;  %v10871_v26 = vld [vmem:[#allocation95_spill] sm:$0xff]  ;;  %v10872_v28 = vld [vmem:[#allocation96_spill] sm:$0xff] }
 0x41a   : > { %v4525_v39 = vpop.f32.mrb[40].mxu0  ;;  %v5567_v35 = vpop.f32.mrb[40].mxu1 }
 0x41b   : > { %v5884_v40 = vmax.f32 %v5800_v29, 0.0  ;;  %v4668_v56 = vmax.f32 %v10858_v30, %v4525_v39  ;;  %v4527_v46 = vpop.f32.mrb[41].mxu0  ;;  %v5569_v47 = vpop.f32.mrb[41].mxu1  ;;  %v10873_v29 = vmax.f32 %v10871_v26, %v10872_v28 }
 0x41c   : > { %v4528_v44 = vpop.f32.mrb[42].mxu0  ;;  %v5570_v1 = vpop.f32.mrb[42].mxu1 }
 0x41d   : > { %v7494_v11 = vpack.c.bf16 %v5884_v40, %v5883_v36  ;;  %v5710_v12 = vmax.f32 %v4668_v56, %v5567_v35  ;;  %v4669_v33 = vmax.f32 %v10861_v32, %v4528_v44  ;;  %v4530_v55 = vpop.f32.mrb[43].mxu0  ;;  %v5572_v3 = vpop.f32.mrb[43].mxu1  ;;  %v10874_v44 = vld [vmem:[#allocation97_spill] sm:$0xff] }
 0x41f   : > { %7577 = vst [vmem:[%s10000_s9 + $0xf8] sm:$0xff] %v7494_v11   ;;  %v5801_v4 = vadd.f32 %v10276_v0, %v5710_v12  ;;  %v5711_v50 = vmax.f32 %v4669_v33, %v5570_v1  ;;  %v10875_v1 = vld [vmem:[#allocation98_spill] sm:$0xff] }
 0x420   : > { %v10876_v11 = vmax.f32 %v10874_v44, %v10875_v1 }
 0x421   : > { %v5802_v51 = vadd.f32 %v10276_v0, %v5711_v50  ;;  %v5885_v5 = vmax.f32 %v5801_v4, 0.0  ;;  %v10877_v4 = vld [vmem:[#allocation99_spill] sm:$0xff]  ;;  %v10878_v50 = vld [vmem:[#allocation100_spill] sm:$0xff] }
 0x422   : > { %v4533_v57 = vpop.f32.mrb[44].mxu0  ;;  %v5575_v2 = vpop.f32.mrb[44].mxu1 }
 0x423   : > { %v5886_v14 = vmax.f32 %v5802_v51, 0.0  ;;  %v4670_v13 = vmax.f32 %v10864_v49, %v4533_v57  ;;  %v4535_v37 = vpop.f32.mrb[45].mxu0  ;;  %v5577_v27 = vpop.f32.mrb[45].mxu1  ;;  %v10879_v51 = vmax.f32 %v10877_v4, %v10878_v50 }
 0x424   : > { %v4536_v16 = vpop.f32.mrb[46].mxu0  ;;  %v5578_v58 = vpop.f32.mrb[46].mxu1 }
 0x425   : > { %v7499_v62 = vpack.c.bf16 %v5886_v14, %v5885_v5  ;;  %v5712_v52 = vmax.f32 %v4670_v13, %v5575_v2  ;;  %v4671_v31 = vmax.f32 %v10867_v21, %v4536_v16  ;;  %v4538_v17 = vpop.f32.mrb[47].mxu0  ;;  %v5580_v9 = vpop.f32.mrb[47].mxu1  ;;  %v10880_v16 = vld [vmem:[#allocation101_spill] sm:$0xff] }
 0x427   : > { %7578 = vst [vmem:[%s10000_s9 + $0x100] sm:$0xff] %v7499_v62   ;;  %v5803_v53 = vadd.f32 %v10276_v0, %v5712_v52  ;;  %v5713_v54 = vmax.f32 %v4671_v31, %v5578_v58  ;;  %v10881_v58 = vld [vmem:[#allocation102_spill] sm:$0xff] }
 0x428   : > { %v10882_v62 = vmax.f32 %v10880_v16, %v10881_v58 }
 0x429   : > { %v5804_v24 = vadd.f32 %v10276_v0, %v5713_v54  ;;  %v5887_v20 = vmax.f32 %v5803_v53, 0.0  ;;  %v10883_v53 = vld [vmem:[#allocation103_spill] sm:$0xff]  ;;  %v10884_v54 = vld [vmem:[#allocation104_spill] sm:$0xff] }
 0x42a   : > { %v4541_v41 = vpop.f32.mrb[48].mxu0  ;;  %v5583_v42 = vpop.f32.mrb[48].mxu1 }
 0x42b   : > { %v5888_v60 = vmax.f32 %v5804_v24, 0.0  ;;  %v4672_v38 = vmax.f32 %v10870_v61, %v4541_v41  ;;  %v4543_v6 = vpop.f32.mrb[49].mxu0  ;;  %v5585_v25 = vpop.f32.mrb[49].mxu1  ;;  %v10885_v24 = vmax.f32 %v10883_v53, %v10884_v54 }
 0x42c   : > { %v4544_v22 = vpop.f32.mrb[50].mxu0  ;;  %v5586_v7 = vpop.f32.mrb[50].mxu1 }
 0x42d   : > { %v7504_v8 = vpack.c.bf16 %v5888_v60, %v5887_v20  ;;  %v5714_v23 = vmax.f32 %v4672_v38, %v5583_v42  ;;  %v4673_v39 = vmax.f32 %v10873_v29, %v4544_v22  ;;  %v4546_v35 = vpop.f32.mrb[51].mxu0  ;;  %v5588_v36 = vpop.f32.mrb[51].mxu1  ;;  %v10886_v22 = vld [vmem:[#allocation105_spill] sm:$0xff] }
 0x42f   : > { %7579 = vst [vmem:[%s10000_s9 + $0x108] sm:$0xff] %v7504_v8   ;;  %v5805_v40 = vadd.f32 %v10276_v0, %v5714_v23  ;;  %v5715_v45 = vmax.f32 %v4673_v39, %v5586_v7  ;;  %v10887_v7 = vld [vmem:[#allocation106_spill] sm:$0xff] }
 0x430   : > { %v10888_v8 = vmax.f32 %v10886_v22, %v10887_v7 }
 0x431   : > { %v5806_v15 = vadd.f32 %v10276_v0, %v5715_v45  ;;  %v5889_v46 = vmax.f32 %v5805_v40, 0.0  ;;  %v10889_v40 = vld [vmem:[#allocation107_spill] sm:$0xff]  ;;  %v10890_v45 = vld [vmem:[#allocation108_spill] sm:$0xff] }
 0x432   : > { %v4549_v30 = vpop.f32.mrb[52].mxu0  ;;  %v5591_v56 = vpop.f32.mrb[52].mxu1 }
 0x433   : > { %v5890_v47 = vmax.f32 %v5806_v15, 0.0  ;;  %v4674_v12 = vmax.f32 %v10876_v11, %v4549_v30  ;;  %v4551_v18 = vpop.f32.mrb[53].mxu0  ;;  %v5593_v19 = vpop.f32.mrb[53].mxu1  ;;  %v10891_v15 = vmax.f32 %v10889_v40, %v10890_v45 }
 0x434   : > { %v4552_v32 = vpop.f32.mrb[54].mxu0  ;;  %v5594_v33 = vpop.f32.mrb[54].mxu1 }
 0x435   : > { %v7509_v55 = vpack.c.bf16 %v5890_v47, %v5889_v46  ;;  %v5716_v3 = vmax.f32 %v4674_v12, %v5591_v56  ;;  %v4675_v57 = vmax.f32 %v10879_v51, %v4552_v32  ;;  %v4554_v2 = vpop.f32.mrb[55].mxu0  ;;  %v5596_v5 = vpop.f32.mrb[55].mxu1  ;;  %v10892_v32 = vld [vmem:[#allocation109_spill] sm:$0xff] }
 0x437   : > { %7580 = vst [vmem:[%s10000_s9 + $0x110] sm:$0xff] %v7509_v55   ;;  %v5807_v14 = vadd.f32 %v10276_v0, %v5716_v3  ;;  %v5717_v10 = vmax.f32 %v4675_v57, %v5594_v33  ;;  %v10893_v33 = vld [vmem:[#allocation110_spill] sm:$0xff] }
 0x438   : > { %v10894_v55 = vmax.f32 %v10892_v32, %v10893_v33 }
 0x439   : > { %v5808_v48 = vadd.f32 %v10276_v0, %v5717_v10  ;;  %v5891_v37 = vmax.f32 %v5807_v14, 0.0  ;;  %v10895_v14 = vld [vmem:[#allocation111_spill] sm:$0xff]  ;;  %v10896_v10 = vld [vmem:[#allocation112_spill] sm:$0xff] }
 0x43a   : > { %v4557_v49 = vpop.f32.mrb[56].mxu0  ;;  %v5599_v13 = vpop.f32.mrb[56].mxu1 }
 0x43b   : > { %v5892_v27 = vmax.f32 %v5808_v48, 0.0  ;;  %v4676_v52 = vmax.f32 %v10882_v62, %v4557_v49  ;;  %v4559_v34 = vpop.f32.mrb[57].mxu0  ;;  %v5601_v59 = vpop.f32.mrb[57].mxu1  ;;  %v10897_v48 = vmax.f32 %v10895_v14, %v10896_v10 }
 0x43c   : > { %v4560_v21 = vpop.f32.mrb[58].mxu0  ;;  %v5602_v31 = vpop.f32.mrb[58].mxu1 }
 0x43d   : > { %v7514_v17 = vpack.c.bf16 %v5892_v27, %v5891_v37  ;;  %v5718_v9 = vmax.f32 %v4676_v52, %v5599_v13  ;;  %v4677_v41 = vmax.f32 %v10885_v24, %v4560_v21  ;;  %v4562_v42 = vpop.f32.mrb[59].mxu0  ;;  %v5604_v20 = vpop.f32.mrb[59].mxu1  ;;  %v10898_v21 = vld [vmem:[#allocation113_spill] sm:$0xff] }
 0x43f   : > { %7581 = vst [vmem:[%s10000_s9 + $0x118] sm:$0xff] %v7514_v17   ;;  %v5809_v60 = vadd.f32 %v10276_v0, %v5718_v9  ;;  %v5719_v43 = vmax.f32 %v4677_v41, %v5602_v31  ;;  %v10899_v31 = vld [vmem:[#allocation114_spill] sm:$0xff] }
 0x440   : > { %v10900_v17 = vmax.f32 %v10898_v21, %v10899_v31 }
 0x441   : > { %v5810_v63 = vadd.f32 %v10276_v0, %v5719_v43  ;;  %v5893_v6 = vmax.f32 %v5809_v60, 0.0  ;;  %v10901_v60 = vld [vmem:[#allocation115_spill] sm:$0xff]  ;;  %v10902_v43 = vld [vmem:[#allocation116_spill] sm:$0xff] }
 0x442   : > { %v4565_v61 = vpop.f32.mrb[60].mxu0  ;;  %v5607_v38 = vpop.f32.mrb[60].mxu1 }
 0x443   : > { %v5894_v25 = vmax.f32 %v5810_v63, 0.0  ;;  %v4678_v23 = vmax.f32 %v10888_v8, %v4565_v61  ;;  %v4567_v26 = vpop.f32.mrb[61].mxu0  ;;  %v5609_v28 = vpop.f32.mrb[61].mxu1  ;;  %v10903_v63 = vmax.f32 %v10901_v60, %v10902_v43 }
 0x444   : > { %v4568_v29 = vpop.f32.mrb[62].mxu0  ;;  %v5610_v39 = vpop.f32.mrb[62].mxu1 }
 0x445   : > { %v7519_v35 = vpack.c.bf16 %v5894_v25, %v5893_v6  ;;  %v5720_v36 = vmax.f32 %v4678_v23, %v5607_v38  ;;  %v4679_v30 = vmax.f32 %v10891_v15, %v4568_v29  ;;  %v4570_v56 = vpop.f32.mrb[63].mxu0  ;;  %v5612_v46 = vpop.f32.mrb[63].mxu1  ;;  %v10904_v29 = vld [vmem:[#allocation117_spill] sm:$0xff] }
 0x447   : > { %7582 = vst [vmem:[%s10000_s9 + $0x120] sm:$0xff] %v7519_v35   ;;  %v5811_v47 = vadd.f32 %v10276_v0, %v5720_v36  ;;  %v5721_v44 = vmax.f32 %v4679_v30, %v5610_v39  ;;  %v10905_v39 = vld [vmem:[#allocation118_spill] sm:$0xff] }
 0x448   : > { %v10906_v35 = vmax.f32 %v10904_v29, %v10905_v39 }
 0x449   : > { %v5812_v1 = vadd.f32 %v10276_v0, %v5721_v44  ;;  %v5895_v18 = vmax.f32 %v5811_v47, 0.0  ;;  %v10907_v47 = vld [vmem:[#allocation119_spill] sm:$0xff]  ;;  %v10908_v44 = vld [vmem:[#allocation120_spill] sm:$0xff] }
 0x44a   : > { %v4573_v11 = vpop.f32.mrb[64].mxu0  ;;  %v5615_v12 = vpop.f32.mrb[64].mxu1 }
 0x44b   : > { %v5896_v19 = vmax.f32 %v5812_v1, 0.0  ;;  %v4680_v3 = vmax.f32 %v10894_v55, %v4573_v11  ;;  %v4575_v4 = vpop.f32.mrb[65].mxu0  ;;  %v5617_v50 = vpop.f32.mrb[65].mxu1  ;;  %v10909_v1 = vmax.f32 %v10907_v47, %v10908_v44 }
 0x44c   : > { %v4576_v51 = vpop.f32.mrb[66].mxu0  ;;  %v5618_v57 = vpop.f32.mrb[66].mxu1 }
 0x44d   : > { %v7524_v2 = vpack.c.bf16 %v5896_v19, %v5895_v18  ;;  %v5722_v5 = vmax.f32 %v4680_v3, %v5615_v12  ;;  %v4681_v49 = vmax.f32 %v10897_v48, %v4576_v51  ;;  %v4578_v13 = vpop.f32.mrb[67].mxu0  ;;  %v5620_v37 = vpop.f32.mrb[67].mxu1  ;;  %v10910_v51 = vld [vmem:[#allocation121_spill] sm:$0xff] }
 0x44f   : > { %7583 = vst [vmem:[%s10000_s9 + $0x128] sm:$0xff] %v7524_v2   ;;  %v5813_v27 = vadd.f32 %v10276_v0, %v5722_v5  ;;  %v5723_v16 = vmax.f32 %v4681_v49, %v5618_v57  ;;  %v10911_v57 = vld [vmem:[#allocation122_spill] sm:$0xff] }
 0x450   : > { %v10912_v2 = vmax.f32 %v10910_v51, %v10911_v57 }
 0x451   : > { %v5814_v58 = vadd.f32 %v10276_v0, %v5723_v16  ;;  %v5897_v34 = vmax.f32 %v5813_v27, 0.0  ;;  %v10913_v27 = vld [vmem:[#allocation123_spill] sm:$0xff]  ;;  %v10914_v16 = vld [vmem:[#allocation124_spill] sm:$0xff] }
 0x452   : > { %v4581_v62 = vpop.f32.mrb[68].mxu0  ;;  %v5623_v52 = vpop.f32.mrb[68].mxu1 }
 0x453   : > { %v5898_v59 = vmax.f32 %v5814_v58, 0.0  ;;  %v4682_v9 = vmax.f32 %v10900_v17, %v4581_v62  ;;  %v4583_v53 = vpop.f32.mrb[69].mxu0  ;;  %v5625_v54 = vpop.f32.mrb[69].mxu1  ;;  %v10915_v58 = vmax.f32 %v10913_v27, %v10914_v16 }
 0x454   : > { %v4584_v24 = vpop.f32.mrb[70].mxu0  ;;  %v5626_v41 = vpop.f32.mrb[70].mxu1 }
 0x455   : > { %v7529_v42 = vpack.c.bf16 %v5898_v59, %v5897_v34  ;;  %v5724_v20 = vmax.f32 %v4682_v9, %v5623_v52  ;;  %v4683_v61 = vmax.f32 %v10903_v63, %v4584_v24  ;;  %v4586_v38 = vpop.f32.mrb[71].mxu0  ;;  %v5628_v6 = vpop.f32.mrb[71].mxu1 }
 0x457   : > { %7584 = vst [vmem:[%s10000_s9 + $0x130] sm:$0xff] %v7529_v42   ;;  %v5815_v25 = vadd.f32 %v10276_v0, %v5724_v20  ;;  %v5725_v22 = vmax.f32 %v4683_v61, %v5626_v41 }
 0x459   : > { %v5816_v7 = vadd.f32 %v10276_v0, %v5725_v22  ;;  %v5899_v26 = vmax.f32 %v5815_v25, 0.0 }
 0x45a   : > { %v4589_v8 = vpop.f32.mrb[72].mxu0  ;;  %v5631_v23 = vpop.f32.mrb[72].mxu1 }
 0x45b   : > { %v5900_v28 = vmax.f32 %v5816_v7, 0.0  ;;  %v4684_v36 = vmax.f32 %v10906_v35, %v4589_v8  ;;  %v4591_v40 = vpop.f32.mrb[73].mxu0  ;;  %v5633_v45 = vpop.f32.mrb[73].mxu1 }
 0x45c   : > { %v4592_v15 = vpop.f32.mrb[74].mxu0  ;;  %v5634_v30 = vpop.f32.mrb[74].mxu1 }
 0x45d   : > { %v7534_v56 = vpack.c.bf16 %v5900_v28, %v5899_v26  ;;  %v5726_v46 = vmax.f32 %v4684_v36, %v5631_v23  ;;  %v4685_v11 = vmax.f32 %v10909_v1, %v4592_v15  ;;  %v4594_v12 = vpop.f32.mrb[75].mxu0  ;;  %v5636_v18 = vpop.f32.mrb[75].mxu1 }
 0x45f   : > { %7585 = vst [vmem:[%s10000_s9 + $0x138] sm:$0xff] %v7534_v56   ;;  %v5817_v19 = vadd.f32 %v10276_v0, %v5726_v46  ;;  %v5727_v32 = vmax.f32 %v4685_v11, %v5634_v30 }
 0x461   : > { %v5818_v33 = vadd.f32 %v10276_v0, %v5727_v32  ;;  %v5901_v4 = vmax.f32 %v5817_v19, 0.0 }
 0x462   : > { %v4597_v55 = vpop.f32.mrb[76].mxu0  ;;  %v5639_v3 = vpop.f32.mrb[76].mxu1 }
 0x463   : > { %v5902_v50 = vmax.f32 %v5818_v33, 0.0  ;;  %v4686_v5 = vmax.f32 %v10912_v2, %v4597_v55  ;;  %v4599_v14 = vpop.f32.mrb[77].mxu0  ;;  %v5641_v10 = vpop.f32.mrb[77].mxu1 }
 0x464   : > { %v4600_v48 = vpop.f32.mrb[78].mxu0  ;;  %v5642_v49 = vpop.f32.mrb[78].mxu1 }
 0x465   : > { %v7539_v13 = vpack.c.bf16 %v5902_v50, %v5901_v4  ;;  %v5728_v37 = vmax.f32 %v4686_v5, %v5639_v3  ;;  %v4687_v62 = vmax.f32 %v10915_v58, %v4600_v48  ;;  %v4602_v52 = vpop.f32.mrb[79].mxu0  ;;  %v5644_v34 = vpop.f32.mrb[79].mxu1 }
 0x467   : > { %7586 = vst [vmem:[%s10000_s9 + $0x140] sm:$0xff] %v7539_v13   ;;  %v5819_v59 = vadd.f32 %v10276_v0, %v5728_v37  ;;  %v5729_v21 = vmax.f32 %v4687_v62, %v5642_v49 }
 0x469   : > { %v5820_v31 = vadd.f32 %v10276_v0, %v5729_v21  ;;  %v5903_v17 = vmax.f32 %v5819_v59, 0.0 }
 0x46b   : > { %v5904_v9 = vmax.f32 %v5820_v31, 0.0 }
 0x46d   : > { %v7544_v53 = vpack.c.bf16 %v5904_v9, %v5903_v17 }
 0x46f   : > { %7587 = vst [vmem:[%s10000_s9 + $0x148] sm:$0xff] %v7544_v53  }
 0x470 PF: > { %p10_p9 = scmp.ge.s32.totalorder %s8194_s16, 4   ;;  %s10916_s12 = smov %s8150_s13 }
 0x471   : > { %s10917_s13 = smov %s8203_s19  ;;  %s10918_s14 = smov %s8194_s16 }
 0x472   :  { %12 = sbr.rel (!%p10_p9) target bundleno = 2 (0x2), region = 108 }

// kernel: cnn_forward.4
= control target key start
LH: loop header
LB: loop body
LE: loop exit
PB: predicated region body
PF: predicated region fallthrough
CT: control target
= control target key end

     0   :  { %s2429_s12 = smov 0   ;;  %s2431_s13 = smov 0   ;;  %s3007_s0 = inlined_call_operand.vmem [shape: bf16[4,336,64], index: 0, kind: input, shape index: {}]   ;;  %s3008_s1 = inlined_call_operand.vmem [shape: bf16[64,128], index: 1, kind: input, shape index: {}]   ;;  %s3009_s2 = inlined_call_operand.vmem [shape: f32[1,128], index: 2, kind: input, shape index: {}]   ;;  %s3010_s3 = inlined_call_operand.vmem [shape: bf16[336,128], index: 3, kind: output, shape index: {}]  }
   0x1   :  { %s2433_s14 = smov 0  }
   0x2 LB: > { %s1772_s15 = sadd.s32 4294967295, %s2405_s14   ;;  %s2446_s16 = sadd.s32 1, %s2405_s14   ;;  %s2405_s14 = sphi %s2433_s14, %s3025_s14   ;;  %s2401_s13 = sphi %s2431_s13, %s3024_s13   ;;  %s2397_s12 = sphi %s2429_s12, %s3023_s12  }
   0x3   : > { %s17_s17 = ssub.s32 %s2405_s14, %s2446_s16  ;;  %s20_s18 = sadd.s32 1, %s2401_s13 }
   0x4   : > { %p18_p0 = scmp.eq.s32.totalorder %s17_s17, 0  ;;  %p27_p1 = scmp.ne.s32.totalorder %s2401_s13, %s2397_s12 }
   0x5   : > { %p28_p2 = scmp.eq.s32.totalorder %s2405_s14, 0  ;;  %p1775_p4 = scmp.ge.s32.totalorder %s2405_s14, 2 }
   0x6   : > { %s2455_s19 = scalar_select %p18_p0, %s2401_s13, %s20_s18  }
   0x7   : > { %p29_p3 = por %p28_p2, %p27_p1  ;;  %127 = sbr.rel (%p1775_p4) target bundleno = 41 (0x29), region = 24 }
   0xe   : > { %130 = sbr.rel (!%p29_p3) target bundleno = 41 (0x29), region = 28  ;;  %s132_s20 = sand.u32 (%p29_p3), 1, %s2401_s13  }
   0xf   : > { %s1958_s21 = smul.u32 (%p29_p3), 84, %s2405_s14 }
  0x10   : > { %s2307_s22 = smul.u32 (%p29_p3), 336, %s132_s20 }
  0x11   : > { %s2463_s25 = scalar_lea.vmem (%p29_p3), %s3007_s0, %s1958_s21 }
  0x12   : > { %v153_v0 = vld [vmem:[%s2463_s25] sm:$0xff] (%p29_p3)   ;;  %v157_v1 = vld [vmem:[%s2463_s25 + $0x8] sm:$0xff] (%p29_p3)   ;;  %v161_v2 = vld [vmem:[%s2463_s25 + $0x10] sm:$0xff] (%p29_p3)   ;;  %s2468_s26 = scalar_lea.vmem (%p29_p3), [#allocation2], %s2307_s22 }
  0x13   : > { %154 = vst [vmem:[%s2468_s26] sm:$0xff] (%p29_p3), %v153_v0   ;;  %158 = vst [vmem:[%s2468_s26 + $0x8] sm:$0xff] (%p29_p3), %v157_v1   ;;  %v165_v3 = vld [vmem:[%s2463_s25 + $0x18] sm:$0xff] (%p29_p3)   ;;  %v169_v4 = vld [vmem:[%s2463_s25 + $0x20] sm:$0xff] (%p29_p3)  }
  0x14   : > { %162 = vst [vmem:[%s2468_s26 + $0x10] sm:$0xff] (%p29_p3), %v161_v2   ;;  %v173_v5 = vld [vmem:[%s2463_s25 + $0x28] sm:$0xff] (%p29_p3)   ;;  %166 = vst [vmem:[%s2468_s26 + $0x18] sm:$0xff] (%p29_p3), %v165_v3   ;;  %v177_v6 = vld [vmem:[%s2463_s25 + $0x30] sm:$0xff] (%p29_p3)  }
  0x15   : > { %170 = vst [vmem:[%s2468_s26 + $0x20] sm:$0xff] %v169_v4   ;;  %174 = vst [vmem:[%s2468_s26 + $0x28] sm:$0xff] %v173_v5   ;;  %v181_v7 = vld [vmem:[%s2463_s25 + $0x38] sm:$0xff]   ;;  %v185_v8 = vld [vmem:[%s2463_s25 + $0x40] sm:$0xff]  }
  0x16   : > { %178 = vst [vmem:[%s2468_s26 + $0x30] sm:$0xff] %v177_v6   ;;  %182 = vst [vmem:[%s2468_s26 + $0x38] sm:$0xff] %v181_v7   ;;  %v189_v9 = vld [vmem:[%s2463_s25 + $0x48] sm:$0xff]   ;;  %v193_v10 = vld [vmem:[%s2463_s25 + $0x50] sm:$0xf] }
  0x17   : > { %186 = vst [vmem:[%s2468_s26 + $0x40] sm:$0xff] %v185_v8   ;;  %v195_v11 = vld [vmem:[%s2463_s25 + $0xa8] sm:$0xff]   ;;  %190 = vst [vmem:[%s2468_s26 + $0x48] sm:$0xff] %v189_v9   ;;  %v199_v12 = vld [vmem:[%s2463_s25 + $0xb0] sm:$0xff]  }
  0x18   : > { %194 = vst [vmem:[%s2468_s26 + $0x50] sm:$0xf] %v193_v10  ;;  %196 = vst [vmem:[%s2468_s26 + $0x54] sm:$0xff] %v195_v11   ;;  %v203_v13 = vld [vmem:[%s2463_s25 + $0xb8] sm:$0xff]   ;;  %v207_v14 = vld [vmem:[%s2463_s25 + $0xc0] sm:$0xff]  }
  0x19   : > { %200 = vst [vmem:[%s2468_s26 + $0x5c] sm:$0xff] %v199_v12   ;;  %204 = vst [vmem:[%s2468_s26 + $0x64] sm:$0xff] %v203_v13   ;;  %v211_v15 = vld [vmem:[%s2463_s25 + $0xc8] sm:$0xff]   ;;  %v215_v16 = vld [vmem:[%s2463_s25 + $0xd0] sm:$0xff]  }
  0x1a   : > { %208 = vst [vmem:[%s2468_s26 + $0x6c] sm:$0xff] %v207_v14   ;;  %v219_v17 = vld [vmem:[%s2463_s25 + $0xd8] sm:$0xff]   ;;  %212 = vst [vmem:[%s2468_s26 + $0x74] sm:$0xff] %v211_v15   ;;  %v223_v18 = vld [vmem:[%s2463_s25 + $0xe0] sm:$0xff]  }
  0x1b   : > { %216 = vst [vmem:[%s2468_s26 + $0x7c] sm:$0xff] %v215_v16   ;;  %220 = vst [vmem:[%s2468_s26 + $0x84] sm:$0xff] %v219_v17   ;;  %v227_v19 = vld [vmem:[%s2463_s25 + $0xe8] sm:$0xff]   ;;  %v231_v20 = vld [vmem:[%s2463_s25 + $0xf0] sm:$0xff]  }
  0x1c   : > { %224 = vst [vmem:[%s2468_s26 + $0x8c] sm:$0xff] %v223_v18   ;;  %228 = vst [vmem:[%s2468_s26 + $0x94] sm:$0xff] %v227_v19   ;;  %v235_v21 = vld [vmem:[%s2463_s25 + $0xf8] sm:$0xf]  ;;  %v237_v22 = vld [vmem:[%s2463_s25 + $0x150] sm:$0xff]  }
  0x1d   : > { %232 = vst [vmem:[%s2468_s26 + $0x9c] sm:$0xff] %v231_v20   ;;  %v241_v23 = vld [vmem:[%s2463_s25 + $0x158] sm:$0xff]   ;;  %236 = vst [vmem:[%s2468_s26 + $0xa4] sm:$0xf] %v235_v21  ;;  %v245_v24 = vld [vmem:[%s2463_s25 + $0x160] sm:$0xff]  }
  0x1e   : > { %238 = vst [vmem:[%s2468_s26 + $0xa8] sm:$0xff] %v237_v22   ;;  %242 = vst [vmem:[%s2468_s26 + $0xb0] sm:$0xff] %v241_v23   ;;  %v249_v25 = vld [vmem:[%s2463_s25 + $0x168] sm:$0xff]   ;;  %v253_v26 = vld [vmem:[%s2463_s25 + $0x170] sm:$0xff]  }
  0x1f   : > { %246 = vst [vmem:[%s2468_s26 + $0xb8] sm:$0xff] %v245_v24   ;;  %250 = vst [vmem:[%s2468_s26 + $0xc0] sm:$0xff] %v249_v25   ;;  %v257_v27 = vld [vmem:[%s2463_s25 + $0x178] sm:$0xff]   ;;  %v261_v28 = vld [vmem:[%s2463_s25 + $0x180] sm:$0xff]  }
  0x20   : > { %254 = vst [vmem:[%s2468_s26 + $0xc8] sm:$0xff] %v253_v26   ;;  %v265_v29 = vld [vmem:[%s2463_s25 + $0x188] sm:$0xff]   ;;  %258 = vst [vmem:[%s2468_s26 + $0xd0] sm:$0xff] %v257_v27   ;;  %v269_v30 = vld [vmem:[%s2463_s25 + $0x190] sm:$0xff]  }
  0x21   : > { %262 = vst [vmem:[%s2468_s26 + $0xd8] sm:$0xff] %v261_v28   ;;  %266 = vst [vmem:[%s2468_s26 + $0xe0] sm:$0xff] %v265_v29   ;;  %v273_v31 = vld [vmem:[%s2463_s25 + $0x198] sm:$0xff]   ;;  %v277_v32 = vld [vmem:[%s2463_s25 + $0x1a0] sm:$0xf] }
  0x22   : > { %270 = vst [vmem:[%s2468_s26 + $0xe8] sm:$0xff] %v269_v30   ;;  %274 = vst [vmem:[%s2468_s26 + $0xf0] sm:$0xff] %v273_v31   ;;  %v279_v33 = vld [vmem:[%s2463_s25 + $0x1f8] sm:$0xff]   ;;  %v283_v34 = vld [vmem:[%s2463_s25 + $0x200] sm:$0xff]  }
  0x23   : > { %278 = vst [vmem:[%s2468_s26 + $0xf8] sm:$0xf] %v277_v32  ;;  %v287_v35 = vld [vmem:[%s2463_s25 + $0x208] sm:$0xff]   ;;  %280 = vst [vmem:[%s2468_s26 + $0xfc] sm:$0xff] %v279_v33   ;;  %v291_v36 = vld [vmem:[%s2463_s25 + $0x210] sm:$0xff]  }
  0x24   : > { %284 = vst [vmem:[%s2468_s26 + $0x104] sm:$0xff] %v283_v34   ;;  %288 = vst [vmem:[%s2468_s26 + $0x10c] sm:$0xff] %v287_v35   ;;  %v295_v37 = vld [vmem:[%s2463_s25 + $0x218] sm:$0xff]   ;;  %v299_v38 = vld [vmem:[%s2463_s25 + $0x220] sm:$0xff]  }
  0x25   : > { %292 = vst [vmem:[%s2468_s26 + $0x114] sm:$0xff] %v291_v36   ;;  %296 = vst [vmem:[%s2468_s26 + $0x11c] sm:$0xff] %v295_v37   ;;  %v303_v39 = vld [vmem:[%s2463_s25 + $0x228] sm:$0xff]   ;;  %v307_v40 = vld [vmem:[%s2463_s25 + $0x230] sm:$0xff]  }
  0x26   : > { %300 = vst [vmem:[%s2468_s26 + $0x124] sm:$0xff] %v299_v38   ;;  %v311_v41 = vld [vmem:[%s2463_s25 + $0x238] sm:$0xff]   ;;  %304 = vst [vmem:[%s2468_s26 + $0x12c] sm:$0xff] %v303_v39   ;;  %v315_v42 = vld [vmem:[%s2463_s25 + $0x240] sm:$0xff]  }
  0x27   : > { %308 = vst [vmem:[%s2468_s26 + $0x134] sm:$0xff] %v307_v40   ;;  %312 = vst [vmem:[%s2468_s26 + $0x13c] sm:$0xff] %v311_v41   ;;  %v319_v43 = vld [vmem:[%s2463_s25 + $0x248] sm:$0xf] }
  0x28   : > { %316 = vst [vmem:[%s2468_s26 + $0x144] sm:$0xff] %v315_v42   ;;  %320 = vst [vmem:[%s2468_s26 + $0x14c] sm:$0xf] %v319_v43 }
  0x29 PF: > { %p1777_p5 = scmp.ge.s32.totalorder %s2405_s14, 1  ;;  %p510_p6 = scmp.lt.s32.totalorder %s2405_s14, 3 }
  0x2b   : > { %p511_p7 = pnand %p1777_p5, %p510_p6 }
  0x2c   : > { %v2335_v44 = vld [vmem:[%s3008_s1] sm:$0xff] (!%p511_p7)   ;;  %v2407_v45 = vmov (!%p511_p7), 0.0   ;;  %v2336_v46 = vld [vmem:[%s3008_s1 + $0x8] sm:$0xff] (!%p511_p7)   ;;  %s517_s4 = sand.u32 (!%p511_p7), 1, %s2397_s12   ;;  %vm2408_vm0 = vmmov (!%p511_p7), 0   ;;  %v2337_v47 = vld [vmem:[%s3008_s1 + $0x10] sm:$0xff] (!%p511_p7)  }
  0x2d   : > { %514 = sbr.rel (%p511_p7) target bundleno = 452 (0x1c4), region = 69  ;;  %2099 = vmatprep.subr.bf16.mxu0 (!%p511_p7), %v2407_v45  ;;  %2151 = vmatprep.subr.bf16.mxu1 (!%p511_p7), %v2407_v45  ;;  %v2338_v48 = vld [vmem:[%s3008_s1 + $0x18] sm:$0xff] (!%p511_p7)   ;;  %vm654_vm1 = vcmask (!%p511_p7), 523264  }
  0x2e   : > { %2100 = vmatpush3.bf16.msra.mxu0 (!%p511_p7), %v2335_v44  ;;  %2152 = vmatpush3.bf16.msra.mxu1 (!%p511_p7), %v2335_v44  ;;  %s2308_s5 = smul.u32 (!%p511_p7), 336, %s517_s4 }
  0x2f   : > { %2101 = vmatprep.subr.bf16.mxu0 (!%p511_p7), %v2407_v45  ;;  %2153 = vmatprep.subr.bf16.mxu1 (!%p511_p7), %v2407_v45  ;;  %s541_s11 = smul.u32 (!%p511_p7), 21, %s1772_s15 }
  0x30   : > { %2107 = vmatprep.mubr.msk.bf16.mxu0 (!%p511_p7), %vm2408_vm0, %v2407_v45  ;;  %2159 = vmatprep.mubr.msk.bf16.mxu1 (!%p511_p7), %vm2408_vm0, %v2407_v45  ;;  %s2575_s8 = scalar_lea.vmem (!%p511_p7), [#allocation2], %s2308_s5 }
  0x31   : > { %v2339_v49 = vld [vmem:[%s2575_s8] sm:$0xff] (!%p511_p7)   ;;  %v2340_v50 = vld [vmem:[%s2575_s8 + $0x54] sm:$0xff] (!%p511_p7)   ;;  %v2341_v51 = vld [vmem:[%s2575_s8 + $0x8] sm:$0xff] (!%p511_p7)   ;;  %p542_p8 = scmp.lt.s32.totalorder (!%p511_p7), %s541_s11, 41 }
  0x32   : > { %2102 = vmatpush3.bf16.msra.mxu0 (!%p511_p7), %v2336_v46  ;;  %2154 = vmatpush3.bf16.msra.mxu1 (!%p511_p7), %v2336_v46  ;;  %v2342_v52 = vld [vmem:[%s2575_s8 + $0x5c] sm:$0xff] (!%p511_p7)   ;;  %v2343_v53 = vld [vmem:[%s2575_s8 + $0x10] sm:$0xff] (!%p511_p7)   ;;  %v2344_v54 = vld [vmem:[%s2575_s8 + $0x64] sm:$0xff] (!%p511_p7)  }
  0x33   : > { %2103 = vmatprep.subr.bf16.mxu0 (!%p511_p7), %v2407_v45  ;;  %2155 = vmatprep.subr.bf16.mxu1 (!%p511_p7), %v2407_v45  ;;  %v2345_v55 = vld [vmem:[%s2575_s8 + $0x18] sm:$0xff] (!%p511_p7)   ;;  %v2346_v56 = vld [vmem:[%s2575_s8 + $0x6c] sm:$0xff] (!%p511_p7)   ;;  %v2347_v57 = vld [vmem:[%s2575_s8 + $0x20] sm:$0xff] (!%p511_p7)  }
  0x34   : > { %v2348_v58 = vld [vmem:[%s2575_s8 + $0x74] sm:$0xff]   ;;  %v2349_v59 = vld [vmem:[%s2575_s8 + $0x28] sm:$0xff]   ;;  %v2350_v60 = vld [vmem:[%s2575_s8 + $0x7c] sm:$0xff]   ;;  %s3027_s11 = smov (!%p542_p8, %s541_s11), 41 }
  0x35   : > { %v2351_v61 = vld [vmem:[%s2575_s8 + $0x30] sm:$0xff]   ;;  %v2352_v62 = vld [vmem:[%s2575_s8 + $0x84] sm:$0xff]   ;;  %v2353_v63 = vld [vmem:[%s2575_s8 + $0x38] sm:$0xff]   ;;  %s1778_s14 = sshll.u32 %s3027_s11, 2 }
  0x36   : > { %2104 = vmatpush3.bf16.msra.mxu0 %v2337_v47  ;;  %2156 = vmatpush3.bf16.msra.mxu1 %v2337_v47  ;;  %v2354_v0 = vld [vmem:[%s2575_s8 + $0x8c] sm:$0xff]   ;;  %v2355_v1 = vld [vmem:[%s2575_s8 + $0x40] sm:$0xff]   ;;  %v2356_v2 = vld [vmem:[%s2575_s8 + $0x94] sm:$0xff]   ;;  %s2911_s20 = scalar_lea.vmem %s3010_s3, %s1778_s14 }
  0x37   : > { %2105 = vmatprep.subr.bf16.mxu0 %v2407_v45  ;;  %2157 = vmatprep.subr.bf16.mxu1 %v2407_v45  ;;  %v2357_v3 = vld [vmem:[%s2575_s8 + $0x48] sm:$0xff]   ;;  %v2358_v4 = vld [vmem:[%s2575_s8 + $0x9c] sm:$0xff]   ;;  %v2359_v5 = vld [vmem:[%s2575_s8 + $0x50] ss:$0 sps:$4 sm:$0xff]  }
  0x38   : > { %v2360_v6 = vld [vmem:[%s2575_s8 + $0xa4] ss:$0 sps:$4 sm:$0xff]   ;;  %v2361_v7 = vld [vmem:[%s2575_s8 + $0xa8] sm:$0xff]   ;;  %v2362_v8 = vld [vmem:[%s2575_s8 + $0xfc] sm:$0xff]  }
  0x39   : > { %v2363_v9 = vld [vmem:[%s2575_s8 + $0xb0] sm:$0xff]   ;;  %v2364_v10 = vld [vmem:[%s2575_s8 + $0x104] sm:$0xff]   ;;  %v2365_v11 = vld [vmem:[%s2575_s8 + $0xb8] sm:$0xff]  }
  0x3a   : > { %2106 = vmatpush3.bf16.msra.mxu0 %v2338_v48  ;;  %2158 = vmatpush3.bf16.msra.mxu1 %v2338_v48  ;;  %v2366_v12 = vld [vmem:[%s2575_s8 + $0x10c] sm:$0xff]   ;;  %v2367_v13 = vld [vmem:[%s2575_s8 + $0xc0] sm:$0xff]   ;;  %v2368_v14 = vld [vmem:[%s2575_s8 + $0x114] sm:$0xff]  }
  0x3b   : > { %2203 = vmatprep.subr.bf16.mxu0 %v2407_v45  ;;  %2255 = vmatprep.subr.bf16.mxu1 %v2407_v45  ;;  %v2369_v15 = vld [vmem:[%s2575_s8 + $0xc8] sm:$0xff]   ;;  %v2370_v16 = vld [vmem:[%s2575_s8 + $0x11c] sm:$0xff]   ;;  %v2371_v17 = vld [vmem:[%s2575_s8 + $0xd0] sm:$0xff]  }
  0x3c   : > { %v2372_v18 = vld [vmem:[%s2575_s8 + $0x124] sm:$0xff]   ;;  %v2373_v19 = vld [vmem:[%s2575_s8 + $0xd8] sm:$0xff]   ;;  %v2374_v20 = vld [vmem:[%s2575_s8 + $0x12c] sm:$0xff]  }
  0x3d   : > { %2108 = vmatmul.mubr.msk.bf16.vlgmr.msra.gmra.mrb[0].mxu0 %vm654_vm1, %v2339_v49  ;;  %2160 = vmatmul.mubr.msk.bf16.vlgmr.msra.gmra.mrb[0].mxu1 %vm654_vm1, %v2340_v50  ;;  %v2375_v21 = vld [vmem:[%s2575_s8 + $0xe0] sm:$0xff]   ;;  %v2376_v22 = vld [vmem:[%s2575_s8 + $0x134] sm:$0xff]   ;;  %v2377_v23 = vld [vmem:[%s2575_s8 + $0xe8] sm:$0xff]  }
  0x3e   : > { %2204 = vmatpush3.bf16.msra.mxu0 %v2335_v44  ;;  %2256 = vmatpush3.bf16.msra.mxu1 %v2335_v44  ;;  %v2378_v24 = vld [vmem:[%s2575_s8 + $0x13c] sm:$0xff]   ;;  %v2379_v25 = vld [vmem:[%s2575_s8 + $0xf0] sm:$0xff]   ;;  %v2380_v26 = vld [vmem:[%s2575_s8 + $0x144] sm:$0xff]  }
  0x3f   : > { %2111 = vmatprep.mubr.msk.bf16.mxu0 %vm2408_vm0, %v2407_v45  ;;  %2163 = vmatprep.mubr.msk.bf16.mxu1 %vm2408_vm0, %v2407_v45  ;;  %v2381_v27 = vld [vmem:[%s2575_s8 + $0xf8] ss:$0 sps:$4 sm:$0xff]   ;;  %v2382_v28 = vld [vmem:[%s2575_s8 + $0x14c] ss:$0 sps:$4 sm:$0xff]  }
  0x40   : > { %2205 = vmatprep.subr.bf16.mxu0 %v2407_v45  ;;  %2257 = vmatprep.subr.bf16.mxu1 %v2407_v45 }
  0x42   : > { %2206 = vmatpush3.bf16.msra.mxu0 %v2336_v46  ;;  %2258 = vmatpush3.bf16.msra.mxu1 %v2336_v46 }
  0x43   : > { %2207 = vmatprep.subr.bf16.mxu0 %v2407_v45  ;;  %2259 = vmatprep.subr.bf16.mxu1 %v2407_v45 }
  0x45   : > { %2112 = vmatmul.mubr.msk.bf16.gmra.mrb[4].mxu0 %vm654_vm1, %v2341_v51  ;;  %2164 = vmatmul.mubr.msk.bf16.gmra.mrb[4].mxu1 %vm654_vm1, %v2342_v52 }
  0x46   : > { %2115 = vmatprep.mubr.msk.bf16.mxu0 %vm2408_vm0, %v2407_v45  ;;  %2167 = vmatprep.mubr.msk.bf16.mxu1 %vm2408_vm0, %v2407_v45 }
  0x47   : > { %2208 = vmatpush3.bf16.msra.mxu0 %v2337_v47  ;;  %2260 = vmatpush3.bf16.msra.mxu1 %v2337_v47 }
  0x48   : > { %2209 = vmatprep.subr.bf16.mxu0 %v2407_v45  ;;  %2261 = vmatprep.subr.bf16.mxu1 %v2407_v45 }
  0x4b   : > { %2210 = vmatpush3.bf16.msra.mxu0 %v2338_v48  ;;  %2262 = vmatpush3.bf16.msra.mxu1 %v2338_v48 }
  0x4d   : > { %2116 = vmatmul.mubr.msk.bf16.gmra.mrb[8].mxu0 %vm654_vm1, %v2343_v53  ;;  %2168 = vmatmul.mubr.msk.bf16.gmra.mrb[8].mxu1 %vm654_vm1, %v2344_v54 }
  0x4e   : > { %2119 = vmatprep.mubr.msk.bf16.mxu0 %vm2408_vm0, %v2407_v45  ;;  %2171 = vmatprep.mubr.msk.bf16.mxu1 %vm2408_vm0, %v2407_v45 }
  0x55   : > { %2120 = vmatmul.mubr.msk.bf16.gmra.mrb[12].mxu0 %vm654_vm1, %v2345_v55  ;;  %2172 = vmatmul.mubr.msk.bf16.gmra.mrb[12].mxu1 %vm654_vm1, %v2346_v56 }
  0x56   : > { %2123 = vmatprep.mubr.msk.bf16.mxu0 %vm2408_vm0, %v2407_v45  ;;  %2175 = vmatprep.mubr.msk.bf16.mxu1 %vm2408_vm0, %v2407_v45 }
  0x5d   : > { %2124 = vmatmul.mubr.msk.bf16.gmra.mrb[16].mxu0 %vm654_vm1, %v2347_v57  ;;  %2176 = vmatmul.mubr.msk.bf16.gmra.mrb[16].mxu1 %vm654_vm1, %v2348_v58 }
  0x5e   : > { %2127 = vmatprep.mubr.msk.bf16.mxu0 %vm2408_vm0, %v2407_v45  ;;  %2179 = vmatprep.mubr.msk.bf16.mxu1 %vm2408_vm0, %v2407_v45 }
  0x65   : > { %2128 = vmatmul.mubr.msk.bf16.gmra.mrb[20].mxu0 %vm654_vm1, %v2349_v59  ;;  %2180 = vmatmul.mubr.msk.bf16.gmra.mrb[20].mxu1 %vm654_vm1, %v2350_v60 }
  0x66   : > { %2131 = vmatprep.mubr.msk.bf16.mxu0 %vm2408_vm0, %v2407_v45  ;;  %2183 = vmatprep.mubr.msk.bf16.mxu1 %vm2408_vm0, %v2407_v45 }
  0x6d   : > { %2132 = vmatmul.mubr.msk.bf16.gmra.mrb[24].mxu0 %vm654_vm1, %v2351_v61  ;;  %2184 = vmatmul.mubr.msk.bf16.gmra.mrb[24].mxu1 %vm654_vm1, %v2352_v62 }
  0x6e   : > { %2135 = vmatprep.mubr.msk.bf16.mxu0 %vm2408_vm0, %v2407_v45  ;;  %2187 = vmatprep.mubr.msk.bf16.mxu1 %vm2408_vm0, %v2407_v45 }
  0x75   : > { %2136 = vmatmul.mubr.msk.bf16.gmra.mrb[28].mxu0 %vm654_vm1, %v2353_v63  ;;  %2188 = vmatmul.mubr.msk.bf16.gmra.mrb[28].mxu1 %vm654_vm1, %v2354_v0 }
  0x76   : > { %2139 = vmatprep.mubr.msk.bf16.mxu0 %vm2408_vm0, %v2407_v45  ;;  %2191 = vmatprep.mubr.msk.bf16.mxu1 %vm2408_vm0, %v2407_v45 }
  0x7d   : > { %2140 = vmatmul.mubr.msk.bf16.gmra.mrb[32].mxu0 %vm654_vm1, %v2355_v1  ;;  %2192 = vmatmul.mubr.msk.bf16.gmra.mrb[32].mxu1 %vm654_vm1, %v2356_v2 }
  0x7e   : > { %2143 = vmatprep.mubr.msk.bf16.mxu0 %vm2408_vm0, %v2407_v45  ;;  %2195 = vmatprep.mubr.msk.bf16.mxu1 %vm2408_vm0, %v2407_v45 }
  0x85   : > { %2144 = vmatmul.mubr.msk.bf16.gmra.mrb[36].mxu0 %vm654_vm1, %v2357_v3  ;;  %2196 = vmatmul.mubr.msk.bf16.gmra.mrb[36].mxu1 %vm654_vm1, %v2358_v4 }
  0x86   : > { %2147 = vmatprep.mubr.msk.bf16.mxu0 %vm2408_vm0, %v2407_v45  ;;  %2199 = vmatprep.mubr.msk.bf16.mxu1 %vm2408_vm0, %v2407_v45 }
  0x8d   : > { %2148 = vmatmul.mubr.msk.bf16.gmra.mrb[40].mxu0 %vm654_vm1, %v2359_v5  ;;  %2200 = vmatmul.mubr.msk.bf16.gmra.mrb[40].mxu1 %vm654_vm1, %v2360_v6 }
  0x8e   : > { %2211 = vmatprep.mubr.msk.bf16.mxu0 %vm2408_vm0, %v2407_v45  ;;  %2263 = vmatprep.mubr.msk.bf16.mxu1 %vm2408_vm0, %v2407_v45 }
  0x95   : > { %2212 = vmatmul.mubr.msk.bf16.vlgmr.msra.gmra.mrb[44].mxu0 %vm654_vm1, %v2361_v7  ;;  %2264 = vmatmul.mubr.msk.bf16.vlgmr.msra.gmra.mrb[44].mxu1 %vm654_vm1, %v2362_v8 }
  0x96   : > { %2215 = vmatprep.mubr.msk.bf16.mxu0 %vm2408_vm0, %v2407_v45  ;;  %2267 = vmatprep.mubr.msk.bf16.mxu1 %vm2408_vm0, %v2407_v45 }
  0x9d   : > { %2216 = vmatmul.mubr.msk.bf16.gmra.mrb[48].mxu0 %vm654_vm1, %v2363_v9  ;;  %2268 = vmatmul.mubr.msk.bf16.gmra.mrb[48].mxu1 %vm654_vm1, %v2364_v10 }
  0x9e   : > { %2219 = vmatprep.mubr.msk.bf16.mxu0 %vm2408_vm0, %v2407_v45  ;;  %2271 = vmatprep.mubr.msk.bf16.mxu1 %vm2408_vm0, %v2407_v45 }
  0xa5   : > { %2220 = vmatmul.mubr.msk.bf16.gmra.mrb[52].mxu0 %vm654_vm1, %v2365_v11  ;;  %2272 = vmatmul.mubr.msk.bf16.gmra.mrb[52].mxu1 %vm654_vm1, %v2366_v12 }
  0xa6   : > { %2223 = vmatprep.mubr.msk.bf16.mxu0 %vm2408_vm0, %v2407_v45  ;;  %2275 = vmatprep.mubr.msk.bf16.mxu1 %vm2408_vm0, %v2407_v45 }
  0xad   : > { %2224 = vmatmul.mubr.msk.bf16.gmra.mrb[56].mxu0 %vm654_vm1, %v2367_v13  ;;  %2276 = vmatmul.mubr.msk.bf16.gmra.mrb[56].mxu1 %vm654_vm1, %v2368_v14 }
  0xae   : > { %2227 = vmatprep.mubr.msk.bf16.mxu0 %vm2408_vm0, %v2407_v45  ;;  %2279 = vmatprep.mubr.msk.bf16.mxu1 %vm2408_vm0, %v2407_v45 }
  0xb5   : > { %2228 = vmatmul.mubr.msk.bf16.gmra.mrb[60].mxu0 %vm654_vm1, %v2369_v15  ;;  %2280 = vmatmul.mubr.msk.bf16.gmra.mrb[60].mxu1 %vm654_vm1, %v2370_v16 }
  0xb6   : > { %2231 = vmatprep.mubr.msk.bf16.mxu0 %vm2408_vm0, %v2407_v45  ;;  %2283 = vmatprep.mubr.msk.bf16.mxu1 %vm2408_vm0, %v2407_v45 }
  0xbd   : > { %2232 = vmatmul.mubr.msk.bf16.gmra.mrb[64].mxu0 %vm654_vm1, %v2371_v17  ;;  %2284 = vmatmul.mubr.msk.bf16.gmra.mrb[64].mxu1 %vm654_vm1, %v2372_v18 }
  0xbe   : > { %2235 = vmatprep.mubr.msk.bf16.mxu0 %vm2408_vm0, %v2407_v45  ;;  %2287 = vmatprep.mubr.msk.bf16.mxu1 %vm2408_vm0, %v2407_v45 }
  0xc5   : > { %2236 = vmatmul.mubr.msk.bf16.gmra.mrb[68].mxu0 %vm654_vm1, %v2373_v19  ;;  %2288 = vmatmul.mubr.msk.bf16.gmra.mrb[68].mxu1 %vm654_vm1, %v2374_v20 }
  0xc6   : > { %2239 = vmatprep.mubr.msk.bf16.mxu0 %vm2408_vm0, %v2407_v45  ;;  %2291 = vmatprep.mubr.msk.bf16.mxu1 %vm2408_vm0, %v2407_v45 }
  0xcd   : > { %2240 = vmatmul.mubr.msk.bf16.gmra.mrb[72].mxu0 %vm654_vm1, %v2375_v21  ;;  %2292 = vmatmul.mubr.msk.bf16.gmra.mrb[72].mxu1 %vm654_vm1, %v2376_v22 }
  0xce   : > { %2243 = vmatprep.mubr.msk.bf16.mxu0 %vm2408_vm0, %v2407_v45  ;;  %2295 = vmatprep.mubr.msk.bf16.mxu1 %vm2408_vm0, %v2407_v45 }
  0xd5   : > { %2244 = vmatmul.mubr.msk.bf16.gmra.mrb[76].mxu0 %vm654_vm1, %v2377_v23  ;;  %2296 = vmatmul.mubr.msk.bf16.gmra.mrb[76].mxu1 %vm654_vm1, %v2378_v24 }
  0xd6   : > { %2247 = vmatprep.mubr.msk.bf16.mxu0 %vm2408_vm0, %v2407_v45  ;;  %2299 = vmatprep.mubr.msk.bf16.mxu1 %vm2408_vm0, %v2407_v45 }
  0xdd   : > { %2248 = vmatmul.mubr.msk.bf16.gmra.mrb[80].mxu0 %vm654_vm1, %v2379_v25  ;;  %2300 = vmatmul.mubr.msk.bf16.gmra.mrb[80].mxu1 %vm654_vm1, %v2380_v26 }
  0xde   : > { %2251 = vmatprep.mubr.msk.bf16.mxu0 %vm2408_vm0, %v2407_v45  ;;  %2303 = vmatprep.mubr.msk.bf16.mxu1 %vm2408_vm0, %v2407_v45 }
  0xe5   : > { %2252 = vmatmul.mubr.msk.bf16.gmra.mrb[84].mxu0 %vm654_vm1, %v2381_v27  ;;  %2304 = vmatmul.mubr.msk.bf16.gmra.mrb[84].mxu1 %vm654_vm1, %v2382_v28 }
 0x110   : > { %v2764_v29 = vpop.f32.mrb[0].mxu0  ;;  %v2766_v30 = vpop.f32.mrb[0].mxu1 }
 0x111   : > { %v1036_v31 = vmax.f32 %v2764_v29, %v2766_v30  ;;  %v2109_v32 = vpop.f32.mrb[1].mxu0  ;;  %v2161_v33 = vpop.f32.mrb[1].mxu1 }
 0x112   : > { %v2770_v34 = vpop.f32.mrb[2].mxu0  ;;  %v2772_v35 = vpop.f32.mrb[2].mxu1 }
 0x113   : > { %v1037_v36 = vmax.f32 %v2770_v34, %v2772_v35  ;;  %v2110_v37 = vpop.f32.mrb[3].mxu0  ;;  %v2162_v38 = vpop.f32.mrb[3].mxu1 }
 0x118   : > { %v2776_v39 = vpop.f32.mrb[4].mxu0  ;;  %v2778_v40 = vpop.f32.mrb[4].mxu1 }
 0x119   : > { %v1038_v41 = vmax.f32 %v2776_v39, %v2778_v40  ;;  %v2113_v42 = vpop.f32.mrb[5].mxu0  ;;  %v2165_v43 = vpop.f32.mrb[5].mxu1 }
 0x11a   : > { %v2782_v44 = vpop.f32.mrb[6].mxu0  ;;  %v2784_v45 = vpop.f32.mrb[6].mxu1 }
 0x11b   : > { %v1039_v46 = vmax.f32 %v2782_v44, %v2784_v45  ;;  %v2114_v47 = vpop.f32.mrb[7].mxu0  ;;  %v2166_v48 = vpop.f32.mrb[7].mxu1 }
 0x120   : > { %v2788_v49 = vpop.f32.mrb[8].mxu0  ;;  %v2790_v50 = vpop.f32.mrb[8].mxu1 }
 0x121   : > { %v1040_v51 = vmax.f32 %v2788_v49, %v2790_v50  ;;  %v2117_v52 = vpop.f32.mrb[9].mxu0  ;;  %v2169_v53 = vpop.f32.mrb[9].mxu1 }
 0x122   : > { %v2794_v54 = vpop.f32.mrb[10].mxu0  ;;  %v2796_v55 = vpop.f32.mrb[10].mxu1 }
 0x123   : > { %v1041_v56 = vmax.f32 %v2794_v54, %v2796_v55  ;;  %v2118_v57 = vpop.f32.mrb[11].mxu0  ;;  %v2170_v58 = vpop.f32.mrb[11].mxu1 }
 0x128   : > { %v2800_v59 = vpop.f32.mrb[12].mxu0  ;;  %v2802_v60 = vpop.f32.mrb[12].mxu1 }
 0x129   : > { %v1042_v61 = vmax.f32 %v2800_v59, %v2802_v60  ;;  %v2121_v62 = vpop.f32.mrb[13].mxu0  ;;  %v2173_v63 = vpop.f32.mrb[13].mxu1 }
 0x12a   : > { %v2806_v0 = vpop.f32.mrb[14].mxu0  ;;  %v2808_v1 = vpop.f32.mrb[14].mxu1 }
 0x12b   : > { %v1043_v2 = vmax.f32 %v2806_v0, %v2808_v1  ;;  %v2122_v3 = vpop.f32.mrb[15].mxu0  ;;  %v2174_v4 = vpop.f32.mrb[15].mxu1 }
 0x130   : > { %v2812_v5 = vpop.f32.mrb[16].mxu0  ;;  %v2814_v6 = vpop.f32.mrb[16].mxu1 }
 0x131   : > { %v1044_v7 = vmax.f32 %v2812_v5, %v2814_v6  ;;  %v2125_v8 = vpop.f32.mrb[17].mxu0  ;;  %v2177_v9 = vpop.f32.mrb[17].mxu1 }
 0x132   : > { %v2818_v10 = vpop.f32.mrb[18].mxu0  ;;  %v2820_v11 = vpop.f32.mrb[18].mxu1 }
 0x133   : > { %v2126_v13 = vpop.f32.mrb[19].mxu0  ;;  %v2178_v14 = vpop.f32.mrb[19].mxu1 }
 0x138   : > { %v2824_v15 = vpop.f32.mrb[20].mxu0  ;;  %v2826_v16 = vpop.f32.mrb[20].mxu1 }
 0x139   : > { %v2129_v18 = vpop.f32.mrb[21].mxu0  ;;  %v2181_v19 = vpop.f32.mrb[21].mxu1 }
 0x13a   : > { %v2830_v20 = vpop.f32.mrb[22].mxu0  ;;  %v2832_v21 = vpop.f32.mrb[22].mxu1 }
 0x13b   : > { %v2130_v23 = vpop.f32.mrb[23].mxu0  ;;  %v2182_v24 = vpop.f32.mrb[23].mxu1 }
 0x140   : > { %v2836_v25 = vpop.f32.mrb[24].mxu0  ;;  %v2838_v26 = vpop.f32.mrb[24].mxu1 }
 0x141   : > { %v2133_v28 = vpop.f32.mrb[25].mxu0  ;;  %v2185_v32 = vpop.f32.mrb[25].mxu1 }
 0x142   : > { %v2842_v33 = vpop.f32.mrb[26].mxu0  ;;  %v2844_v37 = vpop.f32.mrb[26].mxu1 }
 0x143   : > { %v2134_v42 = vpop.f32.mrb[27].mxu0  ;;  %v2186_v43 = vpop.f32.mrb[27].mxu1 }
 0x148   : > { %v2848_v47 = vpop.f32.mrb[28].mxu0  ;;  %v2850_v48 = vpop.f32.mrb[28].mxu1 }
 0x149   : > { %v2137_v53 = vpop.f32.mrb[29].mxu0  ;;  %v2189_v57 = vpop.f32.mrb[29].mxu1 }
 0x14a   : > { %v2854_v58 = vpop.f32.mrb[30].mxu0  ;;  %v2856_v62 = vpop.f32.mrb[30].mxu1 }
 0x14b   : > { %v2138_v3 = vpop.f32.mrb[31].mxu0  ;;  %v2190_v4 = vpop.f32.mrb[31].mxu1 }
 0x150   : > { %v2860_v8 = vpop.f32.mrb[32].mxu0  ;;  %v2862_v9 = vpop.f32.mrb[32].mxu1 }
 0x151   : > { %v2141_v14 = vpop.f32.mrb[33].mxu0  ;;  %v2193_v18 = vpop.f32.mrb[33].mxu1 }
 0x152   : > { %v2866_v19 = vpop.f32.mrb[34].mxu0  ;;  %v2868_v23 = vpop.f32.mrb[34].mxu1 }
 0x153   : > { %v2142_v28 = vpop.f32.mrb[35].mxu0  ;;  %v2194_v32 = vpop.f32.mrb[35].mxu1 }
 0x158   : > { %v2872_v42 = vpop.f32.mrb[36].mxu0  ;;  %v2874_v43 = vpop.f32.mrb[36].mxu1 }
 0x159   : > { %v2145_v57 = vpop.f32.mrb[37].mxu0  ;;  %v2197_v3 = vpop.f32.mrb[37].mxu1 }
 0x15a   : > { %v2878_v4 = vpop.f32.mrb[38].mxu0  ;;  %v2880_v14 = vpop.f32.mrb[38].mxu1 }
 0x15b   : > { %v2146_v24 = vpop.f32.mrb[39].mxu0  ;;  %v2198_v28 = vpop.f32.mrb[39].mxu1 }
 0x160   : > { %v2884_v32 = vpop.f32.mrb[40].mxu0  ;;  %v2886_v13 = vpop.f32.mrb[40].mxu1 }
 0x161   : > { %v2149_v53 = vpop.f32.mrb[41].mxu0  ;;  %v2201_v57 = vpop.f32.mrb[41].mxu1 }
 0x162   : > { %v805_v52 = vpop.f32.mrb[42].mxu0  ;;  %v1033_v3 = vpop.f32.mrb[42].mxu1  ;;  %v2898_v53 = vld [vmem:[%s3009_s2] ss:$0 sm:$0xff] }
 0x163   : > { %v2150_v38 = vpop.f32.mrb[43].mxu0  ;;  %v2202_v27 = vpop.f32.mrb[43].mxu1 }
 0x168   : > { %v1199_v22 = vpop.f32.mrb[44].mxu0  ;;  %v1448_v18 = vpop.f32.mrb[44].mxu1 }
 0x169   : > { %v1285_v24 = vmax.f32 %v1036_v31, %v1199_v22  ;;  %v2213_v28 = vpop.f32.mrb[45].mxu0  ;;  %v2265_v17 = vpop.f32.mrb[45].mxu1 }
 0x16a   : > { %v1202_v52 = vpop.f32.mrb[46].mxu0  ;;  %v1451_v57 = vpop.f32.mrb[46].mxu1 }
 0x16b   : > { %v1534_v38 = vmax.f32 %v1285_v24, %v1448_v18  ;;  %v1286_v27 = vmax.f32 %v1037_v36, %v1202_v52  ;;  %v2214_v3 = vpop.f32.mrb[47].mxu0  ;;  %v2266_v63 = vpop.f32.mrb[47].mxu1 }
 0x16d   : > { %v1562_v29 = vadd.f32 %v2898_v53, %v1534_v38  ;;  %v1535_v30 = vmax.f32 %v1286_v27, %v1451_v57 }
 0x16f   : > { %v1563_v31 = vadd.f32 %v2898_v53, %v1535_v30  ;;  %v1583_v28 = vmax.f32 %v1562_v29, 0.0 }
 0x170   : > { %v1207_v17 = vpop.f32.mrb[48].mxu0  ;;  %v1456_v22 = vpop.f32.mrb[48].mxu1 }
 0x171   : > { %v1584_v12 = vmax.f32 %v1563_v31, 0.0  ;;  %v1287_v18 = vmax.f32 %v1038_v41, %v1207_v17  ;;  %v2217_v24 = vpop.f32.mrb[49].mxu0  ;;  %v2269_v34 = vpop.f32.mrb[49].mxu1 }
 0x172   : > { %v1210_v35 = vpop.f32.mrb[50].mxu0  ;;  %v1459_v36 = vpop.f32.mrb[50].mxu1 }
 0x173   : > { %v1983_v63 = vpack.c.bf16 %v1584_v12, %v1583_v28  ;;  %v1536_v52 = vmax.f32 %v1287_v18, %v1456_v22  ;;  %v1288_v57 = vmax.f32 %v1039_v46, %v1210_v35  ;;  %v2218_v38 = vpop.f32.mrb[51].mxu0  ;;  %v2270_v27 = vpop.f32.mrb[51].mxu1 }
 0x175   : > { %1984 = vst [vmem:[%s2911_s20] sm:$0xff] %v1983_v63   ;;  %v1564_v39 = vadd.f32 %v2898_v53, %v1536_v52  ;;  %v1537_v40 = vmax.f32 %v1288_v57, %v1459_v36 }
 0x177   : > { %v1565_v41 = vadd.f32 %v2898_v53, %v1537_v40  ;;  %v1585_v30 = vmax.f32 %v1564_v39, 0.0 }
 0x178   : > { %v1215_v3 = vpop.f32.mrb[52].mxu0  ;;  %v1464_v29 = vpop.f32.mrb[52].mxu1 }
 0x179   : > { %v1586_v31 = vmax.f32 %v1565_v41, 0.0  ;;  %v1289_v12 = vmax.f32 %v1040_v51, %v1215_v3  ;;  %v2221_v17 = vpop.f32.mrb[53].mxu0  ;;  %v2273_v44 = vpop.f32.mrb[53].mxu1 }
 0x17a   : > { %v1218_v45 = vpop.f32.mrb[54].mxu0  ;;  %v1467_v46 = vpop.f32.mrb[54].mxu1 }
 0x17b   : > { %v1988_v22 = vpack.c.bf16 %v1586_v31, %v1585_v30  ;;  %v1538_v28 = vmax.f32 %v1289_v12, %v1464_v29  ;;  %v1290_v18 = vmax.f32 %v1041_v56, %v1218_v45  ;;  %v2222_v24 = vpop.f32.mrb[55].mxu0  ;;  %v2274_v34 = vpop.f32.mrb[55].mxu1 }
 0x17d   : > { %2030 = vst [vmem:[%s2911_s20 + $0x8] sm:$0xff] %v1988_v22   ;;  %v1566_v35 = vadd.f32 %v2898_v53, %v1538_v28  ;;  %v1539_v36 = vmax.f32 %v1290_v18, %v1467_v46  ;;  %v3011_v22 = vmax.f32 %v2818_v10, %v2820_v11 }
 0x17f   : > { %v1567_v49 = vadd.f32 %v2898_v53, %v1539_v36  ;;  %v1587_v63 = vmax.f32 %v1566_v35, 0.0 }
 0x180   : > { %v1223_v50 = vpop.f32.mrb[56].mxu0  ;;  %v1472_v51 = vpop.f32.mrb[56].mxu1 }
 0x181   : > { %v1588_v52 = vmax.f32 %v1567_v49, 0.0  ;;  %v1291_v57 = vmax.f32 %v1042_v61, %v1223_v50  ;;  %v2225_v38 = vpop.f32.mrb[57].mxu0  ;;  %v2277_v54 = vpop.f32.mrb[57].mxu1  ;;  %v3012_v50 = vmax.f32 %v2824_v15, %v2826_v16 }
 0x182   : > { %v1226_v55 = vpop.f32.mrb[58].mxu0  ;;  %v1475_v56 = vpop.f32.mrb[58].mxu1  ;;  %v3013_v54 = vmax.f32 %v2830_v20, %v2832_v21 }
 0x183   : > { %v1993_v27 = vpack.c.bf16 %v1588_v52, %v1587_v63  ;;  %v1540_v39 = vmax.f32 %v1291_v57, %v1472_v51  ;;  %v1292_v40 = vmax.f32 %v1043_v2, %v1226_v55  ;;  %v2226_v41 = vpop.f32.mrb[59].mxu0  ;;  %v2278_v3 = vpop.f32.mrb[59].mxu1 }
 0x185   : > { %2031 = vst [vmem:[%s2911_s20 + $0x10] sm:$0xff] %v1993_v27   ;;  %v1568_v29 = vadd.f32 %v2898_v53, %v1540_v39  ;;  %v1541_v30 = vmax.f32 %v1292_v40, %v1475_v56 }
 0x187   : > { %v1569_v59 = vadd.f32 %v2898_v53, %v1541_v30  ;;  %v1589_v31 = vmax.f32 %v1568_v29, 0.0  ;;  %v3014_v30 = vmax.f32 %v2836_v25, %v2838_v26 }
 0x188   : > { %v1231_v60 = vpop.f32.mrb[60].mxu0  ;;  %v1480_v61 = vpop.f32.mrb[60].mxu1 }
 0x189   : > { %v1590_v12 = vmax.f32 %v1569_v59, 0.0  ;;  %v1293_v17 = vmax.f32 %v1044_v7, %v1231_v60  ;;  %v2229_v44 = vpop.f32.mrb[61].mxu0  ;;  %v2281_v0 = vpop.f32.mrb[61].mxu1 }
 0x18a   : > { %v1234_v1 = vpop.f32.mrb[62].mxu0  ;;  %v1483_v2 = vpop.f32.mrb[62].mxu1 }
 0x18b   : > { %v1998_v45 = vpack.c.bf16 %v1590_v12, %v1589_v31  ;;  %v1542_v46 = vmax.f32 %v1293_v17, %v1480_v61  ;;  %v1294_v28 = vmax.f32 %v3011_v22, %v1234_v1  ;;  %v2230_v18 = vpop.f32.mrb[63].mxu0  ;;  %v2282_v24 = vpop.f32.mrb[63].mxu1  ;;  %v3015_v17 = vmax.f32 %v2842_v33, %v2844_v37 }
 0x18c   : > { %v3016_v18 = vmax.f32 %v2848_v47, %v2850_v48 }
 0x18d   : > { %2032 = vst [vmem:[%s2911_s20 + $0x18] sm:$0xff] %v1998_v45   ;;  %v1570_v34 = vadd.f32 %v2898_v53, %v1542_v46  ;;  %v1543_v35 = vmax.f32 %v1294_v28, %v1483_v2 }
 0x18f   : > { %v1571_v5 = vadd.f32 %v2898_v53, %v1543_v35  ;;  %v1591_v36 = vmax.f32 %v1570_v34, 0.0 }
 0x190   : > { %v1239_v6 = vpop.f32.mrb[64].mxu0  ;;  %v1488_v7 = vpop.f32.mrb[64].mxu1 }
 0x191   : > { %v1592_v49 = vmax.f32 %v1571_v5, 0.0  ;;  %v1295_v51 = vmax.f32 %v3012_v50, %v1239_v6  ;;  %v2233_v63 = vpop.f32.mrb[65].mxu0  ;;  %v2285_v10 = vpop.f32.mrb[65].mxu1 }
 0x192   : > { %v1242_v11 = vpop.f32.mrb[66].mxu0  ;;  %v1491_v52 = vpop.f32.mrb[66].mxu1 }
 0x193   : > { %v2003_v57 = vpack.c.bf16 %v1592_v49, %v1591_v36  ;;  %v1544_v38 = vmax.f32 %v1295_v51, %v1488_v7  ;;  %v1296_v55 = vmax.f32 %v3013_v54, %v1242_v11  ;;  %v2234_v56 = vpop.f32.mrb[67].mxu0  ;;  %v2286_v27 = vpop.f32.mrb[67].mxu1  ;;  %v3017_v7 = vmax.f32 %v2854_v58, %v2856_v62 }
 0x195   : > { %2033 = vst [vmem:[%s2911_s20 + $0x20] sm:$0xff] %v2003_v57   ;;  %v1572_v39 = vadd.f32 %v2898_v53, %v1544_v38  ;;  %v1545_v40 = vmax.f32 %v1296_v55, %v1491_v52  ;;  %v3018_v57 = vmax.f32 %v2860_v8, %v2862_v9 }
 0x197   : > { %v1573_v15 = vadd.f32 %v2898_v53, %v1545_v40  ;;  %v1593_v3 = vmax.f32 %v1572_v39, 0.0  ;;  %v3019_v39 = vmax.f32 %v2866_v19, %v2868_v23 }
 0x198   : > { %v1247_v16 = vpop.f32.mrb[68].mxu0  ;;  %v1496_v41 = vpop.f32.mrb[68].mxu1 }
 0x199   : > { %v1594_v29 = vmax.f32 %v1573_v15, 0.0  ;;  %v1297_v59 = vmax.f32 %v3014_v30, %v1247_v16  ;;  %v2237_v60 = vpop.f32.mrb[69].mxu0  ;;  %v2289_v20 = vpop.f32.mrb[69].mxu1 }
 0x19a   : > { %v1250_v21 = vpop.f32.mrb[70].mxu0  ;;  %v1499_v61 = vpop.f32.mrb[70].mxu1  ;;  %v3020_v60 = vmax.f32 %v2872_v42, %v2874_v43 }
 0x19b   : > { %v2008_v31 = vpack.c.bf16 %v1594_v29, %v1593_v3  ;;  %v1546_v12 = vmax.f32 %v1297_v59, %v1496_v41  ;;  %v1298_v44 = vmax.f32 %v3015_v17, %v1250_v21  ;;  %v2238_v0 = vpop.f32.mrb[71].mxu0  ;;  %v2290_v1 = vpop.f32.mrb[71].mxu1  ;;  %v3021_v17 = vmax.f32 %v2878_v4, %v2880_v14 }
 0x19d   : > { %2034 = vst [vmem:[%s2911_s20 + $0x28] sm:$0xff] %v2008_v31   ;;  %v1574_v2 = vadd.f32 %v2898_v53, %v1546_v12  ;;  %v1547_v45 = vmax.f32 %v1298_v44, %v1499_v61 }
 0x19f   : > { %v1575_v25 = vadd.f32 %v2898_v53, %v1547_v45  ;;  %v1595_v22 = vmax.f32 %v1574_v2, 0.0 }
 0x1a0   : > { %v1255_v26 = vpop.f32.mrb[72].mxu0  ;;  %v1504_v46 = vpop.f32.mrb[72].mxu1 }
 0x1a1   : > { %v1596_v28 = vmax.f32 %v1575_v25, 0.0  ;;  %v1299_v24 = vmax.f32 %v3016_v18, %v1255_v26  ;;  %v2241_v34 = vpop.f32.mrb[73].mxu0  ;;  %v2293_v33 = vpop.f32.mrb[73].mxu1 }
 0x1a2   : > { %v1258_v37 = vpop.f32.mrb[74].mxu0  ;;  %v1507_v35 = vpop.f32.mrb[74].mxu1 }
 0x1a3   : > { %v2013_v5 = vpack.c.bf16 %v1596_v28, %v1595_v22  ;;  %v1548_v6 = vmax.f32 %v1299_v24, %v1504_v46  ;;  %v1300_v36 = vmax.f32 %v3017_v7, %v1258_v37  ;;  %v2242_v49 = vpop.f32.mrb[75].mxu0  ;;  %v2294_v50 = vpop.f32.mrb[75].mxu1  ;;  %v3022_v22 = vmax.f32 %v2884_v32, %v2886_v13 }
 0x1a5   : > { %2035 = vst [vmem:[%s2911_s20 + $0x30] sm:$0xff] %v2013_v5   ;;  %v1576_v51 = vadd.f32 %v2898_v53, %v1548_v6  ;;  %v1549_v63 = vmax.f32 %v1300_v36, %v1507_v35 }
 0x1a7   : > { %v1577_v47 = vadd.f32 %v2898_v53, %v1549_v63  ;;  %v1597_v11 = vmax.f32 %v1576_v51, 0.0 }
 0x1a8   : > { %v1263_v48 = vpop.f32.mrb[76].mxu0  ;;  %v1512_v10 = vpop.f32.mrb[76].mxu1 }
 0x1a9   : > { %v1598_v52 = vmax.f32 %v1577_v47, 0.0  ;;  %v1301_v38 = vmax.f32 %v3018_v57, %v1263_v48  ;;  %v2245_v54 = vpop.f32.mrb[77].mxu0  ;;  %v2297_v58 = vpop.f32.mrb[77].mxu1 }
 0x1aa   : > { %v1266_v62 = vpop.f32.mrb[78].mxu0  ;;  %v1515_v55 = vpop.f32.mrb[78].mxu1 }
 0x1ab   : > { %v2018_v56 = vpack.c.bf16 %v1598_v52, %v1597_v11  ;;  %v1550_v27 = vmax.f32 %v1301_v38, %v1512_v10  ;;  %v1302_v40 = vmax.f32 %v3019_v39, %v1266_v62  ;;  %v2246_v15 = vpop.f32.mrb[79].mxu0  ;;  %v2298_v16 = vpop.f32.mrb[79].mxu1 }
 0x1ad   : > { %2036 = vst [vmem:[%s2911_s20 + $0x38] sm:$0xff] %v2018_v56   ;;  %v1578_v41 = vadd.f32 %v2898_v53, %v1550_v27  ;;  %v1551_v3 = vmax.f32 %v1302_v40, %v1515_v55 }
 0x1af   : > { %v1579_v8 = vadd.f32 %v2898_v53, %v1551_v3  ;;  %v1599_v30 = vmax.f32 %v1578_v41, 0.0 }
 0x1b0   : > { %v1271_v9 = vpop.f32.mrb[80].mxu0  ;;  %v1520_v29 = vpop.f32.mrb[80].mxu1 }
 0x1b1   : > { %v1600_v59 = vmax.f32 %v1579_v8, 0.0  ;;  %v1303_v20 = vmax.f32 %v3020_v60, %v1271_v9  ;;  %v2249_v21 = vpop.f32.mrb[81].mxu0  ;;  %v2301_v19 = vpop.f32.mrb[81].mxu1 }
 0x1b2   : > { %v1274_v23 = vpop.f32.mrb[82].mxu0  ;;  %v1523_v61 = vpop.f32.mrb[82].mxu1 }
 0x1b3   : > { %v2023_v31 = vpack.c.bf16 %v1600_v59, %v1599_v30  ;;  %v1552_v12 = vmax.f32 %v1303_v20, %v1520_v29  ;;  %v1304_v44 = vmax.f32 %v3021_v17, %v1274_v23  ;;  %v2250_v0 = vpop.f32.mrb[83].mxu0  ;;  %v2302_v1 = vpop.f32.mrb[83].mxu1 }
 0x1b5   : > { %2037 = vst [vmem:[%s2911_s20 + $0x40] sm:$0xff] %v2023_v31   ;;  %v1580_v2 = vadd.f32 %v2898_v53, %v1552_v12  ;;  %v1553_v45 = vmax.f32 %v1304_v44, %v1523_v61 }
 0x1b7   : > { %v1581_v42 = vadd.f32 %v2898_v53, %v1553_v45  ;;  %v1601_v26 = vmax.f32 %v1580_v2, 0.0 }
 0x1b8   : > { %v1279_v43 = vpop.f32.mrb[84].mxu0  ;;  %v1528_v25 = vpop.f32.mrb[84].mxu1 }
 0x1b9   : > { %v1602_v46 = vmax.f32 %v1581_v42, 0.0  ;;  %v1305_v28 = vmax.f32 %v3022_v22, %v1279_v43  ;;  %v2253_v4 = vpop.f32.mrb[85].mxu0  ;;  %v2305_v14 = vpop.f32.mrb[85].mxu1 }
 0x1ba   : > { %v1282_v18 = vpop.f32.mrb[86].mxu0  ;;  %v1531_v24 = vpop.f32.mrb[86].mxu1 }
 0x1bb   : > { %v2028_v34 = vpack.c.bf16 %v1602_v46, %v1601_v26  ;;  %v1554_v33 = vmax.f32 %v1305_v28, %v1528_v25  ;;  %v2254_v37 = vpop.f32.mrb[87].mxu0  ;;  %v2306_v35 = vpop.f32.mrb[87].mxu1 }
 0x1bd   : > { %2038 = vst [vmem:[%s2911_s20 + $0x48] sm:$0xff] %v2028_v34   ;;  %v1582_v5 = vadd.f32 %v2898_v53, %v1554_v33 }
 0x1bf   : > { %v1603_v6 = vmax.f32 %v1582_v5, 0.0 }
 0x1c1   : > { %v1979_v7 = vpack.c.bf16 %v1603_v6, %v1603_v6 }
 0x1c3   : > { %1709 = vst [vmem:[%s2911_s20 + $0x50] sm:$0xf] %v1979_v7 }
 0x1c4 PF: > { %p10_p9 = scmp.ge.s32.totalorder %s2446_s16, 4   ;;  %s3023_s12 = smov %s2401_s13 }
 0x1c5   : > { %s3024_s13 = smov %s2455_s19  ;;  %s3025_s14 = smov %s2446_s16 }
 0x1c6   :  { %12 = sbr.rel (!%p10_p9) target bundleno = 2 (0x2), region = 111 }

// kernel: cnn_forward.5
= control target key start
LH: loop header
LB: loop body
LE: loop exit
PB: predicated region body
PF: predicated region fallthrough
CT: control target
= control target key end

     0   :  { %vm3916_vm0 = vmmov 0   ;;  %s5130_s1 = inlined_call_operand.vmem [shape: bf16[2688,256], index: 1, kind: input, shape index: {}]   ;;  %s5131_s0 = inlined_call_operand.vmem [shape: bf16[8,2688], index: 0, kind: input, shape index: {}]   ;;  %s5132_s3 = inlined_call_operand.vmem [shape: bf16[256,128], index: 3, kind: input, shape index: {}]   ;;  %s5133_s5 = inlined_call_operand.vmem [shape: bf16[128,128], index: 5, kind: input, shape index: {}]   ;;  %s5134_s2 = inlined_call_operand.vmem [shape: f32[1,256], index: 2, kind: input, shape index: {}]   ;;  %s5135_s4 = inlined_call_operand.vmem [shape: f32[1,128], index: 4, kind: input, shape index: {}]   ;;  %s5136_s6 = inlined_call_operand.vmem [shape: f32[1,128], index: 6, kind: input, shape index: {}]   ;;  %s5137_s7 = inlined_call_operand.vmem [shape: f32[8,128], index: 7, kind: output, shape index: {}]  }
   0x1   :  { %v3365_v0 = vld [vmem:[%s5130_s1 + $0x4] ss:$8 sps:$4 sm:$0xff]   ;;  %v3369_v2 = vld [vmem:[%s5130_s1] ss:$8 sps:$4 sm:$0xff]   ;;  %v3371_v4 = vld [vmem:[%s5130_s1 + $0x14] ss:$8 sps:$4 sm:$0xff]  }
   0x2   :  { %v3367_v1 = vld [vmem:[%s5130_s1 + $0x504] ss:$8 sps:$4 sm:$0xff]   ;;  %2140 = vmatprep.subr.bf16.mxu1 %v3365_v0  ;;  %v3370_v3 = vld [vmem:[%s5130_s1 + $0x500] ss:$8 sps:$4 sm:$0xff]   ;;  %v3373_v5 = vld [vmem:[%s5130_s1 + $0x514] ss:$8 sps:$4 sm:$0xff]  }
   0x3   :  { %2345 = vmatprep.subr.bf16.mxu0 %v3367_v1  ;;  %2141 = vmatpush1.bf16.msra.mxu1 %v3369_v2  ;;  %v3375_v6 = vld [vmem:[%s5130_s1 + $0x10] ss:$8 sps:$4 sm:$0xff]   ;;  %v3377_v8 = vld [vmem:[%s5130_s1 + $0x24] ss:$8 sps:$4 sm:$0xff]   ;;  %v3381_v10 = vld [vmem:[%s5130_s1 + $0x20] ss:$8 sps:$4 sm:$0xff]  }
   0x4   :  { %2346 = vmatpush1.bf16.msra.mxu0 %v3370_v3  ;;  %2142 = vmatprep.subr.bf16.mxu1 %v3371_v4  ;;  %v3376_v7 = vld [vmem:[%s5130_s1 + $0x510] ss:$8 sps:$4 sm:$0xff]   ;;  %v3379_v9 = vld [vmem:[%s5130_s1 + $0x524] ss:$8 sps:$4 sm:$0xff]   ;;  %v3382_v11 = vld [vmem:[%s5130_s1 + $0x520] ss:$8 sps:$4 sm:$0xff]  }
   0x5   :  { %2347 = vmatprep.subr.bf16.mxu0 %v3373_v5  ;;  %v3383_v12 = vld [vmem:[%s5130_s1 + $0x34] ss:$8 sps:$4 sm:$0xff]   ;;  %v3387_v14 = vld [vmem:[%s5130_s1 + $0x30] ss:$8 sps:$4 sm:$0xff]   ;;  %v3389_v16 = vld [vmem:[%s5130_s1 + $0x44] ss:$8 sps:$4 sm:$0xff]  }
   0x6   :  { %v3385_v13 = vld [vmem:[%s5130_s1 + $0x534] ss:$8 sps:$4 sm:$0xff]   ;;  %v3388_v15 = vld [vmem:[%s5130_s1 + $0x530] ss:$8 sps:$4 sm:$0xff]   ;;  %v3391_v17 = vld [vmem:[%s5130_s1 + $0x544] ss:$8 sps:$4 sm:$0xff]  }
   0x7   :  { %2143 = vmatpush1.bf16.msra.mxu1 %v3375_v6  ;;  %v3393_v18 = vld [vmem:[%s5130_s1 + $0x40] ss:$8 sps:$4 sm:$0xff]   ;;  %v3395_v20 = vld [vmem:[%s5130_s1 + $0x54] ss:$8 sps:$4 sm:$0xff]   ;;  %v3399_v22 = vld [vmem:[%s5130_s1 + $0x50] ss:$8 sps:$4 sm:$0xff]  }
   0x8   :  { %2348 = vmatpush1.bf16.msra.mxu0 %v3376_v7  ;;  %2144 = vmatprep.subr.bf16.mxu1 %v3377_v8  ;;  %v3394_v19 = vld [vmem:[%s5130_s1 + $0x540] ss:$8 sps:$4 sm:$0xff]   ;;  %v3397_v21 = vld [vmem:[%s5130_s1 + $0x554] ss:$8 sps:$4 sm:$0xff]   ;;  %v3400_v23 = vld [vmem:[%s5130_s1 + $0x550] ss:$8 sps:$4 sm:$0xff]  }
   0x9   :  { %2349 = vmatprep.subr.bf16.mxu0 %v3379_v9  ;;  %v3401_v24 = vld [vmem:[%s5130_s1 + $0x64] ss:$8 sps:$4 sm:$0xff]   ;;  %v3405_v26 = vld [vmem:[%s5130_s1 + $0x60] ss:$8 sps:$4 sm:$0xff]   ;;  %v3407_v28 = vld [vmem:[%s5130_s1 + $0x74] ss:$8 sps:$4 sm:$0xff]  }
   0xa   :  { %v3403_v25 = vld [vmem:[%s5130_s1 + $0x564] ss:$8 sps:$4 sm:$0xff]   ;;  %v3406_v27 = vld [vmem:[%s5130_s1 + $0x560] ss:$8 sps:$4 sm:$0xff]   ;;  %v3409_v29 = vld [vmem:[%s5130_s1 + $0x574] ss:$8 sps:$4 sm:$0xff]  }
   0xb   :  { %2145 = vmatpush1.bf16.msra.mxu1 %v3381_v10  ;;  %v3411_v30 = vld [vmem:[%s5130_s1 + $0x70] ss:$8 sps:$4 sm:$0xff]   ;;  %v3413_v32 = vld [vmem:[%s5130_s1 + $0x84] ss:$8 sps:$4 sm:$0xff]   ;;  %v3417_v34 = vld [vmem:[%s5130_s1 + $0x80] ss:$8 sps:$4 sm:$0xff]  }
   0xc   :  { %2350 = vmatpush1.bf16.msra.mxu0 %v3382_v11  ;;  %2146 = vmatprep.subr.bf16.mxu1 %v3383_v12  ;;  %v3412_v31 = vld [vmem:[%s5130_s1 + $0x570] ss:$8 sps:$4 sm:$0xff]   ;;  %v3415_v33 = vld [vmem:[%s5130_s1 + $0x584] ss:$8 sps:$4 sm:$0xff]   ;;  %v3418_v35 = vld [vmem:[%s5130_s1 + $0x580] ss:$8 sps:$4 sm:$0xff]  }
   0xd   :  { %2351 = vmatprep.subr.bf16.mxu0 %v3385_v13  ;;  %v3419_v36 = vld [vmem:[%s5130_s1 + $0x94] ss:$8 sps:$4 sm:$0xff]   ;;  %v3423_v38 = vld [vmem:[%s5130_s1 + $0x90] ss:$8 sps:$4 sm:$0xff]   ;;  %v3425_v40 = vld [vmem:[%s5130_s1 + $0xa4] ss:$8 sps:$4 sm:$0xff]  }
   0xe   :  { %v3421_v37 = vld [vmem:[%s5130_s1 + $0x594] ss:$8 sps:$4 sm:$0xff]   ;;  %v3424_v39 = vld [vmem:[%s5130_s1 + $0x590] ss:$8 sps:$4 sm:$0xff]   ;;  %v3427_v41 = vld [vmem:[%s5130_s1 + $0x5a4] ss:$8 sps:$4 sm:$0xff]  }
   0xf   :  { %2147 = vmatpush1.bf16.msra.mxu1 %v3387_v14  ;;  %v3429_v42 = vld [vmem:[%s5130_s1 + $0xa0] ss:$8 sps:$4 sm:$0xff]   ;;  %v3431_v44 = vld [vmem:[%s5130_s1 + $0xb4] ss:$8 sps:$4 sm:$0xff]   ;;  %v3435_v47 = vld [vmem:[%s5130_s1 + $0xb0] ss:$8 sps:$4 sm:$0xff]  }
  0x10   :  { %2352 = vmatpush1.bf16.msra.mxu0 %v3388_v15  ;;  %2148 = vmatprep.subr.bf16.mxu1 %v3389_v16  ;;  %v3430_v43 = vld [vmem:[%s5130_s1 + $0x5a0] ss:$8 sps:$4 sm:$0xff]   ;;  %v3433_v45 = vld [vmem:[%s5130_s1 + $0x5b4] ss:$8 sps:$4 sm:$0xff]   ;;  %v3436_v49 = vld [vmem:[%s5130_s1 + $0x5b0] ss:$8 sps:$4 sm:$0xff]  }
  0x11   :  { %2353 = vmatprep.subr.bf16.mxu0 %v3391_v17  ;;  %v27_v46 = vld [vmem:[%s5131_s0] sm:$0xff]  ;;  %v32_v50 = vld [vmem:[%s5131_s0 + $0x28] sm:$0xff]  ;;  %v3443_v56 = vld [vmem:[%s5130_s1 + $0xd4] ss:$8 sps:$4 sm:$0xff]  }
  0x12   :  { %v2889_v48 = vcombine.high %v27_v46, %v27_v46  ;;  %v3437_v51 = vld [vmem:[%s5130_s1 + $0xc4] ss:$8 sps:$4 sm:$0xff]   ;;  %v2899_v53 = vcombine.high %v32_v50, %v32_v50  ;;  %v3441_v54 = vld [vmem:[%s5130_s1 + $0xc0] ss:$8 sps:$4 sm:$0xff]   ;;  %v3445_v57 = vld [vmem:[%s5130_s1 + $0x5d4] ss:$8 sps:$4 sm:$0xff]   ;;  %v2888_v6 = vcombine.low %v27_v46, %v27_v46  ;;  %v2898_v7 = vcombine.low %v32_v50, %v32_v50 }
  0x13   :  { %2149 = vmatpush1.bf16.msra.mxu1 %v3393_v18  ;;  %v3439_v52 = vld [vmem:[%s5130_s1 + $0x5c4] ss:$8 sps:$4 sm:$0xff]   ;;  %v3442_v55 = vld [vmem:[%s5130_s1 + $0x5c0] ss:$8 sps:$4 sm:$0xff]   ;;  %v3447_v58 = vld [vmem:[%s5130_s1 + $0xd0] ss:$8 sps:$4 sm:$0xff]  }
  0x14   :  { %2354 = vmatpush1.bf16.msra.mxu0 %v3394_v19  ;;  %2150 = vmatprep.subr.bf16.mxu1 %v3395_v20  ;;  %v3448_v59 = vld [vmem:[%s5130_s1 + $0x5d0] ss:$8 sps:$4 sm:$0xff]   ;;  %v3449_v60 = vld [vmem:[%s5130_s1 + $0xe4] ss:$8 sps:$4 sm:$0xff]   ;;  %v3453_v62 = vld [vmem:[%s5130_s1 + $0xe0] ss:$8 sps:$4 sm:$0xff]  }
  0x15   :  { %2355 = vmatprep.subr.bf16.mxu0 %v3397_v21  ;;  %2172 = vmatprep.mubr.bf16.mxu1 %v2889_v48  ;;  %v3451_v61 = vld [vmem:[%s5130_s1 + $0x5e4] ss:$8 sps:$4 sm:$0xff]   ;;  %v3454_v63 = vld [vmem:[%s5130_s1 + $0x5e0] ss:$8 sps:$4 sm:$0xff]   ;;  %v3455_v0 = vld [vmem:[%s5130_s1 + $0xf4] ss:$8 sps:$4 sm:$0xff]  }
  0x16   :  { %2377 = vmatprep.mubr.bf16.mxu0 %v2899_v53  ;;  %v3457_v1 = vld [vmem:[%s5130_s1 + $0x5f4] ss:$8 sps:$4 sm:$0xff]   ;;  %v3459_v2 = vld [vmem:[%s5130_s1 + $0xf0] ss:$8 sps:$4 sm:$0xff]   ;;  %v3465_v4 = vld [vmem:[%s5130_s1 + $0x104] ss:$8 sps:$4 sm:$0xff]  }
  0x17   :  { %2151 = vmatpush1.bf16.msra.mxu1 %v3399_v22  ;;  %v3460_v3 = vld [vmem:[%s5130_s1 + $0x5f0] ss:$8 sps:$4 sm:$0xff]   ;;  %v3470_v5 = vld [vmem:[%s5130_s1 + $0x604] ss:$8 sps:$4 sm:$0xff]   ;;  %v3463_v8 = vld [vmem:[%s5130_s1 + $0x100] ss:$8 sps:$4 sm:$0xff]  }
  0x18   :  { %2356 = vmatpush1.bf16.msra.mxu0 %v3400_v23  ;;  %2152 = vmatprep.subr.bf16.mxu1 %v3401_v24  ;;  %v3468_v9 = vld [vmem:[%s5130_s1 + $0x600] ss:$8 sps:$4 sm:$0xff]   ;;  %v3473_v10 = vld [vmem:[%s5130_s1 + $0x114] ss:$8 sps:$4 sm:$0xff]   ;;  %v3471_v12 = vld [vmem:[%s5130_s1 + $0x110] ss:$8 sps:$4 sm:$0xff]  }
  0x19   :  { %2357 = vmatprep.subr.bf16.mxu0 %v3403_v25  ;;  %v3476_v11 = vld [vmem:[%s5130_s1 + $0x614] ss:$8 sps:$4 sm:$0xff]   ;;  %v3474_v13 = vld [vmem:[%s5130_s1 + $0x610] ss:$8 sps:$4 sm:$0xff]   ;;  %v3479_v14 = vld [vmem:[%s5130_s1 + $0x124] ss:$8 sps:$4 sm:$0xff]  }
  0x1a   :  { %v3482_v15 = vld [vmem:[%s5130_s1 + $0x624] ss:$8 sps:$4 sm:$0xff]   ;;  %v3477_v16 = vld [vmem:[%s5130_s1 + $0x120] ss:$8 sps:$4 sm:$0xff]   ;;  %v3485_v18 = vld [vmem:[%s5130_s1 + $0x134] ss:$8 sps:$4 sm:$0xff]  }
  0x1b   :  { %2153 = vmatpush1.bf16.msra.mxu1 %v3405_v26  ;;  %v3480_v17 = vld [vmem:[%s5130_s1 + $0x620] ss:$8 sps:$4 sm:$0xff]   ;;  %v3488_v19 = vld [vmem:[%s5130_s1 + $0x634] ss:$8 sps:$4 sm:$0xff]   ;;  %v3483_v20 = vld [vmem:[%s5130_s1 + $0x130] ss:$8 sps:$4 sm:$0xff]  }
  0x1c   :  { %2358 = vmatpush1.bf16.msra.mxu0 %v3406_v27  ;;  %2154 = vmatprep.subr.bf16.mxu1 %v3407_v28  ;;  %v3486_v21 = vld [vmem:[%s5130_s1 + $0x630] ss:$8 sps:$4 sm:$0xff]   ;;  %v3491_v22 = vld [vmem:[%s5130_s1 + $0x144] ss:$8 sps:$4 sm:$0xff]   ;;  %v3489_v24 = vld [vmem:[%s5130_s1 + $0x140] ss:$8 sps:$4 sm:$0xff]  }
  0x1d   :  { %2359 = vmatprep.subr.bf16.mxu0 %v3409_v29  ;;  %v3494_v23 = vld [vmem:[%s5130_s1 + $0x644] ss:$8 sps:$4 sm:$0xff]   ;;  %v3492_v25 = vld [vmem:[%s5130_s1 + $0x640] ss:$8 sps:$4 sm:$0xff]   ;;  %v3497_v26 = vld [vmem:[%s5130_s1 + $0x154] ss:$8 sps:$4 sm:$0xff]  }
  0x1e   :  { %v3500_v27 = vld [vmem:[%s5130_s1 + $0x654] ss:$8 sps:$4 sm:$0xff]   ;;  %v3495_v28 = vld [vmem:[%s5130_s1 + $0x150] ss:$8 sps:$4 sm:$0xff]   ;;  %v3527_v50 = vld [vmem:[%s5130_s1 + $0x1a4] ss:$8 sps:$4 sm:$0xff]  }
  0x1f   :  { %2155 = vmatpush1.bf16.msra.mxu1 %v3411_v30  ;;  %v3498_v29 = vld [vmem:[%s5130_s1 + $0x650] ss:$8 sps:$4 sm:$0xff]   ;;  %v3503_v30 = vld [vmem:[%s5130_s1 + $0x164] ss:$8 sps:$4 sm:$0xff]   ;;  %v3521_v46 = vld [vmem:[%s5130_s1 + $0x194] ss:$8 sps:$4 sm:$0xff]  }
  0x20   :  { %2360 = vmatpush1.bf16.msra.mxu0 %v3412_v31  ;;  %2156 = vmatprep.subr.bf16.mxu1 %v3413_v32  ;;  %v3506_v31 = vld [vmem:[%s5130_s1 + $0x664] ss:$8 sps:$4 sm:$0xff]   ;;  %v3519_v48 = vld [vmem:[%s5130_s1 + $0x190] ss:$8 sps:$4 sm:$0xff]   ;;  %v3528_v53 = vld [vmem:[%s5130_s1 + $0x6a0] ss:$8 sps:$4 sm:$0xff]  }
  0x21   :  { %2361 = vmatprep.subr.bf16.mxu0 %v3415_v33  ;;  %v4236_v32 = vld [vmem:[%s5131_s0 + $0x8] sm:$0xff] }
  0x22   :  { %v3501_v33 = vld [vmem:[%s5130_s1 + $0x160] ss:$8 sps:$4 sm:$0xff]  }
  0x23   :  { %2157 = vmatpush1.bf16.msra.mxu1 %v3417_v34  ;;  %v3504_v34 = vld [vmem:[%s5130_s1 + $0x660] ss:$8 sps:$4 sm:$0xff]  }
  0x24   :  { %2362 = vmatpush1.bf16.msra.mxu0 %v3418_v35  ;;  %2158 = vmatprep.subr.bf16.mxu1 %v3419_v36  ;;  %v2891_v35 = vcombine.high %v4236_v32, %v4236_v32  ;;  %v4249_v36 = vld [vmem:[%s5131_s0 + $0x30] sm:$0xff] }
  0x25   :  { %2363 = vmatprep.subr.bf16.mxu0 %v3421_v37  ;;  %v3509_v37 = vld [vmem:[%s5130_s1 + $0x174] ss:$8 sps:$4 sm:$0xff]  }
  0x27   :  { %2159 = vmatpush1.bf16.msra.mxu1 %v3423_v38  ;;  %v2901_v38 = vcombine.high %v4249_v36, %v4249_v36 }
  0x28   :  { %2364 = vmatpush1.bf16.msra.mxu0 %v3424_v39  ;;  %2160 = vmatprep.subr.bf16.mxu1 %v3425_v40  ;;  %v3512_v39 = vld [vmem:[%s5130_s1 + $0x674] ss:$8 sps:$4 sm:$0xff]   ;;  %v3507_v40 = vld [vmem:[%s5130_s1 + $0x170] ss:$8 sps:$4 sm:$0xff]  }
  0x29   :  { %2365 = vmatprep.subr.bf16.mxu0 %v3427_v41  ;;  %v3510_v41 = vld [vmem:[%s5130_s1 + $0x670] ss:$8 sps:$4 sm:$0xff]  }
  0x2b   :  { %2161 = vmatpush1.bf16.msra.mxu1 %v3429_v42  ;;  %v3515_v42 = vld [vmem:[%s5130_s1 + $0x184] ss:$8 sps:$4 sm:$0xff]  }
  0x2c   :  { %2366 = vmatpush1.bf16.msra.mxu0 %v3430_v43  ;;  %2162 = vmatprep.subr.bf16.mxu1 %v3431_v44  ;;  %v3518_v43 = vld [vmem:[%s5130_s1 + $0x684] ss:$8 sps:$4 sm:$0xff]   ;;  %v3513_v44 = vld [vmem:[%s5130_s1 + $0x180] ss:$8 sps:$4 sm:$0xff]  }
  0x2d   :  { %2367 = vmatprep.subr.bf16.mxu0 %v3433_v45  ;;  %v3516_v45 = vld [vmem:[%s5130_s1 + $0x680] ss:$8 sps:$4 sm:$0xff]  }
  0x2f   :  { %2163 = vmatpush1.bf16.msra.mxu1 %v3435_v47  ;;  %v3524_v47 = vld [vmem:[%s5130_s1 + $0x694] ss:$8 sps:$4 sm:$0xff]  }
  0x30   :  { %2368 = vmatpush1.bf16.msra.mxu0 %v3436_v49  ;;  %2164 = vmatprep.subr.bf16.mxu1 %v3437_v51  ;;  %v3522_v49 = vld [vmem:[%s5130_s1 + $0x690] ss:$8 sps:$4 sm:$0xff]   ;;  %v3530_v51 = vld [vmem:[%s5130_s1 + $0x6a4] ss:$8 sps:$4 sm:$0xff]  }
  0x31   :  { %2369 = vmatprep.subr.bf16.mxu0 %v3439_v52  ;;  %v3525_v52 = vld [vmem:[%s5130_s1 + $0x1a0] ss:$8 sps:$4 sm:$0xff]  }
  0x33   :  { %2165 = vmatpush1.bf16.msra.mxu1 %v3441_v54  ;;  %v3533_v54 = vld [vmem:[%s5130_s1 + $0x1b4] ss:$8 sps:$4 sm:$0xff]  }
  0x34   :  { %2370 = vmatpush1.bf16.msra.mxu0 %v3442_v55  ;;  %2166 = vmatprep.subr.bf16.mxu1 %v3443_v56  ;;  %v3536_v55 = vld [vmem:[%s5130_s1 + $0x6b4] ss:$8 sps:$4 sm:$0xff]   ;;  %v3531_v56 = vld [vmem:[%s5130_s1 + $0x1b0] ss:$8 sps:$4 sm:$0xff]  }
  0x35   :  { %2371 = vmatprep.subr.bf16.mxu0 %v3445_v57  ;;  %v3534_v57 = vld [vmem:[%s5130_s1 + $0x6b0] ss:$8 sps:$4 sm:$0xff]  }
  0x37   :  { %2167 = vmatpush1.bf16.msra.mxu1 %v3447_v58  ;;  %v3539_v58 = vld [vmem:[%s5130_s1 + $0x1c4] ss:$8 sps:$4 sm:$0xff]  }
  0x38   :  { %2372 = vmatpush1.bf16.msra.mxu0 %v3448_v59  ;;  %2168 = vmatprep.subr.bf16.mxu1 %v3449_v60  ;;  %v3542_v59 = vld [vmem:[%s5130_s1 + $0x6c4] ss:$8 sps:$4 sm:$0xff]   ;;  %v3537_v60 = vld [vmem:[%s5130_s1 + $0x1c0] ss:$8 sps:$4 sm:$0xff]  }
  0x39   :  { %2373 = vmatprep.subr.bf16.mxu0 %v3451_v61  ;;  %v3540_v61 = vld [vmem:[%s5130_s1 + $0x6c0] ss:$8 sps:$4 sm:$0xff]  }
  0x3b   :  { %2169 = vmatpush1.bf16.msra.mxu1 %v3453_v62  ;;  %v3545_v62 = vld [vmem:[%s5130_s1 + $0x1d4] ss:$8 sps:$4 sm:$0xff]  }
  0x3c   :  { %2374 = vmatpush1.bf16.msra.mxu0 %v3454_v63  ;;  %2170 = vmatprep.subr.bf16.mxu1 %v3455_v0  ;;  %v3548_v63 = vld [vmem:[%s5130_s1 + $0x6d4] ss:$8 sps:$4 sm:$0xff]   ;;  %v3543_v0 = vld [vmem:[%s5130_s1 + $0x1d0] ss:$8 sps:$4 sm:$0xff]  }
  0x3d   :  { %2375 = vmatprep.subr.bf16.mxu0 %v3457_v1  ;;  %v3546_v1 = vld [vmem:[%s5130_s1 + $0x6d0] ss:$8 sps:$4 sm:$0xff]  }
  0x3f   :  { %2171 = vmatpush1.bf16.msra.mxu1 %v3459_v2  ;;  %v3551_v2 = vld [vmem:[%s5130_s1 + $0x1e4] ss:$8 sps:$4 sm:$0xff]  }
  0x40   :  { %2376 = vmatpush1.bf16.msra.mxu0 %v3460_v3  ;;  %2181 = vmatprep.subr.bf16.mxu1 %v3465_v4  ;;  %v3554_v3 = vld [vmem:[%s5130_s1 + $0x6e4] ss:$8 sps:$4 sm:$0xff]   ;;  %v3549_v4 = vld [vmem:[%s5130_s1 + $0x1e0] ss:$8 sps:$4 sm:$0xff]  }
  0x41   :  { %2386 = vmatprep.subr.bf16.mxu0 %v3470_v5  ;;  %v3552_v5 = vld [vmem:[%s5130_s1 + $0x6e0] ss:$8 sps:$4 sm:$0xff]  }
  0x42   :  { %2173 = vmatmul.mubr.bf16.vlgmr.msra.gmra.mrb[0].mxu1 %v2888_v6  ;;  %v3557_v6 = vld [vmem:[%s5130_s1 + $0x1f4] ss:$8 sps:$4 sm:$0xff]  }
  0x43   :  { %2378 = vmatmul.mubr.bf16.vlgmr.msra.gmra.mrb[0].mxu0 %v2898_v7  ;;  %2182 = vmatpush1.bf16.msra.mxu1 %v3463_v8  ;;  %v3560_v7 = vld [vmem:[%s5130_s1 + $0x6f4] ss:$8 sps:$4 sm:$0xff]   ;;  %v3555_v8 = vld [vmem:[%s5130_s1 + $0x1f0] ss:$8 sps:$4 sm:$0xff]  }
  0x44   :  { %2387 = vmatpush1.bf16.msra.mxu0 %v3468_v9  ;;  %2183 = vmatprep.subr.bf16.mxu1 %v3473_v10  ;;  %v3558_v9 = vld [vmem:[%s5130_s1 + $0x6f0] ss:$8 sps:$4 sm:$0xff]   ;;  %v3565_v10 = vld [vmem:[%s5130_s1 + $0x204] ss:$8 sps:$4 sm:$0xff]  }
  0x45   :  { %2388 = vmatprep.subr.bf16.mxu0 %v3476_v11  ;;  %2213 = vmatprep.mubr.bf16.mxu1 %v2891_v35  ;;  %v3570_v11 = vld [vmem:[%s5130_s1 + $0x704] ss:$8 sps:$4 sm:$0xff]   ;;  %v3592_v35 = vld [vmem:[%s5130_s1 + $0x740] ss:$8 sps:$4 sm:$0xff]  }
  0x46   :  { %2418 = vmatprep.mubr.bf16.mxu0 %v2901_v38  ;;  %v3595_v38 = vld [vmem:[%s5130_s1 + $0x250] ss:$8 sps:$4 sm:$0xff]  }
  0x47   :  { %2184 = vmatpush1.bf16.msra.mxu1 %v3471_v12  ;;  %v2890_v12 = vcombine.low %v4236_v32, %v4236_v32  ;;  %v3591_v32 = vld [vmem:[%s5130_s1 + $0x244] ss:$8 sps:$4 sm:$0xff]  }
  0x48   :  { %2389 = vmatpush1.bf16.msra.mxu0 %v3474_v13  ;;  %2185 = vmatprep.subr.bf16.mxu1 %v3479_v14  ;;  %v3563_v13 = vld [vmem:[%s5130_s1 + $0x200] ss:$8 sps:$4 sm:$0xff]   ;;  %v2900_v14 = vcombine.low %v4249_v36, %v4249_v36  ;;  %v3597_v36 = vld [vmem:[%s5130_s1 + $0x254] ss:$8 sps:$4 sm:$0xff]  }
  0x49   :  { %2390 = vmatprep.subr.bf16.mxu0 %v3482_v15  ;;  %v3568_v15 = vld [vmem:[%s5130_s1 + $0x700] ss:$8 sps:$4 sm:$0xff]  }
  0x4b   :  { %2186 = vmatpush1.bf16.msra.mxu1 %v3477_v16  ;;  %v3573_v16 = vld [vmem:[%s5130_s1 + $0x214] ss:$8 sps:$4 sm:$0xff]  }
  0x4c   :  { %2391 = vmatpush1.bf16.msra.mxu0 %v3480_v17  ;;  %2187 = vmatprep.subr.bf16.mxu1 %v3485_v18  ;;  %v3576_v17 = vld [vmem:[%s5130_s1 + $0x714] ss:$8 sps:$4 sm:$0xff]  }
  0x4d   :  { %2392 = vmatprep.subr.bf16.mxu0 %v3488_v19  ;;  %v4386_v18 = vld [vmem:[%s5131_s0 + $0x10] sm:$0xff] }
  0x4e   :  { %v2893_v19 = vcombine.high %v4386_v18, %v4386_v18 }
  0x4f   :  { %2188 = vmatpush1.bf16.msra.mxu1 %v3483_v20  ;;  %v4393_v20 = vld [vmem:[%s5131_s0 + $0x38] sm:$0xff] }
  0x50   :  { %2393 = vmatpush1.bf16.msra.mxu0 %v3486_v21  ;;  %2189 = vmatprep.subr.bf16.mxu1 %v3491_v22  ;;  %v3571_v21 = vld [vmem:[%s5130_s1 + $0x210] ss:$8 sps:$4 sm:$0xff]  }
  0x51   :  { %2394 = vmatprep.subr.bf16.mxu0 %v3494_v23  ;;  %v3574_v22 = vld [vmem:[%s5130_s1 + $0x710] ss:$8 sps:$4 sm:$0xff]   ;;  %v2903_v23 = vcombine.high %v4393_v20, %v4393_v20 }
  0x53   :  { %2190 = vmatpush1.bf16.msra.mxu1 %v3489_v24  ;;  %v3579_v24 = vld [vmem:[%s5130_s1 + $0x224] ss:$8 sps:$4 sm:$0xff]  }
  0x54   :  { %2395 = vmatpush1.bf16.msra.mxu0 %v3492_v25  ;;  %2191 = vmatprep.subr.bf16.mxu1 %v3497_v26  ;;  %v3582_v25 = vld [vmem:[%s5130_s1 + $0x724] ss:$8 sps:$4 sm:$0xff]   ;;  %v3577_v26 = vld [vmem:[%s5130_s1 + $0x220] ss:$8 sps:$4 sm:$0xff]  }
  0x55   :  { %2396 = vmatprep.subr.bf16.mxu0 %v3500_v27  ;;  %v3580_v27 = vld [vmem:[%s5130_s1 + $0x720] ss:$8 sps:$4 sm:$0xff]  }
  0x57   :  { %2192 = vmatpush1.bf16.msra.mxu1 %v3495_v28  ;;  %v3585_v28 = vld [vmem:[%s5130_s1 + $0x234] ss:$8 sps:$4 sm:$0xff]  }
  0x58   :  { %2397 = vmatpush1.bf16.msra.mxu0 %v3498_v29  ;;  %2193 = vmatprep.subr.bf16.mxu1 %v3503_v30  ;;  %v3588_v29 = vld [vmem:[%s5130_s1 + $0x734] ss:$8 sps:$4 sm:$0xff]   ;;  %v3583_v30 = vld [vmem:[%s5130_s1 + $0x230] ss:$8 sps:$4 sm:$0xff]  }
  0x59   :  { %2398 = vmatprep.subr.bf16.mxu0 %v3506_v31  ;;  %v3586_v31 = vld [vmem:[%s5130_s1 + $0x730] ss:$8 sps:$4 sm:$0xff]  }
  0x5b   :  { %2194 = vmatpush1.bf16.msra.mxu1 %v3501_v33  ;;  %v3594_v33 = vld [vmem:[%s5130_s1 + $0x744] ss:$8 sps:$4 sm:$0xff]  }
  0x5c   :  { %2399 = vmatpush1.bf16.msra.mxu0 %v3504_v34  ;;  %2195 = vmatprep.subr.bf16.mxu1 %v3509_v37  ;;  %v3589_v34 = vld [vmem:[%s5130_s1 + $0x240] ss:$8 sps:$4 sm:$0xff]   ;;  %v3600_v37 = vld [vmem:[%s5130_s1 + $0x754] ss:$8 sps:$4 sm:$0xff]  }
  0x5d   :  { %2400 = vmatprep.subr.bf16.mxu0 %v3512_v39  ;;  %v3598_v39 = vld [vmem:[%s5130_s1 + $0x750] ss:$8 sps:$4 sm:$0xff]  }
  0x5f   :  { %2196 = vmatpush1.bf16.msra.mxu1 %v3507_v40  ;;  %v3603_v40 = vld [vmem:[%s5130_s1 + $0x264] ss:$8 sps:$4 sm:$0xff]  }
  0x60   :  { %2401 = vmatpush1.bf16.msra.mxu0 %v3510_v41  ;;  %2197 = vmatprep.subr.bf16.mxu1 %v3515_v42  ;;  %v3606_v41 = vld [vmem:[%s5130_s1 + $0x764] ss:$8 sps:$4 sm:$0xff]   ;;  %v3601_v42 = vld [vmem:[%s5130_s1 + $0x260] ss:$8 sps:$4 sm:$0xff]  }
  0x61   :  { %2402 = vmatprep.subr.bf16.mxu0 %v3518_v43  ;;  %v3604_v43 = vld [vmem:[%s5130_s1 + $0x760] ss:$8 sps:$4 sm:$0xff]  }
  0x63   :  { %2198 = vmatpush1.bf16.msra.mxu1 %v3513_v44  ;;  %v3609_v44 = vld [vmem:[%s5130_s1 + $0x274] ss:$8 sps:$4 sm:$0xff]  }
  0x64   :  { %2403 = vmatpush1.bf16.msra.mxu0 %v3516_v45  ;;  %2199 = vmatprep.subr.bf16.mxu1 %v3521_v46  ;;  %v3612_v45 = vld [vmem:[%s5130_s1 + $0x774] ss:$8 sps:$4 sm:$0xff]   ;;  %v3607_v46 = vld [vmem:[%s5130_s1 + $0x270] ss:$8 sps:$4 sm:$0xff]  }
  0x65   :  { %2404 = vmatprep.subr.bf16.mxu0 %v3524_v47  ;;  %v3610_v47 = vld [vmem:[%s5130_s1 + $0x770] ss:$8 sps:$4 sm:$0xff]  }
  0x67   :  { %2200 = vmatpush1.bf16.msra.mxu1 %v3519_v48  ;;  %v3615_v48 = vld [vmem:[%s5130_s1 + $0x284] ss:$8 sps:$4 sm:$0xff]  }
  0x68   :  { %2405 = vmatpush1.bf16.msra.mxu0 %v3522_v49  ;;  %2201 = vmatprep.subr.bf16.mxu1 %v3527_v50  ;;  %v3618_v49 = vld [vmem:[%s5130_s1 + $0x784] ss:$8 sps:$4 sm:$0xff]   ;;  %v3613_v50 = vld [vmem:[%s5130_s1 + $0x280] ss:$8 sps:$4 sm:$0xff]  }
  0x69   :  { %2406 = vmatprep.subr.bf16.mxu0 %v3530_v51  ;;  %v3616_v51 = vld [vmem:[%s5130_s1 + $0x780] ss:$8 sps:$4 sm:$0xff]  }
  0x6b   :  { %2202 = vmatpush1.bf16.msra.mxu1 %v3525_v52  ;;  %v3621_v52 = vld [vmem:[%s5130_s1 + $0x294] ss:$8 sps:$4 sm:$0xff]  }
  0x6c   :  { %2407 = vmatpush1.bf16.msra.mxu0 %v3528_v53  ;;  %2203 = vmatprep.subr.bf16.mxu1 %v3533_v54  ;;  %v3624_v53 = vld [vmem:[%s5130_s1 + $0x794] ss:$8 sps:$4 sm:$0xff]   ;;  %v3619_v54 = vld [vmem:[%s5130_s1 + $0x290] ss:$8 sps:$4 sm:$0xff]  }
  0x6d   :  { %2408 = vmatprep.subr.bf16.mxu0 %v3536_v55  ;;  %v3622_v55 = vld [vmem:[%s5130_s1 + $0x790] ss:$8 sps:$4 sm:$0xff]  }
  0x6f   :  { %2204 = vmatpush1.bf16.msra.mxu1 %v3531_v56  ;;  %v3627_v56 = vld [vmem:[%s5130_s1 + $0x2a4] ss:$8 sps:$4 sm:$0xff]  }
  0x70   :  { %2409 = vmatpush1.bf16.msra.mxu0 %v3534_v57  ;;  %2205 = vmatprep.subr.bf16.mxu1 %v3539_v58  ;;  %v3630_v57 = vld [vmem:[%s5130_s1 + $0x7a4] ss:$8 sps:$4 sm:$0xff]   ;;  %v3625_v58 = vld [vmem:[%s5130_s1 + $0x2a0] ss:$8 sps:$4 sm:$0xff]  }
  0x71   :  { %2410 = vmatprep.subr.bf16.mxu0 %v3542_v59  ;;  %v3628_v59 = vld [vmem:[%s5130_s1 + $0x7a0] ss:$8 sps:$4 sm:$0xff]  }
  0x73   :  { %2206 = vmatpush1.bf16.msra.mxu1 %v3537_v60  ;;  %v3633_v60 = vld [vmem:[%s5130_s1 + $0x2b4] ss:$8 sps:$4 sm:$0xff]  }
  0x74   :  { %2411 = vmatpush1.bf16.msra.mxu0 %v3540_v61  ;;  %2207 = vmatprep.subr.bf16.mxu1 %v3545_v62  ;;  %v3636_v61 = vld [vmem:[%s5130_s1 + $0x7b4] ss:$8 sps:$4 sm:$0xff]   ;;  %v3631_v62 = vld [vmem:[%s5130_s1 + $0x2b0] ss:$8 sps:$4 sm:$0xff]  }
  0x75   :  { %2412 = vmatprep.subr.bf16.mxu0 %v3548_v63  ;;  %v3634_v63 = vld [vmem:[%s5130_s1 + $0x7b0] ss:$8 sps:$4 sm:$0xff]  }
  0x77   :  { %2208 = vmatpush1.bf16.msra.mxu1 %v3543_v0  ;;  %v3639_v0 = vld [vmem:[%s5130_s1 + $0x2c4] ss:$8 sps:$4 sm:$0xff]  }
  0x78   :  { %2413 = vmatpush1.bf16.msra.mxu0 %v3546_v1  ;;  %2209 = vmatprep.subr.bf16.mxu1 %v3551_v2  ;;  %v3642_v1 = vld [vmem:[%s5130_s1 + $0x7c4] ss:$8 sps:$4 sm:$0xff]   ;;  %v3637_v2 = vld [vmem:[%s5130_s1 + $0x2c0] ss:$8 sps:$4 sm:$0xff]  }
  0x79   :  { %2414 = vmatprep.subr.bf16.mxu0 %v3554_v3  ;;  %v3640_v3 = vld [vmem:[%s5130_s1 + $0x7c0] ss:$8 sps:$4 sm:$0xff]  }
  0x7b   :  { %2210 = vmatpush1.bf16.msra.mxu1 %v3549_v4  ;;  %v3645_v4 = vld [vmem:[%s5130_s1 + $0x2d4] ss:$8 sps:$4 sm:$0xff]  }
  0x7c   :  { %2415 = vmatpush1.bf16.msra.mxu0 %v3552_v5  ;;  %2211 = vmatprep.subr.bf16.mxu1 %v3557_v6  ;;  %v3648_v5 = vld [vmem:[%s5130_s1 + $0x7d4] ss:$8 sps:$4 sm:$0xff]   ;;  %v3643_v6 = vld [vmem:[%s5130_s1 + $0x2d0] ss:$8 sps:$4 sm:$0xff]  }
  0x7d   :  { %2416 = vmatprep.subr.bf16.mxu0 %v3560_v7  ;;  %v3646_v7 = vld [vmem:[%s5130_s1 + $0x7d0] ss:$8 sps:$4 sm:$0xff]  }
  0x7f   :  { %2212 = vmatpush1.bf16.msra.mxu1 %v3555_v8  ;;  %v3651_v8 = vld [vmem:[%s5130_s1 + $0x2e4] ss:$8 sps:$4 sm:$0xff]  }
  0x80   :  { %2417 = vmatpush1.bf16.msra.mxu0 %v3558_v9  ;;  %2222 = vmatprep.subr.bf16.mxu1 %v3565_v10  ;;  %v3654_v9 = vld [vmem:[%s5130_s1 + $0x7e4] ss:$8 sps:$4 sm:$0xff]   ;;  %v3649_v10 = vld [vmem:[%s5130_s1 + $0x2e0] ss:$8 sps:$4 sm:$0xff]  }
  0x81   :  { %2427 = vmatprep.subr.bf16.mxu0 %v3570_v11  ;;  %v3652_v11 = vld [vmem:[%s5130_s1 + $0x7e0] ss:$8 sps:$4 sm:$0xff]  }
  0x82   :  { %2214 = vmatmul.mubr.bf16.vlgmr.msra.gmra.mrb[0].mxu1 %v2890_v12  ;;  %v3657_v12 = vld [vmem:[%s5130_s1 + $0x2f4] ss:$8 sps:$4 sm:$0xff]  }
  0x83   :  { %2419 = vmatmul.mubr.bf16.vlgmr.msra.gmra.mrb[0].mxu0 %v2900_v14  ;;  %2223 = vmatpush1.bf16.msra.mxu1 %v3563_v13  ;;  %v3660_v13 = vld [vmem:[%s5130_s1 + $0x7f4] ss:$8 sps:$4 sm:$0xff]   ;;  %v3655_v14 = vld [vmem:[%s5130_s1 + $0x2f0] ss:$8 sps:$4 sm:$0xff]  }
  0x84   :  { %2428 = vmatpush1.bf16.msra.mxu0 %v3568_v15  ;;  %2224 = vmatprep.subr.bf16.mxu1 %v3573_v16  ;;  %v3658_v15 = vld [vmem:[%s5130_s1 + $0x7f0] ss:$8 sps:$4 sm:$0xff]   ;;  %v3665_v16 = vld [vmem:[%s5130_s1 + $0x304] ss:$8 sps:$4 sm:$0xff]  }
  0x85   :  { %2429 = vmatprep.subr.bf16.mxu0 %v3576_v17  ;;  %2254 = vmatprep.mubr.bf16.mxu1 %v2893_v19  ;;  %v3670_v17 = vld [vmem:[%s5130_s1 + $0x804] ss:$8 sps:$4 sm:$0xff]   ;;  %v3663_v19 = vld [vmem:[%s5130_s1 + $0x300] ss:$8 sps:$4 sm:$0xff]  }
  0x86   :  { %2459 = vmatprep.mubr.bf16.mxu0 %v2903_v23  ;;  %v2902_v23 = vcombine.low %v4393_v20, %v4393_v20 }
  0x87   :  { %2225 = vmatpush1.bf16.msra.mxu1 %v3571_v21  ;;  %v3668_v21 = vld [vmem:[%s5130_s1 + $0x800] ss:$8 sps:$4 sm:$0xff]  }
  0x88   :  { %2430 = vmatpush1.bf16.msra.mxu0 %v3574_v22  ;;  %2226 = vmatprep.subr.bf16.mxu1 %v3579_v24  ;;  %v2892_v22 = vcombine.low %v4386_v18, %v4386_v18  ;;  %v4590_v24 = vld [vmem:[%s5131_s0 + $0x18] sm:$0xff] }
  0x89   :  { %2431 = vmatprep.subr.bf16.mxu0 %v3582_v25  ;;  %v4595_v25 = vld [vmem:[%s5131_s0 + $0x40] sm:$0xff]  ;;  %v3676_v18 = vld [vmem:[%s5130_s1 + $0x814] ss:$8 sps:$4 sm:$0xff]   ;;  %v2895_v20 = vcombine.high %v4590_v24, %v4590_v24 }
  0x8b   :  { %2227 = vmatpush1.bf16.msra.mxu1 %v3577_v26  ;;  %v3673_v26 = vld [vmem:[%s5130_s1 + $0x314] ss:$8 sps:$4 sm:$0xff]  }
  0x8c   :  { %2432 = vmatpush1.bf16.msra.mxu0 %v3580_v27  ;;  %2228 = vmatprep.subr.bf16.mxu1 %v3585_v28  ;;  %v2905_v27 = vcombine.high %v4595_v25, %v4595_v25  ;;  %v3671_v28 = vld [vmem:[%s5130_s1 + $0x310] ss:$8 sps:$4 sm:$0xff]  }
  0x8d   :  { %2433 = vmatprep.subr.bf16.mxu0 %v3588_v29  ;;  %v3674_v29 = vld [vmem:[%s5130_s1 + $0x810] ss:$8 sps:$4 sm:$0xff]  }
  0x8f   :  { %2229 = vmatpush1.bf16.msra.mxu1 %v3583_v30  ;;  %v3679_v30 = vld [vmem:[%s5130_s1 + $0x324] ss:$8 sps:$4 sm:$0xff]  }
  0x90   :  { %2434 = vmatpush1.bf16.msra.mxu0 %v3586_v31  ;;  %2230 = vmatprep.subr.bf16.mxu1 %v3591_v32  ;;  %v3682_v31 = vld [vmem:[%s5130_s1 + $0x824] ss:$8 sps:$4 sm:$0xff]   ;;  %v3677_v32 = vld [vmem:[%s5130_s1 + $0x320] ss:$8 sps:$4 sm:$0xff]  }
  0x91   :  { %2435 = vmatprep.subr.bf16.mxu0 %v3594_v33  ;;  %v3680_v33 = vld [vmem:[%s5130_s1 + $0x820] ss:$8 sps:$4 sm:$0xff]  }
  0x93   :  { %2231 = vmatpush1.bf16.msra.mxu1 %v3589_v34  ;;  %v3685_v34 = vld [vmem:[%s5130_s1 + $0x334] ss:$8 sps:$4 sm:$0xff]  }
  0x94   :  { %2436 = vmatpush1.bf16.msra.mxu0 %v3592_v35  ;;  %2232 = vmatprep.subr.bf16.mxu1 %v3597_v36  ;;  %v3688_v35 = vld [vmem:[%s5130_s1 + $0x834] ss:$8 sps:$4 sm:$0xff]   ;;  %v3683_v36 = vld [vmem:[%s5130_s1 + $0x330] ss:$8 sps:$4 sm:$0xff]  }
  0x95   :  { %2437 = vmatprep.subr.bf16.mxu0 %v3600_v37  ;;  %v3686_v37 = vld [vmem:[%s5130_s1 + $0x830] ss:$8 sps:$4 sm:$0xff]  }
  0x97   :  { %2233 = vmatpush1.bf16.msra.mxu1 %v3595_v38  ;;  %v3691_v38 = vld [vmem:[%s5130_s1 + $0x344] ss:$8 sps:$4 sm:$0xff]  }
  0x98   :  { %2438 = vmatpush1.bf16.msra.mxu0 %v3598_v39  ;;  %2234 = vmatprep.subr.bf16.mxu1 %v3603_v40  ;;  %v3694_v39 = vld [vmem:[%s5130_s1 + $0x844] ss:$8 sps:$4 sm:$0xff]   ;;  %v3689_v40 = vld [vmem:[%s5130_s1 + $0x340] ss:$8 sps:$4 sm:$0xff]  }
  0x99   :  { %2439 = vmatprep.subr.bf16.mxu0 %v3606_v41  ;;  %v3692_v41 = vld [vmem:[%s5130_s1 + $0x840] ss:$8 sps:$4 sm:$0xff]  }
  0x9b   :  { %2235 = vmatpush1.bf16.msra.mxu1 %v3601_v42  ;;  %v3697_v42 = vld [vmem:[%s5130_s1 + $0x354] ss:$8 sps:$4 sm:$0xff]  }
  0x9c   :  { %2440 = vmatpush1.bf16.msra.mxu0 %v3604_v43  ;;  %2236 = vmatprep.subr.bf16.mxu1 %v3609_v44  ;;  %v3700_v43 = vld [vmem:[%s5130_s1 + $0x854] ss:$8 sps:$4 sm:$0xff]   ;;  %v3695_v44 = vld [vmem:[%s5130_s1 + $0x350] ss:$8 sps:$4 sm:$0xff]  }
  0x9d   :  { %2441 = vmatprep.subr.bf16.mxu0 %v3612_v45  ;;  %v3698_v45 = vld [vmem:[%s5130_s1 + $0x850] ss:$8 sps:$4 sm:$0xff]  }
  0x9f   :  { %2237 = vmatpush1.bf16.msra.mxu1 %v3607_v46  ;;  %v3703_v46 = vld [vmem:[%s5130_s1 + $0x364] ss:$8 sps:$4 sm:$0xff]  }
  0xa0   :  { %2442 = vmatpush1.bf16.msra.mxu0 %v3610_v47  ;;  %2238 = vmatprep.subr.bf16.mxu1 %v3615_v48  ;;  %v3706_v47 = vld [vmem:[%s5130_s1 + $0x864] ss:$8 sps:$4 sm:$0xff]   ;;  %v3701_v48 = vld [vmem:[%s5130_s1 + $0x360] ss:$8 sps:$4 sm:$0xff]  }
  0xa1   :  { %2443 = vmatprep.subr.bf16.mxu0 %v3618_v49  ;;  %v3704_v49 = vld [vmem:[%s5130_s1 + $0x860] ss:$8 sps:$4 sm:$0xff]  }
  0xa3   :  { %2239 = vmatpush1.bf16.msra.mxu1 %v3613_v50  ;;  %v3709_v50 = vld [vmem:[%s5130_s1 + $0x374] ss:$8 sps:$4 sm:$0xff]  }
  0xa4   :  { %2444 = vmatpush1.bf16.msra.mxu0 %v3616_v51  ;;  %2240 = vmatprep.subr.bf16.mxu1 %v3621_v52  ;;  %v3712_v51 = vld [vmem:[%s5130_s1 + $0x874] ss:$8 sps:$4 sm:$0xff]   ;;  %v3707_v52 = vld [vmem:[%s5130_s1 + $0x370] ss:$8 sps:$4 sm:$0xff]  }
  0xa5   :  { %2445 = vmatprep.subr.bf16.mxu0 %v3624_v53  ;;  %v3710_v53 = vld [vmem:[%s5130_s1 + $0x870] ss:$8 sps:$4 sm:$0xff]  }
  0xa7   :  { %2241 = vmatpush1.bf16.msra.mxu1 %v3619_v54  ;;  %v3715_v54 = vld [vmem:[%s5130_s1 + $0x384] ss:$8 sps:$4 sm:$0xff]  }
  0xa8   :  { %2446 = vmatpush1.bf16.msra.mxu0 %v3622_v55  ;;  %2242 = vmatprep.subr.bf16.mxu1 %v3627_v56  ;;  %v3718_v55 = vld [vmem:[%s5130_s1 + $0x884] ss:$8 sps:$4 sm:$0xff]   ;;  %v3713_v56 = vld [vmem:[%s5130_s1 + $0x380] ss:$8 sps:$4 sm:$0xff]  }
  0xa9   :  { %2447 = vmatprep.subr.bf16.mxu0 %v3630_v57  ;;  %v3716_v57 = vld [vmem:[%s5130_s1 + $0x880] ss:$8 sps:$4 sm:$0xff]  }
  0xab   :  { %2243 = vmatpush1.bf16.msra.mxu1 %v3625_v58  ;;  %v3721_v58 = vld [vmem:[%s5130_s1 + $0x394] ss:$8 sps:$4 sm:$0xff]  }
  0xac   :  { %2448 = vmatpush1.bf16.msra.mxu0 %v3628_v59  ;;  %2244 = vmatprep.subr.bf16.mxu1 %v3633_v60  ;;  %v3724_v59 = vld [vmem:[%s5130_s1 + $0x894] ss:$8 sps:$4 sm:$0xff]   ;;  %v3719_v60 = vld [vmem:[%s5130_s1 + $0x390] ss:$8 sps:$4 sm:$0xff]  }
  0xad   :  { %2449 = vmatprep.subr.bf16.mxu0 %v3636_v61  ;;  %v3722_v61 = vld [vmem:[%s5130_s1 + $0x890] ss:$8 sps:$4 sm:$0xff]  }
  0xaf   :  { %2245 = vmatpush1.bf16.msra.mxu1 %v3631_v62  ;;  %v3727_v62 = vld [vmem:[%s5130_s1 + $0x3a4] ss:$8 sps:$4 sm:$0xff]  }
  0xb0   :  { %2450 = vmatpush1.bf16.msra.mxu0 %v3634_v63  ;;  %2246 = vmatprep.subr.bf16.mxu1 %v3639_v0  ;;  %v3730_v63 = vld [vmem:[%s5130_s1 + $0x8a4] ss:$8 sps:$4 sm:$0xff]   ;;  %v3725_v0 = vld [vmem:[%s5130_s1 + $0x3a0] ss:$8 sps:$4 sm:$0xff]  }
  0xb1   :  { %2451 = vmatprep.subr.bf16.mxu0 %v3642_v1  ;;  %v3728_v1 = vld [vmem:[%s5130_s1 + $0x8a0] ss:$8 sps:$4 sm:$0xff]  }
  0xb3   :  { %2247 = vmatpush1.bf16.msra.mxu1 %v3637_v2  ;;  %v3733_v2 = vld [vmem:[%s5130_s1 + $0x3b4] ss:$8 sps:$4 sm:$0xff]  }
  0xb4   :  { %2452 = vmatpush1.bf16.msra.mxu0 %v3640_v3  ;;  %2248 = vmatprep.subr.bf16.mxu1 %v3645_v4  ;;  %v3736_v3 = vld [vmem:[%s5130_s1 + $0x8b4] ss:$8 sps:$4 sm:$0xff]   ;;  %v3731_v4 = vld [vmem:[%s5130_s1 + $0x3b0] ss:$8 sps:$4 sm:$0xff]  }
  0xb5   :  { %2453 = vmatprep.subr.bf16.mxu0 %v3648_v5  ;;  %v3734_v5 = vld [vmem:[%s5130_s1 + $0x8b0] ss:$8 sps:$4 sm:$0xff]  }
  0xb7   :  { %2249 = vmatpush1.bf16.msra.mxu1 %v3643_v6  ;;  %v3739_v6 = vld [vmem:[%s5130_s1 + $0x3c4] ss:$8 sps:$4 sm:$0xff]  }
  0xb8   :  { %2454 = vmatpush1.bf16.msra.mxu0 %v3646_v7  ;;  %2250 = vmatprep.subr.bf16.mxu1 %v3651_v8  ;;  %v3742_v7 = vld [vmem:[%s5130_s1 + $0x8c4] ss:$8 sps:$4 sm:$0xff]   ;;  %v3737_v8 = vld [vmem:[%s5130_s1 + $0x3c0] ss:$8 sps:$4 sm:$0xff]  }
  0xb9   :  { %2455 = vmatprep.subr.bf16.mxu0 %v3654_v9  ;;  %v3740_v9 = vld [vmem:[%s5130_s1 + $0x8c0] ss:$8 sps:$4 sm:$0xff]  }
  0xbb   :  { %2251 = vmatpush1.bf16.msra.mxu1 %v3649_v10  ;;  %v3745_v10 = vld [vmem:[%s5130_s1 + $0x3d4] ss:$8 sps:$4 sm:$0xff]  }
  0xbc   :  { %2456 = vmatpush1.bf16.msra.mxu0 %v3652_v11  ;;  %2252 = vmatprep.subr.bf16.mxu1 %v3657_v12  ;;  %v3748_v11 = vld [vmem:[%s5130_s1 + $0x8d4] ss:$8 sps:$4 sm:$0xff]   ;;  %v3743_v12 = vld [vmem:[%s5130_s1 + $0x3d0] ss:$8 sps:$4 sm:$0xff]  }
  0xbd   :  { %2457 = vmatprep.subr.bf16.mxu0 %v3660_v13  ;;  %v3746_v13 = vld [vmem:[%s5130_s1 + $0x8d0] ss:$8 sps:$4 sm:$0xff]  }
  0xbf   :  { %2253 = vmatpush1.bf16.msra.mxu1 %v3655_v14  ;;  %v3751_v14 = vld [vmem:[%s5130_s1 + $0x3e4] ss:$8 sps:$4 sm:$0xff]  }
  0xc0   :  { %2458 = vmatpush1.bf16.msra.mxu0 %v3658_v15  ;;  %2263 = vmatprep.subr.bf16.mxu1 %v3665_v16  ;;  %v3754_v15 = vld [vmem:[%s5130_s1 + $0x8e4] ss:$8 sps:$4 sm:$0xff]   ;;  %v3749_v16 = vld [vmem:[%s5130_s1 + $0x3e0] ss:$8 sps:$4 sm:$0xff]  }
  0xc1   :  { %2468 = vmatprep.subr.bf16.mxu0 %v3670_v17  ;;  %v3752_v17 = vld [vmem:[%s5130_s1 + $0x8e0] ss:$8 sps:$4 sm:$0xff]  }
  0xc2   :  { %2255 = vmatmul.mubr.bf16.vlgmr.msra.gmra.mrb[0].mxu1 %v2892_v22  ;;  %v3755_v22 = vld [vmem:[%s5130_s1 + $0x3f0] ss:$8 sps:$4 sm:$0xff]  }
  0xc3   :  { %2460 = vmatmul.mubr.bf16.vlgmr.msra.gmra.mrb[0].mxu0 %v2902_v23  ;;  %2264 = vmatpush1.bf16.msra.mxu1 %v3663_v19  ;;  %v3757_v19 = vld [vmem:[%s5130_s1 + $0x3f4] ss:$8 sps:$4 sm:$0xff]   ;;  %v3758_v23 = vld [vmem:[%s5130_s1 + $0x8f0] ss:$8 sps:$4 sm:$0xff]  }
  0xc4   :  { %2469 = vmatpush1.bf16.msra.mxu0 %v3668_v21  ;;  %2265 = vmatprep.subr.bf16.mxu1 %v3673_v26  ;;  %v3760_v21 = vld [vmem:[%s5130_s1 + $0x8f4] ss:$8 sps:$4 sm:$0xff]   ;;  %v3765_v26 = vld [vmem:[%s5130_s1 + $0x404] ss:$8 sps:$4 sm:$0xff]  }
  0xc5   :  { %2470 = vmatprep.subr.bf16.mxu0 %v3676_v18  ;;  %2295 = vmatprep.mubr.bf16.mxu1 %v2895_v20  ;;  %v3770_v18 = vld [vmem:[%s5130_s1 + $0x904] ss:$8 sps:$4 sm:$0xff]   ;;  %v2894_v20 = vcombine.low %v4590_v24, %v4590_v24  ;;  %v3768_v24 = vld [vmem:[%s5130_s1 + $0x900] ss:$8 sps:$4 sm:$0xff]  }
  0xc6   :  { %2500 = vmatprep.mubr.bf16.mxu0 %v2905_v27  ;;  %v2904_v27 = vcombine.low %v4595_v25, %v4595_v25  ;;  %v3773_v25 = vld [vmem:[%s5130_s1 + $0x414] ss:$8 sps:$4 sm:$0xff]  }
  0xc7   :  { %2266 = vmatpush1.bf16.msra.mxu1 %v3671_v28  ;;  %v4794_v28 = vld [vmem:[%s5131_s0 + $0x20] sm:$0xff] }
  0xc8   :  { %2471 = vmatpush1.bf16.msra.mxu0 %v3674_v29  ;;  %2267 = vmatprep.subr.bf16.mxu1 %v3679_v30  ;;  %v4799_v29 = vld [vmem:[%s5131_s0 + $0x48] sm:$0xff] }
  0xc9   :  { %2472 = vmatprep.subr.bf16.mxu0 %v3682_v31  ;;  %v3763_v30 = vld [vmem:[%s5130_s1 + $0x400] ss:$8 sps:$4 sm:$0xff]   ;;  %v3776_v31 = vld [vmem:[%s5130_s1 + $0x914] ss:$8 sps:$4 sm:$0xff]  }
  0xcb   :  { %2268 = vmatpush1.bf16.msra.mxu1 %v3677_v32  ;;  %v2897_v32 = vcombine.high %v4794_v28, %v4794_v28 }
  0xcc   :  { %2473 = vmatpush1.bf16.msra.mxu0 %v3680_v33  ;;  %2269 = vmatprep.subr.bf16.mxu1 %v3685_v34  ;;  %v2907_v33 = vcombine.high %v4799_v29, %v4799_v29  ;;  %v3771_v34 = vld [vmem:[%s5130_s1 + $0x410] ss:$8 sps:$4 sm:$0xff]  }
  0xcd   :  { %2474 = vmatprep.subr.bf16.mxu0 %v3688_v35  ;;  %v3774_v35 = vld [vmem:[%s5130_s1 + $0x910] ss:$8 sps:$4 sm:$0xff]  }
  0xcf   :  { %2270 = vmatpush1.bf16.msra.mxu1 %v3683_v36  ;;  %v3779_v36 = vld [vmem:[%s5130_s1 + $0x424] ss:$8 sps:$4 sm:$0xff]  }
  0xd0   :  { %2475 = vmatpush1.bf16.msra.mxu0 %v3686_v37  ;;  %2271 = vmatprep.subr.bf16.mxu1 %v3691_v38  ;;  %v3782_v37 = vld [vmem:[%s5130_s1 + $0x924] ss:$8 sps:$4 sm:$0xff]   ;;  %v3777_v38 = vld [vmem:[%s5130_s1 + $0x420] ss:$8 sps:$4 sm:$0xff]  }
  0xd1   :  { %2476 = vmatprep.subr.bf16.mxu0 %v3694_v39  ;;  %v3780_v39 = vld [vmem:[%s5130_s1 + $0x920] ss:$8 sps:$4 sm:$0xff]  }
  0xd3   :  { %2272 = vmatpush1.bf16.msra.mxu1 %v3689_v40  ;;  %v3785_v40 = vld [vmem:[%s5130_s1 + $0x434] ss:$8 sps:$4 sm:$0xff]  }
  0xd4   :  { %2477 = vmatpush1.bf16.msra.mxu0 %v3692_v41  ;;  %2273 = vmatprep.subr.bf16.mxu1 %v3697_v42  ;;  %v3788_v41 = vld [vmem:[%s5130_s1 + $0x934] ss:$8 sps:$4 sm:$0xff]   ;;  %v3783_v42 = vld [vmem:[%s5130_s1 + $0x430] ss:$8 sps:$4 sm:$0xff]  }
  0xd5   :  { %2478 = vmatprep.subr.bf16.mxu0 %v3700_v43  ;;  %v3786_v43 = vld [vmem:[%s5130_s1 + $0x930] ss:$8 sps:$4 sm:$0xff]  }
  0xd7   :  { %2274 = vmatpush1.bf16.msra.mxu1 %v3695_v44  ;;  %v3791_v44 = vld [vmem:[%s5130_s1 + $0x444] ss:$8 sps:$4 sm:$0xff]  }
  0xd8   :  { %2479 = vmatpush1.bf16.msra.mxu0 %v3698_v45  ;;  %2275 = vmatprep.subr.bf16.mxu1 %v3703_v46  ;;  %v3794_v45 = vld [vmem:[%s5130_s1 + $0x944] ss:$8 sps:$4 sm:$0xff]   ;;  %v3789_v46 = vld [vmem:[%s5130_s1 + $0x440] ss:$8 sps:$4 sm:$0xff]  }
  0xd9   :  { %2480 = vmatprep.subr.bf16.mxu0 %v3706_v47  ;;  %v3792_v47 = vld [vmem:[%s5130_s1 + $0x940] ss:$8 sps:$4 sm:$0xff]  }
  0xdb   :  { %2276 = vmatpush1.bf16.msra.mxu1 %v3701_v48  ;;  %v3797_v48 = vld [vmem:[%s5130_s1 + $0x454] ss:$8 sps:$4 sm:$0xff]  }
  0xdc   :  { %2481 = vmatpush1.bf16.msra.mxu0 %v3704_v49  ;;  %2277 = vmatprep.subr.bf16.mxu1 %v3709_v50  ;;  %v3800_v49 = vld [vmem:[%s5130_s1 + $0x954] ss:$8 sps:$4 sm:$0xff]   ;;  %v3795_v50 = vld [vmem:[%s5130_s1 + $0x450] ss:$8 sps:$4 sm:$0xff]  }
  0xdd   :  { %2482 = vmatprep.subr.bf16.mxu0 %v3712_v51  ;;  %v3798_v51 = vld [vmem:[%s5130_s1 + $0x950] ss:$8 sps:$4 sm:$0xff]  }
  0xdf   :  { %2278 = vmatpush1.bf16.msra.mxu1 %v3707_v52  ;;  %v3803_v52 = vld [vmem:[%s5130_s1 + $0x464] ss:$8 sps:$4 sm:$0xff]  }
  0xe0   :  { %2483 = vmatpush1.bf16.msra.mxu0 %v3710_v53  ;;  %2279 = vmatprep.subr.bf16.mxu1 %v3715_v54  ;;  %v3806_v53 = vld [vmem:[%s5130_s1 + $0x964] ss:$8 sps:$4 sm:$0xff]   ;;  %v3801_v54 = vld [vmem:[%s5130_s1 + $0x460] ss:$8 sps:$4 sm:$0xff]  }
  0xe1   :  { %2484 = vmatprep.subr.bf16.mxu0 %v3718_v55  ;;  %v3804_v55 = vld [vmem:[%s5130_s1 + $0x960] ss:$8 sps:$4 sm:$0xff]  }
  0xe3   :  { %2280 = vmatpush1.bf16.msra.mxu1 %v3713_v56  ;;  %v3809_v56 = vld [vmem:[%s5130_s1 + $0x474] ss:$8 sps:$4 sm:$0xff]  }
  0xe4   :  { %2485 = vmatpush1.bf16.msra.mxu0 %v3716_v57  ;;  %2281 = vmatprep.subr.bf16.mxu1 %v3721_v58  ;;  %v3812_v57 = vld [vmem:[%s5130_s1 + $0x974] ss:$8 sps:$4 sm:$0xff]   ;;  %v3807_v58 = vld [vmem:[%s5130_s1 + $0x470] ss:$8 sps:$4 sm:$0xff]  }
  0xe5   :  { %2486 = vmatprep.subr.bf16.mxu0 %v3724_v59  ;;  %v3810_v59 = vld [vmem:[%s5130_s1 + $0x970] ss:$8 sps:$4 sm:$0xff]  }
  0xe7   :  { %2282 = vmatpush1.bf16.msra.mxu1 %v3719_v60  ;;  %v3815_v60 = vld [vmem:[%s5130_s1 + $0x484] ss:$8 sps:$4 sm:$0xff]  }
  0xe8   :  { %2487 = vmatpush1.bf16.msra.mxu0 %v3722_v61  ;;  %2283 = vmatprep.subr.bf16.mxu1 %v3727_v62  ;;  %v3818_v61 = vld [vmem:[%s5130_s1 + $0x984] ss:$8 sps:$4 sm:$0xff]   ;;  %v3813_v62 = vld [vmem:[%s5130_s1 + $0x480] ss:$8 sps:$4 sm:$0xff]  }
  0xe9   :  { %2488 = vmatprep.subr.bf16.mxu0 %v3730_v63  ;;  %v3816_v63 = vld [vmem:[%s5130_s1 + $0x980] ss:$8 sps:$4 sm:$0xff]  }
  0xeb   :  { %2284 = vmatpush1.bf16.msra.mxu1 %v3725_v0  ;;  %v3821_v0 = vld [vmem:[%s5130_s1 + $0x494] ss:$8 sps:$4 sm:$0xff]  }
  0xec   :  { %2489 = vmatpush1.bf16.msra.mxu0 %v3728_v1  ;;  %2285 = vmatprep.subr.bf16.mxu1 %v3733_v2  ;;  %v3824_v1 = vld [vmem:[%s5130_s1 + $0x994] ss:$8 sps:$4 sm:$0xff]   ;;  %v3819_v2 = vld [vmem:[%s5130_s1 + $0x490] ss:$8 sps:$4 sm:$0xff]  }
  0xed   :  { %2490 = vmatprep.subr.bf16.mxu0 %v3736_v3  ;;  %v3822_v3 = vld [vmem:[%s5130_s1 + $0x990] ss:$8 sps:$4 sm:$0xff]  }
  0xef   :  { %2286 = vmatpush1.bf16.msra.mxu1 %v3731_v4  ;;  %v3827_v4 = vld [vmem:[%s5130_s1 + $0x4a4] ss:$8 sps:$4 sm:$0xff]  }
  0xf0   :  { %2491 = vmatpush1.bf16.msra.mxu0 %v3734_v5  ;;  %2287 = vmatprep.subr.bf16.mxu1 %v3739_v6  ;;  %v3830_v5 = vld [vmem:[%s5130_s1 + $0x9a4] ss:$8 sps:$4 sm:$0xff]   ;;  %v3825_v6 = vld [vmem:[%s5130_s1 + $0x4a0] ss:$8 sps:$4 sm:$0xff]  }
  0xf1   :  { %2492 = vmatprep.subr.bf16.mxu0 %v3742_v7  ;;  %v3828_v7 = vld [vmem:[%s5130_s1 + $0x9a0] ss:$8 sps:$4 sm:$0xff]  }
  0xf3   :  { %2288 = vmatpush1.bf16.msra.mxu1 %v3737_v8  ;;  %v3833_v8 = vld [vmem:[%s5130_s1 + $0x4b4] ss:$8 sps:$4 sm:$0xff]  }
  0xf4   :  { %2493 = vmatpush1.bf16.msra.mxu0 %v3740_v9  ;;  %2289 = vmatprep.subr.bf16.mxu1 %v3745_v10  ;;  %v3836_v9 = vld [vmem:[%s5130_s1 + $0x9b4] ss:$8 sps:$4 sm:$0xff]   ;;  %v3831_v10 = vld [vmem:[%s5130_s1 + $0x4b0] ss:$8 sps:$4 sm:$0xff]  }
  0xf5   :  { %2494 = vmatprep.subr.bf16.mxu0 %v3748_v11  ;;  %v3834_v11 = vld [vmem:[%s5130_s1 + $0x9b0] ss:$8 sps:$4 sm:$0xff]  }
  0xf7   :  { %2290 = vmatpush1.bf16.msra.mxu1 %v3743_v12  ;;  %v3839_v12 = vld [vmem:[%s5130_s1 + $0x4c4] ss:$8 sps:$4 sm:$0xff]  }
  0xf8   :  { %2495 = vmatpush1.bf16.msra.mxu0 %v3746_v13  ;;  %2291 = vmatprep.subr.bf16.mxu1 %v3751_v14  ;;  %v3842_v13 = vld [vmem:[%s5130_s1 + $0x9c4] ss:$8 sps:$4 sm:$0xff]   ;;  %v3837_v14 = vld [vmem:[%s5130_s1 + $0x4c0] ss:$8 sps:$4 sm:$0xff]  }
  0xf9   :  { %2496 = vmatprep.subr.bf16.mxu0 %v3754_v15  ;;  %v3840_v15 = vld [vmem:[%s5130_s1 + $0x9c0] ss:$8 sps:$4 sm:$0xff]  }
  0xfb   :  { %2292 = vmatpush1.bf16.msra.mxu1 %v3749_v16  ;;  %v3845_v16 = vld [vmem:[%s5130_s1 + $0x4d4] ss:$8 sps:$4 sm:$0xff]  }
  0xfc   :  { %2497 = vmatpush1.bf16.msra.mxu0 %v3752_v17  ;;  %2293 = vmatprep.subr.bf16.mxu1 %v3757_v19  ;;  %v3848_v17 = vld [vmem:[%s5130_s1 + $0x9d4] ss:$8 sps:$4 sm:$0xff]   ;;  %v3843_v19 = vld [vmem:[%s5130_s1 + $0x4d0] ss:$8 sps:$4 sm:$0xff]  }
  0xfd   :  { %2498 = vmatprep.subr.bf16.mxu0 %v3760_v21  ;;  %v3846_v21 = vld [vmem:[%s5130_s1 + $0x9d0] ss:$8 sps:$4 sm:$0xff]  }
  0xff   :  { %2294 = vmatpush1.bf16.msra.mxu1 %v3755_v22  ;;  %v3851_v22 = vld [vmem:[%s5130_s1 + $0x4e4] ss:$8 sps:$4 sm:$0xff]  }
 0x100   :  { %2499 = vmatpush1.bf16.msra.mxu0 %v3758_v23  ;;  %2304 = vmatprep.subr.bf16.mxu1 %v3765_v26  ;;  %v3854_v23 = vld [vmem:[%s5130_s1 + $0x9e4] ss:$8 sps:$4 sm:$0xff]   ;;  %v3849_v26 = vld [vmem:[%s5130_s1 + $0x4e0] ss:$8 sps:$4 sm:$0xff]  }
 0x101   :  { %2509 = vmatprep.subr.bf16.mxu0 %v3770_v18  ;;  %v3852_v18 = vld [vmem:[%s5130_s1 + $0x9e0] ss:$8 sps:$4 sm:$0xff]  }
 0x102   :  { %2296 = vmatmul.mubr.bf16.vlgmr.msra.gmra.mrb[0].mxu1 %v2894_v20  ;;  %v3857_v20 = vld [vmem:[%s5130_s1 + $0x4f4] ss:$8 sps:$4 sm:$0xff]  }
 0x103   :  { %2501 = vmatmul.mubr.bf16.vlgmr.msra.gmra.mrb[0].mxu0 %v2904_v27  ;;  %2305 = vmatpush1.bf16.msra.mxu1 %v3763_v30  ;;  %v3860_v27 = vld [vmem:[%s5130_s1 + $0x9f4] ss:$8 sps:$4 sm:$0xff]   ;;  %v3855_v30 = vld [vmem:[%s5130_s1 + $0x4f0] ss:$8 sps:$4 sm:$0xff]  }
 0x104   :  { %2510 = vmatpush1.bf16.msra.mxu0 %v3768_v24  ;;  %2306 = vmatprep.subr.bf16.mxu1 %v3773_v25  ;;  %v3858_v24 = vld [vmem:[%s5130_s1 + $0x9f0] ss:$8 sps:$4 sm:$0xff]   ;;  %v3867_v25 = vld [vmem:[%s5130_s1 + $0xa04] ss:$8 sps:$4 sm:$0xff]  }
 0x105   :  { %2511 = vmatprep.subr.bf16.mxu0 %v3776_v31  ;;  %2336 = vmatprep.mubr.bf16.mxu1 %v2897_v32  ;;  %v2896_v31 = vcombine.low %v4794_v28, %v4794_v28  ;;  %v2906_v32 = vcombine.low %v4799_v29, %v4799_v29  ;;  %v3868_v28 = vld [vmem:[%s5130_s1 + $0xa10] ss:$8 sps:$4 sm:$0xff]   ;;  %v3873_v29 = vld [vmem:[%s5130_s1 + $0xa24] ss:$8 sps:$4 sm:$0xff]  }
 0x106   :  { %2541 = vmatprep.mubr.bf16.mxu0 %v2907_v33  ;;  %v3865_v33 = vld [vmem:[%s5130_s1 + $0xa00] ss:$8 sps:$4 sm:$0xff]  }
 0x107   :  { %2307 = vmatpush1.bf16.msra.mxu1 %v3771_v34  ;;  %v3870_v34 = vld [vmem:[%s5130_s1 + $0xa14] ss:$8 sps:$4 sm:$0xff]  }
 0x108   :  { %2512 = vmatpush1.bf16.msra.mxu0 %v3774_v35  ;;  %2308 = vmatprep.subr.bf16.mxu1 %v3779_v36  ;;  %v3914_v35 = vmov 0   ;;  %v3871_v36 = vld [vmem:[%s5130_s1 + $0xa20] ss:$8 sps:$4 sm:$0xff]  }
 0x109   :  { %2513 = vmatprep.subr.bf16.mxu0 %v3782_v37  ;;  %v3876_v37 = vld [vmem:[%s5130_s1 + $0xa34] ss:$8 sps:$4 sm:$0xff]  }
 0x10b   :  { %2309 = vmatpush1.bf16.msra.mxu1 %v3777_v38  ;;  %v3874_v38 = vld [vmem:[%s5130_s1 + $0xa30] ss:$8 sps:$4 sm:$0xff]  }
 0x10c   :  { %2514 = vmatpush1.bf16.msra.mxu0 %v3780_v39  ;;  %2310 = vmatprep.subr.bf16.mxu1 %v3785_v40  ;;  %v3879_v39 = vld [vmem:[%s5130_s1 + $0xa44] ss:$8 sps:$4 sm:$0xff]   ;;  %v3877_v40 = vld [vmem:[%s5130_s1 + $0xa40] ss:$8 sps:$4 sm:$0xff]  }
 0x10d   :  { %2515 = vmatprep.subr.bf16.mxu0 %v3788_v41  ;;  %v3882_v41 = vld [vmem:[%s5130_s1 + $0xa54] ss:$8 sps:$4 sm:$0xff]  }
 0x10f   :  { %2311 = vmatpush1.bf16.msra.mxu1 %v3783_v42  ;;  %v3880_v42 = vld [vmem:[%s5130_s1 + $0xa50] ss:$8 sps:$4 sm:$0xff]  }
 0x110   :  { %2516 = vmatpush1.bf16.msra.mxu0 %v3786_v43  ;;  %2312 = vmatprep.subr.bf16.mxu1 %v3791_v44  ;;  %v3885_v43 = vld [vmem:[%s5130_s1 + $0xa64] ss:$8 sps:$4 sm:$0xff]   ;;  %v3883_v44 = vld [vmem:[%s5130_s1 + $0xa60] ss:$8 sps:$4 sm:$0xff]  }
 0x111   :  { %2517 = vmatprep.subr.bf16.mxu0 %v3794_v45  ;;  %v3888_v45 = vld [vmem:[%s5130_s1 + $0xa74] ss:$8 sps:$4 sm:$0xff]  }
 0x113   :  { %2313 = vmatpush1.bf16.msra.mxu1 %v3789_v46  ;;  %v3886_v46 = vld [vmem:[%s5130_s1 + $0xa70] ss:$8 sps:$4 sm:$0xff]  }
 0x114   :  { %2518 = vmatpush1.bf16.msra.mxu0 %v3792_v47  ;;  %2314 = vmatprep.subr.bf16.mxu1 %v3797_v48  ;;  %v3889_v47 = vld [vmem:[%s5131_s0 + $0x50] ss:$0 sps:$4 sm:$0xff]   ;;  %v3890_v48 = vld [vmem:[%s5132_s3 + $0x40] sm:$0xff]  }
 0x115   :  { %2519 = vmatprep.subr.bf16.mxu0 %v3800_v49  ;;  %v3891_v49 = vld [vmem:[%s5132_s3] sm:$0xff]  }
 0x117   :  { %2315 = vmatpush1.bf16.msra.mxu1 %v3795_v50  ;;  %v3892_v50 = vld [vmem:[%s5132_s3 + $0x48] sm:$0xff]  }
 0x118   :  { %2520 = vmatpush1.bf16.msra.mxu0 %v3798_v51  ;;  %2316 = vmatprep.subr.bf16.mxu1 %v3803_v52  ;;  %v3893_v51 = vld [vmem:[%s5132_s3 + $0x8] sm:$0xff]   ;;  %v3894_v52 = vld [vmem:[%s5132_s3 + $0x50] sm:$0xff]  }
 0x119   :  { %2521 = vmatprep.subr.bf16.mxu0 %v3806_v53  ;;  %v3895_v53 = vld [vmem:[%s5132_s3 + $0x10] sm:$0xff]  }
 0x11b   :  { %2317 = vmatpush1.bf16.msra.mxu1 %v3801_v54  ;;  %v3896_v54 = vld [vmem:[%s5132_s3 + $0x58] sm:$0xff]  }
 0x11c   :  { %2522 = vmatpush1.bf16.msra.mxu0 %v3804_v55  ;;  %2318 = vmatprep.subr.bf16.mxu1 %v3809_v56  ;;  %v3897_v55 = vld [vmem:[%s5132_s3 + $0x18] sm:$0xff]   ;;  %v3898_v56 = vld [vmem:[%s5132_s3 + $0x60] sm:$0xff]  }
 0x11d   :  { %2523 = vmatprep.subr.bf16.mxu0 %v3812_v57  ;;  %v3899_v57 = vld [vmem:[%s5132_s3 + $0x20] sm:$0xff]  }
 0x11f   :  { %2319 = vmatpush1.bf16.msra.mxu1 %v3807_v58  ;;  %v3900_v58 = vld [vmem:[%s5132_s3 + $0x68] sm:$0xff]  }
 0x120   :  { %2524 = vmatpush1.bf16.msra.mxu0 %v3810_v59  ;;  %2320 = vmatprep.subr.bf16.mxu1 %v3815_v60  ;;  %v3901_v59 = vld [vmem:[%s5132_s3 + $0x28] sm:$0xff]   ;;  %v3902_v60 = vld [vmem:[%s5132_s3 + $0x70] sm:$0xff]  }
 0x121   :  { %2525 = vmatprep.subr.bf16.mxu0 %v3818_v61  ;;  %v3903_v61 = vld [vmem:[%s5132_s3 + $0x30] sm:$0xff]  }
 0x123   :  { %2321 = vmatpush1.bf16.msra.mxu1 %v3813_v62  ;;  %v3904_v62 = vld [vmem:[%s5132_s3 + $0x78] sm:$0xff]  }
 0x124   :  { %2526 = vmatpush1.bf16.msra.mxu0 %v3816_v63  ;;  %2322 = vmatprep.subr.bf16.mxu1 %v3821_v0  ;;  %v3905_v63 = vld [vmem:[%s5132_s3 + $0x38] sm:$0xff]   ;;  %v3915_v0 = vmov 0.0  }
 0x125   :  { %2527 = vmatprep.subr.bf16.mxu0 %v3824_v1 }
 0x127   :  { %2323 = vmatpush1.bf16.msra.mxu1 %v3819_v2 }
 0x128   :  { %2528 = vmatpush1.bf16.msra.mxu0 %v3822_v3  ;;  %2324 = vmatprep.subr.bf16.mxu1 %v3827_v4 }
 0x129   :  { %2529 = vmatprep.subr.bf16.mxu0 %v3830_v5  ;;  %v376_v5 = vlaneseq }
 0x12b   :  { %2325 = vmatpush1.bf16.msra.mxu1 %v3825_v6  ;;  %v377_v6 = vshrl.u32 %v376_v5, 7 }
 0x12c   :  { %2530 = vmatpush1.bf16.msra.mxu0 %v3828_v7  ;;  %2326 = vmatprep.subr.bf16.mxu1 %v3833_v8  ;;  %v374_v8 = vld [vmem:[%s5134_s2] sm:$0x3] }
 0x12d   :  { %2531 = vmatprep.subr.bf16.mxu0 %v3836_v9  ;;  %v378_v7 = vsub.s32 0, %v377_v6  ;;  %v382_v9 = vsub.s32 1, %v377_v6 }
 0x12f   :  { %2327 = vmatpush1.bf16.msra.mxu1 %v3831_v10  ;;  %v379_v10 = vrot.slane %v374_v8, %v378_v7 }
 0x130   :  { %2532 = vmatpush1.bf16.msra.mxu0 %v3834_v11  ;;  %2328 = vmatprep.subr.bf16.mxu1 %v3839_v12  ;;  %v383_v11 = vrot.slane %v374_v8, %v382_v9 }
 0x131   :  { %2533 = vmatprep.subr.bf16.mxu0 %v3842_v13 }
 0x133   :  { %2329 = vmatpush1.bf16.msra.mxu1 %v3837_v14 }
 0x134   :  { %2534 = vmatpush1.bf16.msra.mxu0 %v3840_v15  ;;  %2330 = vmatprep.subr.bf16.mxu1 %v3845_v16 }
 0x135   :  { %2535 = vmatprep.subr.bf16.mxu0 %v3848_v17 }
 0x137   :  { %2331 = vmatpush1.bf16.msra.mxu1 %v3843_v19 }
 0x138   :  { %2536 = vmatpush1.bf16.msra.mxu0 %v3846_v21  ;;  %2332 = vmatprep.subr.bf16.mxu1 %v3851_v22 }
 0x139   :  { %2537 = vmatprep.subr.bf16.mxu0 %v3854_v23 }
 0x13b   :  { %2333 = vmatpush1.bf16.msra.mxu1 %v3849_v26 }
 0x13c   :  { %2538 = vmatpush1.bf16.msra.mxu0 %v3852_v18  ;;  %2334 = vmatprep.subr.bf16.mxu1 %v3857_v20  ;;  %v3906_v18 = vld [vmem:[%s5133_s5] sm:$0xff]  }
 0x13d   :  { %2539 = vmatprep.subr.bf16.mxu0 %v3860_v27  ;;  %v3907_v27 = vld [vmem:[%s5133_s5 + $0x8] sm:$0xff]  }
 0x13f   :  { %2335 = vmatpush1.bf16.msra.mxu1 %v3855_v30  ;;  %v3908_v30 = vld [vmem:[%s5133_s5 + $0x10] sm:$0xff]  }
 0x140   :  { %2540 = vmatpush1.bf16.msra.mxu0 %v3858_v24  ;;  %3271 = vmatprep.subr.bf16.mxu1 %v3890_v48  ;;  %v3909_v24 = vld [vmem:[%s5133_s5 + $0x18] sm:$0xff]  }
 0x141   :  { %2550 = vmatprep.subr.bf16.mxu0 %v3867_v25  ;;  %v3910_v25 = vld [vmem:[%s5133_s5 + $0x20] sm:$0xff]  }
 0x142   :  { %2337 = vmatmul.mubr.bf16.vlgmr.msra.gmra.mrb[0].mxu1 %v2896_v31  ;;  %v3911_v31 = vld [vmem:[%s5133_s5 + $0x28] sm:$0xff]  }
 0x143   :  { %2542 = vmatmul.mubr.bf16.vlgmr.msra.gmra.mrb[0].mxu0 %v2906_v32  ;;  %3272 = vmatpush3.bf16.msra.mxu1 %v3891_v49  ;;  %v3912_v32 = vld [vmem:[%s5133_s5 + $0x30] sm:$0xff]  }
 0x144   :  { %2551 = vmatpush1.bf16.msra.mxu0 %v3865_v33  ;;  %2582 = vmatprep.mubr.bf16.mxu0 %v3914_v35  ;;  %v3913_v33 = vld [vmem:[%s5133_s5 + $0x38] sm:$0xff]  }
 0x145   :  { %2552 = vmatprep.subr.bf16.mxu0 %v3870_v34  ;;  %3273 = vmatprep.subr.bf16.mxu1 %v3892_v50 }
 0x147   :  { %3274 = vmatpush3.bf16.msra.mxu1 %v3893_v51 }
 0x148   :  { %2553 = vmatpush1.bf16.msra.mxu0 %v3868_v28  ;;  %3275 = vmatprep.subr.bf16.mxu1 %v3894_v52  ;;  %v3245_v28 = vld [vmem:[%s5135_s4] ss:$0 sm:$0xff] }
 0x149   :  { %2554 = vmatprep.subr.bf16.mxu0 %v3873_v29 }
 0x14b   :  { %3276 = vmatpush3.bf16.msra.mxu1 %v3895_v53 }
 0x14c   :  { %2555 = vmatpush1.bf16.msra.mxu0 %v3871_v36  ;;  %3277 = vmatprep.subr.bf16.mxu1 %v3896_v54 }
 0x14d   :  { %2556 = vmatprep.subr.bf16.mxu0 %v3876_v37 }
 0x14f   :  { %3278 = vmatpush3.bf16.msra.mxu1 %v3897_v55 }
 0x150   :  { %2557 = vmatpush1.bf16.msra.mxu0 %v3874_v38  ;;  %3279 = vmatprep.subr.bf16.mxu1 %v3898_v56 }
 0x151   :  { %2558 = vmatprep.subr.bf16.mxu0 %v3879_v39 }
 0x153   :  { %3280 = vmatpush3.bf16.msra.mxu1 %v3899_v57 }
 0x154   :  { %2559 = vmatpush1.bf16.msra.mxu0 %v3877_v40  ;;  %3281 = vmatprep.subr.bf16.mxu1 %v3900_v58 }
 0x155   :  { %2560 = vmatprep.subr.bf16.mxu0 %v3882_v41  ;;  %v3262_v41 = vld [vmem:[%s5136_s6] ss:$0 sm:$0xff] }
 0x157   :  { %3282 = vmatpush3.bf16.msra.mxu1 %v3901_v59 }
 0x158   :  { %2561 = vmatpush1.bf16.msra.mxu0 %v3880_v42  ;;  %3283 = vmatprep.subr.bf16.mxu1 %v3902_v60 }
 0x159   :  { %2562 = vmatprep.subr.bf16.mxu0 %v3885_v43 }
 0x15b   :  { %3284 = vmatpush3.bf16.msra.mxu1 %v3903_v61 }
 0x15c   :  { %2563 = vmatpush1.bf16.msra.mxu0 %v3883_v44  ;;  %3285 = vmatprep.subr.bf16.mxu1 %v3904_v62 }
 0x15d   :  { %2564 = vmatprep.subr.bf16.mxu0 %v3888_v45 }
 0x15f   :  { %3286 = vmatpush3.bf16.msra.mxu1 %v3905_v63 }
 0x160   :  { %2565 = vmatpush1.bf16.msra.mxu0 %v3886_v46  ;;  %3302 = vmatprep.subr.bf16.mxu1 %v3915_v0 }
 0x163   :  { %2583 = vmatmul.mubr.bf16.vlgmr.msra.gmra.mrb[0].mxu0 %v3889_v47 }
 0x215   :  { %v2338_v1 = vpop.f32.mrb[0].mxu1 }
 0x216   :  { %v2340_v2 = vpop.f32.mrb[1].mxu1  ;;  %v3322_v12 = vadd.f32 %v2338_v1, %v379_v10 }
 0x217   :  { %v2342_v3 = vpop.f32.mrb[2].mxu1  ;;  %v3324_v13 = vadd.f32 %v2340_v2, %v383_v11 }
 0x218   :  { %v2343_v4 = vpop.f32.mrb[3].mxu1 }
 0x236   :  { %v2584_v14 = vpop.f32.mrb[0].mxu0 }
 0x237   :  { %v3323_v15 = vadd.f32 %v3322_v12, %v2584_v14  ;;  %v2586_v16 = vpop.f32.mrb[1].mxu0 }
 0x238   :  { %v3325_v17 = vadd.f32 %v3324_v13, %v2586_v16  ;;  %v2588_v19 = vpop.f32.mrb[2].mxu0 }
 0x239   :  { %v2591_v21 = vmax.f32 %v3323_v15, 0.0  ;;  %v2589_v22 = vpop.f32.mrb[3].mxu0 }
 0x23a   :  { %v2592_v23 = vmax.f32 %v3325_v17, 0.0 }
 0x23b   :  { %v2593_v20 = vpack.c.bf16 %v2591_v21, %v2591_v21 }
 0x23c   :  { %v2594_v26 = vpack.c.bf16 %v2592_v23, %v2592_v23 }
 0x23e   :  { %2762 = vmatprep.mubr.bf16.mxu1 %v2594_v26 }
 0x23f   :  { %2763 = vmatmul.mubr.bf16.vlgmr.msra.gmra.mrb[4].mxu1 %v2593_v20 }
 0x240   :  { %3303 = vmatpush3.bf16.msra.mxu1 %v3906_v18  ;;  %3318 = vmatprep.mubr.msk.bf16.mxu1 %vm3916_vm0, %v3915_v0 }
 0x241   :  { %3304 = vmatprep.subr.bf16.mxu1 %v3915_v0 }
 0x244   :  { %3305 = vmatpush3.bf16.msra.mxu1 %v3907_v27 }
 0x245   :  { %3306 = vmatprep.subr.bf16.mxu1 %v3915_v0 }
 0x248   :  { %3307 = vmatpush3.bf16.msra.mxu1 %v3908_v30 }
 0x249   :  { %3308 = vmatprep.subr.bf16.mxu1 %v3915_v0 }
 0x24c   :  { %3309 = vmatpush3.bf16.msra.mxu1 %v3909_v24 }
 0x24d   :  { %3310 = vmatprep.subr.bf16.mxu1 %v3915_v0 }
 0x250   :  { %3311 = vmatpush3.bf16.msra.mxu1 %v3910_v25 }
 0x251   :  { %3312 = vmatprep.subr.bf16.mxu1 %v3915_v0 }
 0x254   :  { %3313 = vmatpush3.bf16.msra.mxu1 %v3911_v31 }
 0x255   :  { %3314 = vmatprep.subr.bf16.mxu1 %v3915_v0 }
 0x258   :  { %3315 = vmatpush3.bf16.msra.mxu1 %v3912_v32 }
 0x259   :  { %3316 = vmatprep.subr.bf16.mxu1 %v3915_v0 }
 0x25c   :  { %3317 = vmatpush3.bf16.msra.mxu1 %v3913_v33 }
 0x312   :  { %v3287_v34 = vpop.f32.mrb[4].mxu1 }
 0x313   :  { %v3288_v35 = vpop.f32.mrb[5].mxu1 }
 0x314   :  { %v3289_v29 = vadd.f32 %v3288_v35, %v3287_v34  ;;  %v3290_v36 = vpop.f32.mrb[6].mxu1 }
 0x315   :  { %v3291_v37 = vpop.f32.mrb[7].mxu1 }
 0x316   :  { %v2765_v38 = vadd.f32 %v3289_v29, %v3245_v28 }
 0x318   :  { %v2770_v39 = vmax.f32 %v2765_v38, 0.0 }
 0x31a   :  { %v2771_v40 = vpack.c.bf16 %v2770_v39, %v2770_v39 }
 0x31c   :  { %3319 = vmatmul.mubr.bf16.vlgmr.msra.gmra.mrb[8].mxu1 %v2771_v40 }
 0x3ef   :  { %v2877_v42 = vpop.f32.mrb[8].mxu1 }
 0x3f0   :  { %v2878_v43 = vadd.f32 %v3262_v41, %v2877_v42  ;;  %v3320_v44 = vpop.f32.mrb[9].mxu1 }
 0x3f1   :  { %v2880_v45 = vpop.f32.mrb[10].mxu1 }
 0x3f2   :  { %2883 = vst [vmem:[%s5137_s7] sm:$0xff] %v2878_v43  ;;  %v3321_v46 = vpop.f32.mrb[11].mxu1 }

</bundles_post_ra>
